<compile_context>
chip_gen: v5e
topology: v5e:2x2
jax: 0.10.0
libtpu: 0.0.40
codegen_flags: <defaults>
</compile_context>

<pallas_src>
import functools

import numpy as np

import jax
import jax.numpy as jnp
from jax.experimental import pallas as pl
from jax.experimental.pallas import tpu as pltpu


@functools.lru_cache(maxsize=None)
def _vmem_limit_bytes():
    """Generation-aware scoped-VMEM limit: ~40 MiB on v7x (64 MiB physical),
    48 MiB on v5e/v6e (128 MiB physical)."""
    phys = 64 * 1024 * 1024                      # conservative default (v7x)
    try:
        info = pltpu.get_tpu_info()
        phys = int(getattr(info, "vmem_capacity_bytes", phys))
    except Exception:
        pass
    return min(48 * 1024 * 1024, (phys * 5) // 8)


# ----------------------------- Pallas kernels -------------------------------

def _conv_stats_kernel(x_ref, w_ref, y_ref, sum_ref, sq_ref, slab_ref, *, Wp, W):
    """Fused 3x3 conv (single K=9*Cin MXU matmul) + per-channel batch stats.

    x_ref    : (1, (H+3)*Wp, Cin) bf16  zero-padded image, rows in raster order
    w_ref    : (9*Cin, Cout)      bf16  tap-major weights ((dy*3+dx)*Cin + ci)
    y_ref    : (1, H*Wp, Cout)    bf16  conv output in padded-W raster; columns
                                        W, W+1 of each row are wrap-around
                                        garbage (masked out of the stats,
                                        dropped in kernel B)
    sum_ref, sq_ref : (1, 1, Cout) f32  per-batch partial statistics
    slab_ref : (H*Wp, 9*Cin) bf16 VMEM scratch (im2col slab, built once)
    """
    m = y_ref.shape[1]                                     # H * Wp output rows
    cin = x_ref.shape[2]

    # Build the (m, 9*Cin) im2col slab from 9 statically shifted slices.
    for t in range(9):
        dy, dx = divmod(t, 3)
        off = dy * Wp + dx                                 # static tap offset
        slab_ref[:, t * cin:(t + 1) * cin] = x_ref[0, off:off + m, :]

    # One bf16 MXU matmul with K = 9*Cin, f32 accumulation (in-MXU accumulate;
    # no per-tap read-modify-write on the output ref).
    acc = jnp.dot(slab_ref[...], w_ref[...], preferred_element_type=jnp.float32)
    y_ref[0] = acc.astype(y_ref.dtype)

    # Per-channel batch statistics, masking the padded garbage columns.
    # Done as (1,m) x (m,Cout) MXU matmuls instead of cross-sublane reductions.
    col = jax.lax.broadcasted_iota(jnp.int32, (1, m), 1) % Wp
    valid = (col < W).astype(jnp.float32)                  # (1, m) 0/1 mask
    sum_ref[0] = jnp.dot(valid, acc, preferred_element_type=jnp.float32)
    sq_ref[0] = jnp.dot(valid, acc * acc, preferred_element_type=jnp.float32)


def _bn_relu_pool_kernel(y_ref, scale_ref, shift_ref, pmat_ref, o_ref):
    """Fused BatchNorm(affine) + ReLU + 2x2 average pool.

    y_ref     : (rb, 2*Wp*C) bf16   one pooling row-pair per row
    scale_ref : (1, 2*Wp*C)  f32    gamma / sqrt(var + eps), tiled per lane
    shift_ref : (1, 2*Wp*C)  f32    beta - mean * scale, tiled per lane
    pmat_ref  : (2*Wp*C, (W//2)*C) bf16  constant 0/0.25 pooling matrix (also
                                         drops the padded garbage columns)
    o_ref     : (rb, (W//2)*C) f32  lane-dense pooled output
    """
    z = jnp.maximum(y_ref[...].astype(jnp.float32) * scale_ref[...]
                    + shift_ref[...], 0.0)
    o_ref[...] = jnp.dot(z.astype(jnp.bfloat16), pmat_ref[...],
                         preferred_element_type=jnp.float32)


# ------------------------------ host-side glue ------------------------------

def _row_tile(rows, lanes_in, bytes_per=2, budget=4 * 1024 * 1024):
    """Row tile for kernel B sized from a per-buffer VMEM byte budget."""
    cap = max(8, budget // max(1, lanes_in * bytes_per))
    if rows <= cap:
        return rows
    for d in range(min(cap, rows), 7, -1):
        if d % 8 == 0 and rows % d == 0:
            return d
    return rows


def _pool_matrix(W, Wp, C):
    """Constant (2*Wp*C, (W//2)*C) bf16 matrix: 0.25 on the four 2x2-window
    taps of each output (k, c); padded garbage columns (x >= W) get 0."""
    pm = np.zeros((2 * Wp * C, (W // 2) * C), np.float32)
    for hh in range(2):
        for k in range(W // 2):
            for px in (2 * k, 2 * k + 1):
                r0 = (hh * Wp + px) * C
                np.fill_diagonal(pm[r0:r0 + C, k * C:(k + 1) * C], 0.25)
    return jnp.asarray(pm, dtype=jnp.bfloat16)             # 0.25 exact in bf16


def _down_block(x, w, gamma, beta, eps=1e-5):
    """DownBlock2d on NHWC data.  Returns NHWC (N, H//2, W//2, Cout)."""
    N, H, W, Cin = x.shape
    Cout = w.shape[-1]
    assert H % 2 == 0 and W % 2 == 0
    Wp = W + 2                                     # padded width
    L = (H + 3) * Wp                               # padded flattened rows
    M = H * Wp                                     # conv output rows (padded-W raster)
    vmem_limit = _vmem_limit_bytes()

    # ---- Kernel A: conv (fused im2col) + batch statistics ----
    # TODO(synk): for production-scale H/W/C, add a Cout-tiling grid axis and
    # row-tile x with halos so block bytes stay bounded on v7x's 64 MiB VMEM.
    xpad = jnp.pad(x, ((0, 0), (1, 2), (1, 1), (0, 0)))     # (N, H+3, Wp, Cin)
    xflat = xpad.reshape(N, L, Cin).astype(jnp.bfloat16)    # bf16 halves DMA
    w9 = w.reshape(9 * Cin, Cout).astype(jnp.bfloat16)

    y, ssum, ssq = pl.pallas_call(
        functools.partial(_conv_stats_kernel, Wp=Wp, W=W),
        grid=(N,),
        in_specs=[pl.BlockSpec((1, L, Cin), lambda n: (n, 0, 0)),
                  pl.BlockSpec((9 * Cin, Cout), lambda n: (0, 0))],
        out_specs=(pl.BlockSpec((1, M, Cout), lambda n: (n, 0, 0)),
                   pl.BlockSpec((1, 1, Cout), lambda n: (n, 0, 0)),
                   pl.BlockSpec((1, 1, Cout), lambda n: (n, 0, 0))),
        out_shape=(jax.ShapeDtypeStruct((N, M, Cout), jnp.bfloat16),
                   jax.ShapeDtypeStruct((N, 1, Cout), jnp.float32),
                   jax.ShapeDtypeStruct((N, 1, Cout), jnp.float32)),
        scratch_shapes=[pltpu.VMEM((M, 9 * Cin), jnp.bfloat16)],
        compiler_params=pltpu.CompilerParams(
            dimension_semantics=("parallel",),   # per-batch partial stats -> megacore OK
            vmem_limit_bytes=vmem_limit),
    )(xflat, w9)

    # ---- tiny per-channel BN coefficient math (PyTorch training-mode stats) ----
    # TODO(synk): running_mean/running_var state (PyTorch BN buffers) is not
    # tracked; only the forward-pass batch statistics are computed.
    count = float(N * H * W)
    mean = jnp.sum(ssum, axis=(0, 1)) / count
    var = jnp.maximum(jnp.sum(ssq, axis=(0, 1)) / count - mean * mean, 0.0)
    scale = gamma * jax.lax.rsqrt(var + eps)
    shift = beta - mean * scale

    # ---- Kernel B: BN apply + ReLU + 2x2 average pool ----
    R = N * (H // 2)
    lanes_in = 2 * Wp * Cout
    lanes_out = (W // 2) * Cout
    y2 = y.reshape(R, lanes_in)                             # free reshape, bf16
    scale_row = jnp.tile(scale, 2 * Wp).reshape(1, lanes_in)
    shift_row = jnp.tile(shift, 2 * Wp).reshape(1, lanes_in)
    pmat = _pool_matrix(W, Wp, Cout)
    rb = _row_tile(R, lanes_in)

    z = pl.pallas_call(
        _bn_relu_pool_kernel,
        grid=(R // rb,),
        in_specs=[pl.BlockSpec((rb, lanes_in), lambda r: (r, 0)),
                  pl.BlockSpec((1, lanes_in), lambda r: (0, 0)),
                  pl.BlockSpec((1, lanes_in), lambda r: (0, 0)),
                  pl.BlockSpec((lanes_in, lanes_out), lambda r: (0, 0))],
        out_specs=pl.BlockSpec((rb, lanes_out), lambda r: (r, 0)),
        out_shape=jax.ShapeDtypeStruct((R, lanes_out), jnp.float32),
        compiler_params=pltpu.CompilerParams(
            dimension_semantics=("parallel",),
            vmem_limit_bytes=vmem_limit),
    )(y2, scale_row, shift_row, pmat)

    return z.reshape(N, H // 2, W // 2, Cout)


# ------------------------------ Encoder module ------------------------------

def init_encoder_params(key, block_expansion, in_features, num_blocks=3,
                        max_features=256):
    params = []
    keys = jax.random.split(key, num_blocks)
    for i in range(num_blocks):
        cin = in_features if i == 0 else min(max_features, block_expansion * 2 ** i)
        cout = min(max_features, block_expansion * 2 ** (i + 1))
        bound = 1.0 / float(9 * cin) ** 0.5
        w = jax.random.uniform(keys[i], (3, 3, cin, cout), jnp.float32,
                               -bound, bound)
        # Conv2d bias omitted: it is cancelled exactly by the training-mode
        # BatchNorm that immediately follows, so the block output is identical.
        params.append(dict(w=w,
                           gamma=jnp.ones((cout,), jnp.float32),
                           beta=jnp.zeros((cout,), jnp.float32)))
    return params


def encoder_forward(x_nchw, params):
    """Hourglass Encoder forward: returns [x, out_1, ..., out_num_blocks]
    (all NCHW), matching the PyTorch reference `Encoder.forward`."""
    outs = [x_nchw]
    h = jnp.transpose(x_nchw, (0, 2, 3, 1))                 # NCHW -> NHWC
    for p in params:
        h = _down_block(h, p["w"], p["gamma"], p["beta"])
        outs.append(jnp.transpose(h, (0, 3, 1, 2)))         # NHWC -> NCHW
    return outs


if __name__ == "__main__":
    key = jax.random.PRNGKey(0)
    kx, kp = jax.random.split(key)

    block_expansion, in_features, num_blocks, max_features = 8, 4, 3, 256
    N, H, W = 2, 16, 16

    x = jax.random.normal(kx, (N, in_features, H, W), jnp.float32)
    params = init_encoder_params(kp, block_expansion, in_features,
                                 num_blocks, max_features)

    fwd = jax.jit(encoder_forward)
    outs = fwd(x, params)
    outs = [jax.block_until_ready(o) for o in outs]

    # Shape / sanity checks against the PyTorch Encoder semantics.
    assert len(outs) == num_blocks + 1
    assert outs[0].shape == (N, in_features, H, W), outs[0].shape
    hw = H
    for i in range(num_blocks):
        cout = min(max_features, block_expansion * 2 ** (i + 1))
        hw //= 2
        assert outs[i + 1].shape == (N, cout, hw, hw), outs[i + 1].shape
    for o in outs:
        assert bool(jnp.all(jnp.isfinite(o)))
    print("KERNEL_OK")
</pallas_src>

<mosaic_0001>
module attributes {stable_mosaic.version = 11 : i64} {
  func.func @_conv_stats_kernel(%arg0: i32, %arg1: memref<1x342x4xbf16, #tpu.memory_space<vmem>>, %arg2: memref<36x16xbf16, #tpu.memory_space<vmem>>, %arg3: memref<1x288x16xbf16, #tpu.memory_space<vmem>>, %arg4: memref<1x1x16xf32, #tpu.memory_space<vmem>>, %arg5: memref<1x1x16xf32, #tpu.memory_space<vmem>>, %arg6: memref<288x36xbf16, #tpu.memory_space<vmem>>) attributes {dimension_semantics = [#tpu.dimension_semantics<parallel>], iteration_bounds = array<i64: 2>, scalar_prefetch = 0 : i64, scratch_operands = 1 : i64, tpu.core_type = #tpu.core_type<tc>, window_params = [{transform_indices = @transform_0, window_bounds = array<i64: 1, 342, 4>}, {pipeline_mode = #tpu.pipeline_mode<synchronous>, transform_indices = @transform_1, window_bounds = array<i64: 36, 16>}, {transform_indices = @transform_2, window_bounds = array<i64: 1, 288, 16>}, {transform_indices = @transform_3, window_bounds = array<i64: 1, 1, 16>}, {transform_indices = @transform_4, window_bounds = array<i64: 1, 1, 16>}]} {
    %c0 = arith.constant 0 : index
    %c0_0 = arith.constant 0 : index
    %c0_1 = arith.constant 0 : index
    %0 = vector.load %arg1[%c0, %c0_0, %c0_1] : memref<1x342x4xbf16, #tpu.memory_space<vmem>>, vector<1x288x4xbf16>
    %1 = vector.shape_cast %0 : vector<1x288x4xbf16> to vector<288x4xbf16>
    %c0_2 = arith.constant 0 : index
    %c0_3 = arith.constant 0 : index
    %2 = vector.load %arg6[%c0_2, %c0_3] : memref<288x36xbf16, #tpu.memory_space<vmem>>, vector<288x4xbf16>
    tpu.vector_store %arg6[%c0_2, %c0_3], %1 {strides = array<i32>} : memref<288x36xbf16, #tpu.memory_space<vmem>>, vector<288x4xbf16>,
    %c0_4 = arith.constant 0 : index
    %c1 = arith.constant 1 : index
    %c0_5 = arith.constant 0 : index
    %3 = vector.load %arg1[%c0_4, %c1, %c0_5] : memref<1x342x4xbf16, #tpu.memory_space<vmem>>, vector<1x288x4xbf16>
    %4 = vector.shape_cast %3 : vector<1x288x4xbf16> to vector<288x4xbf16>
    %c0_6 = arith.constant 0 : index
    %c4 = arith.constant 4 : index
    %5 = vector.load %arg6[%c0_6, %c4] : memref<288x36xbf16, #tpu.memory_space<vmem>>, vector<288x4xbf16>
    tpu.vector_store %arg6[%c0_6, %c4], %4 {strides = array<i32>} : memref<288x36xbf16, #tpu.memory_space<vmem>>, vector<288x4xbf16>,
    %c0_7 = arith.constant 0 : index
    %c2 = arith.constant 2 : index
    %c0_8 = arith.constant 0 : index
    %6 = vector.load %arg1[%c0_7, %c2, %c0_8] : memref<1x342x4xbf16, #tpu.memory_space<vmem>>, vector<1x288x4xbf16>
    %7 = vector.shape_cast %6 : vector<1x288x4xbf16> to vector<288x4xbf16>
    %c0_9 = arith.constant 0 : index
    %c8 = arith.constant 8 : index
    %8 = vector.load %arg6[%c0_9, %c8] : memref<288x36xbf16, #tpu.memory_space<vmem>>, vector<288x4xbf16>
    tpu.vector_store %arg6[%c0_9, %c8], %7 {strides = array<i32>} : memref<288x36xbf16, #tpu.memory_space<vmem>>, vector<288x4xbf16>,
    %c0_10 = arith.constant 0 : index
    %c18 = arith.constant 18 : index
    %c0_11 = arith.constant 0 : index
    %9 = vector.load %arg1[%c0_10, %c18, %c0_11] : memref<1x342x4xbf16, #tpu.memory_space<vmem>>, vector<1x288x4xbf16>
    %10 = vector.shape_cast %9 : vector<1x288x4xbf16> to vector<288x4xbf16>
    %c0_12 = arith.constant 0 : index
    %c12 = arith.constant 12 : index
    %11 = vector.load %arg6[%c0_12, %c12] : memref<288x36xbf16, #tpu.memory_space<vmem>>, vector<288x4xbf16>
    tpu.vector_store %arg6[%c0_12, %c12], %10 {strides = array<i32>} : memref<288x36xbf16, #tpu.memory_space<vmem>>, vector<288x4xbf16>,
    %c0_13 = arith.constant 0 : index
    %c19 = arith.constant 19 : index
    %c0_14 = arith.constant 0 : index
    %12 = vector.load %arg1[%c0_13, %c19, %c0_14] : memref<1x342x4xbf16, #tpu.memory_space<vmem>>, vector<1x288x4xbf16>
    %13 = vector.shape_cast %12 : vector<1x288x4xbf16> to vector<288x4xbf16>
    %c0_15 = arith.constant 0 : index
    %c16 = arith.constant 16 : index
    %14 = vector.load %arg6[%c0_15, %c16] : memref<288x36xbf16, #tpu.memory_space<vmem>>, vector<288x4xbf16>
    tpu.vector_store %arg6[%c0_15, %c16], %13 {strides = array<i32>} : memref<288x36xbf16, #tpu.memory_space<vmem>>, vector<288x4xbf16>,
    %c0_16 = arith.constant 0 : index
    %c20 = arith.constant 20 : index
    %c0_17 = arith.constant 0 : index
    %15 = vector.load %arg1[%c0_16, %c20, %c0_17] : memref<1x342x4xbf16, #tpu.memory_space<vmem>>, vector<1x288x4xbf16>
    %16 = vector.shape_cast %15 : vector<1x288x4xbf16> to vector<288x4xbf16>
    %c0_18 = arith.constant 0 : index
    %c20_19 = arith.constant 20 : index
    %17 = vector.load %arg6[%c0_18, %c20_19] : memref<288x36xbf16, #tpu.memory_space<vmem>>, vector<288x4xbf16>
    tpu.vector_store %arg6[%c0_18, %c20_19], %16 {strides = array<i32>} : memref<288x36xbf16, #tpu.memory_space<vmem>>, vector<288x4xbf16>,
    %c0_20 = arith.constant 0 : index
    %c36 = arith.constant 36 : index
    %c0_21 = arith.constant 0 : index
    %18 = vector.load %arg1[%c0_20, %c36, %c0_21] : memref<1x342x4xbf16, #tpu.memory_space<vmem>>, vector<1x288x4xbf16>
    %19 = vector.shape_cast %18 : vector<1x288x4xbf16> to vector<288x4xbf16>
    %c0_22 = arith.constant 0 : index
    %c24 = arith.constant 24 : index
    %20 = vector.load %arg6[%c0_22, %c24] : memref<288x36xbf16, #tpu.memory_space<vmem>>, vector<288x4xbf16>
    tpu.vector_store %arg6[%c0_22, %c24], %19 {strides = array<i32>} : memref<288x36xbf16, #tpu.memory_space<vmem>>, vector<288x4xbf16>,
    %c0_23 = arith.constant 0 : index
    %c37 = arith.constant 37 : index
    %c0_24 = arith.constant 0 : index
    %21 = vector.load %arg1[%c0_23, %c37, %c0_24] : memref<1x342x4xbf16, #tpu.memory_space<vmem>>, vector<1x288x4xbf16>
    %22 = vector.shape_cast %21 : vector<1x288x4xbf16> to vector<288x4xbf16>
    %c0_25 = arith.constant 0 : index
    %c28 = arith.constant 28 : index
    %23 = vector.load %arg6[%c0_25, %c28] : memref<288x36xbf16, #tpu.memory_space<vmem>>, vector<288x4xbf16>
    tpu.vector_store %arg6[%c0_25, %c28], %22 {strides = array<i32>} : memref<288x36xbf16, #tpu.memory_space<vmem>>, vector<288x4xbf16>,
    %c0_26 = arith.constant 0 : index
    %c38 = arith.constant 38 : index
    %c0_27 = arith.constant 0 : index
    %24 = vector.load %arg1[%c0_26, %c38, %c0_27] : memref<1x342x4xbf16, #tpu.memory_space<vmem>>, vector<1x288x4xbf16>
    %25 = vector.shape_cast %24 : vector<1x288x4xbf16> to vector<288x4xbf16>
    %c0_28 = arith.constant 0 : index
    %c32 = arith.constant 32 : index
    %26 = vector.load %arg6[%c0_28, %c32] : memref<288x36xbf16, #tpu.memory_space<vmem>>, vector<288x4xbf16>
    tpu.vector_store %arg6[%c0_28, %c32], %25 {strides = array<i32>} : memref<288x36xbf16, #tpu.memory_space<vmem>>, vector<288x4xbf16>,
    %c0_29 = arith.constant 0 : index
    %c0_30 = arith.constant 0 : index
    %27 = vector.load %arg6[%c0_29, %c0_30] : memref<288x36xbf16, #tpu.memory_space<vmem>>, vector<288x36xbf16>
    %c0_31 = arith.constant 0 : index
    %c0_32 = arith.constant 0 : index
    %28 = vector.load %arg2[%c0_31, %c0_32] : memref<36x16xbf16, #tpu.memory_space<vmem>>, vector<36x16xbf16>
    %cst = arith.constant dense<0.000000e+00> : vector<288x16xf32>
    %29 = tpu.matmul %27, %28, %cst {dimension_numbers = #tpu.dot_dimension_numbers<[1], [0], [0], [1], [0, 0, 1, 1], [], []>} : vector<288x36xbf16>, vector<36x16xbf16>, vector<288x16xf32> -> vector<288x16xf32>
    %30 = arith.truncf %29 : vector<288x16xf32> to vector<288x16xbf16>
    %c0_33 = arith.constant 0 : index
    %c0_34 = arith.constant 0 : index
    %c0_35 = arith.constant 0 : index
    %31 = vector.load %arg3[%c0_33, %c0_34, %c0_35] : memref<1x288x16xbf16, #tpu.memory_space<vmem>>, vector<1x288x16xbf16>
    %32 = vector.shape_cast %31 : vector<1x288x16xbf16> to vector<288x16xbf16>
    %33 = vector.shape_cast %30 : vector<288x16xbf16> to vector<1x288x16xbf16>
    tpu.vector_store %arg3[%c0_33, %c0_34, %c0_35], %33 {strides = array<i32>} : memref<1x288x16xbf16, #tpu.memory_space<vmem>>, vector<1x288x16xbf16>,
    %34 = tpu.iota {dimensions = array<i32: 1>} : vector<1x288xi32>
    %c18_i32 = arith.constant 18 : i32
    %c0_i32 = arith.constant 0 : i32
    %35 = arith.cmpi eq, %c18_i32, %c0_i32 : i32
    %c1_i32 = arith.constant 1 : i32
    %36 = arith.select %35, %c1_i32, %c18_i32 : i32
    %37 = vector.broadcast %36 : i32 to vector<1x288xi32>
    %38 = arith.remsi %34, %37 : vector<1x288xi32>
    %c0_i32_36 = arith.constant 0 : i32
    %39 = vector.broadcast %c0_i32_36 : i32 to vector<1x288xi32>
    %40 = arith.cmpi ne, %38, %39 : vector<1x288xi32>
    %c0_i32_37 = arith.constant 0 : i32
    %41 = vector.broadcast %c0_i32_37 : i32 to vector<1x288xi32>
    %42 = arith.cmpi slt, %38, %41 : vector<1x288xi32>
    %c0_i32_38 = arith.constant 0 : i32
    %43 = arith.cmpi slt, %36, %c0_i32_38 : i32
    %44 = vector.broadcast %43 : i1 to vector<1x288xi1>
    %45 = vector.broadcast %44 : vector<1x288xi1> to vector<1x288xi1>
    %46 = arith.xori %42, %45 : vector<1x288xi1>
    %47 = arith.andi %46, %40 : vector<1x288xi1>
    %48 = vector.broadcast %36 : i32 to vector<1x288xi32>
    %49 = arith.addi %38, %48 : vector<1x288xi32>
    %50 = arith.select %47, %49, %38 : vector<1x288xi1>, vector<1x288xi32>
    %c16_i32 = arith.constant 16 : i32
    %51 = vector.broadcast %c16_i32 : i32 to vector<1x288xi32>
    %52 = arith.cmpi slt, %50, %51 : vector<1x288xi32>
    %53 = arith.extui %52 : vector<1x288xi1> to vector<1x288xi32>
    %54 = arith.sitofp %53 : vector<1x288xi32> to vector<1x288xf32>
    %cst_39 = arith.constant dense<0.000000e+00> : vector<1x16xf32>
    %55 = tpu.matmul %54, %29, %cst_39 {dimension_numbers = #tpu.dot_dimension_numbers<[1], [0], [0], [1], [0, 0, 1, 1], [], []>} : vector<1x288xf32>, vector<288x16xf32>, vector<1x16xf32> -> vector<1x16xf32>
    %c0_40 = arith.constant 0 : index
    %c0_41 = arith.constant 0 : index
    %c0_42 = arith.constant 0 : index
    %56 = vector.load %arg4[%c0_40, %c0_41, %c0_42] : memref<1x1x16xf32, #tpu.memory_space<vmem>>, vector<1x1x16xf32>
    %57 = vector.shape_cast %56 : vector<1x1x16xf32> to vector<1x16xf32>
    %58 = vector.shape_cast %55 : vector<1x16xf32> to vector<1x1x16xf32>
    tpu.vector_store %arg4[%c0_40, %c0_41, %c0_42], %58 {strides = array<i32>} : memref<1x1x16xf32, #tpu.memory_space<vmem>>, vector<1x1x16xf32>,
    %59 = arith.mulf %29, %29 : vector<288x16xf32>
    %cst_43 = arith.constant dense<0.000000e+00> : vector<1x16xf32>
    %60 = tpu.matmul %54, %59, %cst_43 {dimension_numbers = #tpu.dot_dimension_numbers<[1], [0], [0], [1], [0, 0, 1, 1], [], []>} : vector<1x288xf32>, vector<288x16xf32>, vector<1x16xf32> -> vector<1x16xf32>
    %c0_44 = arith.constant 0 : index
    %c0_45 = arith.constant 0 : index
    %c0_46 = arith.constant 0 : index
    %61 = vector.load %arg5[%c0_44, %c0_45, %c0_46] : memref<1x1x16xf32, #tpu.memory_space<vmem>>, vector<1x1x16xf32>
    %62 = vector.shape_cast %61 : vector<1x1x16xf32> to vector<1x16xf32>
    %63 = vector.shape_cast %60 : vector<1x16xf32> to vector<1x1x16xf32>
    tpu.vector_store %arg5[%c0_44, %c0_45, %c0_46], %63 {strides = array<i32>} : memref<1x1x16xf32, #tpu.memory_space<vmem>>, vector<1x1x16xf32>,
    return
  }
  func.func @transform_0(%arg0: i32) -> (i32, i32, i32) {
    %c0_i32 = arith.constant 0 : i32
    %c0_i32_0 = arith.constant 0 : i32
    %c0_i32_1 = arith.constant 0 : i32
    return %arg0, %c0_i32, %c0_i32_0 : i32, i32, i32
  }
  func.func @transform_1(%arg0: i32) -> (i32, i32) {
    %c0_i32 = arith.constant 0 : i32
    %c0_i32_0 = arith.constant 0 : i32
    %c0_i32_1 = arith.constant 0 : i32
    return %c0_i32, %c0_i32_0 : i32, i32
  }
  func.func @transform_2(%arg0: i32) -> (i32, i32, i32) {
    %c0_i32 = arith.constant 0 : i32
    %c0_i32_0 = arith.constant 0 : i32
    %c0_i32_1 = arith.constant 0 : i32
    return %arg0, %c0_i32, %c0_i32_0 : i32, i32, i32
  }
  func.func @transform_3(%arg0: i32) -> (i32, i32, i32) {
    %c0_i32 = arith.constant 0 : i32
    %c0_i32_0 = arith.constant 0 : i32
    %c0_i32_1 = arith.constant 0 : i32
    return %arg0, %c0_i32, %c0_i32_0 : i32, i32, i32
  }
  func.func @transform_4(%arg0: i32) -> (i32, i32, i32) {
    %c0_i32 = arith.constant 0 : i32
    %c0_i32_0 = arith.constant 0 : i32
    %c0_i32_1 = arith.constant 0 : i32
    return %arg0, %c0_i32, %c0_i32_0 : i32, i32, i32
  }
}

module attributes {stable_mosaic.version = 11 : i64} {
  func.func @_bn_relu_pool_kernel(%arg0: i32, %arg1: memref<16x576xbf16, #tpu.memory_space<vmem>>, %arg2: memref<1x576xf32, #tpu.memory_space<vmem>>, %arg3: memref<1x576xf32, #tpu.memory_space<vmem>>, %arg4: memref<576x128xbf16, #tpu.memory_space<vmem>>, %arg5: memref<16x128xf32, #tpu.memory_space<vmem>>) attributes {dimension_semantics = [#tpu.dimension_semantics<parallel>], iteration_bounds = array<i64: 1>, scalar_prefetch = 0 : i64, scratch_operands = 0 : i64, tpu.core_type = #tpu.core_type<tc>, window_params = [{transform_indices = @transform_0, window_bounds = array<i64: 16, 576>}, {pipeline_mode = #tpu.pipeline_mode<synchronous>, transform_indices = @transform_1, window_bounds = array<i64: 1, 576>}, {pipeline_mode = #tpu.pipeline_mode<synchronous>, transform_indices = @transform_2, window_bounds = array<i64: 1, 576>}, {pipeline_mode = #tpu.pipeline_mode<synchronous>, transform_indices = @transform_3, window_bounds = array<i64: 576, 128>}, {transform_indices = @transform_4, window_bounds = array<i64: 16, 128>}]} {
    %c0 = arith.constant 0 : index
    %c0_0 = arith.constant 0 : index
    %0 = vector.load %arg1[%c0, %c0_0] : memref<16x576xbf16, #tpu.memory_space<vmem>>, vector<16x576xbf16>
    %1 = arith.extf %0 : vector<16x576xbf16> to vector<16x576xf32>
    %c0_1 = arith.constant 0 : index
    %c0_2 = arith.constant 0 : index
    %2 = vector.load %arg2[%c0_1, %c0_2] : memref<1x576xf32, #tpu.memory_space<vmem>>, vector<1x576xf32>
    %3 = vector.broadcast %2 : vector<1x576xf32> to vector<16x576xf32>
    %4 = arith.mulf %1, %3 : vector<16x576xf32>
    %c0_3 = arith.constant 0 : index
    %c0_4 = arith.constant 0 : index
    %5 = vector.load %arg3[%c0_3, %c0_4] : memref<1x576xf32, #tpu.memory_space<vmem>>, vector<1x576xf32>
    %6 = vector.broadcast %5 : vector<1x576xf32> to vector<16x576xf32>
    %7 = arith.addf %4, %6 : vector<16x576xf32>
    %cst = arith.constant 0.000000e+00 : f32
    %8 = vector.broadcast %cst : f32 to vector<16x576xf32>
    %9 = arith.maximumf %7, %8 : vector<16x576xf32>
    %10 = arith.truncf %9 : vector<16x576xf32> to vector<16x576xbf16>
    %c0_5 = arith.constant 0 : index
    %c0_6 = arith.constant 0 : index
    %11 = vector.load %arg4[%c0_5, %c0_6] : memref<576x128xbf16, #tpu.memory_space<vmem>>, vector<576x128xbf16>
    %cst_7 = arith.constant dense<0.000000e+00> : vector<16x128xf32>
    %12 = tpu.matmul %10, %11, %cst_7 {dimension_numbers = #tpu.dot_dimension_numbers<[1], [0], [0], [1], [0, 0, 1, 1], [], []>} : vector<16x576xbf16>, vector<576x128xbf16>, vector<16x128xf32> -> vector<16x128xf32>
    %c0_8 = arith.constant 0 : index
    %c0_9 = arith.constant 0 : index
    %13 = vector.load %arg5[%c0_8, %c0_9] : memref<16x128xf32, #tpu.memory_space<vmem>>, vector<16x128xf32>
    tpu.vector_store %arg5[%c0_8, %c0_9], %12 {strides = array<i32>} : memref<16x128xf32, #tpu.memory_space<vmem>>, vector<16x128xf32>,
    return
  }
  func.func @transform_0(%arg0: i32) -> (i32, i32) {
    %c0_i32 = arith.constant 0 : i32
    %c0_i32_0 = arith.constant 0 : i32
    return %arg0, %c0_i32 : i32, i32
  }
  func.func @transform_1(%arg0: i32) -> (i32, i32) {
    %c0_i32 = arith.constant 0 : i32
    %c0_i32_0 = arith.constant 0 : i32
    %c0_i32_1 = arith.constant 0 : i32
    return %c0_i32, %c0_i32_0 : i32, i32
  }
  func.func @transform_2(%arg0: i32) -> (i32, i32) {
    %c0_i32 = arith.constant 0 : i32
    %c0_i32_0 = arith.constant 0 : i32
    %c0_i32_1 = arith.constant 0 : i32
    return %c0_i32, %c0_i32_0 : i32, i32
  }
  func.func @transform_3(%arg0: i32) -> (i32, i32) {
    %c0_i32 = arith.constant 0 : i32
    %c0_i32_0 = arith.constant 0 : i32
    %c0_i32_1 = arith.constant 0 : i32
    return %c0_i32, %c0_i32_0 : i32, i32
  }
  func.func @transform_4(%arg0: i32) -> (i32, i32) {
    %c0_i32 = arith.constant 0 : i32
    %c0_i32_0 = arith.constant 0 : i32
    return %arg0, %c0_i32 : i32, i32
  }
}

module attributes {stable_mosaic.version = 11 : i64} {
  func.func @_conv_stats_kernel(%arg0: i32, %arg1: memref<1x110x16xbf16, #tpu.memory_space<vmem>>, %arg2: memref<144x32xbf16, #tpu.memory_space<vmem>>, %arg3: memref<1x80x32xbf16, #tpu.memory_space<vmem>>, %arg4: memref<1x1x32xf32, #tpu.memory_space<vmem>>, %arg5: memref<1x1x32xf32, #tpu.memory_space<vmem>>, %arg6: memref<80x144xbf16, #tpu.memory_space<vmem>>) attributes {dimension_semantics = [#tpu.dimension_semantics<parallel>], iteration_bounds = array<i64: 2>, scalar_prefetch = 0 : i64, scratch_operands = 1 : i64, tpu.core_type = #tpu.core_type<tc>, window_params = [{transform_indices = @transform_0, window_bounds = array<i64: 1, 110, 16>}, {pipeline_mode = #tpu.pipeline_mode<synchronous>, transform_indices = @transform_1, window_bounds = array<i64: 144, 32>}, {transform_indices = @transform_2, window_bounds = array<i64: 1, 80, 32>}, {transform_indices = @transform_3, window_bounds = array<i64: 1, 1, 32>}, {transform_indices = @transform_4, window_bounds = array<i64: 1, 1, 32>}]} {
    %c0 = arith.constant 0 : index
    %c0_0 = arith.constant 0 : index
    %c0_1 = arith.constant 0 : index
    %0 = vector.load %arg1[%c0, %c0_0, %c0_1] : memref<1x110x16xbf16, #tpu.memory_space<vmem>>, vector<1x80x16xbf16>
    %1 = vector.shape_cast %0 : vector<1x80x16xbf16> to vector<80x16xbf16>
    %c0_2 = arith.constant 0 : index
    %c0_3 = arith.constant 0 : index
    %2 = vector.load %arg6[%c0_2, %c0_3] : memref<80x144xbf16, #tpu.memory_space<vmem>>, vector<80x16xbf16>
    tpu.vector_store %arg6[%c0_2, %c0_3], %1 {strides = array<i32>} : memref<80x144xbf16, #tpu.memory_space<vmem>>, vector<80x16xbf16>,
    %c0_4 = arith.constant 0 : index
    %c1 = arith.constant 1 : index
    %c0_5 = arith.constant 0 : index
    %3 = vector.load %arg1[%c0_4, %c1, %c0_5] : memref<1x110x16xbf16, #tpu.memory_space<vmem>>, vector<1x80x16xbf16>
    %4 = vector.shape_cast %3 : vector<1x80x16xbf16> to vector<80x16xbf16>
    %c0_6 = arith.constant 0 : index
    %c16 = arith.constant 16 : index
    %5 = vector.load %arg6[%c0_6, %c16] : memref<80x144xbf16, #tpu.memory_space<vmem>>, vector<80x16xbf16>
    tpu.vector_store %arg6[%c0_6, %c16], %4 {strides = array<i32>} : memref<80x144xbf16, #tpu.memory_space<vmem>>, vector<80x16xbf16>,
    %c0_7 = arith.constant 0 : index
    %c2 = arith.constant 2 : index
    %c0_8 = arith.constant 0 : index
    %6 = vector.load %arg1[%c0_7, %c2, %c0_8] : memref<1x110x16xbf16, #tpu.memory_space<vmem>>, vector<1x80x16xbf16>
    %7 = vector.shape_cast %6 : vector<1x80x16xbf16> to vector<80x16xbf16>
    %c0_9 = arith.constant 0 : index
    %c32 = arith.constant 32 : index
    %8 = vector.load %arg6[%c0_9, %c32] : memref<80x144xbf16, #tpu.memory_space<vmem>>, vector<80x16xbf16>
    tpu.vector_store %arg6[%c0_9, %c32], %7 {strides = array<i32>} : memref<80x144xbf16, #tpu.memory_space<vmem>>, vector<80x16xbf16>,
    %c0_10 = arith.constant 0 : index
    %c10 = arith.constant 10 : index
    %c0_11 = arith.constant 0 : index
    %9 = vector.load %arg1[%c0_10, %c10, %c0_11] : memref<1x110x16xbf16, #tpu.memory_space<vmem>>, vector<1x80x16xbf16>
    %10 = vector.shape_cast %9 : vector<1x80x16xbf16> to vector<80x16xbf16>
    %c0_12 = arith.constant 0 : index
    %c48 = arith.constant 48 : index
    %11 = vector.load %arg6[%c0_12, %c48] : memref<80x144xbf16, #tpu.memory_space<vmem>>, vector<80x16xbf16>
    tpu.vector_store %arg6[%c0_12, %c48], %10 {strides = array<i32>} : memref<80x144xbf16, #tpu.memory_space<vmem>>, vector<80x16xbf16>,
    %c0_13 = arith.constant 0 : index
    %c11 = arith.constant 11 : index
    %c0_14 = arith.constant 0 : index
    %12 = vector.load %arg1[%c0_13, %c11, %c0_14] : memref<1x110x16xbf16, #tpu.memory_space<vmem>>, vector<1x80x16xbf16>
    %13 = vector.shape_cast %12 : vector<1x80x16xbf16> to vector<80x16xbf16>
    %c0_15 = arith.constant 0 : index
    %c64 = arith.constant 64 : index
    %14 = vector.load %arg6[%c0_15, %c64] : memref<80x144xbf16, #tpu.memory_space<vmem>>, vector<80x16xbf16>
    tpu.vector_store %arg6[%c0_15, %c64], %13 {strides = array<i32>} : memref<80x144xbf16, #tpu.memory_space<vmem>>, vector<80x16xbf16>,
    %c0_16 = arith.constant 0 : index
    %c12 = arith.constant 12 : index
    %c0_17 = arith.constant 0 : index
    %15 = vector.load %arg1[%c0_16, %c12, %c0_17] : memref<1x110x16xbf16, #tpu.memory_space<vmem>>, vector<1x80x16xbf16>
    %16 = vector.shape_cast %15 : vector<1x80x16xbf16> to vector<80x16xbf16>
    %c0_18 = arith.constant 0 : index
    %c80 = arith.constant 80 : index
    %17 = vector.load %arg6[%c0_18, %c80] : memref<80x144xbf16, #tpu.memory_space<vmem>>, vector<80x16xbf16>
    tpu.vector_store %arg6[%c0_18, %c80], %16 {strides = array<i32>} : memref<80x144xbf16, #tpu.memory_space<vmem>>, vector<80x16xbf16>,
    %c0_19 = arith.constant 0 : index
    %c20 = arith.constant 20 : index
    %c0_20 = arith.constant 0 : index
    %18 = vector.load %arg1[%c0_19, %c20, %c0_20] : memref<1x110x16xbf16, #tpu.memory_space<vmem>>, vector<1x80x16xbf16>
    %19 = vector.shape_cast %18 : vector<1x80x16xbf16> to vector<80x16xbf16>
    %c0_21 = arith.constant 0 : index
    %c96 = arith.constant 96 : index
    %20 = vector.load %arg6[%c0_21, %c96] : memref<80x144xbf16, #tpu.memory_space<vmem>>, vector<80x16xbf16>
    tpu.vector_store %arg6[%c0_21, %c96], %19 {strides = array<i32>} : memref<80x144xbf16, #tpu.memory_space<vmem>>, vector<80x16xbf16>,
    %c0_22 = arith.constant 0 : index
    %c21 = arith.constant 21 : index
    %c0_23 = arith.constant 0 : index
    %21 = vector.load %arg1[%c0_22, %c21, %c0_23] : memref<1x110x16xbf16, #tpu.memory_space<vmem>>, vector<1x80x16xbf16>
    %22 = vector.shape_cast %21 : vector<1x80x16xbf16> to vector<80x16xbf16>
    %c0_24 = arith.constant 0 : index
    %c112 = arith.constant 112 : index
    %23 = vector.load %arg6[%c0_24, %c112] : memref<80x144xbf16, #tpu.memory_space<vmem>>, vector<80x16xbf16>
    tpu.vector_store %arg6[%c0_24, %c112], %22 {strides = array<i32>} : memref<80x144xbf16, #tpu.memory_space<vmem>>, vector<80x16xbf16>,
    %c0_25 = arith.constant 0 : index
    %c22 = arith.constant 22 : index
    %c0_26 = arith.constant 0 : index
    %24 = vector.load %arg1[%c0_25, %c22, %c0_26] : memref<1x110x16xbf16, #tpu.memory_space<vmem>>, vector<1x80x16xbf16>
    %25 = vector.shape_cast %24 : vector<1x80x16xbf16> to vector<80x16xbf16>
    %c0_27 = arith.constant 0 : index
    %c128 = arith.constant 128 : index
    %26 = vector.load %arg6[%c0_27, %c128] : memref<80x144xbf16, #tpu.memory_space<vmem>>, vector<80x16xbf16>
    tpu.vector_store %arg6[%c0_27, %c128], %25 {strides = array<i32>} : memref<80x144xbf16, #tpu.memory_space<vmem>>, vector<80x16xbf16>,
    %c0_28 = arith.constant 0 : index
    %c0_29 = arith.constant 0 : index
    %27 = vector.load %arg6[%c0_28, %c0_29] : memref<80x144xbf16, #tpu.memory_space<vmem>>, vector<80x144xbf16>
    %c0_30 = arith.constant 0 : index
    %c0_31 = arith.constant 0 : index
    %28 = vector.load %arg2[%c0_30, %c0_31] : memref<144x32xbf16, #tpu.memory_space<vmem>>, vector<144x32xbf16>
    %cst = arith.constant dense<0.000000e+00> : vector<80x32xf32>
    %29 = tpu.matmul %27, %28, %cst {dimension_numbers = #tpu.dot_dimension_numbers<[1], [0], [0], [1], [0, 0, 1, 1], [], []>} : vector<80x144xbf16>, vector<144x32xbf16>, vector<80x32xf32> -> vector<80x32xf32>
    %30 = arith.truncf %29 : vector<80x32xf32> to vector<80x32xbf16>
    %c0_32 = arith.constant 0 : index
    %c0_33 = arith.constant 0 : index
    %c0_34 = arith.constant 0 : index
    %31 = vector.load %arg3[%c0_32, %c0_33, %c0_34] : memref<1x80x32xbf16, #tpu.memory_space<vmem>>, vector<1x80x32xbf16>
    %32 = vector.shape_cast %31 : vector<1x80x32xbf16> to vector<80x32xbf16>
    %33 = vector.shape_cast %30 : vector<80x32xbf16> to vector<1x80x32xbf16>
    tpu.vector_store %arg3[%c0_32, %c0_33, %c0_34], %33 {strides = array<i32>} : memref<1x80x32xbf16, #tpu.memory_space<vmem>>, vector<1x80x32xbf16>,
    %34 = tpu.iota {dimensions = array<i32: 1>} : vector<1x80xi32>
    %c10_i32 = arith.constant 10 : i32
    %c0_i32 = arith.constant 0 : i32
    %35 = arith.cmpi eq, %c10_i32, %c0_i32 : i32
    %c1_i32 = arith.constant 1 : i32
    %36 = arith.select %35, %c1_i32, %c10_i32 : i32
    %37 = vector.broadcast %36 : i32 to vector<1x80xi32>
    %38 = arith.remsi %34, %37 : vector<1x80xi32>
    %c0_i32_35 = arith.constant 0 : i32
    %39 = vector.broadcast %c0_i32_35 : i32 to vector<1x80xi32>
    %40 = arith.cmpi ne, %38, %39 : vector<1x80xi32>
    %c0_i32_36 = arith.constant 0 : i32
    %41 = vector.broadcast %c0_i32_36 : i32 to vector<1x80xi32>
    %42 = arith.cmpi slt, %38, %41 : vector<1x80xi32>
    %c0_i32_37 = arith.constant 0 : i32
    %43 = arith.cmpi slt, %36, %c0_i32_37 : i32
    %44 = vector.broadcast %43 : i1 to vector<1x80xi1>
    %45 = vector.broadcast %44 : vector<1x80xi1> to vector<1x80xi1>
    %46 = arith.xori %42, %45 : vector<1x80xi1>
    %47 = arith.andi %46, %40 : vector<1x80xi1>
    %48 = vector.broadcast %36 : i32 to vector<1x80xi32>
    %49 = arith.addi %38, %48 : vector<1x80xi32>
    %50 = arith.select %47, %49, %38 : vector<1x80xi1>, vector<1x80xi32>
    %c8_i32 = arith.constant 8 : i32
    %51 = vector.broadcast %c8_i32 : i32 to vector<1x80xi32>
    %52 = arith.cmpi slt, %50, %51 : vector<1x80xi32>
    %53 = arith.extui %52 : vector<1x80xi1> to vector<1x80xi32>
    %54 = arith.sitofp %53 : vector<1x80xi32> to vector<1x80xf32>
    %cst_38 = arith.constant dense<0.000000e+00> : vector<1x32xf32>
    %55 = tpu.matmul %54, %29, %cst_38 {dimension_numbers = #tpu.dot_dimension_numbers<[1], [0], [0], [1], [0, 0, 1, 1], [], []>} : vector<1x80xf32>, vector<80x32xf32>, vector<1x32xf32> -> vector<1x32xf32>
    %c0_39 = arith.constant 0 : index
    %c0_40 = arith.constant 0 : index
    %c0_41 = arith.constant 0 : index
    %56 = vector.load %arg4[%c0_39, %c0_40, %c0_41] : memref<1x1x32xf32, #tpu.memory_space<vmem>>, vector<1x1x32xf32>
    %57 = vector.shape_cast %56 : vector<1x1x32xf32> to vector<1x32xf32>
    %58 = vector.shape_cast %55 : vector<1x32xf32> to vector<1x1x32xf32>
    tpu.vector_store %arg4[%c0_39, %c0_40, %c0_41], %58 {strides = array<i32>} : memref<1x1x32xf32, #tpu.memory_space<vmem>>, vector<1x1x32xf32>,
    %59 = arith.mulf %29, %29 : vector<80x32xf32>
    %cst_42 = arith.constant dense<0.000000e+00> : vector<1x32xf32>
    %60 = tpu.matmul %54, %59, %cst_42 {dimension_numbers = #tpu.dot_dimension_numbers<[1], [0], [0], [1], [0, 0, 1, 1], [], []>} : vector<1x80xf32>, vector<80x32xf32>, vector<1x32xf32> -> vector<1x32xf32>
    %c0_43 = arith.constant 0 : index
    %c0_44 = arith.constant 0 : index
    %c0_45 = arith.constant 0 : index
    %61 = vector.load %arg5[%c0_43, %c0_44, %c0_45] : memref<1x1x32xf32, #tpu.memory_space<vmem>>, vector<1x1x32xf32>
    %62 = vector.shape_cast %61 : vector<1x1x32xf32> to vector<1x32xf32>
    %63 = vector.shape_cast %60 : vector<1x32xf32> to vector<1x1x32xf32>
    tpu.vector_store %arg5[%c0_43, %c0_44, %c0_45], %63 {strides = array<i32>} : memref<1x1x32xf32, #tpu.memory_space<vmem>>, vector<1x1x32xf32>,
    return
  }
  func.func @transform_0(%arg0: i32) -> (i32, i32, i32) {
    %c0_i32 = arith.constant 0 : i32
    %c0_i32_0 = arith.constant 0 : i32
    %c0_i32_1 = arith.constant 0 : i32
    return %arg0, %c0_i32, %c0_i32_0 : i32, i32, i32
  }
  func.func @transform_1(%arg0: i32) -> (i32, i32) {
    %c0_i32 = arith.constant 0 : i32
    %c0_i32_0 = arith.constant 0 : i32
    %c0_i32_1 = arith.constant 0 : i32
    return %c0_i32, %c0_i32_0 : i32, i32
  }
  func.func @transform_2(%arg0: i32) -> (i32, i32, i32) {
    %c0_i32 = arith.constant 0 : i32
    %c0_i32_0 = arith.constant 0 : i32
    %c0_i32_1 = arith.constant 0 : i32
    return %arg0, %c0_i32, %c0_i32_0 : i32, i32, i32
  }
  func.func @transform_3(%arg0: i32) -> (i32, i32, i32) {
    %c0_i32 = arith.constant 0 : i32
    %c0_i32_0 = arith.constant 0 : i32
    %c0_i32_1 = arith.constant 0 : i32
    return %arg0, %c0_i32, %c0_i32_0 : i32, i32, i32
  }
  func.func @transform_4(%arg0: i32) -> (i32, i32, i32) {
    %c0_i32 = arith.constant 0 : i32
    %c0_i32_0 = arith.constant 0 : i32
    %c0_i32_1 = arith.constant 0 : i32
    return %arg0, %c0_i32, %c0_i32_0 : i32, i32, i32
  }
}

module attributes {stable_mosaic.version = 11 : i64} {
  func.func @_bn_relu_pool_kernel(%arg0: i32, %arg1: memref<8x640xbf16, #tpu.memory_space<vmem>>, %arg2: memref<1x640xf32, #tpu.memory_space<vmem>>, %arg3: memref<1x640xf32, #tpu.memory_space<vmem>>, %arg4: memref<640x128xbf16, #tpu.memory_space<vmem>>, %arg5: memref<8x128xf32, #tpu.memory_space<vmem>>) attributes {dimension_semantics = [#tpu.dimension_semantics<parallel>], iteration_bounds = array<i64: 1>, scalar_prefetch = 0 : i64, scratch_operands = 0 : i64, tpu.core_type = #tpu.core_type<tc>, window_params = [{transform_indices = @transform_0, window_bounds = array<i64: 8, 640>}, {pipeline_mode = #tpu.pipeline_mode<synchronous>, transform_indices = @transform_1, window_bounds = array<i64: 1, 640>}, {pipeline_mode = #tpu.pipeline_mode<synchronous>, transform_indices = @transform_2, window_bounds = array<i64: 1, 640>}, {pipeline_mode = #tpu.pipeline_mode<synchronous>, transform_indices = @transform_3, window_bounds = array<i64: 640, 128>}, {transform_indices = @transform_4, window_bounds = array<i64: 8, 128>}]} {
    %c0 = arith.constant 0 : index
    %c0_0 = arith.constant 0 : index
    %0 = vector.load %arg1[%c0, %c0_0] : memref<8x640xbf16, #tpu.memory_space<vmem>>, vector<8x640xbf16>
    %1 = arith.extf %0 : vector<8x640xbf16> to vector<8x640xf32>
    %c0_1 = arith.constant 0 : index
    %c0_2 = arith.constant 0 : index
    %2 = vector.load %arg2[%c0_1, %c0_2] : memref<1x640xf32, #tpu.memory_space<vmem>>, vector<1x640xf32>
    %3 = vector.broadcast %2 : vector<1x640xf32> to vector<8x640xf32>
    %4 = arith.mulf %1, %3 : vector<8x640xf32>
    %c0_3 = arith.constant 0 : index
    %c0_4 = arith.constant 0 : index
    %5 = vector.load %arg3[%c0_3, %c0_4] : memref<1x640xf32, #tpu.memory_space<vmem>>, vector<1x640xf32>
    %6 = vector.broadcast %5 : vector<1x640xf32> to vector<8x640xf32>
    %7 = arith.addf %4, %6 : vector<8x640xf32>
    %cst = arith.constant 0.000000e+00 : f32
    %8 = vector.broadcast %cst : f32 to vector<8x640xf32>
    %9 = arith.maximumf %7, %8 : vector<8x640xf32>
    %10 = arith.truncf %9 : vector<8x640xf32> to vector<8x640xbf16>
    %c0_5 = arith.constant 0 : index
    %c0_6 = arith.constant 0 : index
    %11 = vector.load %arg4[%c0_5, %c0_6] : memref<640x128xbf16, #tpu.memory_space<vmem>>, vector<640x128xbf16>
    %cst_7 = arith.constant dense<0.000000e+00> : vector<8x128xf32>
    %12 = tpu.matmul %10, %11, %cst_7 {dimension_numbers = #tpu.dot_dimension_numbers<[1], [0], [0], [1], [0, 0, 1, 1], [], []>} : vector<8x640xbf16>, vector<640x128xbf16>, vector<8x128xf32> -> vector<8x128xf32>
    %c0_8 = arith.constant 0 : index
    %c0_9 = arith.constant 0 : index
    %13 = vector.load %arg5[%c0_8, %c0_9] : memref<8x128xf32, #tpu.memory_space<vmem>>, vector<8x128xf32>
    tpu.vector_store %arg5[%c0_8, %c0_9], %12 {strides = array<i32>} : memref<8x128xf32, #tpu.memory_space<vmem>>, vector<8x128xf32>,
    return
  }
  func.func @transform_0(%arg0: i32) -> (i32, i32) {
    %c0_i32 = arith.constant 0 : i32
    %c0_i32_0 = arith.constant 0 : i32
    return %arg0, %c0_i32 : i32, i32
  }
  func.func @transform_1(%arg0: i32) -> (i32, i32) {
    %c0_i32 = arith.constant 0 : i32
    %c0_i32_0 = arith.constant 0 : i32
    %c0_i32_1 = arith.constant 0 : i32
    return %c0_i32, %c0_i32_0 : i32, i32
  }
  func.func @transform_2(%arg0: i32) -> (i32, i32) {
    %c0_i32 = arith.constant 0 : i32
    %c0_i32_0 = arith.constant 0 : i32
    %c0_i32_1 = arith.constant 0 : i32
    return %c0_i32, %c0_i32_0 : i32, i32
  }
  func.func @transform_3(%arg0: i32) -> (i32, i32) {
    %c0_i32 = arith.constant 0 : i32
    %c0_i32_0 = arith.constant 0 : i32
    %c0_i32_1 = arith.constant 0 : i32
    return %c0_i32, %c0_i32_0 : i32, i32
  }
  func.func @transform_4(%arg0: i32) -> (i32, i32) {
    %c0_i32 = arith.constant 0 : i32
    %c0_i32_0 = arith.constant 0 : i32
    return %arg0, %c0_i32 : i32, i32
  }
}

module attributes {stable_mosaic.version = 11 : i64} {
  func.func @_conv_stats_kernel(%arg0: i32, %arg1: memref<1x42x32xbf16, #tpu.memory_space<vmem>>, %arg2: memref<288x64xbf16, #tpu.memory_space<vmem>>, %arg3: memref<1x24x64xbf16, #tpu.memory_space<vmem>>, %arg4: memref<1x1x64xf32, #tpu.memory_space<vmem>>, %arg5: memref<1x1x64xf32, #tpu.memory_space<vmem>>, %arg6: memref<24x288xbf16, #tpu.memory_space<vmem>>) attributes {dimension_semantics = [#tpu.dimension_semantics<parallel>], iteration_bounds = array<i64: 2>, scalar_prefetch = 0 : i64, scratch_operands = 1 : i64, tpu.core_type = #tpu.core_type<tc>, window_params = [{transform_indices = @transform_0, window_bounds = array<i64: 1, 42, 32>}, {pipeline_mode = #tpu.pipeline_mode<synchronous>, transform_indices = @transform_1, window_bounds = array<i64: 288, 64>}, {transform_indices = @transform_2, window_bounds = array<i64: 1, 24, 64>}, {transform_indices = @transform_3, window_bounds = array<i64: 1, 1, 64>}, {transform_indices = @transform_4, window_bounds = array<i64: 1, 1, 64>}]} {
    %c0 = arith.constant 0 : index
    %c0_0 = arith.constant 0 : index
    %c0_1 = arith.constant 0 : index
    %0 = vector.load %arg1[%c0, %c0_0, %c0_1] : memref<1x42x32xbf16, #tpu.memory_space<vmem>>, vector<1x24x32xbf16>
    %1 = vector.shape_cast %0 : vector<1x24x32xbf16> to vector<24x32xbf16>
    %c0_2 = arith.constant 0 : index
    %c0_3 = arith.constant 0 : index
    %2 = vector.load %arg6[%c0_2, %c0_3] : memref<24x288xbf16, #tpu.memory_space<vmem>>, vector<24x32xbf16>
    tpu.vector_store %arg6[%c0_2, %c0_3], %1 {strides = array<i32>} : memref<24x288xbf16, #tpu.memory_space<vmem>>, vector<24x32xbf16>,
    %c0_4 = arith.constant 0 : index
    %c1 = arith.constant 1 : index
    %c0_5 = arith.constant 0 : index
    %3 = vector.load %arg1[%c0_4, %c1, %c0_5] : memref<1x42x32xbf16, #tpu.memory_space<vmem>>, vector<1x24x32xbf16>
    %4 = vector.shape_cast %3 : vector<1x24x32xbf16> to vector<24x32xbf16>
    %c0_6 = arith.constant 0 : index
    %c32 = arith.constant 32 : index
    %5 = vector.load %arg6[%c0_6, %c32] : memref<24x288xbf16, #tpu.memory_space<vmem>>, vector<24x32xbf16>
    tpu.vector_store %arg6[%c0_6, %c32], %4 {strides = array<i32>} : memref<24x288xbf16, #tpu.memory_space<vmem>>, vector<24x32xbf16>,
    %c0_7 = arith.constant 0 : index
    %c2 = arith.constant 2 : index
    %c0_8 = arith.constant 0 : index
    %6 = vector.load %arg1[%c0_7, %c2, %c0_8] : memref<1x42x32xbf16, #tpu.memory_space<vmem>>, vector<1x24x32xbf16>
    %7 = vector.shape_cast %6 : vector<1x24x32xbf16> to vector<24x32xbf16>
    %c0_9 = arith.constant 0 : index
    %c64 = arith.constant 64 : index
    %8 = vector.load %arg6[%c0_9, %c64] : memref<24x288xbf16, #tpu.memory_space<vmem>>, vector<24x32xbf16>
    tpu.vector_store %arg6[%c0_9, %c64], %7 {strides = array<i32>} : memref<24x288xbf16, #tpu.memory_space<vmem>>, vector<24x32xbf16>,
    %c0_10 = arith.constant 0 : index
    %c6 = arith.constant 6 : index
    %c0_11 = arith.constant 0 : index
    %9 = vector.load %arg1[%c0_10, %c6, %c0_11] : memref<1x42x32xbf16, #tpu.memory_space<vmem>>, vector<1x24x32xbf16>
    %10 = vector.shape_cast %9 : vector<1x24x32xbf16> to vector<24x32xbf16>
    %c0_12 = arith.constant 0 : index
    %c96 = arith.constant 96 : index
    %11 = vector.load %arg6[%c0_12, %c96] : memref<24x288xbf16, #tpu.memory_space<vmem>>, vector<24x32xbf16>
    tpu.vector_store %arg6[%c0_12, %c96], %10 {strides = array<i32>} : memref<24x288xbf16, #tpu.memory_space<vmem>>, vector<24x32xbf16>,
    %c0_13 = arith.constant 0 : index
    %c7 = arith.constant 7 : index
    %c0_14 = arith.constant 0 : index
    %12 = vector.load %arg1[%c0_13, %c7, %c0_14] : memref<1x42x32xbf16, #tpu.memory_space<vmem>>, vector<1x24x32xbf16>
    %13 = vector.shape_cast %12 : vector<1x24x32xbf16> to vector<24x32xbf16>
    %c0_15 = arith.constant 0 : index
    %c128 = arith.constant 128 : index
    %14 = vector.load %arg6[%c0_15, %c128] : memref<24x288xbf16, #tpu.memory_space<vmem>>, vector<24x32xbf16>
    tpu.vector_store %arg6[%c0_15, %c128], %13 {strides = array<i32>} : memref<24x288xbf16, #tpu.memory_space<vmem>>, vector<24x32xbf16>,
    %c0_16 = arith.constant 0 : index
    %c8 = arith.constant 8 : index
    %c0_17 = arith.constant 0 : index
    %15 = vector.load %arg1[%c0_16, %c8, %c0_17] : memref<1x42x32xbf16, #tpu.memory_space<vmem>>, vector<1x24x32xbf16>
    %16 = vector.shape_cast %15 : vector<1x24x32xbf16> to vector<24x32xbf16>
    %c0_18 = arith.constant 0 : index
    %c160 = arith.constant 160 : index
    %17 = vector.load %arg6[%c0_18, %c160] : memref<24x288xbf16, #tpu.memory_space<vmem>>, vector<24x32xbf16>
    tpu.vector_store %arg6[%c0_18, %c160], %16 {strides = array<i32>} : memref<24x288xbf16, #tpu.memory_space<vmem>>, vector<24x32xbf16>,
    %c0_19 = arith.constant 0 : index
    %c12 = arith.constant 12 : index
    %c0_20 = arith.constant 0 : index
    %18 = vector.load %arg1[%c0_19, %c12, %c0_20] : memref<1x42x32xbf16, #tpu.memory_space<vmem>>, vector<1x24x32xbf16>
    %19 = vector.shape_cast %18 : vector<1x24x32xbf16> to vector<24x32xbf16>
    %c0_21 = arith.constant 0 : index
    %c192 = arith.constant 192 : index
    %20 = vector.load %arg6[%c0_21, %c192] : memref<24x288xbf16, #tpu.memory_space<vmem>>, vector<24x32xbf16>
    tpu.vector_store %arg6[%c0_21, %c192], %19 {strides = array<i32>} : memref<24x288xbf16, #tpu.memory_space<vmem>>, vector<24x32xbf16>,
    %c0_22 = arith.constant 0 : index
    %c13 = arith.constant 13 : index
    %c0_23 = arith.constant 0 : index
    %21 = vector.load %arg1[%c0_22, %c13, %c0_23] : memref<1x42x32xbf16, #tpu.memory_space<vmem>>, vector<1x24x32xbf16>
    %22 = vector.shape_cast %21 : vector<1x24x32xbf16> to vector<24x32xbf16>
    %c0_24 = arith.constant 0 : index
    %c224 = arith.constant 224 : index
    %23 = vector.load %arg6[%c0_24, %c224] : memref<24x288xbf16, #tpu.memory_space<vmem>>, vector<24x32xbf16>
    tpu.vector_store %arg6[%c0_24, %c224], %22 {strides = array<i32>} : memref<24x288xbf16, #tpu.memory_space<vmem>>, vector<24x32xbf16>,
    %c0_25 = arith.constant 0 : index
    %c14 = arith.constant 14 : index
    %c0_26 = arith.constant 0 : index
    %24 = vector.load %arg1[%c0_25, %c14, %c0_26] : memref<1x42x32xbf16, #tpu.memory_space<vmem>>, vector<1x24x32xbf16>
    %25 = vector.shape_cast %24 : vector<1x24x32xbf16> to vector<24x32xbf16>
    %c0_27 = arith.constant 0 : index
    %c256 = arith.constant 256 : index
    %26 = vector.load %arg6[%c0_27, %c256] : memref<24x288xbf16, #tpu.memory_space<vmem>>, vector<24x32xbf16>
    tpu.vector_store %arg6[%c0_27, %c256], %25 {strides = array<i32>} : memref<24x288xbf16, #tpu.memory_space<vmem>>, vector<24x32xbf16>,
    %c0_28 = arith.constant 0 : index
    %c0_29 = arith.constant 0 : index
    %27 = vector.load %arg6[%c0_28, %c0_29] : memref<24x288xbf16, #tpu.memory_space<vmem>>, vector<24x288xbf16>
    %c0_30 = arith.constant 0 : index
    %c0_31 = arith.constant 0 : index
    %28 = vector.load %arg2[%c0_30, %c0_31] : memref<288x64xbf16, #tpu.memory_space<vmem>>, vector<288x64xbf16>
    %cst = arith.constant dense<0.000000e+00> : vector<24x64xf32>
    %29 = tpu.matmul %27, %28, %cst {dimension_numbers = #tpu.dot_dimension_numbers<[1], [0], [0], [1], [0, 0, 1, 1], [], []>} : vector<24x288xbf16>, vector<288x64xbf16>, vector<24x64xf32> -> vector<24x64xf32>
    %30 = arith.truncf %29 : vector<24x64xf32> to vector<24x64xbf16>
    %c0_32 = arith.constant 0 : index
    %c0_33 = arith.constant 0 : index
    %c0_34 = arith.constant 0 : index
    %31 = vector.load %arg3[%c0_32, %c0_33, %c0_34] : memref<1x24x64xbf16, #tpu.memory_space<vmem>>, vector<1x24x64xbf16>
    %32 = vector.shape_cast %31 : vector<1x24x64xbf16> to vector<24x64xbf16>
    %33 = vector.shape_cast %30 : vector<24x64xbf16> to vector<1x24x64xbf16>
    tpu.vector_store %arg3[%c0_32, %c0_33, %c0_34], %33 {strides = array<i32>} : memref<1x24x64xbf16, #tpu.memory_space<vmem>>, vector<1x24x64xbf16>,
    %34 = tpu.iota {dimensions = array<i32: 1>} : vector<1x24xi32>
    %c6_i32 = arith.constant 6 : i32
    %c0_i32 = arith.constant 0 : i32
    %35 = arith.cmpi eq, %c6_i32, %c0_i32 : i32
    %c1_i32 = arith.constant 1 : i32
    %36 = arith.select %35, %c1_i32, %c6_i32 : i32
    %37 = vector.broadcast %36 : i32 to vector<1x24xi32>
    %38 = arith.remsi %34, %37 : vector<1x24xi32>
    %c0_i32_35 = arith.constant 0 : i32
    %39 = vector.broadcast %c0_i32_35 : i32 to vector<1x24xi32>
    %40 = arith.cmpi ne, %38, %39 : vector<1x24xi32>
    %c0_i32_36 = arith.constant 0 : i32
    %41 = vector.broadcast %c0_i32_36 : i32 to vector<1x24xi32>
    %42 = arith.cmpi slt, %38, %41 : vector<1x24xi32>
    %c0_i32_37 = arith.constant 0 : i32
    %43 = arith.cmpi slt, %36, %c0_i32_37 : i32
    %44 = vector.broadcast %43 : i1 to vector<1x24xi1>
    %45 = vector.broadcast %44 : vector<1x24xi1> to vector<1x24xi1>
    %46 = arith.xori %42, %45 : vector<1x24xi1>
    %47 = arith.andi %46, %40 : vector<1x24xi1>
    %48 = vector.broadcast %36 : i32 to vector<1x24xi32>
    %49 = arith.addi %38, %48 : vector<1x24xi32>
    %50 = arith.select %47, %49, %38 : vector<1x24xi1>, vector<1x24xi32>
    %c4_i32 = arith.constant 4 : i32
    %51 = vector.broadcast %c4_i32 : i32 to vector<1x24xi32>
    %52 = arith.cmpi slt, %50, %51 : vector<1x24xi32>
    %53 = arith.extui %52 : vector<1x24xi1> to vector<1x24xi32>
    %54 = arith.sitofp %53 : vector<1x24xi32> to vector<1x24xf32>
    %cst_38 = arith.constant dense<0.000000e+00> : vector<1x64xf32>
    %55 = tpu.matmul %54, %29, %cst_38 {dimension_numbers = #tpu.dot_dimension_numbers<[1], [0], [0], [1], [0, 0, 1, 1], [], []>} : vector<1x24xf32>, vector<24x64xf32>, vector<1x64xf32> -> vector<1x64xf32>
    %c0_39 = arith.constant 0 : index
    %c0_40 = arith.constant 0 : index
    %c0_41 = arith.constant 0 : index
    %56 = vector.load %arg4[%c0_39, %c0_40, %c0_41] : memref<1x1x64xf32, #tpu.memory_space<vmem>>, vector<1x1x64xf32>
    %57 = vector.shape_cast %56 : vector<1x1x64xf32> to vector<1x64xf32>
    %58 = vector.shape_cast %55 : vector<1x64xf32> to vector<1x1x64xf32>
    tpu.vector_store %arg4[%c0_39, %c0_40, %c0_41], %58 {strides = array<i32>} : memref<1x1x64xf32, #tpu.memory_space<vmem>>, vector<1x1x64xf32>,
    %59 = arith.mulf %29, %29 : vector<24x64xf32>
    %cst_42 = arith.constant dense<0.000000e+00> : vector<1x64xf32>
    %60 = tpu.matmul %54, %59, %cst_42 {dimension_numbers = #tpu.dot_dimension_numbers<[1], [0], [0], [1], [0, 0, 1, 1], [], []>} : vector<1x24xf32>, vector<24x64xf32>, vector<1x64xf32> -> vector<1x64xf32>
    %c0_43 = arith.constant 0 : index
    %c0_44 = arith.constant 0 : index
    %c0_45 = arith.constant 0 : index
    %61 = vector.load %arg5[%c0_43, %c0_44, %c0_45] : memref<1x1x64xf32, #tpu.memory_space<vmem>>, vector<1x1x64xf32>
    %62 = vector.shape_cast %61 : vector<1x1x64xf32> to vector<1x64xf32>
    %63 = vector.shape_cast %60 : vector<1x64xf32> to vector<1x1x64xf32>
    tpu.vector_store %arg5[%c0_43, %c0_44, %c0_45], %63 {strides = array<i32>} : memref<1x1x64xf32, #tpu.memory_space<vmem>>, vector<1x1x64xf32>,
    return
  }
  func.func @transform_0(%arg0: i32) -> (i32, i32, i32) {
    %c0_i32 = arith.constant 0 : i32
    %c0_i32_0 = arith.constant 0 : i32
    %c0_i32_1 = arith.constant 0 : i32
    return %arg0, %c0_i32, %c0_i32_0 : i32, i32, i32
  }
  func.func @transform_1(%arg0: i32) -> (i32, i32) {
    %c0_i32 = arith.constant 0 : i32
    %c0_i32_0 = arith.constant 0 : i32
    %c0_i32_1 = arith.constant 0 : i32
    return %c0_i32, %c0_i32_0 : i32, i32
  }
  func.func @transform_2(%arg0: i32) -> (i32, i32, i32) {
    %c0_i32 = arith.constant 0 : i32
    %c0_i32_0 = arith.constant 0 : i32
    %c0_i32_1 = arith.constant 0 : i32
    return %arg0, %c0_i32, %c0_i32_0 : i32, i32, i32
  }
  func.func @transform_3(%arg0: i32) -> (i32, i32, i32) {
    %c0_i32 = arith.constant 0 : i32
    %c0_i32_0 = arith.constant 0 : i32
    %c0_i32_1 = arith.constant 0 : i32
    return %arg0, %c0_i32, %c0_i32_0 : i32, i32, i32
  }
  func.func @transform_4(%arg0: i32) -> (i32, i32, i32) {
    %c0_i32 = arith.constant 0 : i32
    %c0_i32_0 = arith.constant 0 : i32
    %c0_i32_1 = arith.constant 0 : i32
    return %arg0, %c0_i32, %c0_i32_0 : i32, i32, i32
  }
}

module attributes {stable_mosaic.version = 11 : i64} {
  func.func @_bn_relu_pool_kernel(%arg0: i32, %arg1: memref<4x768xbf16, #tpu.memory_space<vmem>>, %arg2: memref<1x768xf32, #tpu.memory_space<vmem>>, %arg3: memref<1x768xf32, #tpu.memory_space<vmem>>, %arg4: memref<768x128xbf16, #tpu.memory_space<vmem>>, %arg5: memref<4x128xf32, #tpu.memory_space<vmem>>) attributes {dimension_semantics = [#tpu.dimension_semantics<parallel>], iteration_bounds = array<i64: 1>, scalar_prefetch = 0 : i64, scratch_operands = 0 : i64, tpu.core_type = #tpu.core_type<tc>, window_params = [{transform_indices = @transform_0, window_bounds = array<i64: 4, 768>}, {pipeline_mode = #tpu.pipeline_mode<synchronous>, transform_indices = @transform_1, window_bounds = array<i64: 1, 768>}, {pipeline_mode = #tpu.pipeline_mode<synchronous>, transform_indices = @transform_2, window_bounds = array<i64: 1, 768>}, {pipeline_mode = #tpu.pipeline_mode<synchronous>, transform_indices = @transform_3, window_bounds = array<i64: 768, 128>}, {transform_indices = @transform_4, window_bounds = array<i64: 4, 128>}]} {
    %c0 = arith.constant 0 : index
    %c0_0 = arith.constant 0 : index
    %0 = vector.load %arg1[%c0, %c0_0] : memref<4x768xbf16, #tpu.memory_space<vmem>>, vector<4x768xbf16>
    %1 = arith.extf %0 : vector<4x768xbf16> to vector<4x768xf32>
    %c0_1 = arith.constant 0 : index
    %c0_2 = arith.constant 0 : index
    %2 = vector.load %arg2[%c0_1, %c0_2] : memref<1x768xf32, #tpu.memory_space<vmem>>, vector<1x768xf32>
    %3 = vector.broadcast %2 : vector<1x768xf32> to vector<4x768xf32>
    %4 = arith.mulf %1, %3 : vector<4x768xf32>
    %c0_3 = arith.constant 0 : index
    %c0_4 = arith.constant 0 : index
    %5 = vector.load %arg3[%c0_3, %c0_4] : memref<1x768xf32, #tpu.memory_space<vmem>>, vector<1x768xf32>
    %6 = vector.broadcast %5 : vector<1x768xf32> to vector<4x768xf32>
    %7 = arith.addf %4, %6 : vector<4x768xf32>
    %cst = arith.constant 0.000000e+00 : f32
    %8 = vector.broadcast %cst : f32 to vector<4x768xf32>
    %9 = arith.maximumf %7, %8 : vector<4x768xf32>
    %10 = arith.truncf %9 : vector<4x768xf32> to vector<4x768xbf16>
    %c0_5 = arith.constant 0 : index
    %c0_6 = arith.constant 0 : index
    %11 = vector.load %arg4[%c0_5, %c0_6] : memref<768x128xbf16, #tpu.memory_space<vmem>>, vector<768x128xbf16>
    %cst_7 = arith.constant dense<0.000000e+00> : vector<4x128xf32>
    %12 = tpu.matmul %10, %11, %cst_7 {dimension_numbers = #tpu.dot_dimension_numbers<[1], [0], [0], [1], [0, 0, 1, 1], [], []>} : vector<4x768xbf16>, vector<768x128xbf16>, vector<4x128xf32> -> vector<4x128xf32>
    %c0_8 = arith.constant 0 : index
    %c0_9 = arith.constant 0 : index
    %13 = vector.load %arg5[%c0_8, %c0_9] : memref<4x128xf32, #tpu.memory_space<vmem>>, vector<4x128xf32>
    tpu.vector_store %arg5[%c0_8, %c0_9], %12 {strides = array<i32>} : memref<4x128xf32, #tpu.memory_space<vmem>>, vector<4x128xf32>,
    return
  }
  func.func @transform_0(%arg0: i32) -> (i32, i32) {
    %c0_i32 = arith.constant 0 : i32
    %c0_i32_0 = arith.constant 0 : i32
    return %arg0, %c0_i32 : i32, i32
  }
  func.func @transform_1(%arg0: i32) -> (i32, i32) {
    %c0_i32 = arith.constant 0 : i32
    %c0_i32_0 = arith.constant 0 : i32
    %c0_i32_1 = arith.constant 0 : i32
    return %c0_i32, %c0_i32_0 : i32, i32
  }
  func.func @transform_2(%arg0: i32) -> (i32, i32) {
    %c0_i32 = arith.constant 0 : i32
    %c0_i32_0 = arith.constant 0 : i32
    %c0_i32_1 = arith.constant 0 : i32
    return %c0_i32, %c0_i32_0 : i32, i32
  }
  func.func @transform_3(%arg0: i32) -> (i32, i32) {
    %c0_i32 = arith.constant 0 : i32
    %c0_i32_0 = arith.constant 0 : i32
    %c0_i32_1 = arith.constant 0 : i32
    return %c0_i32, %c0_i32_0 : i32, i32
  }
  func.func @transform_4(%arg0: i32) -> (i32, i32) {
    %c0_i32 = arith.constant 0 : i32
    %c0_i32_0 = arith.constant 0 : i32
    return %arg0, %c0_i32 : i32, i32
  }
}

</mosaic_0001>

<bundles_post_ra>
// kernel: tile.33
= control target key start
LH: loop header
LB: loop body
LE: loop exit
PB: predicated region body
PF: predicated region fallthrough
CT: control target
= control target key end

     0   :  { %s46_s0 = inlined_call_operand.vmem [shape: f32[16], index: 0, kind: input, shape index: {}]   ;;  %s47_s1 = inlined_call_operand.vmem [shape: f32[36,16], index: 1, kind: output, shape index: {}]  }
   0x1   :  { %v4_v0 = vld [vmem:[%s46_s0] ss:$0 sm:$0xff] }
   0x2   :  { %5 = vst [vmem:[%s47_s1] sm:$0xff] %v4_v0 }
   0x3   :  { %14 = vst [vmem:[%s47_s1 + $0x8] sm:$0xff] %v4_v0 }
   0x4   :  { %15 = vst [vmem:[%s47_s1 + $0x10] sm:$0xff] %v4_v0 }
   0x5   :  { %16 = vst [vmem:[%s47_s1 + $0x18] sm:$0xff] %v4_v0 }
   0x6   :  { %17 = vst [vmem:[%s47_s1 + $0x20] sm:$0xff] %v4_v0 }

// kernel: tile.34
= control target key start
LH: loop header
LB: loop body
LE: loop exit
PB: predicated region body
PF: predicated region fallthrough
CT: control target
= control target key end

     0   :  { %s123_s8 = smov 112   ;;  %s124_s11 = smov 80   ;;  %vm5_vm0 = vcmask 1044484   ;;  %vm7_vm1 = vcmask 130048   ;;  %vm43_vm2 = vcmask 523648   ;;  %vm55_vm3 = vcmask 392448   ;;  %s199_s0 = inlined_call_operand.vmem [shape: f32[36,16], index: 0, kind: input, shape index: {}]   ;;  %s200_s1 = inlined_call_operand.vmem [shape: f32[1,576], index: 1, kind: output, shape index: {}]  }
   0x1   :  { %v102_v0 = vld [vmem:[%s199_s0 + $0x7] ss:$8 sm:$0xf]   ;;  %v104_v1 = vld [vmem:[%s199_s0 + $0x5] ss:$8 sm:$0xf]  }
   0x2   :  { %13 = vrot.lane.b32.xlu0 %v102_v0, %s123_s8  ;;  %25 = vrot.lane.b32.xlu1 %v104_v1, %s124_s11  ;;  %v106_v2 = vld [vmem:[%s199_s0 + $0x3] ss:$8 sm:$0xf]   ;;  %v103_v5 = vld [vmem:[%s199_s0 + $0x6] ss:$8 sm:$0xf]  }
   0x3   :  { %v107_v3 = vld [vmem:[%s199_s0 + $0x1f] sm:$0x10]   ;;  %s125_s18 = smov 48   ;;  %v105_v6 = vld [vmem:[%s199_s0 + $0x4] ss:$8 sm:$0xf]  }
   0x4   :  { %v40_v4 = vsel %vm5_vm0, %v107_v3, %v106_v2  ;;  %v108_v7 = vld [vmem:[%s199_s0 + $0x2] ss:$8 sm:$0xf]   ;;  %s126_s25 = smov 96   ;;  %s127_s26 = smov 64   ;;  %vm15_vm4 = vcmask 1048448  }
   0x5   :  { %41 = vrot.lane.b32.xlu2 %v40_v4, %s125_s18  ;;  %v109_v8 = vld [vmem:[%s199_s0 + $0x1e] sm:$0x10]   ;;  %v110_v9 = vld [vmem:[%s199_s0 + $0x1] ss:$8 sm:$0xf]   ;;  %s128_s2 = smov 32  }
   0x6   :  { %v111_v10 = vld [vmem:[%s199_s0 + $0x1d] sm:$0x10]   ;;  %v52_v11 = vsel %vm5_vm0, %v109_v8, %v108_v7  ;;  %s129_s3 = smov 16   ;;  %v2_v13 = vld [vmem:[%s199_s0] ss:$8 sm:$0xf]  }
   0x7   :  { %v64_v12 = vsel %vm5_vm0, %v111_v10, %v110_v9  ;;  %v101_v14 = vld [vmem:[%s199_s0 + $0x1c] sm:$0x10]   ;;  %vm21_vm5 = vcmask 917248   ;;  %vm27_vm6 = vcmask 786048   ;;  %vm33_vm7 = vcmask 654848  }
   0x8   :  { %v6_v15 = vsel %vm5_vm0, %v101_v14, %v2_v13  ;;  %vm67_vm8 = vcmask 261248  }
   0x9   :  { %8 = vst.msk [vmem:[#allocation0] ss:$8 sm:$0xf] %vm7_vm1, %v6_v15  }
   0xa   :  { %19 = vrot.lane.b32.xlu0 %v103_v5, %s126_s25  ;;  %31 = vrot.lane.b32.xlu1 %v105_v6, %s127_s26  ;;  %10 = vst.msk [vmem:[#allocation0 + $0x1c] sm:$0x10] %vm7_vm1, %v6_v15  }
   0xd   :  { %53 = vrot.lane.b32.xlu2 %v52_v11, %s128_s2 }
  0x12   :  { %65 = vrot.lane.b32.xlu0 %v64_v12, %s129_s3 }
  0x5f   :  { %v42_v16 = vpop.permute.xlu2 %41  }
  0x60   :  { %46 = vst.msk [vmem:[#allocation0 + $0x1c] sm:$0x10] %vm43_vm2, %v42_v16  }
  0x67   :  { %v54_v17 = vpop.permute.xlu2 %53  }
  0x68   :  { %58 = vst.msk [vmem:[#allocation0 + $0x1c] sm:$0x10] %vm55_vm3, %v54_v17  }
  0x74   :  { %v14_v18 = vpop.permute.xlu0 %13   ;;  %v26_v19 = vpop.permute.xlu1 %25  }
  0x75   :  { %16 = vst.msk [vmem:[#allocation0] ss:$8 sm:$0xf] %vm15_vm4, %v14_v18  }
  0x7c   :  { %v20_v20 = vpop.permute.xlu0 %19   ;;  %v32_v21 = vpop.permute.xlu1 %31  }
  0x7d   :  { %22 = vst.msk [vmem:[#allocation0] ss:$8 sm:$0xf] %vm21_vm5, %v20_v20  }
  0x7e   :  { %28 = vst.msk [vmem:[#allocation0] ss:$8 sm:$0xf] %vm27_vm6, %v26_v19  }
  0x7f   :  { %34 = vst.msk [vmem:[#allocation0] ss:$8 sm:$0xf] %vm33_vm7, %v32_v21  }
  0x80   :  { %44 = vst.msk [vmem:[#allocation0] ss:$8 sm:$0xf] %vm43_vm2, %v42_v16  }
  0x81   :  { %56 = vst.msk [vmem:[#allocation0] ss:$8 sm:$0xf] %vm55_vm3, %v54_v17  }
  0x84   :  { %v66_v22 = vpop.permute.xlu0 %65  }
  0x85   :  { %68 = vst.msk [vmem:[#allocation0] ss:$8 sm:$0xf] %vm67_vm8, %v66_v22  }
  0x86   :  { %70 = vst.msk [vmem:[#allocation0 + $0x1c] sm:$0x10] %vm67_vm8, %v66_v22  }
  0x8c   :  { %v73_v23 = vld [vmem:[#allocation0] sm:$0x1]  ;;  %v78_v24 = vld [vmem:[#allocation0 + $0x8] sm:$0x1]  ;;  %v84_v25 = vld [vmem:[#allocation0 + $0x10] sm:$0x1] }
  0x8d   :  { %76 = vst [vmem:[%s200_s1] sm:$0x1] %v73_v23  ;;  %v90_v26 = vld [vmem:[#allocation0 + $0x18] sm:$0x1]  ;;  %v96_v27 = vld [vmem:[#allocation0 + $0x20] sm:$0x1] }
  0x8e   :  { %112 = vst [vmem:[%s200_s1 + $0x1] sm:$0x1] %v78_v24 }
  0x8f   :  { %113 = vst [vmem:[%s200_s1 + $0x2] sm:$0x1] %v84_v25 }
  0x90   :  { %114 = vst [vmem:[%s200_s1 + $0x3] sm:$0x1] %v90_v26 }
  0x91   :  { %115 = vst [vmem:[%s200_s1 + $0x4] sm:$0x1] %v96_v27 }

// kernel: tile.43
= control target key start
LH: loop header
LB: loop body
LE: loop exit
PB: predicated region body
PF: predicated region fallthrough
CT: control target
= control target key end

     0   :  { %s34_s0 = inlined_call_operand.vmem [shape: f32[32], index: 0, kind: input, shape index: {}]   ;;  %s35_s1 = inlined_call_operand.vmem [shape: f32[20,32], index: 1, kind: output, shape index: {}]  }
   0x1   :  { %v4_v0 = vld [vmem:[%s34_s0] ss:$0 sm:$0xff] }
   0x2   :  { %5 = vst [vmem:[%s35_s1] sm:$0xff] %v4_v0 }
   0x3   :  { %10 = vst [vmem:[%s35_s1 + $0x8] sm:$0xff] %v4_v0 }
   0x4   :  { %11 = vst [vmem:[%s35_s1 + $0x10] sm:$0xff] %v4_v0 }

// kernel: tile.44
= control target key start
LH: loop header
LB: loop body
LE: loop exit
PB: predicated region body
PF: predicated region fallthrough
CT: control target
= control target key end

     0   :  { %s71_s8 = smov 96   ;;  %s72_s11 = smov 32   ;;  %vm3_vm0 = vcmask 261120   ;;  %vm11_vm1 = vcmask 1048320   ;;  %vm19_vm2 = vcmask 785920   ;;  %vm27_vm3 = vcmask 523520   ;;  %s111_s0 = inlined_call_operand.vmem [shape: f32[20,32], index: 0, kind: input, shape index: {}]   ;;  %s112_s1 = inlined_call_operand.vmem [shape: f32[1,640], index: 1, kind: output, shape index: {}]  }
   0x1   :  { %v61_v0 = vld [vmem:[%s111_s0 + $0x3] ss:$4 sm:$0x1f]   ;;  %v63_v1 = vld [vmem:[%s111_s0 + $0x1] ss:$4 sm:$0x1f]  }
   0x2   :  { %9 = vrot.lane.b32.xlu0 %v61_v0, %s71_s8  ;;  %25 = vrot.lane.b32.xlu1 %v63_v1, %s72_s11  ;;  %v62_v2 = vld [vmem:[%s111_s0 + $0x2] ss:$4 sm:$0x1f]   ;;  %s73_s14 = smov 64  }
   0x3   :  { %v2_v3 = vld [vmem:[%s111_s0] ss:$4 sm:$0x1f]  }
   0x4   :  { %4 = vst.msk [vmem:[#allocation0] ss:$8 sm:$0xf] %vm3_vm0, %v2_v3  }
   0x5   :  { %6 = vst.msk [vmem:[#allocation0 + $0x1c] sm:$0x10] %vm3_vm0, %v2_v3  }
   0xa   :  { %17 = vrot.lane.b32.xlu0 %v62_v2, %s73_s14 }
  0x74   :  { %v10_v4 = vpop.permute.xlu0 %9   ;;  %v26_v5 = vpop.permute.xlu1 %25  }
  0x75   :  { %12 = vst.msk [vmem:[#allocation0] ss:$8 sm:$0xf] %vm11_vm1, %v10_v4  }
  0x76   :  { %14 = vst.msk [vmem:[#allocation0 + $0x1c] sm:$0x10] %vm11_vm1, %v10_v4  }
  0x7c   :  { %v18_v6 = vpop.permute.xlu0 %17  }
  0x7d   :  { %20 = vst.msk [vmem:[#allocation0] ss:$8 sm:$0xf] %vm19_vm2, %v18_v6  }
  0x7e   :  { %22 = vst.msk [vmem:[#allocation0 + $0x1c] sm:$0x10] %vm19_vm2, %v18_v6  }
  0x7f   :  { %28 = vst.msk [vmem:[#allocation0] ss:$8 sm:$0xf] %vm27_vm3, %v26_v5  }
  0x80   :  { %30 = vst.msk [vmem:[#allocation0 + $0x1c] sm:$0x10] %vm27_vm3, %v26_v5  }
  0x86   :  { %v33_v7 = vld [vmem:[#allocation0] sm:$0x1]  ;;  %v38_v8 = vld [vmem:[#allocation0 + $0x8] sm:$0x1]  ;;  %v44_v9 = vld [vmem:[#allocation0 + $0x10] sm:$0x1] }
  0x87   :  { %36 = vst [vmem:[%s112_s1] sm:$0x1] %v33_v7  ;;  %v50_v10 = vld [vmem:[#allocation0 + $0x18] sm:$0x1]  ;;  %v56_v11 = vld [vmem:[#allocation0 + $0x20] sm:$0x1] }
  0x88   :  { %64 = vst [vmem:[%s112_s1 + $0x1] sm:$0x1] %v38_v8 }
  0x89   :  { %65 = vst [vmem:[%s112_s1 + $0x2] sm:$0x1] %v44_v9 }
  0x8a   :  { %66 = vst [vmem:[%s112_s1 + $0x3] sm:$0x1] %v50_v10 }
  0x8b   :  { %67 = vst [vmem:[%s112_s1 + $0x4] sm:$0x1] %v56_v11 }

// kernel: encoder_forward.7
= control target key start
LH: loop header
LB: loop body
LE: loop exit
PB: predicated region body
PF: predicated region fallthrough
CT: control target
= control target key end

     0   :  { %vm381_vm0 = vcmask 523264   ;;  %s819_s3 = inlined_call_operand.vmem [shape: bf16[576,128], index: 3, kind: input, shape index: {}]   ;;  %s820_s0 = inlined_call_operand.vmem [shape: bf16[16,576], index: 0, kind: input, shape index: {}]   ;;  %s821_s1 = inlined_call_operand.vmem [shape: f32[1,576], index: 1, kind: input, shape index: {}]   ;;  %s822_s2 = inlined_call_operand.vmem [shape: f32[1,576], index: 2, kind: input, shape index: {}]   ;;  %s823_s4 = inlined_call_operand.vmem [shape: f32[16,128], index: 4, kind: output, shape index: {}]  }
   0x1   :  { %v613_v0 = vld [vmem:[%s819_s3 + $0x38] sm:$0xff]  ;;  %v612_v4 = vld [vmem:[%s819_s3 + $0x30] sm:$0xff]  ;;  %v611_v8 = vld [vmem:[%s819_s3 + $0x28] sm:$0xff] }
   0x2   :  { %v621_v1 = vld [vmem:[%s819_s3 + $0x78] sm:$0xff]  ;;  %385 = vmatpush.bf16.msra.mxu0 %v613_v0  ;;  %v620_v5 = vld [vmem:[%s819_s3 + $0x70] sm:$0xff]  ;;  %v619_v9 = vld [vmem:[%s819_s3 + $0x68] sm:$0xff] }
   0x3   :  { %v629_v2 = vld [vmem:[%s819_s3 + $0xb8] sm:$0xff]  ;;  %399 = vmatpush.bf16.msra.mxu1 %v621_v1  ;;  %v628_v6 = vld [vmem:[%s819_s3 + $0xb0] sm:$0xff]  ;;  %v627_v10 = vld [vmem:[%s819_s3 + $0xa8] sm:$0xff] }
   0x4   :  { %v637_v3 = vld [vmem:[%s819_s3 + $0xf8] sm:$0xff]  ;;  %413 = vmatpush.bf16.msra.mxu2 %v629_v2  ;;  %v636_v7 = vld [vmem:[%s819_s3 + $0xf0] sm:$0xff]  ;;  %v635_v11 = vld [vmem:[%s819_s3 + $0xe8] sm:$0xff] }
   0x5   :  { %427 = vmatpush.bf16.msra.mxu3 %v637_v3  ;;  %v610_v12 = vld [vmem:[%s819_s3 + $0x20] sm:$0xff]  ;;  %v21_v17 = vld [vmem:[%s820_s0 + $0x14] sm:$0xff]  ;;  %v19_v23 = vld [vmem:[%s820_s0 + $0x8] sm:$0xff] }
   0x6   :  { %386 = vmatpush.bf16.msra.mxu0 %v612_v4  ;;  %v618_v13 = vld [vmem:[%s819_s3 + $0x60] sm:$0xff]  ;;  %v29_v20 = vunpack.c.l.bf16 %v21_v17  ;;  %v30_v26 = vunpack.c.h.bf16 %v21_v17  ;;  %v26_v28 = vunpack.c.l.bf16 %v19_v23  ;;  %v609_v29 = vld [vmem:[%s819_s3 + $0x18] sm:$0xff]  ;;  %v27_v36 = vunpack.c.h.bf16 %v19_v23  ;;  %v608_v46 = vld [vmem:[%s819_s3 + $0x10] sm:$0xff] }
   0x7   :  { %400 = vmatpush.bf16.msra.mxu1 %v620_v5  ;;  %v626_v14 = vld [vmem:[%s819_s3 + $0xa0] sm:$0xff]  ;;  %v617_v30 = vld [vmem:[%s819_s3 + $0x58] sm:$0xff]  ;;  %v616_v47 = vld [vmem:[%s819_s3 + $0x50] sm:$0xff] }
   0x8   :  { %414 = vmatpush.bf16.msra.mxu2 %v628_v6  ;;  %v18_v15 = vld [vmem:[%s820_s0] sm:$0xff]  ;;  %v625_v33 = vld [vmem:[%s819_s3 + $0x98] sm:$0xff]  ;;  %v624_v50 = vld [vmem:[%s819_s3 + $0x90] sm:$0xff] }
   0x9   :  { %428 = vmatpush.bf16.msra.mxu3 %v636_v7  ;;  %v634_v16 = vld [vmem:[%s819_s3 + $0xe0] sm:$0xff]  ;;  %v24_v19 = vunpack.c.l.bf16 %v18_v15  ;;  %v25_v25 = vunpack.c.h.bf16 %v18_v15  ;;  %v633_v34 = vld [vmem:[%s819_s3 + $0xd8] sm:$0xff]  ;;  %v632_v51 = vld [vmem:[%s819_s3 + $0xd0] sm:$0xff] }
   0xa   :  { %387 = vmatpush.bf16.msra.mxu0 %v611_v8  ;;  %v724_v18 = vld [vmem:[%s821_s1] sm:$0x1f]  ;;  %v607_v59 = vld [vmem:[%s819_s3 + $0x8] sm:$0xff]  ;;  %v20_v8 = vld [vmem:[%s820_s0 + $0x10] sm:$0xf] }
   0xb   :  { %401 = vmatpush.bf16.msra.mxu1 %v619_v9  ;;  %v36_v21 = vperm.slane %v724_v18, 0  ;;  %v730_v22 = vld [vmem:[%s822_s2] sm:$0x1f]  ;;  %v37_v27 = vperm.slane %v724_v18, 1  ;;  %v38_v32 = vperm.slane %v724_v18, 2  ;;  %v39_v45 = vperm.slane %v724_v18, 3 }
   0xc   :  { %415 = vmatpush.bf16.msra.mxu2 %v627_v10  ;;  %v22_v24 = vld [vmem:[%s820_s0 + $0x1c] sm:$0xff]  ;;  %v58_v35 = vperm.slane %v730_v22, 0  ;;  %v59_v40 = vperm.slane %v730_v22, 1  ;;  %v60_v41 = vperm.slane %v730_v22, 2  ;;  %v61_v49 = vperm.slane %v730_v22, 3  ;;  %v615_v60 = vld [vmem:[%s819_s3 + $0x48] sm:$0xff] }
   0xd   :  { %429 = vmatpush.bf16.msra.mxu3 %v635_v11  ;;  %v31_v31 = vunpack.c.l.bf16 %v22_v24  ;;  %v32_v37 = vunpack.c.h.bf16 %v22_v24  ;;  %v46_v38 = vmul.f32 %v36_v21, %v24_v19  ;;  %v51_v39 = vmul.f32 %v36_v21, %v29_v20  ;;  %v623_v0 = vld [vmem:[%s819_s3 + $0x88] sm:$0xff]  ;;  %v606_v4 = vld [vmem:[%s819_s3] sm:$0xff]  ;;  %v641_v17 = vld [vmem:[%s819_s3 + $0x118] sm:$0xff] }
   0xe   :  { %388 = vmatpush.bf16.msra.mxu0 %v610_v12  ;;  %v47_v42 = vmul.f32 %v37_v27, %v25_v25  ;;  %v52_v43 = vmul.f32 %v37_v27, %v30_v26  ;;  %v48_v44 = vmul.f32 %v38_v32, %v26_v28  ;;  %v49_v52 = vmul.f32 %v39_v45, %v27_v36  ;;  %v631_v1 = vld [vmem:[%s819_s3 + $0xc8] sm:$0xff]  ;;  %v614_v5 = vld [vmem:[%s819_s3 + $0x40] sm:$0xff]  ;;  %v640_v26 = vld [vmem:[%s819_s3 + $0x110] sm:$0xff] }
   0xf   :  { %402 = vmatpush.bf16.msra.mxu1 %v618_v13  ;;  %v53_v48 = vmul.f32 %v38_v32, %v31_v31  ;;  %v54_v53 = vmul.f32 %v39_v45, %v32_v37  ;;  %v68_v54 = vadd.f32 %v58_v35, %v46_v38  ;;  %v73_v55 = vadd.f32 %v58_v35, %v51_v39  ;;  %v23_v13 = vld [vmem:[%s820_s0 + $0x24] sm:$0xf] }
  0x10   :  { %416 = vmatpush.bf16.msra.mxu2 %v626_v14  ;;  %v69_v56 = vadd.f32 %v59_v40, %v47_v42  ;;  %v74_v57 = vadd.f32 %v59_v40, %v52_v43  ;;  %v70_v58 = vadd.f32 %v60_v41, %v48_v44  ;;  %v71_v62 = vadd.f32 %v61_v49, %v49_v52  ;;  %v622_v14 = vld [vmem:[%s819_s3 + $0x80] sm:$0xff] }
  0x11   :  { %430 = vmatpush.bf16.msra.mxu3 %v634_v16  ;;  %v75_v61 = vadd.f32 %v60_v41, %v53_v48  ;;  %v76_v63 = vadd.f32 %v61_v49, %v54_v53  ;;  %v78_v2 = vmax.f32 %v68_v54, 0.0  ;;  %v83_v3 = vmax.f32 %v73_v55, 0.0  ;;  %v630_v15 = vld [vmem:[%s819_s3 + $0xc0] sm:$0xff] }
  0x12   :  { %389 = vmatpush.bf16.msra.mxu0 %v609_v29  ;;  %v79_v6 = vmax.f32 %v69_v56, 0.0  ;;  %v84_v7 = vmax.f32 %v74_v57, 0.0  ;;  %v80_v9 = vmax.f32 %v70_v58, 0.0  ;;  %v81_v11 = vmax.f32 %v71_v62, 0.0  ;;  %v638_v32 = vld [vmem:[%s819_s3 + $0x100] sm:$0xff] }
  0x13   :  { %403 = vmatpush.bf16.msra.mxu1 %v617_v30  ;;  %v85_v10 = vmax.f32 %v75_v61, 0.0  ;;  %v86_v12 = vmax.f32 %v76_v63, 0.0  ;;  %v88_v16 = vpack.c.bf16 %v83_v3, %v78_v2  ;;  %v28_v20 = vunpack.c.l.bf16 %v20_v8 }
  0x14   :  { %417 = vmatpush.bf16.msra.mxu2 %v625_v33  ;;  %v89_v19 = vpack.c.bf16 %v84_v7, %v79_v6  ;;  %v33_v21 = vunpack.c.l.bf16 %v23_v13  ;;  %v40_v23 = vperm.slane %v724_v18, 4  ;;  %v62_v29 = vperm.slane %v730_v22, 4  ;;  %v639_v18 = vld [vmem:[%s819_s3 + $0x108] sm:$0xff] }
  0x15   :  { %431 = vmatpush.bf16.msra.mxu3 %v633_v34  ;;  %v90_v24 = vpack.c.bf16 %v85_v10, %v80_v9  ;;  %v91_v25 = vpack.c.bf16 %v86_v12, %v81_v11 }
  0x16   :  { %390 = vmatpush.bf16.msra.mxu0 %v608_v46  ;;  %v50_v27 = vmul.f32 %v40_v23, %v28_v20  ;;  %v55_v28 = vmul.f32 %v40_v23, %v33_v21 }
  0x17   :  { %404 = vmatpush.bf16.msra.mxu1 %v616_v47 }
  0x18   :  { %418 = vmatpush.bf16.msra.mxu2 %v624_v50  ;;  %v72_v30 = vadd.f32 %v62_v29, %v50_v27  ;;  %v77_v31 = vadd.f32 %v62_v29, %v55_v28 }
  0x19   :  { %432 = vmatpush.bf16.msra.mxu3 %v632_v51 }
  0x1a   :  { %391 = vmatpush.bf16.msra.mxu0 %v607_v59  ;;  %v82_v33 = vmax.f32 %v72_v30, 0.0  ;;  %v87_v34 = vmax.f32 %v77_v31, 0.0 }
  0x1b   :  { %405 = vmatpush.bf16.msra.mxu1 %v615_v60 }
  0x1c   :  { %419 = vmatpush.bf16.msra.mxu2 %v623_v0  ;;  %v92_v35 = vpack.c.bf16 %v87_v34, %v82_v33 }
  0x1d   :  { %433 = vmatpush.bf16.msra.mxu3 %v631_v1 }
  0x1e   :  { %392 = vmatpush.bf16.msra.mxu0 %v606_v4 }
  0x1f   :  { %406 = vmatpush.bf16.msra.mxu1 %v614_v5 }
  0x20   :  { %420 = vmatpush.bf16.msra.mxu2 %v622_v14 }
  0x21   :  { %434 = vmatpush.bf16.msra.mxu3 %v630_v15  ;;  %393 = vmatmul.bf16.vlgmr.msra.gmra.mxu0 %v88_v16 }
  0x22   :  { %445 = vmatpush.bf16.msrb.mxu0 %v641_v17  ;;  %407 = vmatmul.bf16.vlgmr.msra.gmra.mxu1 %v89_v19 }
  0x23   :  { %421 = vmatmul.bf16.vlgmr.msra.gmra.mxu2 %v90_v24 }
  0x24   :  { %435 = vmatmul.bf16.vlgmr.msra.gmra.mxu3 %v91_v25 }
  0x26   :  { %446 = vmatpush.bf16.msrb.mxu0 %v640_v26 }
  0x2a   :  { %447 = vmatpush.bf16.msrb.mxu0 %v639_v18 }
  0x2e   :  { %448 = vmatpush.bf16.msrb.mxu0 %v638_v32 }
  0x31   :  { %605 = vmatmul.msk.bf16.vlgmr.msrb.gmra.mxu0 %vm381_vm0, %v92_v35 }
  0x9e   :  { %v394_v22 = vpop.f32.mrf.mxu0 }
  0x9f   :  { %v408_v36 = vpop.f32.mrf.mxu1 }
  0xa0   :  { %v409_v39 = vadd.f32 %v408_v36, %v394_v22 }
  0xa6   :  { %v422_v37 = vpop.f32.mrf.mxu2  ;;  %v396_v38 = vpop.f32.mrf.mxu0 }
  0xa7   :  { %v423_v40 = vadd.f32 %v422_v37, %v409_v39  ;;  %v436_v41 = vpop.f32.mrf.mxu3  ;;  %v410_v42 = vpop.f32.mrf.mxu1 }
  0xa8   :  { %v411_v46 = vadd.f32 %v410_v42, %v396_v38 }
  0xa9   :  { %v437_v43 = vadd.f32 %v436_v41, %v423_v40 }
  0xae   :  { %v424_v44 = vpop.f32.mrf.mxu2  ;;  %v450_v45 = vpop.f32.mrf.mxu0 }
  0xaf   :  { %v451_v47 = vadd.f32 %v450_v45, %v437_v43  ;;  %v425_v48 = vadd.f32 %v424_v44, %v411_v46  ;;  %v438_v49 = vpop.f32.mrf.mxu3 }
  0xb1   :  { %455 = vst [vmem:[%s823_s4] sm:$0xff] %v451_v47  ;;  %v439_v50 = vadd.f32 %v438_v49, %v425_v48 }
  0xb6   :  { %v452_v51 = vpop.f32.mrf.mxu0 }
  0xb7   :  { %v453_v52 = vadd.f32 %v452_v51, %v439_v50 }
  0xb9   :  { %456 = vst [vmem:[%s823_s4 + $0x8] sm:$0xff] %v453_v52 }

// kernel: encoder_forward.8
= control target key start
LH: loop header
LB: loop body
LE: loop exit
PB: predicated region body
PF: predicated region fallthrough
CT: control target
= control target key end

     0   :  { %s1800_s15 = smov 0   ;;  %s2565_s0 = inlined_call_operand.vmem [shape: bf16[2,110,16], index: 0, kind: input, shape index: {}]   ;;  %s2566_s1 = inlined_call_operand.vmem [shape: bf16[144,32], index: 1, kind: input, shape index: {}]   ;;  %s2567_s2 = inlined_call_operand.vmem [shape: bf16[2,80,32], index: 2, kind: output, shape index: {0}]   ;;  %s2568_s3 = inlined_call_operand.vmem [shape: f32[2,1,32], index: 3, kind: output, shape index: {1}]   ;;  %s2569_s4 = inlined_call_operand.vmem [shape: f32[2,1,32], index: 4, kind: output, shape index: {2}]  }
   0x1 LB: > { %s1613_s16 = sadd.s32 4294967295, %s1764_s15   ;;  %p1617_p0 = scmp.ge.s32.totalorder %s1764_s15, 1  ;;  %s1764_s15 = sphi %s1800_s15, %s15_s15  }
   0x2   : > { %p167_p1 = scmp.lt.s32.totalorder %s1764_s15, 3 }
   0x4   : > { %p168_p2 = pnand %p1617_p0, %p167_p1 }
   0x5   : > { %p199_p3 = scmp.lt.s32.totalorder (!%p168_p2), %s1613_s16, 1  ;;  %s1766_s21 = smov (!%p168_p2), 48  }
   0x6   : > { %171 = sbr.rel (%p168_p2) target bundleno = 610 (0x262), region = 28  ;;  %s1767_s22 = smov (!%p168_p2), 32  }
   0x7   : > { %s1768_s23 = smov (!%p168_p2), 16   ;;  %s1769_s24 = smov (!%p168_p2), 64  }
   0x8   : > { %s1770_s25 = smov (!%p168_p2), 80   ;;  %s1771_s26 = smov (!%p168_p2), 96  }
   0x9   : > { %s1772_s27 = smov (!%p168_p2), 112  }
   0xb   : > { %s2583_s16 = smov (!%p199_p3, %s1613_s16), 1  ;;  %vm418_vm0 = vcmask 1042432   ;;  %vm419_vm1 = vcmask 1046532   ;;  %vm248_vm3 = vsmask.f32 3328  ;;  %vm772_vm9 = vcmask 1041408  }
   0xc   : > { %s1739_s17 = smul.u32 56, %s2583_s16  ;;  %vm1816_vm2 = vmor %vm418_vm0, %vm419_vm1  ;;  %vm249_vm4 = vsmask.f32 7440  ;;  %vm598_vm6 = vsmask.f32 2304  ;;  %vm773_vm10 = vcmask 1045508   ;;  %s214_s5 = scalar_lea.vmem %s2569_s4, %s2583_s16 }
   0xd   : > { %vm1846_vm5 = vmor %vm248_vm3, %vm249_vm4  ;;  %vm599_vm7 = vsmask.f32 6416  ;;  %vm952_vm12 = vsmask.f32 1280  ;;  %vm953_vm13 = vsmask.f32 5392 }
   0xe   : > { %s1814_s20 = scalar_lea.vmem %s2565_s0, %s1739_s17  ;;  %vm1901_vm8 = vmor %vm598_vm6, %vm599_vm7  ;;  %vm226_vm15 = vcmask 125952   ;;  %vm385_vm0 = vcmask 257152   ;;  %vm482_vm1 = vcmask 388352   ;;  %vm1126_vm3 = vcmask 1040384  }
   0xf   : > { %v493_v1 = vld [vmem:[%s1814_s20 + $0x4] sm:$0xe]  ;;  %v494_v2 = vld [vmem:[%s1814_s20 + $0x8] sm:$0xf]  ;;  %v396_v3 = vld [vmem:[%s1814_s20] sm:$0xe] }
  0x10   : > { %v1621_v4 = vrot.slane %v493_v1, 9  ;;  %v517_v5 = vrot.slane %v494_v2, 5  ;;  %v397_v6 = vld [vmem:[%s1814_s20 + $0x4] sm:$0xf]  ;;  %v1620_v7 = vrot.slane %v396_v3, 9  ;;  %vm1951_vm11 = vmor %vm772_vm9, %vm773_vm10  ;;  %vm1127_vm4 = vcmask 1044484  }
  0x11   : > { %v423_v8 = vrot.slane %v397_v6, 5  ;;  %v237_v9 = vld [vmem:[%s1814_s20] sm:$0xf]  ;;  %v1828_v11 = vld [vmem:[%s1814_s20 + $0x8] sm:$0xf]  ;;  %vm2005_vm14 = vmor %vm952_vm12, %vm953_vm13  ;;  %vm576_vm7 = vcmask 519552  }
  0x12   : > { %v518_v10 = vsel %vm1816_vm2, %v1621_v4, %v517_v5  ;;  %v238_v12 = vld [vmem:[%s1814_s20 + $0x4] sm:$0xf]  ;;  %v252_v13 = vshrl.u32 %v237_v9, 16  ;;  %v255_v14 = vshll.u32 %v237_v9, 16  ;;  %v1836_v20 = vld [vmem:[%s1814_s20 + $0x8] sm:$0xf]  ;;  %vm2175_vm6 = vmor %vm1126_vm3, %vm1127_vm4 }
  0x13   : > { %546 = vrot.lane.b32.xlu0 %v518_v10, %s1766_s21  ;;  %v424_v15 = vsel %vm1816_vm2, %v1620_v7, %v423_v8  ;;  %v261_v16 = vshll.u32 %v238_v12, 16  ;;  %v265_v17 = vshrl.u32 %v238_v12, 16  ;;  %v425_v21 = vrot.slane %v423_v8, 4  ;;  %v1840_v24 = vld [vmem:[%s1814_s20 + $0x18] sm:$0xf] }
  0x14   : > { %452 = vrot.lane.b32.xlu1 %v424_v15, %s1767_s22  ;;  %v254_v18 = vrot.slane %v252_v13, 4  ;;  %v257_v19 = vrot.slane %v255_v14, 5  ;;  %v426_v22 = vrot.slane %v1828_v11, 5  ;;  %v403_v27 = vld [vmem:[%s1814_s20 + $0x1c] sm:$0xf]  ;;  %v438_v28 = vrot.slane %v1840_v24, 5 }
  0x15   : > { %v267_v23 = vrot.slane %v265_v17, 4  ;;  %v263_v26 = vrot.slane %v261_v16, 5  ;;  %v587_v29 = vld [vmem:[%s1814_s20 + $0x4] sm:$0xe]  ;;  %v271_v31 = vshll.u32 %v1836_v20, 16  ;;  %v441_v32 = vrot.slane %v403_v27, 5 }
  0x16   : > { %v258_v25 = vor.u32 %v257_v19, %v254_v18  ;;  %v1852_v34 = vld [vmem:[%s1814_s20 + $0xc] sm:$0xf]  ;;  %v440_v36 = vrot.slane %v438_v28, 4  ;;  %v427_v37 = vsel %vm1816_vm2, %v425_v21, %v426_v22  ;;  %v588_v38 = vld [vmem:[%s1814_s20 + $0x8] sm:$0xf]  ;;  %v602_v39 = vshrl.u32 %v587_v29, 16 }
  0x17   : > { %v268_v35 = vor.u32 %v267_v23, %v263_v26  ;;  %v605_v40 = vshll.u32 %v587_v29, 16  ;;  %v243_v41 = vld [vmem:[%s1814_s20 + $0x18] sm:$0xf]  ;;  %v244_v44 = vld [vmem:[%s1814_s20 + $0x1c] sm:$0xf]  ;;  %v519_v45 = vrot.slane %v517_v5, 4 }
  0x18   : > { %v259_v33 = vrot.slane %v258_v25, 4  ;;  %v442_v43 = vsel %vm1816_vm2, %v440_v36, %v441_v32  ;;  %v520_v46 = vrot.slane %v1852_v34, 5  ;;  %v1869_v47 = vrot.slane %v271_v31, 5  ;;  %v1880_v62 = vld [vmem:[%s1814_s20 + $0x20] sm:$0xf] }
  0x19   : > { %464 = vrot.lane.b32.xlu2 %v442_v43, %s1767_s22  ;;  %v311_v48 = vshll.u32 %v243_v41, 16  ;;  %v269_v49 = vrot.slane %v268_v35, 4  ;;  %v611_v50 = vshrl.u32 %v588_v38, 16  ;;  %v315_v51 = vshrl.u32 %v243_v41, 16  ;;  %v1887_v4 = vld [vmem:[%s1814_s20 + $0x20] sm:$0xf] }
  0x1a   : > { %v264_v42 = vsel %vm1846_vm5, %v259_v33, %v263_v26  ;;  %v321_v52 = vshll.u32 %v244_v44, 16  ;;  %v604_v53 = vrot.slane %v602_v39, 5  ;;  %v607_v54 = vrot.slane %v605_v40, 6  ;;  %v589_v13 = vld [vmem:[%s1814_s20 + $0xc] sm:$0xf] }
  0x1b   : > { %355 = vrot.lane.b32.xlu0 %v264_v42, %s1768_s23  ;;  %v614_v55 = vshll.u32 %v588_v38, 16  ;;  %v1873_v56 = vrot.slane %v311_v48, 5  ;;  %v317_v57 = vrot.slane %v315_v51, 4  ;;  %v325_v58 = vshrl.u32 %v244_v44, 16  ;;  %v500_v16 = vld [vmem:[%s1814_s20 + $0x20] sm:$0xf] }
  0x1c   : > { %454 = vrot.lane.b32.xlu1 %v427_v37, %s1767_s22  ;;  %v274_v59 = vsel %vm1846_vm5, %v269_v49, %v1869_v47  ;;  %v323_v61 = vrot.slane %v321_v52, 5  ;;  %v521_v63 = vsel %vm1816_vm2, %v519_v45, %v520_v46  ;;  %v608_v1 = vor.u32 %v607_v54, %v604_v53  ;;  %v1899_v17 = vld [vmem:[%s1814_s20 + $0x1c] sm:$0xf]  ;;  %v1916_v33 = vld [vmem:[%s1814_s20 + $0x24] sm:$0xf] }
  0x1d   : > { %v318_v60 = vor.u32 %v317_v57, %v1873_v56  ;;  %v613_v2 = vrot.slane %v611_v50, 5  ;;  %v616_v3 = vrot.slane %v614_v55, 6  ;;  %v327_v6 = vrot.slane %v325_v58, 4  ;;  %v593_v19 = vld [vmem:[%s1814_s20 + $0x1c] sm:$0xf] }
  0x1e   : > { %v331_v7 = vshll.u32 %v1880_v62, 16  ;;  %v443_v8 = vrot.slane %v441_v32, 4  ;;  %v444_v9 = vrot.slane %v1887_v4, 5  ;;  %v609_v14 = vrot.slane %v608_v1, 4  ;;  %v594_v37 = vld [vmem:[%s1814_s20 + $0x20] sm:$0xf] }
  0x1f   : > { %v319_v5 = vrot.slane %v318_v60, 4  ;;  %v328_v12 = vor.u32 %v327_v6, %v323_v61  ;;  %v617_v15 = vor.u32 %v616_v3, %v613_v2  ;;  %v621_v25 = vshrl.u32 %v589_v13, 16  ;;  %v751_v50 = vld [vmem:[%s1814_s20 + $0x8] sm:$0xf]  ;;  %v1940_v60 = vld [vmem:[%s1814_s20 + $0xc] sm:$0xf] }
  0x20   : > { %v1906_v23 = vrot.slane %v331_v7, 5  ;;  %v445_v26 = vsel %vm1816_vm2, %v443_v8, %v444_v9  ;;  %v535_v27 = vrot.slane %v500_v16, 5  ;;  %v532_v29 = vrot.slane %v1899_v17, 5  ;;  %v595_v1 = vld [vmem:[%s1814_s20 + $0x24] sm:$0xf] }
  0x21   : > { %v324_v10 = vsel %vm1846_vm5, %v319_v5, %v323_v61  ;;  %v329_v21 = vrot.slane %v328_v12, 4  ;;  %v624_v31 = vshll.u32 %v589_v13, 16  ;;  %v618_v32 = vsel %vm1901_vm8, %v609_v14, %v617_v15  ;;  %v848_v8 = vld [vmem:[%s1814_s20 + $0xc] sm:$0xf]  ;;  %v216_v4 = vld [vmem:[%s1814_s20] sm:$0xf] }
  0x22   : > { %367 = vrot.lane.b32.xlu2 %v324_v10, %s1768_s23  ;;  %v661_v35 = vshrl.u32 %v593_v19, 16  ;;  %v664_v36 = vshll.u32 %v593_v19, 16  ;;  %v623_v39 = vrot.slane %v621_v25, 5  ;;  %v537_v41 = vrot.slane %v535_v27, 4  ;;  %v941_v10 = vld [vmem:[%s1814_s20 + $0x8] sm:$0xc] }
  0x23   : > { %357 = vrot.lane.b32.xlu0 %v274_v59, %s1768_s23  ;;  %v334_v38 = vsel %vm1846_vm5, %v329_v21, %v1906_v23  ;;  %v626_v40 = vrot.slane %v624_v31, 6  ;;  %v538_v42 = vrot.slane %v1916_v33, 5  ;;  %v534_v43 = vrot.slane %v532_v29, 4  ;;  %v1965_v21 = vld [vmem:[%s1814_s20 + $0x10] sm:$0xf] }
  0x24   : > { %548 = vrot.lane.b32.xlu1 %v521_v63, %s1766_s21  ;;  %v663_v44 = vrot.slane %v661_v35, 5  ;;  %v666_v45 = vrot.slane %v664_v36, 6  ;;  %v671_v48 = vshrl.u32 %v594_v37, 16  ;;  %v674_v49 = vshll.u32 %v594_v37, 16  ;;  %v750_v63 = vld [vmem:[%s1814_s20 + $0x4] sm:$0xc] }
  0x25   : > { %v619_v51 = vrot.slane %v617_v15, 4  ;;  %v1929_v52 = vor.u32 %v626_v40, %v623_v39  ;;  %v536_v53 = vsel %vm1816_vm2, %v534_v43, %v535_v27  ;;  %v777_v54 = vrot.slane %v751_v50, 6  ;;  %v847_v25 = vld [vmem:[%s1814_s20 + $0x8] sm:$0xc]  ;;  %v942_v31 = vld [vmem:[%s1814_s20 + $0xc] sm:$0xf] }
  0x26   : > { %v539_v55 = vsel %vm1816_vm2, %v537_v41, %v538_v42  ;;  %v1937_v57 = vor.u32 %v666_v45, %v663_v44  ;;  %v673_v58 = vrot.slane %v671_v48, 5  ;;  %v676_v59 = vrot.slane %v674_v49, 6  ;;  %v757_v45 = vld [vmem:[%s1814_s20 + $0x20] sm:$0xf]  ;;  %v1979_v50 = vld [vmem:[%s1814_s20 + $0x1c] sm:$0xf] }
  0x27   : > { %v628_v61 = vsel %vm1901_vm8, %v619_v51, %v1929_v52  ;;  %v779_v2 = vrot.slane %v777_v54, 4  ;;  %v780_v3 = vrot.slane %v1940_v60, 6  ;;  %v1622_v12 = vrot.slane %v750_v63, 10  ;;  %227 = vst.msk [vmem:[#allocation2] sm:$0xf] %vm226_vm15, %v216_v4 }
  0x28   : > { %v669_v5 = vrot.slane %v1937_v57, 4  ;;  %v677_v6 = vor.u32 %v676_v59, %v673_v58  ;;  %v681_v13 = vshrl.u32 %v595_v1, 16  ;;  %v684_v14 = vshll.u32 %v595_v1, 16 }
  0x29   : > { %v781_v15 = vsel %vm1951_vm11, %v779_v2, %v780_v3  ;;  %v871_v16 = vrot.slane %v848_v8, 6  ;;  %v959_v27 = vshll.u32 %v941_v10, 16  ;;  %v1623_v39 = vrot.slane %v847_v25, 10  ;;  %v943_v2 = vld [vmem:[%s1814_s20 + $0x10] sm:$0xf] }
  0x2a   : > { %369 = vrot.lane.b32.xlu2 %v334_v38, %s1768_s23  ;;  %v678_v19 = vsel %vm1901_vm8, %v669_v5, %v677_v6  ;;  %v683_v35 = vrot.slane %v681_v13, 5  ;;  %v686_v36 = vrot.slane %v684_v14, 6  ;;  %v874_v38 = vrot.slane %v1965_v21, 6  ;;  %v1999_v8 = vld [vmem:[%s1814_s20 + $0x20] sm:$0xf] }
  0x2b   : > { %466 = vrot.lane.b32.xlu0 %v445_v26, %s1767_s22  ;;  %v956_v26 = vshrl.u32 %v941_v10, 16  ;;  %v873_v37 = vrot.slane %v871_v16, 4  ;;  %v961_v41 = vrot.slane %v959_v27, 7  ;;  %v965_v43 = vshrl.u32 %v942_v31, 16  ;;  %v948_v14 = vld [vmem:[%s1814_s20 + $0x24] sm:$0xf] }
  0x2c   : > { %709 = vrot.lane.b32.xlu1 %v618_v32, %s1769_s24  ;;  %v778_v32 = vsel %vm1951_vm11, %v1622_v12, %v777_v54  ;;  %v968_v44 = vshll.u32 %v942_v31, 16  ;;  %v679_v48 = vrot.slane %v677_v6, 4  ;;  %v1976_v49 = vor.u32 %v686_v36, %v683_v35  ;;  %v1729_v21 = vld [vmem:[%s2566_s1 + $0x40] sm:$0xff] }
  0x2d   : > { %v958_v40 = vrot.slane %v956_v26, 6  ;;  %v875_v51 = vsel %vm1951_vm11, %v873_v37, %v874_v38  ;;  %v795_v54 = vrot.slane %v757_v45, 6  ;;  %v967_v58 = vrot.slane %v965_v43, 6  ;;  %v2023_v43 = vld [vmem:[%s1814_s20 + $0x28] sm:$0xf]  ;;  %1364 = vmatpush.bf16.msra.mxu1 %v1729_v21  ;;  %1738 = vmatpush.bf16.msra.mxu3 %v1729_v21 }
  0x2e   : > { %v970_v59 = vrot.slane %v968_v44, 7  ;;  %v792_v63 = vrot.slane %v1979_v50, 6  ;;  %v688_v1 = vsel %vm1901_vm8, %v679_v48, %v1976_v49  ;;  %v978_v25 = vshll.u32 %v943_v2, 16 }
  0x2f   : > { %v797_v5 = vrot.slane %v795_v54, 4  ;;  %v886_v26 = vrot.slane %v1999_v8, 6  ;;  %v1025_v31 = vshrl.u32 %v948_v14, 16  ;;  %v275_v35 = vshrl.u32 %v1836_v20, 16 }
  0x30   : > { %v971_v12 = vor.u32 %v970_v59, %v967_v58  ;;  %v794_v13 = vrot.slane %v792_v63, 4  ;;  %v980_v45 = vrot.slane %v978_v25, 7  ;;  %vm1307_vm9 = vcmask 130048  }
  0x31   : > { %v888_v20 = vrot.slane %v886_v26, 4  ;;  %vm739_vm10 = vcmask 650752   ;;  %vm836_vm12 = vcmask 781952   ;;  %vm1093_vm13 = vcmask 1044352  }
  0x32   : > { %711 = vrot.lane.b32.xlu2 %v628_v61, %s1769_s24  ;;  %v1988_v61 = vld [vmem:[%s1814_s20 + $0x24] sm:$0xf]  ;;  %vm1451_vm3 = vcmask 654336   ;;  %vm1475_vm4 = vcmask 253952  }
  0x33   : > { %558 = vrot.lane.b32.xlu0 %v536_v53, %s1766_s21  ;;  %v872_v53 = vsel %vm1951_vm11, %v1623_v39, %v871_v16  ;;  %v798_v6 = vrot.slane %v1988_v61, 6  ;;  %v854_v16 = vld [vmem:[%s1814_s20 + $0x24] sm:$0xf]  ;;  %v796_v39 = vsel %vm1951_vm11, %v794_v13, %v795_v54 }
  0x34   : > { %560 = vrot.lane.b32.xlu1 %v539_v55, %s1766_s21  ;;  %v962_v55 = vor.u32 %v961_v41, %v958_v40  ;;  %v889_v37 = vrot.slane %v854_v16, 6  ;;  %v949_v40 = vld [vmem:[%s1814_s20 + $0x28] sm:$0xf]  ;;  %v947_v41 = vld [vmem:[%s1814_s20 + $0x20] sm:$0xf] }
  0x35   : > { %v799_v27 = vsel %vm1951_vm11, %v797_v5, %v798_v6  ;;  %v1015_v48 = vshrl.u32 %v947_v41, 16  ;;  %v1035_v54 = vshrl.u32 %v949_v40, 16  ;;  %v1038_v58 = vshll.u32 %v949_v40, 16  ;;  %v240_v5 = vld [vmem:[%s1814_s20 + $0xc] sm:$0xf] }
  0x36   : > { %v963_v10 = vrot.slane %v962_v55, 4  ;;  %v891_v59 = vrot.slane %v889_v37, 4 }
  0x38   : > { %v972_v36 = vsel %vm2005_vm14, %v963_v10, %v971_v12  ;;  %v973_v10 = vrot.slane %v971_v12, 4  ;;  %v281_v12 = vshll.u32 %v240_v5, 16 }
  0x3a   : > { %806 = vrot.lane.b32.xlu2 %v778_v32, %s1770_s25  ;;  %v1028_v32 = vshll.u32 %v948_v14, 16  ;;  %v1017_v14 = vrot.slane %v1015_v48, 6  ;;  %v399_v48 = vld [vmem:[%s1814_s20 + $0xc] sm:$0xf] }
  0x3b   : > { %808 = vrot.lane.b32.xlu0 %v781_v15, %s1770_s25 }
  0x3c   : > { %721 = vrot.lane.b32.xlu1 %v678_v19, %s1769_s24  ;;  %v975_v19 = vshrl.u32 %v943_v2, 16  ;;  %v1030_v55 = vrot.slane %v1028_v32, 7  ;;  %v277_v2 = vrot.slane %v275_v35, 4 }
  0x3e   : > { %v977_v44 = vrot.slane %v975_v19, 6  ;;  %v890_v19 = vsel %vm1951_vm11, %v888_v20, %v889_v37  ;;  %v278_v35 = vor.u32 %v277_v2, %v1869_v47  ;;  %v246_v47 = vld [vmem:[%s1814_s20 + $0x24] sm:$0xf]  ;;  %v429_v2 = vrot.slane %v399_v48, 5 }
  0x40   : > { %v2032_v13 = vor.u32 %v980_v45, %v977_v44  ;;  %v279_v44 = vrot.slane %v278_v35, 4  ;;  %v283_v45 = vrot.slane %v281_v12, 5  ;;  %v431_v35 = vrot.slane %v429_v2, 4  ;;  %v247_v12 = vld [vmem:[%s1814_s20 + $0x28] sm:$0x1] }
  0x41   : > { %v351_v11 = vshll.u32 %v247_v12, 16  ;;  %v2108_v12 = vld [vmem:[%s1814_s20 + $0x14] sm:$0xf] }
  0x42   : > { %723 = vrot.lane.b32.xlu2 %v688_v1, %s1769_s24  ;;  %v892_v1 = vrot.slane %v2023_v43, 6 }
  0x43   : > { %900 = vrot.lane.b32.xlu0 %v872_v53, %s1771_s26  ;;  %v1027_v53 = vrot.slane %v1025_v31, 6  ;;  %v1040_v31 = vrot.slane %v1038_v58, 7  ;;  %v345_v58 = vshrl.u32 %v246_v47, 16 }
  0x44   : > { %902 = vrot.lane.b32.xlu1 %v875_v51, %s1771_s26  ;;  %v1018_v51 = vshll.u32 %v947_v41, 16  ;;  %v893_v32 = vsel %vm1951_vm11, %v891_v59, %v892_v1  ;;  %v284_v59 = vsel %vm1846_vm5, %v279_v44, %v283_v45 }
  0x45   : > { %v1031_v25 = vor.u32 %v1030_v55, %v1027_v53  ;;  %v2055_v53 = vld [vmem:[%s1814_s20 + $0x10] sm:$0xf] }
  0x46   : > { %v1020_v16 = vrot.slane %v1018_v51, 7 }
  0x47   : > { %v1033_v40 = vrot.slane %v1031_v25, 4 }
  0x48   : > { %v2044_v37 = vor.u32 %v1020_v16, %v1017_v14 }
  0x4a   : > { %818 = vrot.lane.b32.xlu2 %v796_v39, %s1770_s25  ;;  %v982_v39 = vsel %vm2005_vm14, %v973_v10, %v2032_v13  ;;  %v1023_v51 = vrot.slane %v2044_v37, 4  ;;  %v2064_v10 = vld [vmem:[%s1814_s20 + $0x10] sm:$0xf] }
  0x4b   : > { %820 = vrot.lane.b32.xlu0 %v799_v27, %s1770_s25  ;;  %v1037_v27 = vrot.slane %v1035_v54, 6  ;;  %v341_v54 = vshll.u32 %v246_v47, 16 }
  0x4c   : > { %1063 = vrot.lane.b32.xlu1 %v972_v36, %s1772_s27  ;;  %v285_v36 = vshrl.u32 %v240_v5, 16  ;;  %v335_v5 = vshrl.u32 %v1880_v62, 16  ;;  %v1032_v14 = vsel %vm2005_vm14, %v1023_v51, %v1031_v25  ;;  %v432_v62 = vrot.slane %v2064_v10, 5 }
  0x4d   : > { %v2048_v41 = vor.u32 %v1040_v31, %v1037_v27  ;;  %v428_v27 = vrot.slane %v426_v22, 4  ;;  %v343_v31 = vrot.slane %v341_v54, 5  ;;  %v522_v54 = vrot.slane %v520_v46, 4 }
  0x4e   : > { %v287_v20 = vrot.slane %v285_v36, 4  ;;  %v433_v22 = vsel %vm1816_vm2, %v431_v35, %v432_v62  ;;  %v446_v46 = vrot.slane %v444_v9, 4 }
  0x4f   : > { %v1042_v55 = vsel %vm2005_vm14, %v1033_v40, %v2048_v41  ;;  %v430_v40 = vsel %vm1816_vm2, %v428_v27, %v429_v2  ;;  %v591_v27 = vld [vmem:[%s1814_s20 + $0x14] sm:$0xf] }
  0x50   : > { %v288_v16 = vor.u32 %v287_v20, %v283_v45  ;;  %v496_v45 = vld [vmem:[%s1814_s20 + $0x10] sm:$0xf]  ;;  %v353_v20 = vrot.slane %v351_v11, 5 }
  0x52   : > { %1065 = vrot.lane.b32.xlu2 %v982_v39, %s1772_s27  ;;  %v289_v25 = vrot.slane %v288_v16, 4  ;;  %v337_v39 = vrot.slane %v335_v5, 4 }
  0x53   : > { %912 = vrot.lane.b32.xlu0 %v890_v19, %s1771_s26  ;;  %v291_v19 = vshll.u32 %v2055_v53, 16 }
  0x54   : > { %914 = vrot.lane.b32.xlu1 %v893_v32, %s1771_s26  ;;  %v347_v32 = vrot.slane %v345_v58, 4  ;;  %v338_v48 = vor.u32 %v337_v39, %v1906_v23  ;;  %v523_v58 = vrot.slane %v496_v45, 5  ;;  %v641_v39 = vshrl.u32 %v591_v27, 16 }
  0x55   : > { %v2076_v36 = vrot.slane %v291_v19, 5 }
  0x56   : > { %v348_v44 = vor.u32 %v347_v32, %v343_v31  ;;  %v339_v2 = vrot.slane %v338_v48, 4  ;;  %v524_v16 = vsel %vm1816_vm2, %v522_v54, %v523_v58  ;;  %v406_v32 = vld [vmem:[%s1814_s20 + $0x28] sm:$0x1]  ;;  %v525_v9 = vrot.slane %v523_v58, 4 }
  0x57   : > { %v294_v47 = vsel %vm1846_vm5, %v289_v25, %v2076_v36  ;;  %v643_v48 = vrot.slane %v641_v39, 5  ;;  %v2147_v39 = vld [vmem:[%s1814_s20 + $0x14] sm:$0xf] }
  0x58   : > { %v349_v51 = vrot.slane %v348_v44, 4  ;;  %v344_v34 = vsel %vm1846_vm5, %v339_v2, %v343_v31  ;;  %v222_v44 = vld [vmem:[%s1814_s20 + $0x18] sm:$0xf]  ;;  %v526_v31 = vrot.slane %v2108_v12, 5  ;;  %v596_v2 = vld [vmem:[%s1814_s20 + $0x28] sm:$0xf] }
  0x59   : > { %233 = vst.msk [vmem:[#allocation2 + $0x30] sm:$0xf] %vm226_vm15, %v222_v44 }
  0x5a   : > { %1075 = vrot.lane.b32.xlu2 %v1032_v14, %s1772_s27  ;;  %v354_v23 = vsel %vm1846_vm5, %v349_v51, %v353_v20  ;;  %v527_v54 = vsel %vm1816_vm2, %v525_v9, %v526_v31 }
  0x5b   : > { %1077 = vrot.lane.b32.xlu0 %v1042_v55, %s1772_s27  ;;  %v590_v55 = vld [vmem:[%s1814_s20 + $0x10] sm:$0xf] }
  0x5c   : > { %359 = vrot.lane.b32.xlu1 %v284_v59, %s1768_s23  ;;  %v405_v59 = vld [vmem:[%s1814_s20 + $0x24] sm:$0xf]  ;;  %v631_v5 = vshrl.u32 %v590_v55, 16  ;;  %v634_v14 = vshll.u32 %v590_v55, 16  ;;  %v502_v55 = vld [vmem:[%s1814_s20 + $0x28] sm:$0xf] }
  0x5d   : > { %v447_v19 = vrot.slane %v405_v59, 5 }
  0x5e   : > { %v633_v35 = vrot.slane %v631_v5, 5  ;;  %v636_v25 = vrot.slane %v634_v14, 6  ;;  %v540_v5 = vrot.slane %v538_v42, 4  ;;  %v753_v14 = vld [vmem:[%s1814_s20 + $0x10] sm:$0xf] }
  0x5f   : > { %v449_v11 = vrot.slane %v447_v19, 4  ;;  %v448_v45 = vsel %vm1816_vm2, %v446_v46, %v447_v19  ;;  %v217_v19 = vld [vmem:[%s1814_s20 + $0x4] sm:$0xf]  ;;  %v694_v46 = vshll.u32 %v596_v2, 16 }
  0x60   : > { %228 = vst.msk [vmem:[#allocation2 + $0x8] sm:$0xf] %vm226_vm15, %v217_v19 }
  0x61   : > { %v696_v44 = vrot.slane %v694_v46, 6 }
  0x62   : > { %361 = vrot.lane.b32.xlu2 %v294_v47, %s1768_s23  ;;  %v637_v47 = vor.u32 %v636_v25, %v633_v35  ;;  %v783_v35 = vrot.slane %v753_v14, 6  ;;  %v597_v25 = vld [vmem:[%s1814_s20 + $0x2c] sm:$0x3]  ;;  %v850_v14 = vld [vmem:[%s1814_s20 + $0x14] sm:$0xf] }
  0x63   : > { %456 = vrot.lane.b32.xlu0 %v430_v40, %s1767_s22  ;;  %v644_v40 = vshll.u32 %v591_v27, 16  ;;  %v629_v27 = vrot.slane %v1929_v52, 4  ;;  %v701_v4 = vshrl.u32 %v597_v25, 16  ;;  %v704_v9 = vshll.u32 %v597_v25, 16 }
  0x64   : > { %458 = vrot.lane.b32.xlu1 %v433_v22, %s1767_s22  ;;  %v450_v22 = vrot.slane %v406_v32, 5  ;;  %v639_v58 = vrot.slane %v637_v47, 4  ;;  %v223_v32 = vld [vmem:[%s1814_s20 + $0x1c] sm:$0xf]  ;;  %v876_v25 = vrot.slane %v874_v38, 4 }
  0x65   : > { %v646_v51 = vrot.slane %v644_v40, 6  ;;  %234 = vst.msk [vmem:[#allocation2 + $0x38] sm:$0xf] %vm226_vm15, %v223_v32  ;;  %v638_v52 = vsel %vm1901_vm8, %v629_v27, %v637_v47  ;;  %v2172_v27 = vld [vmem:[%s1814_s20 + $0x10] sm:$0xf] }
  0x66   : > { %v451_v20 = vsel %vm1816_vm2, %v449_v11, %v450_v22  ;;  %v503_v11 = vld [vmem:[%s1814_s20 + $0x2c] sm:$0x1]  ;;  %v782_v22 = vrot.slane %v780_v3, 4  ;;  %v703_v3 = vrot.slane %v701_v4, 5 }
  0x67   : > { %v2128_v59 = vor.u32 %v646_v51, %v643_v48  ;;  %v786_v48 = vrot.slane %v2147_v39, 6  ;;  %v544_v51 = vrot.slane %v503_v11, 5  ;;  %v759_v11 = vld [vmem:[%s1814_s20 + $0x28] sm:$0xf] }
  0x68   : > { %v784_v60 = vsel %vm1951_vm11, %v782_v22, %v783_v35  ;;  %v689_v22 = vrot.slane %v1976_v49, 4 }
  0x69   : > { %v648_v33 = vsel %vm1901_vm8, %v639_v58, %v2128_v59  ;;  %v706_v58 = vrot.slane %v704_v9, 6 }
  0x6a   : > { %371 = vrot.lane.b32.xlu2 %v344_v34, %s1768_s23  ;;  %v691_v34 = vshrl.u32 %v596_v2, 16 }
  0x6b   : > { %373 = vrot.lane.b32.xlu0 %v354_v23, %s1768_s23  ;;  %v541_v23 = vrot.slane %v502_v55, 5 }
  0x6c   : > { %550 = vrot.lane.b32.xlu1 %v524_v16, %s1766_s21  ;;  %v693_v40 = vrot.slane %v691_v34, 5 }
  0x6d   : > { %v542_v42 = vsel %vm1816_vm2, %v540_v5, %v541_v23  ;;  %v543_v47 = vrot.slane %v541_v23, 4  ;;  %v1104_v23 = vld [vmem:[%s1814_s20 + $0x8] sm:$0x8] }
  0x6e   : > { %v1624_v46 = vrot.slane %v1104_v23, 11  ;;  %v1727_v23 = vld [vmem:[%s2566_s1 + $0x30] sm:$0xff] }
  0x6f   : > { %v545_v19 = vsel %vm1816_vm2, %v543_v47, %v544_v51 }
  0x72   : > { %552 = vrot.lane.b32.xlu2 %v527_v54, %s1766_s21  ;;  %v1105_v54 = vld [vmem:[%s1814_s20 + $0xc] sm:$0xf] }
  0x73   : > { %468 = vrot.lane.b32.xlu0 %v448_v45, %s1767_s22  ;;  %v465_v16 = vpop.permute.xlu2 %464  ;;  %v785_v45 = vrot.slane %v783_v35, 4  ;;  %v1131_v2 = vrot.slane %v1105_v54, 7  ;;  %v801_v54 = vrot.slane %v759_v11, 6  ;;  %v2226_v11 = vld [vmem:[%s1814_s20 + $0x2c] sm:$0xf] }
  0x74   : > { %470 = vrot.lane.b32.xlu1 %v451_v20, %s1767_s22  ;;  %v697_v20 = vor.u32 %v696_v44, %v693_v40  ;;  %v944_v40 = vld [vmem:[%s1814_s20 + $0x14] sm:$0xf] }
  0x75   : > { %v787_v5 = vsel %vm1951_vm11, %v785_v45, %v786_v48  ;;  %v1132_v4 = vsel %vm2175_vm6, %v1624_v46, %v1131_v2  ;;  %v1728_v45 = vld [vmem:[%s2566_s1 + $0x38] sm:$0xff]  ;;  %v985_v47 = vshrl.u32 %v944_v40, 16  ;;  %v988_v51 = vshll.u32 %v944_v40, 16 }
  0x76   : > { %v699_v32 = vrot.slane %v697_v20, 4  ;;  %1323 = vmatpush.bf16.msra.mxu0 %v1728_v45  ;;  %1170 = vst.msk [vmem:[#allocation2 + $0x4] sm:$0xf] %vm226_vm15, %v1132_v4  ;;  %1730 = vmatpush.bf16.msra.mxu2 %v1728_v45  ;;  %v803_v46 = vrot.slane %v801_v54, 4  ;;  %v1726_v4 = vld [vmem:[%s2566_s1 + $0x28] sm:$0xff] }
  0x7a   : > { %713 = vrot.lane.b32.xlu2 %v638_v52, %s1769_s24  ;;  %v877_v52 = vrot.slane %v850_v14, 6  ;;  %v987_v14 = vrot.slane %v985_v47, 6  ;;  %1324 = vmatpush.bf16.msra.mxu0 %v1727_v23 }
  0x7b   : > { %715 = vrot.lane.b32.xlu0 %v648_v33, %s1769_s24  ;;  %v1133_v33 = vrot.slane %v1131_v2, 4  ;;  %v800_v2 = vrot.slane %v798_v6, 4  ;;  %v950_v6 = vld [vmem:[%s1814_s20 + $0x2c] sm:$0xf]  ;;  %1731 = vmatpush.bf16.msra.mxu2 %v1727_v23  ;;  %v2250_v23 = vld [vmem:[%s1814_s20 + $0x18] sm:$0xf] }
  0x7c   : > { %562 = vrot.lane.b32.xlu1 %v542_v42, %s1766_s21  ;;  %v368_v55 = vpop.permute.xlu2 %367  ;;  %v1134_v42 = vrot.slane %v2172_v27, 7  ;;  %v1048_v47 = vshll.u32 %v950_v6, 16 }
  0x7d   : > { %392 = vst.msk [vmem:[#allocation2 + $0x30] sm:$0xf] %vm385_vm0, %v368_v55  ;;  %v878_v55 = vsel %vm1951_vm11, %v876_v25, %v877_v52  ;;  %v879_v25 = vrot.slane %v877_v52, 4 }
  0x7e   : > { %489 = vst.msk [vmem:[#allocation2 + $0x30] sm:$0xf] %vm482_vm1, %v465_v16  ;;  %v707_v16 = vor.u32 %v706_v58, %v703_v3  ;;  %v1135_v38 = vsel %vm2175_vm6, %v1133_v33, %v1134_v42  ;;  %v760_v3 = vld [vmem:[%s1814_s20 + $0x2c] sm:$0x3]  ;;  %v698_v58 = vsel %vm1901_vm8, %v689_v22, %v697_v20  ;;  %v990_v20 = vrot.slane %v988_v51, 7  ;;  %1325 = vmatpush.bf16.msra.mxu0 %v1726_v4 }
  0x7f   : > { %1171 = vst.msk [vmem:[#allocation2 + $0xc] sm:$0xf] %vm226_vm15, %v1135_v38  ;;  %v804_v33 = vrot.slane %v760_v3, 6  ;;  %v1711_v38 = vld [vmem:[#allocation2 + $0x4] sm:$0xf]  ;;  %1732 = vmatpush.bf16.msra.mxu2 %v1726_v4 }
  0x80   : > { %v708_v49 = vsel %vm1901_vm8, %v699_v32, %v707_v16  ;;  %v991_v45 = vor.u32 %v990_v20, %v987_v14  ;;  %v1107_v3 = vld [vmem:[%s1814_s20 + $0x14] sm:$0xf]  ;;  %v1136_v14 = vrot.slane %v1134_v42, 4  ;;  %v983_v42 = vrot.slane %v2032_v13, 4 }
  0x81   : > { %v1137_v43 = vrot.slane %v1107_v3, 7  ;;  %v1723_v3 = vld [vmem:[%s2566_s1 + $0x10] sm:$0xff] }
  0x82   : > { %564 = vrot.lane.b32.xlu2 %v545_v19, %s1766_s21  ;;  %v993_v20 = vrot.slane %v991_v45, 4 }
  0x83   : > { %810 = vrot.lane.b32.xlu0 %v784_v60, %s1770_s25  ;;  %v945_v60 = vld [vmem:[%s1814_s20 + $0x18] sm:$0xf] }
  0x84   : > { %812 = vrot.lane.b32.xlu1 %v787_v5, %s1770_s25  ;;  %v370_v9 = vpop.permute.xlu2 %369  ;;  %v2214_v5 = vld [vmem:[%s1814_s20 + $0x18] sm:$0xf]  ;;  %v995_v19 = vshrl.u32 %v945_v60, 16  ;;  %v998_v32 = vshll.u32 %v945_v60, 16 }
  0x85   : > { %v547_v35 = vpop.permute.xlu0 %546  ;;  %393 = vst.msk [vmem:[#allocation2 + $0x38] sm:$0xf] %vm385_vm0, %v370_v9  ;;  %v880_v40 = vrot.slane %v2214_v5, 6  ;;  %v802_v9 = vsel %vm1951_vm11, %v800_v2, %v801_v54  ;;  %v1725_v2 = vld [vmem:[%s2566_s1 + $0x20] sm:$0xff] }
  0x86   : > { %v453_v44 = vpop.permute.xlu1 %452  ;;  %v997_v21 = vrot.slane %v995_v19, 6  ;;  %v1000_v52 = vrot.slane %v998_v32, 7  ;;  %v1629_v51 = vld [vmem:[#allocation2 + $0x8] sm:$0xf0]  ;;  %1326 = vmatpush.bf16.msra.mxu0 %v1725_v2  ;;  %1733 = vmatpush.bf16.msra.mxu2 %v1725_v2 }
  0x87   : > { %v881_v54 = vsel %vm1951_vm11, %v879_v25, %v880_v40  ;;  %v1632_v60 = vor.u32 %v1711_v38, %v1629_v51  ;;  %v242_v25 = vld [vmem:[%s1814_s20 + $0x14] sm:$0xf] }
  0x88   : > { %v2255_v19 = vor.u32 %v1000_v52, %v997_v21  ;;  %v1138_v21 = vsel %vm2175_vm6, %v1136_v14, %v1137_v43  ;;  %v301_v13 = vshll.u32 %v242_v25, 16  ;;  %v305_v38 = vshrl.u32 %v242_v25, 16 }
  0x89   : > { %1701 = vmatmul.msk.bf16.vlgmr.msra.gmra.mxu1 %vm1307_vm9, %v1632_v60  ;;  %1172 = vst.msk [vmem:[#allocation2 + $0x14] sm:$0xf] %vm226_vm15, %v1138_v21  ;;  %v857_v60 = vld [vmem:[%s1814_s20 + $0x30] sm:$0x3] }
  0x8a   : > { %725 = vrot.lane.b32.xlu2 %v698_v58, %s1769_s24  ;;  %v895_v58 = vrot.slane %v2226_v11, 6  ;;  %v1139_v11 = vrot.slane %v1137_v43, 4  ;;  %v1002_v52 = vsel %vm2005_vm14, %v993_v20, %v2255_v19  ;;  %v1003_v50 = vrot.slane %v2255_v19, 4 }
  0x8b   : > { %727 = vrot.lane.b32.xlu0 %v708_v49, %s1769_s24  ;;  %v1045_v49 = vshrl.u32 %v950_v6, 16 }
  0x8c   : > { %904 = vrot.lane.b32.xlu1 %v878_v55, %s1771_s26  ;;  %v712_v22 = vpop.permute.xlu2 %711  ;;  %v951_v55 = vld [vmem:[%s1814_s20 + $0x30] sm:$0x7]  ;;  %v897_v43 = vrot.slane %v895_v58, 4 }
  0x8d   : > { %v356_v16 = vpop.permute.xlu0 %355  ;;  %v1058_v6 = vshll.u32 %v951_v55, 16 }
  0x8e   : > { %v455_v61 = vpop.permute.xlu1 %454  ;;  %386 = vst.msk [vmem:[#allocation2] sm:$0xf] %vm385_vm0, %v356_v16  ;;  %v1047_v16 = vrot.slane %v1045_v49, 6 }
  0x8f   : > { %483 = vst.msk [vmem:[#allocation2] sm:$0xf] %vm482_vm1, %v453_v44  ;;  %v805_v44 = vsel %vm1951_vm11, %v803_v46, %v804_v33  ;;  %v1050_v46 = vrot.slane %v1048_v47, 7  ;;  %v1055_v33 = vshrl.u32 %v951_v55, 16  ;;  %v1060_v51 = vrot.slane %v1058_v6, 7 }
  0x90   : > { %577 = vst.msk [vmem:[#allocation2] sm:$0xf] %vm576_vm7, %v547_v35  ;;  %v894_v35 = vrot.slane %v892_v1, 4  ;;  %v1140_v1 = vrot.slane %v2250_v23, 7  ;;  %v295_v55 = vshrl.u32 %v2055_v53, 16  ;;  %v2292_v53 = vrot.slane %v301_v13, 5 }
  0x91   : > { %v1051_v49 = vor.u32 %v1050_v46, %v1047_v16  ;;  %v1057_v47 = vrot.slane %v1055_v33, 6  ;;  %v1722_v46 = vld [vmem:[%s2566_s1 + $0x8] sm:$0xff]  ;;  %v1713_v25 = vld [vmem:[#allocation2 + $0x14] sm:$0xf]  ;;  %v1721_v13 = vld [vmem:[%s2566_s1] sm:$0xff] }
  0x92   : > { %906 = vrot.lane.b32.xlu2 %v881_v54, %s1771_s26  ;;  %v992_v54 = vsel %vm2005_vm14, %v983_v42, %v991_v45  ;;  %v297_v16 = vrot.slane %v295_v55, 4  ;;  %v401_v42 = vld [vmem:[%s1814_s20 + $0x14] sm:$0xf]  ;;  %v592_v55 = vld [vmem:[%s1814_s20 + $0x18] sm:$0xf] }
  0x93   : > { %822 = vrot.lane.b32.xlu0 %v802_v9, %s1770_s25  ;;  %v1724_v9 = vld [vmem:[%s2566_s1 + $0x18] sm:$0xff]  ;;  %v1053_v2 = vrot.slane %v1051_v49, 4  ;;  %v1061_v14 = vor.u32 %v1060_v51, %v1057_v47  ;;  %v434_v47 = vrot.slane %v432_v62, 4  ;;  %v435_v51 = vrot.slane %v401_v42, 5 }
  0x94   : > { %824 = vrot.lane.b32.xlu1 %v805_v44, %s1770_s25  ;;  %v807_v4 = vpop.permute.xlu2 %806  ;;  %v896_v44 = vsel %vm1951_vm11, %v894_v35, %v895_v58  ;;  %1327 = vmatpush.bf16.msra.mxu0 %v1724_v9  ;;  %v307_v35 = vrot.slane %v305_v38, 4  ;;  %v298_v21 = vor.u32 %v297_v16, %v2076_v36 }
  0x95   : > { %v358_v32 = vpop.permute.xlu0 %357  ;;  %1734 = vmatpush.bf16.msra.mxu2 %v1724_v9  ;;  %v1062_v58 = vsel %vm2005_vm14, %v1053_v2, %v1061_v14  ;;  %v436_v2 = vsel %vm1816_vm2, %v434_v47, %v435_v51  ;;  %v852_v47 = vld [vmem:[%s1814_s20 + $0x1c] sm:$0xf] }
  0x96   : > { %v549_v27 = vpop.permute.xlu1 %548  ;;  %387 = vst.msk [vmem:[#allocation2 + $0x8] sm:$0xf] %vm385_vm0, %v358_v32  ;;  %v898_v32 = vrot.slane %v857_v60, 6  ;;  %v308_v6 = vor.u32 %v307_v35, %v2292_v53  ;;  %v299_v60 = vrot.slane %v298_v21, 4  ;;  %v654_v35 = vshll.u32 %v592_v55, 16 }
  0x97   : > { %484 = vst.msk [vmem:[#allocation2 + $0x8] sm:$0xf] %vm482_vm1, %v455_v61  ;;  %v1141_v61 = vsel %vm2175_vm6, %v1139_v11, %v1140_v1 }
  0x98   : > { %578 = vst.msk [vmem:[#allocation2 + $0x8] sm:$0xf] %vm576_vm7, %v549_v27  ;;  %1328 = vmatpush.bf16.msra.mxu0 %v1723_v3  ;;  %v1109_v27 = vld [vmem:[%s1814_s20 + $0x1c] sm:$0xf]  ;;  %v899_v11 = vsel %vm1951_vm11, %v897_v43, %v898_v32  ;;  %v309_v38 = vrot.slane %v308_v6, 4  ;;  %v304_v14 = vsel %vm1846_vm5, %v299_v60, %v2292_v53  ;;  %v656_v32 = vrot.slane %v654_v35, 6 }
  0x99   : > { %741 = vst.msk [vmem:[#allocation2 + $0x8] sm:$0xf] %vm739_vm10, %v712_v22  ;;  %v1043_v22 = vrot.slane %v2048_v41, 4  ;;  %1735 = vmatpush.bf16.msra.mxu2 %v1723_v3  ;;  %v498_v3 = vld [vmem:[%s1814_s20 + $0x18] sm:$0xf]  ;;  %v437_v53 = vrot.slane %v435_v51, 4 }
  0x9a   : > { %1173 = vst.msk [vmem:[#allocation2 + $0x1c] sm:$0xf] %vm226_vm15, %v1141_v61  ;;  %1067 = vrot.lane.b32.xlu2 %v992_v54, %s1772_s27  ;;  %v1142_v61 = vrot.slane %v1140_v1, 4  ;;  %v314_v62 = vsel %vm1846_vm5, %v309_v38, %v1873_v56  ;;  %v529_v56 = vrot.slane %v498_v3, 5  ;;  %v219_v6 = vld [vmem:[%s1814_s20 + $0xc] sm:$0xf] }
  0x9b   : > { %1069 = vrot.lane.b32.xlu0 %v1002_v52, %s1772_s27  ;;  %v1052_v33 = vsel %vm2005_vm14, %v1043_v22, %v1051_v49  ;;  %v2312_v52 = vld [vmem:[%s1814_s20 + $0x20] sm:$0xf]  ;;  %v651_v22 = vshrl.u32 %v592_v55, 16  ;;  %v439_v21 = vsel %vm1816_vm2, %v437_v53, %v438_v28  ;;  %230 = vst.msk [vmem:[#allocation2 + $0x18] sm:$0xf] %vm226_vm15, %v219_v6  ;;  %vm930_vm5 = vcmask 913152  }
  0x9c   : > { %916 = vrot.lane.b32.xlu1 %v896_v44, %s1771_s26  ;;  %v724_v41 = vpop.permute.xlu2 %723  ;;  %1329 = vmatpush.bf16.msra.mxu0 %v1722_v46  ;;  %v1143_v44 = vrot.slane %v1109_v27, 7  ;;  %v1146_v49 = vrot.slane %v2312_v52, 7  ;;  %v788_v38 = vrot.slane %v786_v48, 4  ;;  %v224_v60 = vld [vmem:[%s1814_s20 + $0x20] sm:$0xf] }
  0x9d   : > { %v467_v45 = vpop.permute.xlu0 %466  ;;  %1736 = vmatpush.bf16.msra.mxu2 %v1722_v46  ;;  %v653_v43 = vrot.slane %v651_v22, 5  ;;  %v218_v46 = vld [vmem:[%s1814_s20 + $0x8] sm:$0xf]  ;;  %235 = vst.msk [vmem:[#allocation2 + $0x40] sm:$0xf] %vm226_vm15, %v224_v60 }
  0x9e   : > { %v710_v20 = vpop.permute.xlu1 %709  ;;  %490 = vst.msk [vmem:[#allocation2 + $0x38] sm:$0xf] %vm482_vm1, %v467_v45  ;;  %v1144_v23 = vsel %vm2175_vm6, %v1142_v61, %v1143_v44  ;;  %v1145_v1 = vrot.slane %v1143_v44, 4  ;;  %v946_v44 = vld [vmem:[%s1814_s20 + $0x1c] sm:$0xf] }
  0x9f   : > { %740 = vst.msk [vmem:[#allocation2] sm:$0xf] %vm739_vm10, %v710_v20  ;;  %v528_v20 = vrot.slane %v526_v31, 4  ;;  %v657_v31 = vor.u32 %v656_v32, %v653_v43  ;;  %v1005_v55 = vshrl.u32 %v946_v44, 16 }
  0xa0   : > { %837 = vst.msk [vmem:[#allocation2] sm:$0xf] %vm836_vm12, %v807_v4  ;;  %1330 = vmatpush.bf16.msra.mxu0 %v1721_v13  ;;  %v1147_v45 = vsel %vm2175_vm6, %v1145_v1, %v1146_v49  ;;  %v883_v1 = vrot.slane %v852_v47, 6 }
  0xa1   : > { %v1637_v9 = vld [vmem:[#allocation2 + $0x18] sm:$0xf0]  ;;  %1737 = vmatpush.bf16.msra.mxu2 %v1721_v13  ;;  %1174 = vst.msk [vmem:[#allocation2 + $0x24] sm:$0xf] %vm226_vm15, %v1144_v23  ;;  %v530_v12 = vsel %vm1816_vm2, %v528_v20, %v529_v56  ;;  %v659_v13 = vrot.slane %v657_v31, 4 }
  0xa2   : > { %v1640_v4 = vor.u32 %v1713_v25, %v1637_v9  ;;  %918 = vrot.lane.b32.xlu2 %v899_v11, %s1771_s26  ;;  %1175 = vst.msk [vmem:[#allocation2 + $0x2c] sm:$0xf] %vm226_vm15, %v1147_v45  ;;  %v1111_v25 = vld [vmem:[%s1814_s20 + $0x24] sm:$0xf]  ;;  %v2364_v11 = vld [vmem:[%s1814_s20 + $0x28] sm:$0xf] }
  0xa3   : > { %1079 = vrot.lane.b32.xlu0 %v1052_v33, %s1772_s27  ;;  %229 = vst.msk [vmem:[#allocation2 + $0x10] sm:$0xf] %vm226_vm15, %v218_v46  ;;  %v755_v9 = vld [vmem:[%s1814_s20 + $0x18] sm:$0xf]  ;;  %v1149_v17 = vrot.slane %v1111_v25, 7  ;;  %v668_v48 = vsel %vm1901_vm8, %v659_v13, %v1937_v57  ;;  %v882_v57 = vrot.slane %v880_v40, 4 }
  0xa4   : > { %1081 = vrot.lane.b32.xlu1 %v1062_v58, %s1772_s27  ;;  %1702 = vmatmul.msk.bf16.gmra.mxu1 %vm1307_vm9, %v1640_v4  ;;  %v819_v10 = vpop.permute.xlu2 %818  ;;  %v1148_v4 = vrot.slane %v1146_v49, 4  ;;  %v789_v61 = vrot.slane %v755_v9, 6  ;;  %v885_v22 = vrot.slane %v883_v1, 4  ;;  %v225_v45 = vld [vmem:[%s1814_s20 + $0x24] sm:$0xf] }
  0xa5   : > { %v559_v36 = vpop.permute.xlu0 %558  ;;  %v1151_v24 = vrot.slane %v1149_v17, 4  ;;  %236 = vst.msk [vmem:[#allocation2 + $0x48] sm:$0xf] %vm226_vm15, %v225_v45 }
  0xa6   : > { %v561_v54 = vpop.permute.xlu1 %560  ;;  %583 = vst.msk [vmem:[#allocation2 + $0x30] sm:$0xf] %vm576_vm7, %v559_v36  ;;  %v1150_v0 = vsel %vm2175_vm6, %v1148_v4, %v1149_v17  ;;  %v649_v36 = vrot.slane %v2128_v59, 4  ;;  %v790_v59 = vsel %vm1951_vm11, %v788_v38, %v789_v61  ;;  %v791_v18 = vrot.slane %v789_v61, 4  ;;  %v1114_v38 = vld [vmem:[%s1814_s20 + $0x30] sm:$0x7] }
  0xa7   : > { %584 = vst.msk [vmem:[#allocation2 + $0x38] sm:$0xf] %vm576_vm7, %v561_v54  ;;  %v1008_v54 = vshll.u32 %v946_v44, 16  ;;  %v887_v40 = vsel %vm1951_vm11, %v885_v22, %v886_v26 }
  0xa8   : > { %747 = vst.msk [vmem:[#allocation2 + $0x38] sm:$0xf] %vm739_vm10, %v724_v41  ;;  %v531_v41 = vrot.slane %v529_v56, 4  ;;  %v1715_v58 = vld [vmem:[#allocation2 + $0x24] sm:$0xf]  ;;  %v658_v23 = vsel %vm1901_vm8, %v649_v36, %v657_v31  ;;  %v884_v56 = vsel %vm1951_vm11, %v882_v57, %v883_v1  ;;  %v793_v43 = vsel %vm1951_vm11, %v791_v18, %v792_v63 }
  0xa9   : > { %v1645_v42 = vld [vmem:[#allocation2 + $0x28] sm:$0xf0]  ;;  %1176 = vst.msk [vmem:[#allocation2 + $0x34] sm:$0xf] %vm226_vm15, %v1150_v0 }
  0xaa   : > { %363 = vrot.lane.b32.xlu2 %v304_v14, %s1768_s23  ;;  %v533_v27 = vsel %vm1816_vm2, %v531_v41, %v532_v29  ;;  %v1648_v52 = vor.u32 %v1715_v58, %v1645_v42  ;;  %v1152_v29 = vrot.slane %v2364_v11, 7  ;;  %vm1401_vm2 = vcmask 257024  }
  0xab   : > { %365 = vrot.lane.b32.xlu0 %v314_v62, %s1768_s23  ;;  %v1010_v62 = vrot.slane %v1008_v54, 7  ;;  %v221_v54 = vld [vmem:[%s1814_s20 + $0x14] sm:$0xf] }
  0xac   : > { %460 = vrot.lane.b32.xlu1 %v436_v2, %s1767_s22  ;;  %v1066_v33 = vpop.permute.xlu2 %1065  ;;  %v1153_v39 = vsel %vm2175_vm6, %v1151_v24, %v1152_v29  ;;  %v1113_v24 = vld [vmem:[%s1814_s20 + $0x2c] sm:$0xf]  ;;  %v1154_v61 = vrot.slane %v1152_v29, 4  ;;  %232 = vst.msk [vmem:[#allocation2 + $0x28] sm:$0xf] %vm226_vm15, %v221_v54 }
  0xad   : > { %v809_v16 = vpop.permute.xlu0 %808  ;;  %1177 = vst.msk [vmem:[#allocation2 + $0x3c] sm:$0xf] %vm226_vm15, %v1153_v39 }
  0xae   : > { %v722_v30 = vpop.permute.xlu1 %721  ;;  %838 = vst.msk [vmem:[#allocation2 + $0x8] sm:$0xf] %vm836_vm12, %v809_v16 }
  0xaf   : > { %746 = vst.msk [vmem:[#allocation2 + $0x30] sm:$0xf] %vm739_vm10, %v722_v30 }
  0xb0   : > { %843 = vst.msk [vmem:[#allocation2 + $0x30] sm:$0xf] %vm836_vm12, %v819_v10  ;;  %v1007_v10 = vrot.slane %v1005_v55, 6  ;;  %v1717_v14 = vld [vmem:[#allocation2 + $0x34] sm:$0xf] }
  0xb2   : > { %462 = vrot.lane.b32.xlu2 %v439_v21, %s1767_s22  ;;  %v1011_v5 = vor.u32 %v1010_v62, %v1007_v10 }
  0xb3   : > { %554 = vrot.lane.b32.xlu0 %v530_v12, %s1766_s21 }
  0xb4   : > { %556 = vrot.lane.b32.xlu1 %v533_v27, %s1766_s21  ;;  %1703 = vmatmul.msk.bf16.gmra.mxu1 %vm1307_vm9, %v1648_v52  ;;  %v1076_v51 = vpop.permute.xlu2 %1075  ;;  %v1653_v20 = vld [vmem:[#allocation2 + $0x38] sm:$0xf0]  ;;  %v1013_v41 = vrot.slane %v1011_v5, 4  ;;  %v1012_v46 = vsel %vm2005_vm14, %v1003_v50, %v1011_v5 }
  0xb5   : > { %v901_v28 = vpop.permute.xlu0 %900  ;;  %v1656_v32 = vor.u32 %v1717_v14, %v1653_v20 }
  0xb6   : > { %v903_v49 = vpop.permute.xlu1 %902  ;;  %931 = vst.msk [vmem:[#allocation2] sm:$0xf] %vm930_vm5, %v901_v28  ;;  %v1022_v53 = vsel %vm2005_vm14, %v1013_v41, %v2044_v37  ;;  %v1155_v28 = vrot.slane %v1113_v24, 7 }
  0xb7   : > { %932 = vst.msk [vmem:[#allocation2 + $0x8] sm:$0xf] %vm930_vm5, %v903_v49  ;;  %v1158_v49 = vrot.slane %v1114_v38, 7 }
  0xb8   : > { %1095 = vst.msk [vmem:[#allocation2 + $0x8] sm:$0xf] %vm1093_vm13, %v1066_v33  ;;  %v1157_v44 = vrot.slane %v1155_v28, 4  ;;  %v1156_v39 = vsel %vm2175_vm6, %v1154_v61, %v1155_v28 }
  0xb9   : > { %1178 = vst.msk [vmem:[#allocation2 + $0x44] sm:$0xf] %vm226_vm15, %v1156_v39  ;;  %v1412_v39 = vlaneseq }
  0xba   : > { %717 = vrot.lane.b32.xlu2 %v658_v23, %s1769_s24  ;;  %v1159_v11 = vsel %vm2175_vm6, %v1157_v44, %v1158_v49 }
  0xbb   : > { %719 = vrot.lane.b32.xlu0 %v668_v48, %s1769_s24  ;;  %v220_v48 = vld [vmem:[%s1814_s20 + $0x10] sm:$0xf]  ;;  %1179 = vst.msk [vmem:[#allocation2 + $0x4c] sm:$0xf] %vm226_vm15, %v1159_v11  ;;  %s1740_s20 = smul.u32 40, %s2583_s16 }
  0xbc   : > { %814 = vrot.lane.b32.xlu1 %v790_v59, %s1770_s25  ;;  %v362_v2 = vpop.permute.xlu2 %361  ;;  %231 = vst.msk [vmem:[#allocation2 + $0x20] sm:$0xf] %vm226_vm15, %v220_v48 }
  0xbd   : > { %v821_v3 = vpop.permute.xlu0 %820  ;;  %389 = vst.msk [vmem:[#allocation2 + $0x18] sm:$0xf] %vm385_vm0, %v362_v2  ;;  %s2502_s23 = scalar_lea.vmem %s2567_s2, %s1740_s20 }
  0xbe   : > { %v1064_v35 = vpop.permute.xlu1 %1063  ;;  %844 = vst.msk [vmem:[#allocation2 + $0x38] sm:$0xf] %vm836_vm12, %v821_v3 }
  0xbf   : > { %1094 = vst.msk [vmem:[#allocation2] sm:$0xf] %vm1093_vm13, %v1064_v35  ;;  %v1712_v16 = vld [vmem:[#allocation2 + $0x4] sm:$0xf0] }
  0xc0   : > { %v1719_v34 = vld [vmem:[#allocation2 + $0x44] sm:$0xf] }
  0xc2   : > { %816 = vrot.lane.b32.xlu2 %v793_v43, %s1770_s25  ;;  %v1661_v59 = vld [vmem:[#allocation2 + $0x48] sm:$0xf0] }
  0xc3   : > { %908 = vrot.lane.b32.xlu0 %v884_v56, %s1771_s26  ;;  %v1664_v23 = vor.u32 %v1719_v34, %v1661_v59 }
  0xc4   : > { %910 = vrot.lane.b32.xlu1 %v887_v40, %s1771_s26  ;;  %1704 = vmatmul.msk.bf16.gmra.mxu1 %vm1307_vm9, %v1656_v32  ;;  %v372_v63 = vpop.permute.xlu2 %371  ;;  %s211_s26 = scalar_lea.vmem %s2568_s3, %s2583_s16 }
  0xc5   : > { %v913_v30 = vpop.permute.xlu0 %912  ;;  %394 = vst.msk [vmem:[#allocation2 + $0x40] sm:$0xf] %vm385_vm0, %v372_v63  ;;  %1705 = vmatmul.msk.bf16.vlgmr.msra.gmra.mxu3 %vm1307_vm9, %v1664_v23 }
  0xc6   : > { %v915_v8 = vpop.permute.xlu1 %914  ;;  %937 = vst.msk [vmem:[#allocation2 + $0x30] sm:$0xf] %vm930_vm5, %v913_v30  ;;  %v1627_v26 = vld [vmem:[#allocation2] sm:$0xf] }
  0xc7   : > { %938 = vst.msk [vmem:[#allocation2 + $0x38] sm:$0xf] %vm930_vm5, %v915_v8  ;;  %v1628_v7 = vor.u32 %v1712_v16, %v1627_v26 }
  0xc8   : > { %1100 = vst.msk [vmem:[#allocation2 + $0x30] sm:$0xf] %vm1093_vm13, %v1076_v51 }
  0xc9   : > { %1331 = vmatmul.bf16.vlgmr.msra.gmra.mxu0 %v1628_v7 }
  0xca   : > { %1071 = vrot.lane.b32.xlu2 %v1012_v46, %s1772_s27 }
  0xcb   : > { %1073 = vrot.lane.b32.xlu0 %v1022_v53, %s1772_s27 }
  0xcc   : > { %v553_v6 = vpop.permute.xlu2 %552 }
  0xcd   : > { %v1078_v33 = vpop.permute.xlu0 %1077 }
  0xce   : > { %v360_v19 = vpop.permute.xlu1 %359  ;;  %1101 = vst.msk [vmem:[#allocation2 + $0x38] sm:$0xf] %vm1093_vm13, %v1078_v33 }
  0xcf   : > { %388 = vst.msk [vmem:[#allocation2 + $0x10] sm:$0xf] %vm385_vm0, %v360_v19  ;;  %v1651_v37 = vld [vmem:[#allocation2 + $0x30] sm:$0xf] }
  0xd4   : > { %v714_v15 = vpop.permute.xlu2 %713 }
  0xd5   : > { %v457_v12 = vpop.permute.xlu0 %456  ;;  %v1718_v31 = vld [vmem:[#allocation2 + $0x34] sm:$0xf0] }
  0xd6   : > { %v459_v58 = vpop.permute.xlu1 %458  ;;  %485 = vst.msk [vmem:[#allocation2 + $0x10] sm:$0xf] %vm482_vm1, %v457_v12  ;;  %v1652_v25 = vor.u32 %v1718_v31, %v1651_v37 }
  0xd7   : > { %486 = vst.msk [vmem:[#allocation2 + $0x18] sm:$0xf] %vm482_vm1, %v459_v58 }
  0xd8   : > { %1346 = vmatmul.bf16.vlgmr.msra.gmra.mxu2 %v1652_v25  ;;  %580 = vst.msk [vmem:[#allocation2 + $0x18] sm:$0xf] %vm576_vm7, %v553_v6 }
  0xdc   : > { %v565_v9 = vpop.permute.xlu2 %564 }
  0xdd   : > { %v374_v27 = vpop.permute.xlu0 %373 }
  0xde   : > { %v551_v42 = vpop.permute.xlu1 %550  ;;  %395 = vst.msk [vmem:[#allocation2 + $0x48] sm:$0xf] %vm385_vm0, %v374_v27 }
  0xdf   : > { %579 = vst.msk [vmem:[#allocation2 + $0x10] sm:$0xf] %vm576_vm7, %v551_v42 }
  0xe0   : > { %742 = vst.msk [vmem:[#allocation2 + $0x10] sm:$0xf] %vm739_vm10, %v714_v15 }
  0xe4   : > { %v726_v4 = vpop.permute.xlu2 %725 }
  0xe5   : > { %v469_v21 = vpop.permute.xlu0 %468 }
  0xe6   : > { %v471_v52 = vpop.permute.xlu1 %470  ;;  %491 = vst.msk [vmem:[#allocation2 + $0x40] sm:$0xf] %vm482_vm1, %v469_v21 }
  0xe7   : > { %492 = vst.msk [vmem:[#allocation2 + $0x48] sm:$0xf] %vm482_vm1, %v471_v52 }
  0xe8   : > { %586 = vst.msk [vmem:[#allocation2 + $0x48] sm:$0xf] %vm576_vm7, %v565_v9 }
  0xec   : > { %v907_v0 = vpop.permute.xlu2 %906 }
  0xed   : > { %v716_v17 = vpop.permute.xlu0 %715 }
  0xee   : > { %v563_v13 = vpop.permute.xlu1 %562  ;;  %743 = vst.msk [vmem:[#allocation2 + $0x18] sm:$0xf] %vm739_vm10, %v716_v17 }
  0xef   : > { %585 = vst.msk [vmem:[#allocation2 + $0x40] sm:$0xf] %vm576_vm7, %v563_v13 }
  0xf0   : > { %748 = vst.msk [vmem:[#allocation2 + $0x40] sm:$0xf] %vm739_vm10, %v726_v4 }
  0xf4   : > { %v1068_v51 = vpop.permute.xlu2 %1067 }
  0xf5   : > { %v811_v36 = vpop.permute.xlu0 %810 }
  0xf6   : > { %v813_v47 = vpop.permute.xlu1 %812  ;;  %839 = vst.msk [vmem:[#allocation2 + $0x10] sm:$0xf] %vm836_vm12, %v811_v36 }
  0xf7   : > { %840 = vst.msk [vmem:[#allocation2 + $0x18] sm:$0xf] %vm836_vm12, %v813_v47 }
  0xf8   : > { %934 = vst.msk [vmem:[#allocation2 + $0x18] sm:$0xf] %vm930_vm5, %v907_v0 }
  0xfc   : > { %v919_v60 = vpop.permute.xlu2 %918 }
  0xfd   : > { %v728_v29 = vpop.permute.xlu0 %727 }
  0xfe   : > { %v905_v55 = vpop.permute.xlu1 %904  ;;  %749 = vst.msk [vmem:[#allocation2 + $0x48] sm:$0xf] %vm739_vm10, %v728_v29  ;;  %v1413_v29 = vand.u32 127, %v1412_v39 }
  0xff   : > { %933 = vst.msk [vmem:[#allocation2 + $0x10] sm:$0xf] %vm930_vm5, %v905_v55 }
 0x100   : > { %1096 = vst.msk [vmem:[#allocation2 + $0x10] sm:$0xf] %vm1093_vm13, %v1068_v51  ;;  %v1417_v55 = vand.u32 65535, %v1413_v29  ;;  %v1418_v34 = vshrl.u32 %v1413_v29, 16 }
 0x102   : > { %v1421_v59 = vmul.u32 52428, %v1417_v55 }
 0x104   : > { %v364_v10 = vpop.permute.xlu2 %363 }
 0x105   : > { %v823_v1 = vpop.permute.xlu0 %822  ;;  %390 = vst.msk [vmem:[#allocation2 + $0x20] sm:$0xf] %vm385_vm0, %v364_v10  ;;  %v1424_v10 = vshll.u32 %v1421_v59, 16 }
 0x106   : > { %v825_v57 = vpop.permute.xlu1 %824  ;;  %845 = vst.msk [vmem:[#allocation2 + $0x40] sm:$0xf] %vm836_vm12, %v823_v1  ;;  %v1366_v56 = vpop.f32.mrf.mxu1  ;;  %v1420_v1 = vmul.u32 52429, %v1417_v55 }
 0x107   : > { %846 = vst.msk [vmem:[#allocation2 + $0x48] sm:$0xf] %vm836_vm12, %v825_v57  ;;  %v1635_v22 = vld [vmem:[#allocation2 + $0x10] sm:$0xf]  ;;  %v1422_v57 = vmul.u32 52429, %v1418_v34 }
 0x108   : > { %940 = vst.msk [vmem:[#allocation2 + $0x48] sm:$0xf] %vm930_vm5, %v919_v60  ;;  %vm1428_vm8 = vc.u32 %v1420_v1, %v1424_v10 }
 0x10c   : > { %v463_v14 = vpop.permute.xlu2 %462 }
 0x10d   : > { %v1070_v62 = vpop.permute.xlu0 %1069 }
 0x10e   : > { %v917_v3 = vpop.permute.xlu1 %916  ;;  %1097 = vst.msk [vmem:[#allocation2 + $0x18] sm:$0xf] %vm1093_vm13, %v1070_v62  ;;  %v1368_v30 = vpop.f32.mrf.mxu1 }
 0x10f   : > { %939 = vst.msk [vmem:[#allocation2 + $0x40] sm:$0xf] %vm930_vm5, %v917_v3  ;;  %v1426_v3 = vshll.u32 %v1422_v57, 16 }
 0x114   : > { %v718_v16 = vpop.permute.xlu2 %717 }
 0x115   : > { %v1080_v35 = vpop.permute.xlu0 %1079  ;;  %v1714_v18 = vld [vmem:[#allocation2 + $0x14] sm:$0xf0] }
 0x116   : > { %v1082_v45 = vpop.permute.xlu1 %1081  ;;  %1102 = vst.msk [vmem:[#allocation2 + $0x40] sm:$0xf] %vm1093_vm13, %v1080_v35  ;;  %v1636_v2 = vor.u32 %v1714_v18, %v1635_v22  ;;  %v1430_v22 = vadd.s32 %v1424_v10, %v1420_v1  ;;  %v1423_v18 = vmul.u32 52428, %v1418_v34 }
 0x117   : > { %1103 = vst.msk [vmem:[#allocation2 + $0x48] sm:$0xf] %vm1093_vm13, %v1082_v45 }
 0x118   : > { %1336 = vmatmul.bf16.gmra.mxu0 %v1636_v2  ;;  %v1773_v2 = vmov 0   ;;  %vm1432_vm11 = vc.u32 %v1430_v22, %v1426_v3 }
 0x11c   : > { %v817_v26 = vpop.permute.xlu2 %816 }
 0x11d   : > { %v366_v5 = vpop.permute.xlu0 %365  ;;  %v1659_v40 = vld [vmem:[#allocation2 + $0x40] sm:$0xf] }
 0x11e   : > { %391 = vst.msk [vmem:[#allocation2 + $0x28] sm:$0xf] %vm385_vm0, %v366_v5  ;;  %v1720_v20 = vld [vmem:[#allocation2 + $0x44] sm:$0xf0]  ;;  %v461_v43 = vpop.permute.xlu1 %460 }
 0x11f   : > { %v1660_v32 = vor.u32 %v1720_v20, %v1659_v40  ;;  %487 = vst.msk [vmem:[#allocation2 + $0x20] sm:$0xf] %vm482_vm1, %v461_v43  ;;  %v1433_v43 = vsel %vm1432_vm11, 1, %v1773_v2 }
 0x120   : > { %488 = vst.msk [vmem:[#allocation2 + $0x28] sm:$0xf] %vm482_vm1, %v463_v14  ;;  %v1429_v14 = vsel %vm1428_vm8, 1, %v1773_v2 }
 0x121   : > { %1351 = vmatmul.bf16.gmra.mxu2 %v1660_v32  ;;  %v1371_v63 = vpop.f32.mrf.mxu1  ;;  %v1431_v40 = vadd.s32 %v1429_v14, %v1423_v18 }
 0x124   : > { %v1072_v46 = vpop.permute.xlu2 %1071 }
 0x125   : > { %v555_v41 = vpop.permute.xlu0 %554 }
 0x126   : > { %581 = vst.msk [vmem:[#allocation2 + $0x20] sm:$0xf] %vm576_vm7, %v555_v41  ;;  %v557_v8 = vpop.permute.xlu1 %556  ;;  %v1435_v41 = vadd.s32 %v1433_v43, %v1431_v40 }
 0x127   : > { %582 = vst.msk [vmem:[#allocation2 + $0x28] sm:$0xf] %vm576_vm7, %v557_v8  ;;  %v1427_v8 = vshrl.u32 %v1422_v57, 16 }
 0x128   : > { %744 = vst.msk [vmem:[#allocation2 + $0x20] sm:$0xf] %vm739_vm10, %v718_v16  ;;  %v1425_v16 = vshrl.u32 %v1421_v59, 16 }
 0x129   : > { %v1373_v19 = vpop.f32.mrf.mxu1 }
 0x12d   : > { %v720_v50 = vpop.permute.xlu0 %719 }
 0x12e   : > { %745 = vst.msk [vmem:[#allocation2 + $0x28] sm:$0xf] %vm739_vm10, %v720_v50  ;;  %v815_v7 = vpop.permute.xlu1 %814 }
 0x12f   : > { %841 = vst.msk [vmem:[#allocation2 + $0x20] sm:$0xf] %vm836_vm12, %v815_v7 }
 0x130   : > { %842 = vst.msk [vmem:[#allocation2 + $0x28] sm:$0xf] %vm836_vm12, %v817_v26  ;;  %v1436_v26 = vadd.s32 %v1435_v41, %v1425_v16 }
 0x131   : > { %v2494_v12 = vpop.f32.mrf.mxu1 }
 0x132   : > { %v1437_v50 = vadd.s32 %v1436_v26, %v1427_v8 }
 0x134   : > { %v1438_v7 = vshrl.u32 %v1437_v50, 3 }
 0x135   : > { %v909_v53 = vpop.permute.xlu0 %908 }
 0x136   : > { %935 = vst.msk [vmem:[#allocation2 + $0x20] sm:$0xf] %vm930_vm5, %v909_v53  ;;  %v911_v33 = vpop.permute.xlu1 %910 }
 0x137   : > { %936 = vst.msk [vmem:[#allocation2 + $0x28] sm:$0xf] %vm930_vm5, %v911_v33 }
 0x138   : > { %1098 = vst.msk [vmem:[#allocation2 + $0x20] sm:$0xf] %vm1093_vm13, %v1072_v46 }
 0x139   : > { %v2508_v42 = vpop.f32.mrf.mxu1 }
 0x13d   : > { %v1074_v6 = vpop.permute.xlu0 %1073 }
 0x13e   : > { %1099 = vst.msk [vmem:[#allocation2 + $0x28] sm:$0xf] %vm1093_vm13, %v1074_v6 }
 0x13f   : > { %v1643_v37 = vld [vmem:[#allocation2 + $0x20] sm:$0xf] }
 0x141   : > { %v1381_v4 = vpop.f32.mrf.mxu1 }
 0x145   : > { %v1716_v31 = vld [vmem:[#allocation2 + $0x24] sm:$0xf0] }
 0x146   : > { %v1332_v58 = vpop.f32.mrf.mxu0  ;;  %v1644_v25 = vor.u32 %v1716_v31, %v1643_v37 }
 0x147   : > { %v2497_v15 = vadd.f32 %v1366_v56, %v1332_v58 }
 0x148   : > { %1341 = vmatmul.bf16.gmra.mxu0 %v1644_v25  ;;  %v1386_v11 = vpop.f32.mrf.mxu3 }
 0x149   : > { %v1391_v27 = vpack.c.bf16 %v2497_v15, %v2497_v15  ;;  %v1383_v24 = vpop.f32.mrf.mxu1 }
 0x14b   : > { %1402 = vst.msk [vmem:[%s2502_s23] sm:$0xf] %vm1401_vm2, %v1391_v27 }
 0x14e   : > { %v1334_v9 = vpop.f32.mrf.mxu0 }
 0x14f   : > { %v2510_v21 = vadd.f32 %v1368_v30, %v1334_v9 }
 0x150   : > { %v1388_v62 = vpop.f32.mrf.mxu3 }
 0x151   : > { %v1392_v52 = vpack.c.bf16 %v2510_v21, %v2510_v21 }
 0x153   : > { %1403 = vst.msk [vmem:[%s2502_s23 + $0x4] sm:$0xf] %vm1401_vm2, %v1392_v52  ;;  %v1478_v52 = vmul.f32 %v2510_v21, %v2510_v21 }
 0x15b   : > { %v1347_v17 = vpop.f32.mrf.mxu2 }
 0x15c   : > { %v1382_v13 = vadd.f32 %v1381_v4, %v1347_v17  ;;  %v1774_v4 = vmov 0.0  }
 0x15e   : > { %v1397_v0 = vpack.c.bf16 %v1382_v13, %v1382_v13  ;;  %v1483_v30 = vmul.f32 %v1382_v13, %v1382_v13 }
 0x160   : > { %1408 = vst.msk [vmem:[%s2502_s23 + $0x18] sm:$0xf] %vm1401_vm2, %v1397_v0 }
 0x163   : > { %v1349_v28 = vpop.f32.mrf.mxu2 }
 0x164   : > { %v1384_v38 = vadd.f32 %v1383_v24, %v1349_v28 }
 0x166   : > { %v1398_v61 = vpack.c.bf16 %v1384_v38, %v1384_v38  ;;  %v1484_v32 = vmul.f32 %v1384_v38, %v1384_v38 }
 0x168   : > { %1409 = vst.msk [vmem:[%s2502_s23 + $0x1c] sm:$0xf] %vm1401_vm2, %v1398_v61 }
 0x195   : > { %v1337_v44 = vpop.f32.mrf.mxu0 }
 0x196   : > { %v2520_v49 = vadd.f32 %v1371_v63, %v1337_v44  ;;  %v1439_v63 = vmul.u32 10, %v1438_v7 }
 0x198   : > { %v1393_v36 = vpack.c.bf16 %v2520_v49, %v2520_v49 }
 0x19a   : > { %1404 = vst.msk [vmem:[%s2502_s23 + $0x8] sm:$0xf] %vm1401_vm2, %v1393_v36 }
 0x19d   : > { %v1339_v47 = vpop.f32.mrf.mxu0 }
 0x19e   : > { %v2526_v51 = vadd.f32 %v1373_v19, %v1339_v47  ;;  %v1440_v19 = vsub.s32 %v1413_v29, %v1439_v63 }
 0x1a0   : > { %v1394_v48 = vpack.c.bf16 %v2526_v51, %v2526_v51  ;;  %vm1443_vm14 = vcmp.ne.s32.totalorder %v1440_v19, 0  ;;  %vm1444_vm15 = vcmp.lt.s32.totalorder %v1440_v19, 0  ;;  %v1446_v31 = vadd.s32 10, %v1440_v19 }
 0x1a1   : > { %vm1445_vm0 = vmand %vm1444_vm15, %vm1443_vm14  ;;  %v1480_v9 = vmul.f32 %v2526_v51, %v2526_v51 }
 0x1a2   : > { %1405 = vst.msk [vmem:[%s2502_s23 + $0xc] sm:$0xf] %vm1401_vm2, %v1394_v48 }
 0x1a4   : > { %v1352_v54 = vpop.f32.mrf.mxu2 }
 0x1a5   : > { %v1387_v60 = vadd.f32 %v1386_v11, %v1352_v54 }
 0x1a7   : > { %v1399_v23 = vpack.c.bf16 %v1387_v60, %v1387_v60  ;;  %v1485_v20 = vmul.f32 %v1387_v60, %v1387_v60 }
 0x1a9   : > { %1410 = vst.msk [vmem:[%s2502_s23 + $0x20] sm:$0xf] %vm1401_vm2, %v1399_v23 }
 0x1ac   : > { %v1354_v35 = vpop.f32.mrf.mxu2 }
 0x1ad   : > { %v1389_v45 = vadd.f32 %v1388_v62, %v1354_v35 }
 0x1af   : > { %v1400_v56 = vpack.c.bf16 %v1389_v45, %v1389_v45  ;;  %1461 = vmatpush.msrb.mxu2 %v1389_v45  ;;  %v1486_v5 = vmul.f32 %v1389_v45, %v1389_v45 }
 0x1b1   : > { %1411 = vst.msk [vmem:[%s2502_s23 + $0x24] sm:$0xf] %vm1401_vm2, %v1400_v56  ;;  %1462 = vmatpush.msrb.mxu2 %v1387_v60  ;;  %1493 = vmatpush.msrb.mxu3 %v1486_v5 }
 0x1b3   : > { %1463 = vmatpush.msrb.mxu2 %v1384_v38  ;;  %1494 = vmatpush.msrb.mxu3 %v1485_v20 }
 0x1b5   : > { %1464 = vmatpush.msrb.mxu2 %v1382_v13  ;;  %1495 = vmatpush.msrb.mxu3 %v1484_v32  ;;  %v1477_v13 = vmul.f32 %v2497_v15, %v2497_v15 }
 0x1b7   : > { %1496 = vmatpush.msrb.mxu3 %v1483_v30 }
 0x1c5   : > { %v1342_v53 = vpop.f32.mrf.mxu0 }
 0x1c6   : > { %v1377_v46 = vadd.f32 %v2494_v12, %v1342_v53  ;;  %v1447_v12 = vsel %vm1445_vm0, %v1446_v31, %v1440_v19 }
 0x1c7   : > { %vm1448_vm1 = vcmp.lt.s32.totalorder %v1447_v12, 8 }
 0x1c8   : > { %v1395_v33 = vpack.c.bf16 %v1377_v46, %v1377_v46  ;;  %v1481_v27 = vmul.f32 %v1377_v46, %v1377_v46  ;;  %v1706_v17 = vsel %vm1448_vm1, 1.0, %v1774_v4 }
 0x1ca   : > { %1406 = vst.msk [vmem:[%s2502_s23 + $0x10] sm:$0xf] %vm1401_vm2, %v1395_v33 }
 0x1cd   : > { %v1344_v6 = vpop.f32.mrf.mxu0 }
 0x1ce   : > { %v1379_v37 = vadd.f32 %v2508_v42, %v1344_v6  ;;  %v1479_v42 = vmul.f32 %v2520_v49, %v2520_v49 }
 0x1d0   : > { %v1396_v58 = vpack.c.bf16 %v1379_v37, %v1379_v37  ;;  %1465 = vmatpush.msrb.mxu2 %v1379_v37  ;;  %v1482_v25 = vmul.f32 %v1379_v37, %v1379_v37 }
 0x1d2   : > { %1407 = vst.msk [vmem:[%s2502_s23 + $0x14] sm:$0xf] %vm1401_vm2, %v1396_v58  ;;  %1466 = vmatpush.msrb.mxu2 %v1377_v46  ;;  %1497 = vmatpush.msrb.mxu3 %v1482_v25 }
 0x1d4   : > { %1467 = vmatpush.msrb.mxu2 %v2526_v51  ;;  %1498 = vmatpush.msrb.mxu3 %v1481_v27 }
 0x1d6   : > { %1468 = vmatpush.msrb.mxu2 %v2520_v49  ;;  %1499 = vmatpush.msrb.mxu3 %v1480_v9 }
 0x1d8   : > { %1469 = vmatpush.msrb.mxu2 %v2510_v21  ;;  %1500 = vmatpush.msrb.mxu3 %v1479_v42 }
 0x1da   : > { %1470 = vmatpush.msrb.mxu2 %v2497_v15  ;;  %1501 = vmatpush.msrb.mxu3 %v1478_v52 }
 0x1db   : > { %1707 = vmatmul.msk.f32.vlgmr.msrb.gmra.mxu2 %vm1451_vm3, %v1706_v17 }
 0x1dc   : > { %1502 = vmatpush.msrb.mxu3 %v1477_v13 }
 0x1dd   : > { %1708 = vmatmul.msk.f32.vlgmr.msrb.gmra.mxu3 %vm1451_vm3, %v1706_v17 }
 0x25e   : > { %v1472_v0 = vpop.f32.mrf.mxu2 }
 0x25f   : > { %1476 = vst.msk [vmem:[%s211_s26] sm:$0x1] %vm1475_vm4, %v1472_v0 }
 0x260   : > { %v1504_v21 = vpop.f32.mrf.mxu3 }
 0x261   : > { %1507 = vst.msk [vmem:[%s214_s5] sm:$0x1] %vm1475_vm4, %v1504_v21 }
 0x262 PF: > { %s15_s15 = sadd.s32 1, %s1764_s15  }
 0x263   : > { %p12_p4 = scmp.ge.s32.totalorder %s15_s15, 4  }
 0x265   :  { %14 = sbr.rel (!%p12_p4) target bundleno = 1 (0x1), region = 82 }

// kernel: encoder_forward.9
= control target key start
LH: loop header
LB: loop body
LE: loop exit
PB: predicated region body
PF: predicated region fallthrough
CT: control target
= control target key end

     0   :  { %s836_s3 = inlined_call_operand.vmem [shape: bf16[640,128], index: 3, kind: input, shape index: {}]   ;;  %s837_s0 = inlined_call_operand.vmem [shape: bf16[8,640], index: 0, kind: input, shape index: {}]   ;;  %s838_s1 = inlined_call_operand.vmem [shape: f32[1,640], index: 1, kind: input, shape index: {}]   ;;  %s839_s2 = inlined_call_operand.vmem [shape: f32[1,640], index: 2, kind: input, shape index: {}]   ;;  %s840_s4 = inlined_call_operand.vmem [shape: f32[8,128], index: 4, kind: output, shape index: {}]  }
   0x1   :  { %v626_v0 = vld [vmem:[%s836_s3 + $0x38] sm:$0xff]  ;;  %v625_v3 = vld [vmem:[%s836_s3 + $0x30] sm:$0xff]  ;;  %v624_v8 = vld [vmem:[%s836_s3 + $0x28] sm:$0xff] }
   0x2   :  { %v642_v1 = vld [vmem:[%s836_s3 + $0xb8] sm:$0xff]  ;;  %389 = vmatpush.bf16.msra.mxu0 %v626_v0  ;;  %v641_v5 = vld [vmem:[%s836_s3 + $0xb0] sm:$0xff]  ;;  %v640_v9 = vld [vmem:[%s836_s3 + $0xa8] sm:$0xff] }
   0x3   :  { %v650_v2 = vld [vmem:[%s836_s3 + $0xf8] sm:$0xff]  ;;  %415 = vmatpush.bf16.msra.mxu2 %v642_v1  ;;  %v649_v6 = vld [vmem:[%s836_s3 + $0xf0] sm:$0xff]  ;;  %v648_v10 = vld [vmem:[%s836_s3 + $0xe8] sm:$0xff] }
   0x4   :  { %v634_v4 = vld [vmem:[%s836_s3 + $0x78] sm:$0xff]  ;;  %428 = vmatpush.bf16.msra.mxu3 %v650_v2  ;;  %v633_v7 = vld [vmem:[%s836_s3 + $0x70] sm:$0xff]  ;;  %v632_v11 = vld [vmem:[%s836_s3 + $0x68] sm:$0xff] }
   0x5   :  { %402 = vmatpush.bf16.msra.mxu1 %v634_v4  ;;  %v623_v12 = vld [vmem:[%s836_s3 + $0x20] sm:$0xff]  ;;  %v18_v18 = vld [vmem:[%s837_s0 + $0x8] sm:$0xff]  ;;  %v622_v21 = vld [vmem:[%s836_s3 + $0x18] sm:$0xff] }
   0x6   :  { %390 = vmatpush.bf16.msra.mxu0 %v625_v3  ;;  %v17_v13 = vld [vmem:[%s837_s0] sm:$0xff]  ;;  %v22_v23 = vunpack.c.l.bf16 %v18_v18  ;;  %v638_v25 = vld [vmem:[%s836_s3 + $0x98] sm:$0xff]  ;;  %v23_v27 = vunpack.c.h.bf16 %v18_v18  ;;  %v621_v34 = vld [vmem:[%s836_s3 + $0x10] sm:$0xff] }
   0x7   :  { %416 = vmatpush.bf16.msra.mxu2 %v641_v5  ;;  %v729_v14 = vld [vmem:[%s838_s1] sm:$0x1f]  ;;  %v20_v19 = vunpack.c.l.bf16 %v17_v13  ;;  %v646_v26 = vld [vmem:[%s836_s3 + $0xd8] sm:$0xff]  ;;  %v21_v30 = vunpack.c.h.bf16 %v17_v13  ;;  %v637_v37 = vld [vmem:[%s836_s3 + $0x90] sm:$0xff] }
   0x8   :  { %429 = vmatpush.bf16.msra.mxu3 %v649_v6  ;;  %v639_v15 = vld [vmem:[%s836_s3 + $0xa0] sm:$0xff]  ;;  %v27_v20 = vperm.slane %v729_v14, 0  ;;  %v29_v24 = vperm.slane %v729_v14, 2  ;;  %v30_v28 = vperm.slane %v729_v14, 3  ;;  %v630_v29 = vld [vmem:[%s836_s3 + $0x58] sm:$0xff]  ;;  %v28_v31 = vperm.slane %v729_v14, 1 }
   0x9   :  { %403 = vmatpush.bf16.msra.mxu1 %v633_v7  ;;  %v647_v16 = vld [vmem:[%s836_s3 + $0xe0] sm:$0xff]  ;;  %v645_v38 = vld [vmem:[%s836_s3 + $0xd0] sm:$0xff]  ;;  %v620_v45 = vld [vmem:[%s836_s3 + $0x8] sm:$0xff]  ;;  %v31_v6 = vperm.slane %v729_v14, 4 }
   0xa   :  { %391 = vmatpush.bf16.msra.mxu0 %v624_v8  ;;  %v631_v17 = vld [vmem:[%s836_s3 + $0x60] sm:$0xff]  ;;  %v37_v32 = vmul.f32 %v27_v20, %v20_v19  ;;  %v39_v35 = vmul.f32 %v29_v24, %v22_v23  ;;  %v40_v39 = vmul.f32 %v30_v28, %v23_v27  ;;  %v629_v41 = vld [vmem:[%s836_s3 + $0x50] sm:$0xff]  ;;  %v38_v42 = vmul.f32 %v28_v31, %v21_v30  ;;  %v636_v47 = vld [vmem:[%s836_s3 + $0x88] sm:$0xff] }
   0xb   :  { %417 = vmatpush.bf16.msra.mxu2 %v640_v9  ;;  %v750_v22 = vld [vmem:[%s839_s2] sm:$0x1f]  ;;  %v644_v48 = vld [vmem:[%s836_s3 + $0xc8] sm:$0xff]  ;;  %v658_v55 = vld [vmem:[%s836_s3 + $0x138] sm:$0xff] }
   0xc   :  { %430 = vmatpush.bf16.msra.mxu3 %v648_v10  ;;  %v44_v33 = vperm.slane %v750_v22, 0  ;;  %v46_v36 = vperm.slane %v750_v22, 2  ;;  %v47_v40 = vperm.slane %v750_v22, 3  ;;  %v45_v43 = vperm.slane %v750_v22, 1  ;;  %v628_v50 = vld [vmem:[%s836_s3 + $0x48] sm:$0xff]  ;;  %v619_v53 = vld [vmem:[%s836_s3] sm:$0xff] }
   0xd   :  { %404 = vmatpush.bf16.msra.mxu1 %v632_v11  ;;  %v635_v56 = vld [vmem:[%s836_s3 + $0x80] sm:$0xff]  ;;  %v657_v63 = vld [vmem:[%s836_s3 + $0x130] sm:$0xff]  ;;  %v656_v2 = vld [vmem:[%s836_s3 + $0x128] sm:$0xff]  ;;  %v48_v9 = vperm.slane %v750_v22, 4 }
   0xe   :  { %392 = vmatpush.bf16.msra.mxu0 %v623_v12  ;;  %v54_v44 = vadd.f32 %v44_v33, %v37_v32  ;;  %v56_v46 = vadd.f32 %v46_v36, %v39_v35  ;;  %v57_v49 = vadd.f32 %v47_v40, %v40_v39  ;;  %v55_v51 = vadd.f32 %v45_v43, %v38_v42  ;;  %v643_v58 = vld [vmem:[%s836_s3 + $0xc0] sm:$0xff]  ;;  %v19_v4 = vld [vmem:[%s837_s0 + $0x10] sm:$0xf]  ;;  %v654_v7 = vld [vmem:[%s836_s3 + $0x118] sm:$0xff] }
   0xf   :  { %418 = vmatpush.bf16.msra.mxu2 %v639_v15  ;;  %v627_v59 = vld [vmem:[%s836_s3 + $0x40] sm:$0xff]  ;;  %v24_v5 = vunpack.c.l.bf16 %v19_v4  ;;  %v653_v10 = vld [vmem:[%s836_s3 + $0x110] sm:$0xff]  ;;  %v652_v12 = vld [vmem:[%s836_s3 + $0x108] sm:$0xff] }
  0x10   :  { %431 = vmatpush.bf16.msra.mxu3 %v647_v16  ;;  %v59_v52 = vmax.f32 %v54_v44, 0.0  ;;  %v61_v54 = vmax.f32 %v56_v46, 0.0  ;;  %v62_v57 = vmax.f32 %v57_v49, 0.0  ;;  %v60_v60 = vmax.f32 %v55_v51, 0.0  ;;  %v655_v3 = vld [vmem:[%s836_s3 + $0x120] sm:$0xff] }
  0x11   :  { %405 = vmatpush.bf16.msra.mxu1 %v631_v17  ;;  %v41_v8 = vmul.f32 %v31_v6, %v24_v5  ;;  %v651_v14 = vld [vmem:[%s836_s3 + $0x100] sm:$0xff] }
  0x12   :  { %393 = vmatpush.bf16.msra.mxu0 %v622_v21  ;;  %v64_v61 = vpack.c.bf16 %v59_v52, %v59_v52  ;;  %v66_v62 = vpack.c.bf16 %v61_v54, %v61_v54  ;;  %v67_v0 = vpack.c.bf16 %v62_v57, %v62_v57  ;;  %v65_v1 = vpack.c.bf16 %v60_v60, %v60_v60 }
  0x13   :  { %419 = vmatpush.bf16.msra.mxu2 %v638_v25  ;;  %v58_v11 = vadd.f32 %v48_v9, %v41_v8 }
  0x14   :  { %432 = vmatpush.bf16.msra.mxu3 %v646_v26 }
  0x15   :  { %406 = vmatpush.bf16.msra.mxu1 %v630_v29  ;;  %v63_v13 = vmax.f32 %v58_v11, 0.0 }
  0x16   :  { %394 = vmatpush.bf16.msra.mxu0 %v621_v34 }
  0x17   :  { %420 = vmatpush.bf16.msra.mxu2 %v637_v37  ;;  %v68_v15 = vpack.c.bf16 %v63_v13, %v63_v13 }
  0x18   :  { %433 = vmatpush.bf16.msra.mxu3 %v645_v38 }
  0x19   :  { %407 = vmatpush.bf16.msra.mxu1 %v629_v41 }
  0x1a   :  { %395 = vmatpush.bf16.msra.mxu0 %v620_v45 }
  0x1b   :  { %421 = vmatpush.bf16.msra.mxu2 %v636_v47 }
  0x1c   :  { %434 = vmatpush.bf16.msra.mxu3 %v644_v48 }
  0x1d   :  { %408 = vmatpush.bf16.msra.mxu1 %v628_v50 }
  0x1e   :  { %396 = vmatpush.bf16.msra.mxu0 %v619_v53 }
  0x1f   :  { %422 = vmatpush.bf16.msra.mxu2 %v635_v56 }
  0x20   :  { %435 = vmatpush.bf16.msra.mxu3 %v643_v58 }
  0x21   :  { %409 = vmatpush.bf16.msra.mxu1 %v627_v59  ;;  %397 = vmatmul.bf16.vlgmr.msra.gmra.mxu0 %v64_v61 }
  0x22   :  { %441 = vmatpush.bf16.msrb.mxu0 %v658_v55  ;;  %423 = vmatmul.bf16.vlgmr.msra.gmra.mxu2 %v66_v62 }
  0x23   :  { %436 = vmatmul.bf16.vlgmr.msra.gmra.mxu3 %v67_v0 }
  0x24   :  { %410 = vmatmul.bf16.vlgmr.msra.gmra.mxu1 %v65_v1 }
  0x26   :  { %442 = vmatpush.bf16.msrb.mxu0 %v657_v63 }
  0x2a   :  { %443 = vmatpush.bf16.msrb.mxu0 %v656_v2 }
  0x2e   :  { %444 = vmatpush.bf16.msrb.mxu0 %v655_v3 }
  0x32   :  { %445 = vmatpush.bf16.msrb.mxu0 %v654_v7 }
  0x36   :  { %446 = vmatpush.bf16.msrb.mxu0 %v653_v10 }
  0x3a   :  { %447 = vmatpush.bf16.msrb.mxu0 %v652_v12 }
  0x3e   :  { %448 = vmatpush.bf16.msrb.mxu0 %v651_v14 }
  0x41   :  { %449 = vmatmul.bf16.vlgmr.msrb.gmra.mxu0 %v68_v15 }
  0x9e   :  { %v398_v16 = vpop.f32.mrf.mxu0 }
  0xa1   :  { %v411_v17 = vpop.f32.mrf.mxu1 }
  0xa2   :  { %v412_v24 = vadd.f32 %v411_v17, %v398_v16 }
  0xa5   :  { %v424_v18 = vpop.f32.mrf.mxu2 }
  0xa6   :  { %v400_v19 = vpop.f32.mrf.mxu0  ;;  %v437_v20 = vpop.f32.mrf.mxu3  ;;  %v425_v25 = vadd.f32 %v424_v18, %v412_v24 }
  0xa8   :  { %v438_v26 = vadd.f32 %v437_v20, %v425_v25 }
  0xa9   :  { %v413_v21 = vpop.f32.mrf.mxu1 }
  0xad   :  { %v426_v22 = vpop.f32.mrf.mxu2 }
  0xae   :  { %v439_v23 = vpop.f32.mrf.mxu3 }
  0xbe   :  { %v450_v27 = vpop.f32.mrf.mxu0 }
  0xbf   :  { %v451_v28 = vadd.f32 %v450_v27, %v438_v26 }
  0xc1   :  { %454 = vst [vmem:[%s840_s4] sm:$0xff] %v451_v28 }
  0xc6   :  { %v452_v29 = vpop.f32.mrf.mxu0 }

// kernel: tile.53
= control target key start
LH: loop header
LB: loop body
LE: loop exit
PB: predicated region body
PF: predicated region fallthrough
CT: control target
= control target key end

     0   :  { %s28_s0 = inlined_call_operand.vmem [shape: f32[64], index: 0, kind: input, shape index: {}]   ;;  %s29_s1 = inlined_call_operand.vmem [shape: f32[12,64], index: 1, kind: output, shape index: {}]  }
   0x1   :  { %v4_v0 = vld [vmem:[%s28_s0] ss:$0 sm:$0xff] }
   0x2   :  { %5 = vst [vmem:[%s29_s1] sm:$0xff] %v4_v0 }
   0x3   :  { %8 = vst [vmem:[%s29_s1 + $0x8] sm:$0xff] %v4_v0 }

// kernel: tile.54
= control target key start
LH: loop header
LB: loop body
LE: loop exit
PB: predicated region body
PF: predicated region fallthrough
CT: control target
= control target key end

     0   :  { %vm3_vm0 = vcmask 523264   ;;  %s56_s8 = smov 64   ;;  %vm10_vm1 = vcmask 1048064   ;;  %s91_s0 = inlined_call_operand.vmem [shape: f32[12,64], index: 0, kind: input, shape index: {}]   ;;  %s92_s1 = inlined_call_operand.vmem [shape: f32[1,768], index: 1, kind: output, shape index: {}]  }
   0x1   :  { %v49_v0 = vld [vmem:[%s91_s0 + $0x1] ss:$2 sm:$0x3f]   ;;  %v2_v1 = vld [vmem:[%s91_s0] ss:$2 sm:$0x3f]  }
   0x2   :  { %8 = vrot.lane.b32.xlu0 %v49_v0, %s56_s8  ;;  %4 = vst.msk [vmem:[#allocation0] ss:$8 sm:$0xf] %vm3_vm0, %v2_v1  }
   0x3   :  { %5 = vst.msk [vmem:[#allocation0] ss:$8 sm:$0x30] %vm3_vm0, %v2_v1  }
  0x74   :  { %v9_v2 = vpop.permute.xlu0 %8  }
  0x75   :  { %11 = vst.msk [vmem:[#allocation0] ss:$8 sm:$0xf] %vm10_vm1, %v9_v2  }
  0x76   :  { %12 = vst.msk [vmem:[#allocation0] ss:$8 sm:$0x30] %vm10_vm1, %v9_v2  }
  0x7c   :  { %v15_v3 = vld [vmem:[#allocation0] sm:$0x1]  ;;  %v20_v4 = vld [vmem:[#allocation0 + $0x8] sm:$0x1]  ;;  %v26_v5 = vld [vmem:[#allocation0 + $0x10] sm:$0x1] }
  0x7d   :  { %18 = vst [vmem:[%s92_s1] sm:$0x1] %v15_v3  ;;  %v32_v6 = vld [vmem:[#allocation0 + $0x18] sm:$0x1]  ;;  %v38_v7 = vld [vmem:[#allocation0 + $0x20] sm:$0x1] }
  0x7e   :  { %50 = vst [vmem:[%s92_s1 + $0x1] sm:$0x1] %v20_v4  ;;  %v44_v8 = vld [vmem:[#allocation0 + $0x28] sm:$0x1] }
  0x7f   :  { %51 = vst [vmem:[%s92_s1 + $0x2] sm:$0x1] %v26_v5 }
  0x80   :  { %52 = vst [vmem:[%s92_s1 + $0x3] sm:$0x1] %v32_v6 }
  0x81   :  { %53 = vst [vmem:[%s92_s1 + $0x4] sm:$0x1] %v38_v7 }
  0x82   :  { %54 = vst [vmem:[%s92_s1 + $0x5] sm:$0x1] %v44_v8 }

// kernel: encoder_forward.10
= control target key start
LH: loop header
LB: loop body
LE: loop exit
PB: predicated region body
PF: predicated region fallthrough
CT: control target
= control target key end

     0   :  { %s1135_s15 = smov 0   ;;  %s1396_s0 = inlined_call_operand.vmem [shape: bf16[2,42,32], index: 0, kind: input, shape index: {}]   ;;  %s1397_s1 = inlined_call_operand.vmem [shape: bf16[288,64], index: 1, kind: input, shape index: {}]   ;;  %s1398_s2 = inlined_call_operand.vmem [shape: bf16[2,24,64], index: 2, kind: output, shape index: {0}]   ;;  %s1399_s3 = inlined_call_operand.vmem [shape: f32[2,1,64], index: 3, kind: output, shape index: {1}]   ;;  %s1400_s4 = inlined_call_operand.vmem [shape: f32[2,1,64], index: 4, kind: output, shape index: {2}]  }
   0x1 LB: > { %s958_s16 = sadd.s32 4294967295, %s1103_s15   ;;  %p962_p0 = scmp.ge.s32.totalorder %s1103_s15, 1  ;;  %s1103_s15 = sphi %s1135_s15, %s15_s15  }
   0x2   : > { %p167_p1 = scmp.lt.s32.totalorder %s1103_s15, 3 }
   0x4   : > { %p168_p2 = pnand %p962_p0, %p167_p1 }
   0x5   : > { %p199_p3 = scmp.lt.s32.totalorder (!%p168_p2), %s958_s16, 1  ;;  %s1105_s21 = smov (!%p168_p2), 32  }
   0x6   : > { %171 = sbr.rel (%p168_p2) target bundleno = 464 (0x1d0), region = 28  ;;  %s1106_s22 = smov (!%p168_p2), 64  }
   0x7   : > { %s1107_s23 = smov (!%p168_p2), 96  }
   0xb   : > { %s1414_s16 = smov (!%p199_p3, %s958_s16), 1  ;;  %vm415_vm0 = vcmask 1041408   ;;  %vm416_vm1 = vcmask 1045508   ;;  %vm227_vm3 = vsmask.f32 3328  ;;  %vm285_vm5 = vcmask 1042432  }
   0xc   : > { %s1082_s17 = smul.u32 24, %s1414_s16  ;;  %vm1151_vm2 = vmor %vm415_vm0, %vm416_vm1  ;;  %vm228_vm4 = vsmask.f32 7440  ;;  %vm286_vm6 = vcmask 1046532   ;;  %vm219_vm9 = vcmask 257024   ;;  %vm319_vm11 = vcmask 1040384   ;;  %s211_s18 = scalar_lea.vmem %s1399_s3, %s1414_s16 }
   0xd   : > { %vm1175_vm7 = vmor %vm227_vm3, %vm228_vm4  ;;  %vm444_vm10 = vsmask.f32 1280  ;;  %vm320_vm12 = vcmask 1044484   ;;  %vm445_vm14 = vsmask.f32 5392  ;;  %vm696_vm3 = vcmask 261120  }
   0xe   : > { %s1149_s20 = scalar_lea.vmem %s1396_s0, %s1082_s17  ;;  %vm1185_vm8 = vmor %vm285_vm5, %vm286_vm6  ;;  %vm349_vm0 = vsmask.f32 256  ;;  %vm350_vm1 = vsmask.f32 4368  ;;  %vm273_vm4 = vcmask 519424   ;;  %vm307_vm5 = vcmask 781824  }
   0xf   : > { %v389_v1 = vld [vmem:[%s1149_s20 + $0x4] sm:$0xf]  ;;  %v408_v3 = vld [vmem:[%s1149_s20 + $0x8] sm:$0xf]  ;;  %v223_v6 = vld [vmem:[%s1149_s20] sm:$0xf] }
  0x10   : > { %v407_v2 = vld [vmem:[%s1149_s20 + $0x4] sm:$0xc]  ;;  %395 = vrot.lane.b32.xlu1 %v389_v1, %s1105_s21  ;;  %v420_v5 = vrot.slane %v408_v3, 6  ;;  %v231_v8 = vshrl.u32 %v223_v6, 16  ;;  %v234_v9 = vshll.u32 %v223_v6, 16  ;;  %vm1210_vm13 = vmor %vm319_vm11, %vm320_vm12  ;;  %vm341_vm6 = vcmask 1044224  }
  0x11   : > { %v968_v4 = vrot.slane %v407_v2, 10  ;;  %v224_v7 = vld [vmem:[%s1149_s20 + $0x4] sm:$0xf]  ;;  %v1164_v13 = vld [vmem:[%s1149_s20 + $0xc] sm:$0xf]  ;;  %vm1235_vm15 = vmor %vm444_vm10, %vm445_vm14  ;;  %vm803_vm14 = vcmask 195584  }
  0x12   : > { %v240_v11 = vshll.u32 %v224_v7, 16  ;;  %v244_v12 = vshrl.u32 %v224_v7, 16  ;;  %v233_v14 = vrot.slane %v231_v8, 4  ;;  %v236_v15 = vrot.slane %v234_v9, 5  ;;  %v1168_v16 = vld [vmem:[%s1149_s20 + $0x8] sm:$0xf] }
  0x13   : > { %v421_v10 = vsel %vm1151_vm2, %v968_v4, %v420_v5  ;;  %v440_v17 = vld [vmem:[%s1149_s20 + $0x4] sm:$0xc]  ;;  %v390_v18 = vld [vmem:[%s1149_s20 + $0x8] sm:$0xf]  ;;  %v277_v26 = vld [vmem:[%s1149_s20] sm:$0xe] }
  0x14   : > { %428 = vrot.lane.b32.xlu0 %v421_v10, %s1106_s22  ;;  %v242_v19 = vrot.slane %v240_v11, 5  ;;  %v246_v20 = vrot.slane %v244_v12, 4  ;;  %v441_v21 = vld [vmem:[%s1149_s20 + $0x8] sm:$0xf]  ;;  %v237_v23 = vor.u32 %v236_v15, %v233_v14  ;;  %v448_v24 = vshrl.u32 %v440_v17, 16 }
  0x15   : > { %v451_v25 = vshll.u32 %v440_v17, 16  ;;  %v278_v27 = vld [vmem:[%s1149_s20 + $0x4] sm:$0xf]  ;;  %v422_v28 = vrot.slane %v420_v5, 4  ;;  %v423_v29 = vrot.slane %v1164_v13, 6  ;;  %v250_v30 = vshll.u32 %v1168_v16, 16 }
  0x16   : > { %v238_v32 = vrot.slane %v237_v23, 4  ;;  %v247_v33 = vor.u32 %v246_v20, %v242_v19  ;;  %v965_v34 = vrot.slane %v277_v26, 9  ;;  %v290_v35 = vrot.slane %v278_v27, 5  ;;  %v497_v38 = vld [vmem:[%s1149_s20 + $0x4] sm:$0x8] }
  0x17   : > { %v457_v36 = vshrl.u32 %v441_v21, 16  ;;  %v460_v37 = vshll.u32 %v441_v21, 16  ;;  %v450_v40 = vrot.slane %v448_v24, 6  ;;  %v453_v41 = vrot.slane %v451_v25, 7  ;;  %v498_v43 = vld [vmem:[%s1149_s20 + $0x8] sm:$0xf] }
  0x18   : > { %397 = vrot.lane.b32.xlu1 %v390_v18, %s1105_s21  ;;  %v243_v39 = vsel %vm1175_vm7, %v238_v32, %v242_v19  ;;  %v291_v42 = vsel %vm1185_vm8, %v965_v34, %v290_v35  ;;  %v499_v44 = vld [vmem:[%s1149_s20 + $0xc] sm:$0xf]  ;;  %v424_v45 = vsel %vm1151_vm2, %v422_v28, %v423_v29  ;;  %v252_v46 = vrot.slane %v250_v30, 5  ;;  %v500_v47 = vld [vmem:[%s1149_s20 + $0x10] sm:$0x7] }
  0x19   : > { %298 = vrot.lane.b32.xlu2 %v291_v42, %s1106_s22  ;;  %v969_v48 = vrot.slane %v497_v38, 11  ;;  %v1204_v49 = vld [vmem:[%s1149_s20 + $0x8] sm:$0xf]  ;;  %v248_v50 = vrot.slane %v247_v33, 4  ;;  %v507_v51 = vrot.slane %v498_v43, 7  ;;  %v510_v52 = vrot.slane %v499_v44, 7 }
  0x1a   : > { %v513_v53 = vrot.slane %v500_v47, 7  ;;  %v459_v54 = vrot.slane %v457_v36, 6  ;;  %v462_v55 = vrot.slane %v460_v37, 7  ;;  %v312_v56 = vld [vmem:[%s1149_s20 + $0x4] sm:$0xf]  ;;  %v292_v58 = vrot.slane %v290_v35, 4 }
  0x1b   : > { %v293_v59 = vrot.slane %v1204_v49, 5  ;;  %v454_v60 = vor.u32 %v453_v41, %v450_v40  ;;  %v508_v61 = vsel %vm1210_vm13, %v969_v48, %v507_v51  ;;  %v509_v62 = vrot.slane %v507_v51, 4  ;;  %v311_v7 = vld [vmem:[%s1149_s20] sm:$0x8]  ;;  %v442_v8 = vld [vmem:[%s1149_s20 + $0xc] sm:$0xf] }
  0x1c   : > { %264 = vrot.lane.b32.xlu0 %v243_v39, %s1105_s21  ;;  %v512_v63 = vrot.slane %v510_v52, 4  ;;  %v254_v1 = vshrl.u32 %v1168_v16, 16  ;;  %518 = vst.msk [vmem:[#allocation2 + $0x8] sm:$0xf] %vm219_vm9, %v508_v61  ;;  %v324_v2 = vrot.slane %v312_v56, 7  ;;  %v253_v6 = vsel %vm1175_vm7, %v248_v50, %v252_v46 }
  0x1d   : > { %v511_v3 = vsel %vm1210_vm13, %v509_v62, %v510_v52  ;;  %v294_v5 = vsel %vm1185_vm8, %v292_v58, %v293_v59  ;;  %v455_v9 = vrot.slane %v454_v60, 4  ;;  %v463_v10 = vor.u32 %v462_v55, %v459_v54  ;;  %v313_v11 = vld [vmem:[%s1149_s20 + $0x8] sm:$0xf]  ;;  %v226_v21 = vld [vmem:[%s1149_s20 + $0xc] sm:$0x1] }
  0x1e   : > { %v514_v4 = vsel %vm1210_vm13, %v512_v63, %v513_v53  ;;  %519 = vst.msk [vmem:[#allocation2 + $0x14] sm:$0xf] %vm219_vm9, %v511_v3  ;;  %v966_v14 = vrot.slane %v311_v7, 11  ;;  %v467_v15 = vshrl.u32 %v442_v8, 16  ;;  %v470_v16 = vshll.u32 %v442_v8, 16  ;;  %v1079_v63 = vld [vmem:[%s1397_s1 + $0x78] sm:$0xff] }
  0x1f   : > { %520 = vst.msk [vmem:[#allocation2 + $0x20] sm:$0xf] %vm219_vm9, %v514_v4  ;;  %v326_v17 = vrot.slane %v324_v2, 4  ;;  %v327_v18 = vrot.slane %v313_v11, 7  ;;  %v256_v19 = vrot.slane %v254_v1, 4  ;;  %v464_v20 = vsel %vm1235_vm15, %v455_v9, %v463_v10  ;;  %721 = vmatpush.bf16.msra.mxu1 %v1079_v63  ;;  %v1071_v1 = vld [vmem:[%s1397_s1 + $0x38] sm:$0xff] }
  0x20   : > { %430 = vrot.lane.b32.xlu1 %v424_v45, %s1106_s22  ;;  %v325_v23 = vsel %vm1210_vm13, %v966_v14, %v324_v2  ;;  %v469_v24 = vrot.slane %v467_v15, 6  ;;  %v472_v25 = vrot.slane %v470_v16, 7  ;;  %v260_v28 = vshll.u32 %v226_v21, 16  ;;  %v391_v35 = vld [vmem:[%s1149_s20 + $0xc] sm:$0xf]  ;;  %v1078_v2 = vld [vmem:[%s1397_s1 + $0x70] sm:$0xff]  ;;  %703 = vmatpush.bf16.msra.mxu0 %v1071_v1 }
  0x21   : > { %300 = vrot.lane.b32.xlu2 %v294_v5, %s1106_s22  ;;  %v328_v26 = vsel %vm1210_vm13, %v326_v17, %v327_v18  ;;  %v257_v27 = vor.u32 %v256_v19, %v252_v46  ;;  %v465_v30 = vrot.slane %v463_v10, 4  ;;  %v314_v36 = vld [vmem:[%s1149_s20 + $0xc] sm:$0x7]  ;;  %v443_v40 = vld [vmem:[%s1149_s20 + $0x10] sm:$0x7]  ;;  %v329_v42 = vrot.slane %v327_v18, 4 }
  0x22   : > { %v473_v32 = vor.u32 %v472_v25, %v469_v24  ;;  %v262_v34 = vrot.slane %v260_v28, 5  ;;  %v280_v39 = vld [vmem:[%s1149_s20 + $0xc] sm:$0x1]  ;;  %v410_v41 = vld [vmem:[%s1149_s20 + $0x10] sm:$0x3]  ;;  %v330_v43 = vrot.slane %v314_v36, 7 }
  0x23   : > { %v258_v33 = vrot.slane %v257_v27, 4  ;;  %v295_v44 = vrot.slane %v293_v59, 4  ;;  %v296_v45 = vrot.slane %v280_v39, 5  ;;  %v477_v46 = vshrl.u32 %v443_v40, 16  ;;  %v346_v31 = vld [vmem:[%s1149_s20 + $0x4] sm:$0xf]  ;;  %722 = vmatpush.bf16.msra.mxu1 %v1078_v2 }
  0x24   : > { %266 = vrot.lane.b32.xlu0 %v253_v6, %s1105_s21  ;;  %v474_v37 = vsel %vm1235_vm15, %v465_v30, %v473_v32  ;;  %v480_v47 = vshll.u32 %v443_v40, 16  ;;  %v425_v22 = vrot.slane %v423_v29, 4  ;;  %v426_v48 = vrot.slane %v410_v41, 6  ;;  %v345_v0 = vld [vmem:[%s1149_s20] sm:$0x8]  ;;  %v1070_v9 = vld [vmem:[%s1397_s1 + $0x30] sm:$0xff] }
  0x25   : > { %v263_v38 = vsel %vm1175_vm7, %v258_v33, %v262_v34  ;;  %v331_v49 = vsel %vm1210_vm13, %v329_v42, %v330_v43  ;;  %v297_v50 = vsel %vm1185_vm8, %v295_v44, %v296_v45  ;;  %v479_v51 = vrot.slane %v477_v46, 6  ;;  %v347_v3 = vld [vmem:[%s1149_s20 + $0x8] sm:$0xf]  ;;  %v216_v10 = vld [vmem:[%s1149_s20] sm:$0xf]  ;;  %704 = vmatpush.bf16.msra.mxu0 %v1070_v9  ;;  %v1075_v19 = vld [vmem:[%s1397_s1 + $0x58] sm:$0xff] }
  0x26   : > { %v482_v52 = vrot.slane %v480_v47, 7  ;;  %v427_v53 = vsel %vm1151_vm2, %v425_v22, %v426_v48  ;;  %v475_v13 = vrot.slane %v473_v32, 4  ;;  %v358_v55 = vshrl.u32 %v346_v31, 16  ;;  %vm1279_vm2 = vmor %vm349_vm0, %vm350_vm1  ;;  %v1077_v11 = vld [vmem:[%s1397_s1 + $0x68] sm:$0xff]  ;;  %220 = vst.msk [vmem:[#allocation2] sm:$0xf] %vm219_vm9, %v216_v10 }
  0x27   : > { %v353_v56 = vshrl.u32 %v345_v0, 16  ;;  %v361_v58 = vshll.u32 %v346_v31, 16  ;;  %v367_v4 = vshrl.u32 %v347_v3, 16  ;;  %v370_v6 = vshll.u32 %v347_v3, 16  ;;  %723 = vmatpush.bf16.msra.mxu1 %v1077_v11  ;;  %v1069_v14 = vld [vmem:[%s1397_s1 + $0x28] sm:$0xff]  ;;  %v1076_v15 = vld [vmem:[%s1397_s1 + $0x60] sm:$0xff] }
  0x28   : > { %485 = vrot.lane.b32.xlu1 %v464_v20, %s1107_s23  ;;  %v483_v29 = vor.u32 %v482_v52, %v479_v51  ;;  %v360_v57 = vrot.slane %v358_v55, 7  ;;  %v1068_v16 = vld [vmem:[%s1397_s1 + $0x20] sm:$0xff]  ;;  %v1081_v20 = vld [vmem:[%s1397_s1 + $0x88] sm:$0xff]  ;;  %v1067_v21 = vld [vmem:[%s1397_s1 + $0x18] sm:$0xff] }
  0x29   : > { %332 = vrot.lane.b32.xlu2 %v325_v23, %s1107_s23  ;;  %v967_v60 = vrot.slane %v353_v56, 11  ;;  %v1296_v5 = vrot.slane %v367_v4, 7  ;;  %705 = vmatpush.bf16.msra.mxu0 %v1069_v14  ;;  %v217_v18 = vld [vmem:[%s1149_s20 + $0x4] sm:$0xf]  ;;  %v1074_v23 = vld [vmem:[%s1397_s1 + $0x50] sm:$0xff]  ;;  %v1065_v33 = vld [vmem:[%s1397_s1 + $0x8] sm:$0xff] }
  0x2a   : > { %v484_v54 = vsel %vm1235_vm15, %v475_v13, %v483_v29  ;;  %v363_v61 = vor.u32 %v361_v58, %v360_v57  ;;  %v365_v7 = vrot.slane %v360_v57, 4  ;;  %221 = vst.msk [vmem:[#allocation2 + $0xc] sm:$0xf] %vm219_vm9, %v217_v18  ;;  %745 = vmatpush.bf16.msra.mxu2 %v1081_v20  ;;  %v1080_v24 = vld [vmem:[%s1397_s1 + $0x80] sm:$0xff]  ;;  %v1066_v25 = vld [vmem:[%s1397_s1 + $0x10] sm:$0xff]  ;;  %vm827_vm15 = vcmask 516096  }
  0x2b   : > { %v372_v8 = vor.u32 %v370_v6, %v1296_v5  ;;  %724 = vmatpush.bf16.msra.mxu1 %v1076_v15  ;;  %v980_v27 = vld [vmem:[#allocation2 + $0x8] sm:$0xf]  ;;  %v1063_v28 = vld [vmem:[#allocation2 + $0x10] sm:$0xf0]  ;;  %v1072_v34 = vld [vmem:[%s1397_s1 + $0x40] sm:$0xff]  ;;  %v374_v41 = vrot.slane %v1296_v5, 4 }
  0x2c   : > { %334 = vrot.lane.b32.xlu0 %v328_v26, %s1107_s23  ;;  %v364_v62 = vsel %vm1279_vm2, %v967_v60, %v363_v61  ;;  %v1073_v26 = vld [vmem:[%s1397_s1 + $0x48] sm:$0xff]  ;;  %v981_v32 = vor.u32 %v1063_v28, %v980_v27  ;;  %v526_v22 = vld [vmem:[#allocation2 + $0x20] sm:$0xf] }
  0x2d   : > { %386 = vst.msk [vmem:[#allocation2 + $0x4] sm:$0xf] %vm219_vm9, %v364_v62  ;;  %v373_v12 = vsel %vm1279_vm2, %v365_v7, %v372_v8  ;;  %706 = vmatpush.bf16.msra.mxu0 %v1068_v16  ;;  %v218_v42 = vld [vmem:[%s1149_s20 + $0x8] sm:$0xf]  ;;  %v577_v48 = vunpack.c.l.b16 %v526_v22  ;;  %v764_v7 = vlaneseq }
  0x2e   : > { %387 = vst.msk [vmem:[#allocation2 + $0x10] sm:$0xf] %vm219_vm9, %v373_v12  ;;  %746 = vmatpush.bf16.msra.mxu2 %v1080_v24 }
  0x2f   : > { %725 = vmatpush.bf16.msra.mxu1 %v1075_v19  ;;  %222 = vst.msk [vmem:[#allocation2 + $0x18] sm:$0xf] %vm219_vm9, %v218_v42  ;;  %v765_v8 = vand.u32 127, %v764_v7 }
  0x30   : > { %399 = vrot.lane.b32.xlu1 %v391_v35, %s1105_s21  ;;  %v348_v35 = vld [vmem:[%s1149_s20 + $0xc] sm:$0xf]  ;;  %s1083_s20 = smul.u32 12, %s1414_s16 }
  0x31   : > { %487 = vrot.lane.b32.xlu2 %v474_v37, %s1107_s23  ;;  %707 = vmatpush.bf16.msra.mxu0 %v1067_v21  ;;  %v376_v36 = vshrl.u32 %v348_v35, 16  ;;  %v1064_v37 = vld [vmem:[%s1397_s1] sm:$0xff]  ;;  %v769_v9 = vand.u32 65535, %v765_v8  ;;  %v770_v10 = vshrl.u32 %v765_v8, 16  ;;  %v1108_v21 = vmov 0  }
  0x32   : > { %1054 = vmatmul.msk.bf16.vlgmr.msra.gmra.mxu2 %vm696_vm3, %v981_v32  ;;  %s208_s13 = scalar_lea.vmem %s1398_s2, %s1083_s20 }
  0x33   : > { %726 = vmatpush.bf16.msra.mxu1 %v1074_v23  ;;  %v378_v40 = vrot.slane %v376_v36, 7  ;;  %v773_v11 = vmul.u32 43690, %v769_v9  ;;  %v772_v14 = vmul.u32 43691, %v769_v9  ;;  %v774_v15 = vmul.u32 43691, %v770_v10 }
  0x34   : > { %268 = vrot.lane.b32.xlu0 %v263_v38, %s1105_s21  ;;  %v379_v38 = vshll.u32 %v348_v35, 16  ;;  %v775_v20 = vmul.u32 43690, %v770_v10 }
  0x35   : > { %708 = vmatpush.bf16.msra.mxu0 %v1066_v25  ;;  %v776_v16 = vshll.u32 %v773_v11, 16  ;;  %v777_v27 = vshrl.u32 %v773_v11, 16 }
  0x36   : > { %v381_v43 = vor.u32 %v379_v38, %v378_v40 }
  0x37   : > { %727 = vmatpush.bf16.msra.mxu1 %v1073_v26  ;;  %vm780_vm7 = vc.u32 %v772_v14, %v776_v16  ;;  %v782_v18 = vadd.s32 %v776_v16, %v772_v14 }
  0x38   : > { %336 = vrot.lane.b32.xlu1 %v331_v49, %s1107_s23  ;;  %v382_v45 = vsel %vm1279_vm2, %v374_v41, %v381_v43  ;;  %v781_v23 = vsel %vm780_vm7, 1, %v1108_v21 }
  0x39   : > { %302 = vrot.lane.b32.xlu2 %v297_v50, %s1106_s22  ;;  %709 = vmatpush.bf16.msra.mxu0 %v1065_v33  ;;  %388 = vst.msk [vmem:[#allocation2 + $0x1c] sm:$0xf] %vm219_vm9, %v382_v45  ;;  %v583_v50 = vpack.c.b16 %v577_v48, %v577_v48  ;;  %v783_v24 = vadd.s32 %v781_v23, %v775_v20  ;;  %vm760_vm9 = vcmask 519168  }
  0x3b   : > { %728 = vmatpush.bf16.msra.mxu1 %v1072_v34 }
  0x3c   : > { %432 = vrot.lane.b32.xlu0 %v427_v53, %s1106_s22  ;;  %s214_s22 = scalar_lea.vmem %s1400_s4, %s1414_s16 }
  0x3d   : > { %710 = vmatpush.bf16.msra.mxu0 %v1064_v37 }
  0x41   : > { %489 = vrot.lane.b32.xlu2 %v484_v54, %s1107_s23 }
  0x42   : > { %1055 = vmatmul.msk.bf16.gmra.mxu2 %vm696_vm3, %v583_v50 }
  0x73   : > { %v299_v17 = vpop.permute.xlu2 %298 }
  0x7b   : > { %v301_v30 = vpop.permute.xlu2 %300 }
  0x82   : > { %v396_v39 = vpop.permute.xlu1 %395 }
  0x83   : > { %404 = vst.msk [vmem:[#allocation2 + $0x4] sm:$0xf] %vm273_vm4, %v396_v39  ;;  %v333_v46 = vpop.permute.xlu2 %332 }
  0x86   : > { %v429_v44 = vpop.permute.xlu0 %428 }
  0x87   : > { %437 = vst.msk [vmem:[#allocation2 + $0x4] sm:$0xf] %vm307_vm5, %v429_v44 }
  0x8a   : > { %v398_v47 = vpop.permute.xlu1 %397 }
  0x8b   : > { %405 = vst.msk [vmem:[#allocation2 + $0x10] sm:$0xf] %vm273_vm4, %v398_v47  ;;  %v488_v51 = vpop.permute.xlu2 %487 }
  0x8e   : > { %v265_v49 = vpop.permute.xlu0 %264 }
  0x8f   : > { %274 = vst.msk [vmem:[#allocation2] sm:$0xf] %vm273_vm4, %v265_v49 }
  0x90   : > { %308 = vst.msk [vmem:[#allocation2] sm:$0xf] %vm307_vm5, %v299_v17  ;;  %v778_v17 = vshll.u32 %v774_v15, 16 }
  0x91   : > { %342 = vst.msk [vmem:[#allocation2] sm:$0xf] %vm341_vm6, %v333_v46 }
  0x92   : > { %v431_v52 = vpop.permute.xlu1 %430  ;;  %vm784_vm8 = vc.u32 %v782_v18, %v778_v17 }
  0x93   : > { %438 = vst.msk [vmem:[#allocation2 + $0x10] sm:$0xf] %vm307_vm5, %v431_v52  ;;  %v303_v0 = vpop.permute.xlu2 %302  ;;  %v785_v25 = vsel %vm784_vm8, 1, %v1108_v21 }
  0x94   : > { %495 = vst.msk [vmem:[#allocation2 + $0x10] sm:$0xf] %vm341_vm6, %v488_v51  ;;  %v787_v28 = vadd.s32 %v785_v25, %v783_v24 }
  0x96   : > { %v267_v53 = vpop.permute.xlu0 %266  ;;  %v788_v32 = vadd.s32 %v787_v28, %v777_v27 }
  0x97   : > { %275 = vst.msk [vmem:[#allocation2 + $0xc] sm:$0xf] %vm273_vm4, %v267_v53  ;;  %v1109_v53 = vmov 0.0  }
  0x98   : > { %309 = vst.msk [vmem:[#allocation2 + $0xc] sm:$0xf] %vm307_vm5, %v301_v30  ;;  %v972_v58 = vld [vmem:[#allocation2] sm:$0xf]  ;;  %v779_v30 = vshrl.u32 %v774_v15, 16 }
  0x9a   : > { %v486_v13 = vpop.permute.xlu1 %485  ;;  %v789_v34 = vadd.s32 %v788_v32, %v779_v30 }
  0x9b   : > { %494 = vst.msk [vmem:[#allocation2 + $0x4] sm:$0xf] %vm341_vm6, %v486_v13  ;;  %v974_v54 = vld [vmem:[#allocation2 + $0xc] sm:$0xf0]  ;;  %v490_v62 = vpop.permute.xlu2 %489 }
  0x9c   : > { %v790_v37 = vshrl.u32 %v789_v34, 2 }
  0x9e   : > { %v335_v29 = vpop.permute.xlu0 %334  ;;  %v791_v40 = vmul.u32 6, %v790_v37 }
  0x9f   : > { %343 = vst.msk [vmem:[#allocation2 + $0xc] sm:$0xf] %vm341_vm6, %v335_v29 }
  0xa0   : > { %v792_v44 = vsub.s32 %v765_v8, %v791_v40 }
  0xa2   : > { %v1061_v31 = vld [vmem:[#allocation2 + $0x4] sm:$0xf]  ;;  %v400_v55 = vpop.permute.xlu1 %399  ;;  %vm795_vm10 = vcmp.ne.s32.totalorder %v792_v44, 0  ;;  %vm796_vm11 = vcmp.lt.s32.totalorder %v792_v44, 0  ;;  %v798_v47 = vadd.s32 6, %v792_v44 }
  0xa3   : > { %v977_v56 = vor.u32 %v1061_v31, %v974_v54  ;;  %406 = vst.msk [vmem:[#allocation2 + $0x1c] sm:$0xf] %vm273_vm4, %v400_v55  ;;  %vm797_vm12 = vmand %vm796_vm11, %vm795_vm10 }
  0xa4   : > { %v799_v50 = vsel %vm797_vm12, %v798_v47, %v792_v44 }
  0xa5   : > { %729 = vmatmul.bf16.vlgmr.msra.gmra.mxu1 %v977_v56  ;;  %vm800_vm13 = vcmp.lt.s32.totalorder %v799_v50, 4 }
  0xa6   : > { %v269_v57 = vpop.permute.xlu0 %268  ;;  %v1062_v59 = vld [vmem:[#allocation2 + $0x8] sm:$0xf0]  ;;  %v1056_v13 = vsel %vm800_vm13, 1.0, %v1109_v53 }
  0xa7   : > { %276 = vst.msk [vmem:[#allocation2 + $0x18] sm:$0xf] %vm273_vm4, %v269_v57  ;;  %v973_v60 = vor.u32 %v1062_v59, %v972_v58 }
  0xa8   : > { %310 = vst.msk [vmem:[#allocation2 + $0x18] sm:$0xf] %vm307_vm5, %v303_v0 }
  0xa9   : > { %711 = vmatmul.bf16.vlgmr.msra.gmra.mxu0 %v973_v60 }
  0xaa   : > { %v337_v61 = vpop.permute.xlu1 %336 }
  0xab   : > { %344 = vst.msk [vmem:[#allocation2 + $0x18] sm:$0xf] %vm341_vm6, %v337_v61 }
  0xae   : > { %v433_v63 = vpop.permute.xlu0 %432 }
  0xaf   : > { %439 = vst.msk [vmem:[#allocation2 + $0x1c] sm:$0xf] %vm307_vm5, %v433_v63 }
  0xb0   : > { %496 = vst.msk [vmem:[#allocation2 + $0x1c] sm:$0xf] %vm341_vm6, %v490_v62 }
  0xb5   : > { %v748_v6 = vpop.f32.mrf.mxu2 }
  0xb7   : > { %v525_v1 = vld [vmem:[#allocation2 + $0x18] sm:$0xff] }
  0xb8   : > { %v575_v2 = vunpack.c.l.b16 %v525_v1  ;;  %v576_v3 = vunpack.c.h.b16 %v525_v1 }
  0xba   : > { %v581_v4 = vpack.c.b16 %v575_v2, %v575_v2  ;;  %v582_v5 = vpack.c.b16 %v576_v3, %v576_v3 }
  0xbc   : > { %716 = vmatmul.bf16.gmra.mxu0 %v581_v4  ;;  %734 = vmatmul.bf16.gmra.mxu1 %v582_v5 }
  0xbd   : > { %v750_v12 = vpop.f32.mrf.mxu2 }
  0xc5   : > { %v753_v19 = vpop.f32.mrf.mxu2 }
  0xcd   : > { %v755_v26 = vpop.f32.mrf.mxu2 }
 0x122   : > { %v730_v33 = vpop.f32.mrf.mxu1 }
 0x126   : > { %v712_v35 = vpop.f32.mrf.mxu0 }
 0x127   : > { %v731_v36 = vadd.f32 %v730_v33, %v712_v35 }
 0x129   : > { %v749_v38 = vadd.f32 %v748_v6, %v731_v36 }
 0x12a   : > { %v732_v41 = vpop.f32.mrf.mxu1 }
 0x12b   : > { %v757_v39 = vpack.c.bf16 %v749_v38, %v749_v38  ;;  %v829_v0 = vmul.f32 %v749_v38, %v749_v38 }
 0x12d   : > { %761 = vst.msk [vmem:[%s208_s13] sm:$0xf] %vm760_vm9, %v757_v39 }
 0x12e   : > { %v714_v42 = vpop.f32.mrf.mxu0 }
 0x12f   : > { %v733_v43 = vadd.f32 %v732_v41, %v714_v42 }
 0x131   : > { %v751_v45 = vadd.f32 %v750_v12, %v733_v43 }
 0x133   : > { %v758_v46 = vpack.c.bf16 %v751_v45, %v751_v45  ;;  %v830_v55 = vmul.f32 %v751_v45, %v751_v45 }
 0x135   : > { %762 = vst.msk [vmem:[%s208_s13 + $0x4] sm:$0xf] %vm760_vm9, %v758_v46 }
 0x139   : > { %v717_v22 = vpop.f32.mrf.mxu0  ;;  %v735_v48 = vpop.f32.mrf.mxu1 }
 0x13a   : > { %v736_v49 = vadd.f32 %v735_v48, %v717_v22 }
 0x13c   : > { %v754_v51 = vadd.f32 %v753_v19, %v736_v49 }
 0x13e   : > { %v759_v52 = vpack.c.bf16 %v754_v51, %v754_v51  ;;  %820 = vmatpush.msra.mxu3 %v754_v51  ;;  %v831_v31 = vmul.f32 %v754_v51, %v754_v51 }
 0x140   : > { %763 = vst.msk [vmem:[%s208_s13 + $0x8] sm:$0xf] %vm760_vm9, %v759_v52  ;;  %821 = vmatpush.msra.mxu3 %v751_v45 }
 0x141   : > { %v719_v29 = vpop.f32.mrf.mxu0  ;;  %v737_v54 = vpop.f32.mrf.mxu1 }
 0x142   : > { %822 = vmatpush.msra.mxu3 %v749_v38 }
 0x143   : > { %1057 = vmatmul.msk.f32.vlgmr.msra.gmra.mxu3 %vm803_vm14, %v1056_v13 }
 0x144   : > { %845 = vmatpush.msrb.mxu3 %v831_v31 }
 0x146   : > { %846 = vmatpush.msrb.mxu3 %v830_v55 }
 0x148   : > { %847 = vmatpush.msrb.mxu3 %v829_v0 }
 0x14b   : > { %1058 = vmatmul.msk.f32.vlgmr.msrb.gmra.mxu3 %vm803_vm14, %v1056_v13 }
 0x1c6   : > { %v824_v56 = vpop.f32.mrf.mxu3 }
 0x1c7   : > { %828 = vst.msk [vmem:[%s211_s18] sm:$0x1] %vm827_vm15, %v824_v56 }
 0x1ce   : > { %v849_v57 = vpop.f32.mrf.mxu3 }
 0x1cf   : > { %852 = vst.msk [vmem:[%s214_s22] sm:$0x1] %vm827_vm15, %v849_v57 }
 0x1d0 PF: > { %s15_s15 = sadd.s32 1, %s1103_s15  }
 0x1d1   : > { %p12_p4 = scmp.ge.s32.totalorder %s15_s15, 4  }
 0x1d3   :  { %14 = sbr.rel (!%p12_p4) target bundleno = 1 (0x1), region = 82 }

// kernel: encoder_forward.11
= control target key start
LH: loop header
LB: loop body
LE: loop exit
PB: predicated region body
PF: predicated region fallthrough
CT: control target
= control target key end

     0   :  { %vm33_vm0 = vcmask 1043456   ;;  %s989_s3 = inlined_call_operand.vmem [shape: bf16[768,128], index: 3, kind: input, shape index: {}]   ;;  %s990_s0 = inlined_call_operand.vmem [shape: bf16[4,768], index: 0, kind: input, shape index: {}]   ;;  %s991_s1 = inlined_call_operand.vmem [shape: f32[1,768], index: 1, kind: input, shape index: {}]   ;;  %s992_s2 = inlined_call_operand.vmem [shape: f32[1,768], index: 2, kind: input, shape index: {}]   ;;  %s993_s4 = inlined_call_operand.vmem [shape: f32[4,128], index: 4, kind: output, shape index: {}]  }
   0x1   :  { %v758_v0 = vld [vmem:[%s989_s3 + $0x38] sm:$0xff]  ;;  %v757_v2 = vld [vmem:[%s989_s3 + $0x30] sm:$0xff]  ;;  %v756_v8 = vld [vmem:[%s989_s3 + $0x28] sm:$0xff] }
   0x2   :  { %v766_v1 = vld [vmem:[%s989_s3 + $0x78] sm:$0xff]  ;;  %476 = vmatpush.bf16.msra.mxu0 %v758_v0  ;;  %v765_v3 = vld [vmem:[%s989_s3 + $0x70] sm:$0xff]  ;;  %v764_v9 = vld [vmem:[%s989_s3 + $0x68] sm:$0xff] }
   0x3   :  { %489 = vmatpush.bf16.msra.mxu1 %v766_v1  ;;  %v774_v4 = vld [vmem:[%s989_s3 + $0xb8] sm:$0xff]  ;;  %v773_v6 = vld [vmem:[%s989_s3 + $0xb0] sm:$0xff]  ;;  %v772_v10 = vld [vmem:[%s989_s3 + $0xa8] sm:$0xff] }
   0x4   :  { %v782_v5 = vld [vmem:[%s989_s3 + $0xf8] sm:$0xff]  ;;  %502 = vmatpush.bf16.msra.mxu2 %v774_v4  ;;  %v781_v7 = vld [vmem:[%s989_s3 + $0xf0] sm:$0xff]  ;;  %v780_v11 = vld [vmem:[%s989_s3 + $0xe8] sm:$0xff] }
   0x5   :  { %515 = vmatpush.bf16.msra.mxu3 %v782_v5  ;;  %v755_v12 = vld [vmem:[%s989_s3 + $0x20] sm:$0xff]  ;;  %v754_v26 = vld [vmem:[%s989_s3 + $0x18] sm:$0xff]  ;;  %v18_v34 = vld [vmem:[%s990_s0 + $0x8] sm:$0xf] }
   0x6   :  { %477 = vmatpush.bf16.msra.mxu0 %v757_v2  ;;  %v763_v13 = vld [vmem:[%s989_s3 + $0x60] sm:$0xff]  ;;  %v762_v27 = vld [vmem:[%s989_s3 + $0x58] sm:$0xff]  ;;  %v21_v39 = vunpack.c.l.bf16 %v18_v34  ;;  %v753_v45 = vld [vmem:[%s989_s3 + $0x10] sm:$0xff] }
   0x7   :  { %490 = vmatpush.bf16.msra.mxu1 %v765_v3  ;;  %v17_v14 = vld [vmem:[%s990_s0] sm:$0xff]  ;;  %v770_v35 = vld [vmem:[%s989_s3 + $0x98] sm:$0xff]  ;;  %v761_v46 = vld [vmem:[%s989_s3 + $0x50] sm:$0xff] }
   0x8   :  { %503 = vmatpush.bf16.msra.mxu2 %v773_v6  ;;  %v22_v15 = vld [vmem:[%s991_s1] sm:$0x3f]  ;;  %v19_v18 = vunpack.c.l.bf16 %v17_v14  ;;  %v20_v29 = vunpack.c.h.bf16 %v17_v14  ;;  %v778_v36 = vld [vmem:[%s989_s3 + $0xd8] sm:$0xff]  ;;  %v769_v53 = vld [vmem:[%s989_s3 + $0x90] sm:$0xff] }
   0x9   :  { %516 = vmatpush.bf16.msra.mxu3 %v781_v7  ;;  %v771_v16 = vld [vmem:[%s989_s3 + $0xa0] sm:$0xff]  ;;  %v24_v19 = vperm.slane %v22_v15, 0  ;;  %v25_v20 = vperm.slane %v22_v15, 1  ;;  %v26_v24 = vperm.slane %v22_v15, 2  ;;  %v27_v25 = vperm.slane %v22_v15, 3  ;;  %v777_v54 = vld [vmem:[%s989_s3 + $0xd0] sm:$0xff] }
   0xa   :  { %478 = vmatpush.bf16.msra.mxu0 %v756_v8  ;;  %v779_v17 = vld [vmem:[%s989_s3 + $0xe0] sm:$0xff]  ;;  %v28_v40 = vperm.slane %v22_v15, 4  ;;  %v29_v44 = vperm.slane %v22_v15, 5  ;;  %v752_v59 = vld [vmem:[%s989_s3 + $0x8] sm:$0xff]  ;;  %v790_v6 = vld [vmem:[%s989_s3 + $0x138] sm:$0xff] }
   0xb   :  { %491 = vmatpush.bf16.msra.mxu1 %v764_v9  ;;  %v43_v21 = vld [vmem:[%s992_s2] sm:$0x3f]  ;;  %v30_v28 = vrot.slane %v25_v20, 4  ;;  %v31_v33 = vrot.slane %v27_v25, 4  ;;  %v760_v60 = vld [vmem:[%s989_s3 + $0x48] sm:$0xff]  ;;  %v798_v7 = vld [vmem:[%s989_s3 + $0x178] sm:$0xff] }
   0xc   :  { %504 = vmatpush.bf16.msra.mxu2 %v772_v10  ;;  %v45_v22 = vperm.slane %v43_v21, 0  ;;  %v46_v23 = vperm.slane %v43_v21, 1  ;;  %v47_v30 = vperm.slane %v43_v21, 2  ;;  %v48_v31 = vperm.slane %v43_v21, 3  ;;  %v768_v0 = vld [vmem:[%s989_s3 + $0x88] sm:$0xff]  ;;  %v751_v3 = vld [vmem:[%s989_s3] sm:$0xff] }
   0xd   :  { %517 = vmatpush.bf16.msra.mxu3 %v780_v11  ;;  %v34_v37 = vsel %vm33_vm0, %v24_v19, %v30_v28  ;;  %v35_v43 = vsel %vm33_vm0, %v26_v24, %v31_v33  ;;  %v49_v49 = vperm.slane %v43_v21, 4  ;;  %v50_v50 = vperm.slane %v43_v21, 5  ;;  %v776_v1 = vld [vmem:[%s989_s3 + $0xc8] sm:$0xff]  ;;  %v759_v4 = vld [vmem:[%s989_s3 + $0x40] sm:$0xff]  ;;  %v789_v10 = vld [vmem:[%s989_s3 + $0x130] sm:$0xff] }
   0xe   :  { %479 = vmatpush.bf16.msra.mxu0 %v755_v12  ;;  %v51_v32 = vrot.slane %v46_v23, 4  ;;  %v52_v38 = vrot.slane %v48_v31, 4  ;;  %v40_v41 = vmul.f32 %v34_v37, %v19_v18  ;;  %v41_v47 = vmul.f32 %v35_v43, %v20_v29  ;;  %v767_v8 = vld [vmem:[%s989_s3 + $0x80] sm:$0xff]  ;;  %v797_v11 = vld [vmem:[%s989_s3 + $0x170] sm:$0xff]  ;;  %v788_v20 = vld [vmem:[%s989_s3 + $0x128] sm:$0xff] }
   0xf   :  { %492 = vmatpush.bf16.msra.mxu1 %v763_v13  ;;  %v32_v52 = vrot.slane %v29_v44, 4  ;;  %v53_v56 = vrot.slane %v50_v50, 4  ;;  %v775_v9 = vld [vmem:[%s989_s3 + $0xc0] sm:$0xff]  ;;  %v796_v21 = vld [vmem:[%s989_s3 + $0x168] sm:$0xff]  ;;  %v786_v24 = vld [vmem:[%s989_s3 + $0x118] sm:$0xff] }
  0x10   :  { %505 = vmatpush.bf16.msra.mxu2 %v771_v16  ;;  %v54_v42 = vsel %vm33_vm0, %v45_v22, %v51_v32  ;;  %v55_v48 = vsel %vm33_vm0, %v47_v30, %v52_v38  ;;  %v787_v22 = vld [vmem:[%s989_s3 + $0x120] sm:$0xff]  ;;  %v794_v25 = vld [vmem:[%s989_s3 + $0x158] sm:$0xff]  ;;  %v784_v28 = vld [vmem:[%s989_s3 + $0x108] sm:$0xff] }
  0x11   :  { %518 = vmatpush.bf16.msra.mxu3 %v779_v17  ;;  %v60_v51 = vadd.f32 %v54_v42, %v40_v41  ;;  %v61_v55 = vadd.f32 %v55_v48, %v41_v47  ;;  %v36_v58 = vsel %vm33_vm0, %v28_v40, %v32_v52  ;;  %v56_v63 = vsel %vm33_vm0, %v49_v49, %v53_v56  ;;  %v795_v23 = vld [vmem:[%s989_s3 + $0x160] sm:$0xff]  ;;  %v792_v29 = vld [vmem:[%s989_s3 + $0x148] sm:$0xff] }
  0x12   :  { %480 = vmatpush.bf16.msra.mxu0 %v754_v26  ;;  %v42_v62 = vmul.f32 %v36_v58, %v21_v39  ;;  %v785_v26 = vld [vmem:[%s989_s3 + $0x110] sm:$0xff]  ;;  %v783_v30 = vld [vmem:[%s989_s3 + $0x100] sm:$0xff] }
  0x13   :  { %493 = vmatpush.bf16.msra.mxu1 %v762_v27  ;;  %v63_v57 = vmax.f32 %v60_v51, 0.0  ;;  %v64_v61 = vmax.f32 %v61_v55, 0.0  ;;  %v793_v27 = vld [vmem:[%s989_s3 + $0x150] sm:$0xff]  ;;  %v791_v31 = vld [vmem:[%s989_s3 + $0x140] sm:$0xff] }
  0x14   :  { %506 = vmatpush.bf16.msra.mxu2 %v770_v35  ;;  %v62_v2 = vadd.f32 %v56_v63, %v42_v62 }
  0x15   :  { %519 = vmatpush.bf16.msra.mxu3 %v778_v36  ;;  %69 = vst [vmem:[#allocation1] ss:$2 sm:$0xff] %v63_v57 }
  0x16   :  { %481 = vmatpush.bf16.msra.mxu0 %v753_v45  ;;  %71 = vst [vmem:[#allocation1 + $0x10] ss:$2 sm:$0xff] %v64_v61  ;;  %v65_v5 = vmax.f32 %v62_v2, 0.0 }
  0x17   :  { %494 = vmatpush.bf16.msra.mxu1 %v761_v46 }
  0x18   :  { %507 = vmatpush.bf16.msra.mxu2 %v769_v53  ;;  %73 = vst [vmem:[#allocation1 + $0x20] ss:$2 sm:$0xff] %v65_v5 }
  0x19   :  { %520 = vmatpush.bf16.msra.mxu3 %v777_v54 }
  0x1a   :  { %482 = vmatpush.bf16.msra.mxu0 %v752_v59 }
  0x1b   :  { %495 = vmatpush.bf16.msra.mxu1 %v760_v60 }
  0x1c   :  { %508 = vmatpush.bf16.msra.mxu2 %v768_v0  ;;  %v74_v12 = vld.sshfl [vmem:[#allocation1] sm:$0xff pattern:$0x75316420]  ;;  %v75_v13 = vld.sshfl [vmem:[#allocation1 + $0x8] sm:$0xff pattern:$0x75316420] }
  0x1d   :  { %521 = vmatpush.bf16.msra.mxu3 %v776_v1  ;;  %v86_v14 = vpack.c.bf16 %v74_v12, %v74_v12  ;;  %v87_v15 = vpack.c.bf16 %v75_v13, %v75_v13  ;;  %v76_v16 = vld.sshfl [vmem:[#allocation1 + $0x10] sm:$0xff pattern:$0x75316420]  ;;  %v77_v17 = vld.sshfl [vmem:[#allocation1 + $0x18] sm:$0xff pattern:$0x75316420] }
  0x1e   :  { %483 = vmatpush.bf16.msra.mxu0 %v751_v3  ;;  %v88_v18 = vpack.c.bf16 %v76_v16, %v76_v16  ;;  %v89_v19 = vpack.c.bf16 %v77_v17, %v77_v17 }
  0x1f   :  { %496 = vmatpush.bf16.msra.mxu1 %v759_v4  ;;  %v78_v32 = vld.sshfl [vmem:[#allocation1 + $0x20] sm:$0xff pattern:$0x75316420]  ;;  %v79_v33 = vld.sshfl [vmem:[#allocation1 + $0x28] sm:$0xff pattern:$0x75316420] }
  0x20   :  { %509 = vmatpush.bf16.msra.mxu2 %v767_v8  ;;  %v90_v34 = vpack.c.bf16 %v78_v32, %v78_v32  ;;  %v91_v35 = vpack.c.bf16 %v79_v33, %v79_v33 }
  0x21   :  { %522 = vmatpush.bf16.msra.mxu3 %v775_v9  ;;  %484 = vmatmul.bf16.vlgmr.msra.gmra.mxu0 %v86_v14 }
  0x22   :  { %528 = vmatpush.bf16.msrb.mxu0 %v790_v6  ;;  %497 = vmatmul.bf16.vlgmr.msra.gmra.mxu1 %v87_v15 }
  0x23   :  { %541 = vmatpush.bf16.msrb.mxu1 %v798_v7  ;;  %510 = vmatmul.bf16.vlgmr.msra.gmra.mxu2 %v88_v18 }
  0x24   :  { %523 = vmatmul.bf16.vlgmr.msra.gmra.mxu3 %v89_v19 }
  0x26   :  { %529 = vmatpush.bf16.msrb.mxu0 %v789_v10 }
  0x27   :  { %542 = vmatpush.bf16.msrb.mxu1 %v797_v11 }
  0x2a   :  { %530 = vmatpush.bf16.msrb.mxu0 %v788_v20 }
  0x2b   :  { %543 = vmatpush.bf16.msrb.mxu1 %v796_v21 }
  0x2e   :  { %531 = vmatpush.bf16.msrb.mxu0 %v787_v22 }
  0x2f   :  { %544 = vmatpush.bf16.msrb.mxu1 %v795_v23 }
  0x32   :  { %532 = vmatpush.bf16.msrb.mxu0 %v786_v24 }
  0x33   :  { %545 = vmatpush.bf16.msrb.mxu1 %v794_v25 }
  0x36   :  { %533 = vmatpush.bf16.msrb.mxu0 %v785_v26 }
  0x37   :  { %546 = vmatpush.bf16.msrb.mxu1 %v793_v27 }
  0x3a   :  { %534 = vmatpush.bf16.msrb.mxu0 %v784_v28 }
  0x3b   :  { %547 = vmatpush.bf16.msrb.mxu1 %v792_v29 }
  0x3e   :  { %535 = vmatpush.bf16.msrb.mxu0 %v783_v30 }
  0x3f   :  { %548 = vmatpush.bf16.msrb.mxu1 %v791_v31 }
  0x41   :  { %536 = vmatmul.bf16.vlgmr.msrb.gmra.mxu0 %v90_v34 }
  0x42   :  { %549 = vmatmul.bf16.vlgmr.msrb.gmra.mxu1 %v91_v35 }
  0x9e   :  { %v485_v36 = vpop.f32.mrf.mxu0 }
  0x9f   :  { %v498_v37 = vpop.f32.mrf.mxu1 }
  0xa0   :  { %v499_v44 = vadd.f32 %v498_v37, %v485_v36 }
  0xa6   :  { %v487_v38 = vpop.f32.mrf.mxu0  ;;  %v511_v40 = vpop.f32.mrf.mxu2 }
  0xa7   :  { %v500_v39 = vpop.f32.mrf.mxu1  ;;  %v524_v41 = vpop.f32.mrf.mxu3  ;;  %v512_v45 = vadd.f32 %v511_v40, %v499_v44 }
  0xa9   :  { %v525_v46 = vadd.f32 %v524_v41, %v512_v45 }
  0xae   :  { %v513_v42 = vpop.f32.mrf.mxu2 }
  0xaf   :  { %v526_v43 = vpop.f32.mrf.mxu3 }
  0xbe   :  { %v537_v47 = vpop.f32.mrf.mxu0 }
  0xbf   :  { %v550_v48 = vpop.f32.mrf.mxu1  ;;  %v538_v49 = vadd.f32 %v537_v47, %v525_v46 }
  0xc1   :  { %v551_v50 = vadd.f32 %v550_v48, %v538_v49 }
  0xc3   :  { %554 = vst [vmem:[%s993_s4] sm:$0xf] %v551_v50 }
  0xc6   :  { %v539_v51 = vpop.f32.mrf.mxu0 }
  0xc7   :  { %v552_v52 = vpop.f32.mrf.mxu1 }

// kernel: encoder_forward.6
= control target key start
LH: loop header
LB: loop body
LE: loop exit
PB: predicated region body
PF: predicated region fallthrough
CT: control target
= control target key end

     0   :  { %s4565_s15 = smov 0   ;;  %s6909_s0 = inlined_call_operand.vmem [shape: bf16[2,342,4], index: 0, kind: input, shape index: {}]   ;;  %s6910_s1 = inlined_call_operand.vmem [shape: bf16[36,16], index: 1, kind: input, shape index: {}]   ;;  %s6911_s2 = inlined_call_operand.vmem [shape: bf16[2,288,16], index: 2, kind: output, shape index: {0}]   ;;  %s6912_s3 = inlined_call_operand.vmem [shape: f32[2,1,16], index: 3, kind: output, shape index: {1}]   ;;  %s6913_s4 = inlined_call_operand.vmem [shape: f32[2,1,16], index: 4, kind: output, shape index: {2}]  }
   0x1 LB: > { %s4353_s16 = sadd.s32 4294967295, %s4527_s15   ;;  %p4357_p0 = scmp.ge.s32.totalorder %s4527_s15, 1  ;;  %s4527_s15 = sphi %s4565_s15, %s15_s15  }
   0x2   : > { %p167_p1 = scmp.lt.s32.totalorder %s4527_s15, 3 }
   0x4   : > { %p168_p2 = pnand %p4357_p0, %p167_p1 }
   0x5   : > { %p199_p3 = scmp.lt.s32.totalorder (!%p168_p2), %s4353_s16, 1  ;;  %s4529_s21 = smov (!%p168_p2), 4  }
   0x6   : > { %171 = sbr.rel (%p168_p2) target bundleno = 1220 (0x4c4), region = 28  ;;  %s4530_s22 = smov (!%p168_p2), 8  }
   0x7   : > { %s4531_s23 = smov (!%p168_p2), 12   ;;  %s4532_s24 = smov (!%p168_p2), 16  }
   0x8   : > { %s4533_s25 = smov (!%p168_p2), 24   ;;  %s4534_s26 = smov (!%p168_p2), 20  }
   0x9   : > { %s4535_s27 = smov (!%p168_p2), 28   ;;  %s4536_s28 = smov (!%p168_p2), 32  }
   0xb   : > { %s6931_s16 = smov (!%p199_p3, %s4353_s16), 1  ;;  %vm326_vm0 = vsmask.f32 3328  ;;  %vm327_vm1 = vsmask.f32 7440  ;;  %vm252_vm3 = vcmask 27648  }
   0xc   : > { %s4500_s17 = smul.u32 172, %s6931_s16  ;;  %vm4589_vm2 = vmor %vm326_vm0, %vm327_vm1  ;;  %vm912_vm4 = vcmask 1042432   ;;  %vm913_vm5 = vcmask 1046532   ;;  %vm801_vm7 = vcmask 60448   ;;  %vm1132_vm8 = vcmask 93248  }
   0xd   : > { %vm4740_vm6 = vmor %vm912_vm4, %vm913_vm5  ;;  %vm1534_vm9 = vsmask.f32 2304  ;;  %vm1535_vm10 = vsmask.f32 6416  ;;  %vm1460_vm12 = vcmask 126048   ;;  %vm2124_vm13 = vcmask 1041408  }
   0xe   : > { %s4579_s20 = scalar_lea.vmem %s6909_s0, %s4500_s17  ;;  %vm5168_vm11 = vmor %vm1534_vm9, %vm1535_vm10  ;;  %vm2125_vm14 = vcmask 1045508   ;;  %vm2746_vm0 = vsmask.f32 1280  ;;  %vm2747_vm1 = vsmask.f32 5392  ;;  %vm3337_vm4 = vcmask 1044484   ;;  %s211_s17 = scalar_lea.vmem %s6912_s3, %s6931_s16 }
   0xf   : > { %v291_v0 = vld [vmem:[%s4579_s20 + $0x8] sm:$0xf]  ;;  %v292_v1 = vld [vmem:[%s4579_s20 + $0xc] sm:$0xf]  ;;  %v289_v2 = vld [vmem:[%s4579_s20] sm:$0xf] }
  0x10   : > { %v349_v3 = vshll.u32 %v291_v0, 16  ;;  %v353_v4 = vshrl.u32 %v291_v0, 16  ;;  %v359_v5 = vshll.u32 %v292_v1, 16  ;;  %v363_v6 = vshrl.u32 %v292_v1, 16  ;;  %v290_v7 = vld [vmem:[%s4579_s20 + $0x4] sm:$0xf]  ;;  %vm5309_vm15 = vmor %vm2124_vm13, %vm2125_vm14 }
  0x11   : > { %v330_v8 = vshrl.u32 %v289_v2, 16  ;;  %v333_v9 = vshll.u32 %v289_v2, 16  ;;  %v339_v10 = vshll.u32 %v290_v7, 16  ;;  %v343_v11 = vshrl.u32 %v290_v7, 16  ;;  %v293_v12 = vld [vmem:[%s4579_s20 + $0x10] sm:$0xf] }
  0x12   : > { %v351_v13 = vrot.slane %v349_v3, 5  ;;  %v355_v14 = vrot.slane %v353_v4, 4  ;;  %v361_v15 = vrot.slane %v359_v5, 5  ;;  %v365_v16 = vrot.slane %v363_v6, 4  ;;  %v296_v17 = vld [vmem:[%s4579_s20 + $0x1c] sm:$0xf] }
  0x13   : > { %v332_v18 = vrot.slane %v330_v8, 4  ;;  %v335_v19 = vrot.slane %v333_v9, 5  ;;  %v345_v20 = vrot.slane %v343_v11, 4  ;;  %v369_v23 = vshll.u32 %v293_v12, 16  ;;  %v295_v29 = vld [vmem:[%s4579_s20 + $0x18] sm:$0xf] }
  0x14   : > { %v356_v21 = vor.u32 %v355_v14, %v351_v13  ;;  %v366_v22 = vor.u32 %v365_v16, %v361_v15  ;;  %v341_v26 = vrot.slane %v339_v10, 5  ;;  %v399_v27 = vshll.u32 %v296_v17, 16  ;;  %v294_v33 = vld [vmem:[%s4579_s20 + $0x14] sm:$0xf]  ;;  %v297_v42 = vld [vmem:[%s4579_s20 + $0x20] sm:$0xf] }
  0x15   : > { %v336_v25 = vor.u32 %v335_v19, %v332_v18  ;;  %v403_v28 = vshrl.u32 %v296_v17, 16  ;;  %v371_v36 = vrot.slane %v369_v23, 5  ;;  %v389_v37 = vshll.u32 %v295_v29, 16  ;;  %v299_v49 = vld [vmem:[%s4579_s20 + $0x28] sm:$0xf]  ;;  %s4501_s9 = smul.u32 144, %s6931_s16 }
  0x16   : > { %v357_v30 = vrot.slane %v356_v21, 4  ;;  %v346_v32 = vor.u32 %v345_v20, %v341_v26  ;;  %v367_v35 = vrot.slane %v366_v22, 4  ;;  %v401_v39 = vrot.slane %v399_v27, 5  ;;  %v298_v52 = vld [vmem:[%s4579_s20 + $0x24] sm:$0xf] }
  0x17   : > { %v337_v31 = vrot.slane %v336_v25, 4  ;;  %v405_v40 = vrot.slane %v403_v28, 4  ;;  %v393_v41 = vshrl.u32 %v295_v29, 16  ;;  %v373_v43 = vshrl.u32 %v293_v12, 16  ;;  %v300_v6 = vld [vmem:[%s4579_s20 + $0x2c] sm:$0xf]  ;;  %s6152_s12 = scalar_lea.vmem %s6911_s2, %s4501_s9 }
  0x18   : > { %v362_v34 = vsel %vm4589_vm2, %v357_v30, %v361_v15  ;;  %v379_v44 = vshll.u32 %v294_v33, 16  ;;  %v383_v45 = vshrl.u32 %v294_v33, 16  ;;  %v347_v46 = vrot.slane %v346_v32, 4  ;;  %v302_v12 = vld [vmem:[%s4579_s20 + $0x34] sm:$0xf] }
  0x19   : > { %697 = vrot.lane.b32.xlu1 %v362_v34, %s4529_s21  ;;  %v342_v38 = vsel %vm4589_vm2, %v337_v31, %v341_v26  ;;  %v391_v47 = vrot.slane %v389_v37, 5  ;;  %v395_v48 = vrot.slane %v393_v41, 4  ;;  %v375_v50 = vrot.slane %v373_v43, 4  ;;  %v301_v14 = vld [vmem:[%s4579_s20 + $0x30] sm:$0xf] }
  0x1a   : > { %693 = vrot.lane.b32.xlu0 %v342_v38, %s4529_s21  ;;  %v385_v51 = vrot.slane %v383_v45, 4  ;;  %v372_v53 = vsel %vm4589_vm2, %v367_v35, %v371_v36  ;;  %v406_v54 = vor.u32 %v405_v40, %v401_v39  ;;  %v409_v55 = vshll.u32 %v297_v42, 16  ;;  %v303_v31 = vld [vmem:[%s4579_s20 + $0x38] sm:$0xf]  ;;  %v305_v37 = vld [vmem:[%s4579_s20 + $0x40] sm:$0xf] }
  0x1b   : > { %v376_v56 = vor.u32 %v375_v50, %v371_v36  ;;  %v381_v57 = vrot.slane %v379_v44, 5  ;;  %v429_v58 = vshll.u32 %v299_v49, 16  ;;  %v433_v59 = vshrl.u32 %v299_v49, 16  ;;  %v222_v24 = vld [vmem:[%s4579_s20 + $0x18] sm:$0xf] }
  0x1c   : > { %v352_v60 = vsel %vm4589_vm2, %v347_v46, %v351_v13  ;;  %v396_v61 = vor.u32 %v395_v48, %v391_v47  ;;  %v419_v62 = vshll.u32 %v298_v52, 16  ;;  %v423_v63 = vshrl.u32 %v298_v52, 16  ;;  %259 = vst.msk [vmem:[#allocation2 + $0x18] sm:$0xf] %vm252_vm3, %v222_v24 }
  0x1d   : > { %v377_v0 = vrot.slane %v376_v56, 4  ;;  %v386_v1 = vor.u32 %v385_v51, %v381_v57  ;;  %v411_v2 = vrot.slane %v409_v55, 5  ;;  %v413_v3 = vshrl.u32 %v297_v42, 16 }
  0x1e   : > { %v407_v4 = vrot.slane %v406_v54, 4  ;;  %v431_v7 = vrot.slane %v429_v58, 5  ;;  %v435_v8 = vrot.slane %v433_v59, 4  ;;  %v397_v9 = vrot.slane %v396_v61, 4  ;;  %v306_v59 = vld [vmem:[%s4579_s20 + $0x44] sm:$0xf] }
  0x1f   : > { %v382_v5 = vsel %vm4589_vm2, %v377_v0, %v381_v57  ;;  %v421_v10 = vrot.slane %v419_v62, 5  ;;  %v425_v11 = vrot.slane %v423_v63, 4  ;;  %v387_v13 = vrot.slane %v386_v1, 4  ;;  %v308_v57 = vld [vmem:[%s4579_s20 + $0x4c] sm:$0xf] }
  0x20   : > { %701 = vrot.lane.b32.xlu2 %v382_v5, %s4529_s21  ;;  %v439_v15 = vshll.u32 %v300_v6, 16  ;;  %v415_v16 = vrot.slane %v413_v3, 4  ;;  %v412_v17 = vsel %vm4589_vm2, %v407_v4, %v411_v2  ;;  %v436_v18 = vor.u32 %v435_v8, %v431_v7  ;;  %v307_v63 = vld [vmem:[%s4579_s20 + $0x48] sm:$0xf] }
  0x21   : > { %699 = vrot.lane.b32.xlu1 %v372_v53, %s4529_s21  ;;  %v459_v19 = vshll.u32 %v302_v12, 16  ;;  %v463_v20 = vshrl.u32 %v302_v12, 16  ;;  %v402_v21 = vsel %vm4589_vm2, %v397_v9, %v401_v39  ;;  %v426_v22 = vor.u32 %v425_v11, %v421_v10  ;;  %v304_v39 = vld [vmem:[%s4579_s20 + $0x3c] sm:$0xf] }
  0x22   : > { %695 = vrot.lane.b32.xlu0 %v352_v60, %s4529_s21  ;;  %v449_v23 = vshll.u32 %v301_v14, 16  ;;  %v453_v25 = vshrl.u32 %v301_v14, 16  ;;  %v443_v26 = vshrl.u32 %v300_v6, 16  ;;  %v392_v27 = vsel %vm4589_vm2, %v387_v13, %v391_v47 }
  0x23   : > { %v416_v28 = vor.u32 %v415_v16, %v411_v2  ;;  %v437_v29 = vrot.slane %v436_v18, 4  ;;  %v441_v30 = vrot.slane %v439_v15, 5  ;;  %v461_v32 = vrot.slane %v459_v19, 5 }
  0x24   : > { %v465_v33 = vrot.slane %v463_v20, 4  ;;  %v427_v34 = vrot.slane %v426_v22, 4  ;;  %v451_v35 = vrot.slane %v449_v23, 5  ;;  %v455_v36 = vrot.slane %v453_v25, 4  ;;  %v310_v23 = vld [vmem:[%s4579_s20 + $0x54] sm:$0xf] }
  0x25   : > { %v417_v38 = vrot.slane %v416_v28, 4  ;;  %v445_v40 = vrot.slane %v443_v26, 4  ;;  %v469_v41 = vshll.u32 %v303_v31, 16  ;;  %v442_v42 = vsel %vm4589_vm2, %v437_v29, %v441_v30 }
  0x26   : > { %v466_v43 = vor.u32 %v465_v33, %v461_v32  ;;  %v489_v44 = vshll.u32 %v305_v37, 16  ;;  %v493_v45 = vshrl.u32 %v305_v37, 16  ;;  %v432_v46 = vsel %vm4589_vm2, %v427_v34, %v431_v7 }
  0x27   : > { %v456_v47 = vor.u32 %v455_v36, %v451_v35  ;;  %v479_v48 = vshll.u32 %v304_v39, 16  ;;  %v483_v49 = vshrl.u32 %v304_v39, 16  ;;  %v473_v50 = vshrl.u32 %v303_v31, 16 }
  0x28   : > { %703 = vrot.lane.b32.xlu2 %v392_v27, %s4529_s21  ;;  %v422_v51 = vsel %vm4589_vm2, %v417_v38, %v421_v10  ;;  %v446_v52 = vor.u32 %v445_v40, %v441_v30  ;;  %v467_v53 = vrot.slane %v466_v43, 4  ;;  %v471_v54 = vrot.slane %v469_v41, 5  ;;  %v312_v40 = vld [vmem:[%s4579_s20 + $0x5c] sm:$0xf] }
  0x29   : > { %707 = vrot.lane.b32.xlu1 %v412_v17, %s4529_s21  ;;  %v491_v55 = vrot.slane %v489_v44, 5  ;;  %v495_v56 = vrot.slane %v493_v45, 4  ;;  %v457_v58 = vrot.slane %v456_v47, 4  ;;  %v481_v60 = vrot.slane %v479_v48, 5  ;;  %v309_v17 = vld [vmem:[%s4579_s20 + $0x50] sm:$0xf] }
  0x2a   : > { %705 = vrot.lane.b32.xlu0 %v402_v21, %s4529_s21  ;;  %v485_v61 = vrot.slane %v483_v49, 4  ;;  %v447_v62 = vrot.slane %v446_v52, 4  ;;  %v475_v0 = vrot.slane %v473_v50, 4  ;;  %v519_v1 = vshll.u32 %v308_v57, 16  ;;  %v311_v21 = vld [vmem:[%s4579_s20 + $0x58] sm:$0xf] }
  0x2b   : > { %v523_v2 = vshrl.u32 %v308_v57, 16  ;;  %v472_v3 = vsel %vm4589_vm2, %v467_v53, %v471_v54  ;;  %v496_v4 = vor.u32 %v495_v56, %v491_v55  ;;  %v499_v5 = vshll.u32 %v306_v59, 16  ;;  %v313_v48 = vld [vmem:[%s4579_s20 + $0x60] sm:$0xf] }
  0x2c   : > { %v462_v6 = vsel %vm4589_vm2, %v457_v58, %v461_v32  ;;  %v486_v7 = vor.u32 %v485_v61, %v481_v60  ;;  %v509_v8 = vshll.u32 %v307_v63, 16  ;;  %v513_v9 = vshrl.u32 %v307_v63, 16 }
  0x2d   : > { %v503_v10 = vshrl.u32 %v306_v59, 16  ;;  %v452_v11 = vsel %vm4589_vm2, %v447_v62, %v451_v35  ;;  %v476_v12 = vor.u32 %v475_v0, %v471_v54  ;;  %v521_v13 = vrot.slane %v519_v1, 5 }
  0x2e   : > { %v525_v14 = vrot.slane %v523_v2, 4  ;;  %v497_v15 = vrot.slane %v496_v4, 4  ;;  %v501_v16 = vrot.slane %v499_v5, 5  ;;  %v487_v18 = vrot.slane %v486_v7, 4  ;;  %v317_v2 = vld [vmem:[%s4579_s20 + $0x70] sm:$0xf] }
  0x2f   : > { %v511_v19 = vrot.slane %v509_v8, 5  ;;  %v515_v20 = vrot.slane %v513_v9, 4  ;;  %v477_v22 = vrot.slane %v476_v12, 4  ;;  %v505_v25 = vrot.slane %v503_v10, 4  ;;  %v315_v4 = vld [vmem:[%s4579_s20 + $0x68] sm:$0xf] }
  0x30   : > { %709 = vrot.lane.b32.xlu2 %v422_v51, %s4529_s21  ;;  %v526_v26 = vor.u32 %v525_v14, %v521_v13  ;;  %v529_v27 = vshll.u32 %v309_v17, 16  ;;  %v502_v28 = vsel %vm4589_vm2, %v497_v15, %v501_v16  ;;  %v549_v29 = vshll.u32 %v311_v21, 16  ;;  %v316_v8 = vld [vmem:[%s4579_s20 + $0x6c] sm:$0xf] }
  0x31   : > { %713 = vrot.lane.b32.xlu1 %v442_v42, %s4529_s21  ;;  %v553_v30 = vshrl.u32 %v311_v21, 16  ;;  %v492_v31 = vsel %vm4589_vm2, %v487_v18, %v491_v55  ;;  %v516_v32 = vor.u32 %v515_v20, %v511_v19  ;;  %v539_v33 = vshll.u32 %v310_v23, 16 }
  0x32   : > { %711 = vrot.lane.b32.xlu0 %v432_v46, %s4529_s21  ;;  %v543_v34 = vshrl.u32 %v310_v23, 16  ;;  %v533_v35 = vshrl.u32 %v309_v17, 16  ;;  %v482_v36 = vsel %vm4589_vm2, %v477_v22, %v481_v60  ;;  %v506_v37 = vor.u32 %v505_v25, %v501_v16  ;;  %v314_v46 = vld [vmem:[%s4579_s20 + $0x64] sm:$0xf] }
  0x33   : > { %v527_v38 = vrot.slane %v526_v26, 4  ;;  %v531_v39 = vrot.slane %v529_v27, 5  ;;  %v551_v41 = vrot.slane %v549_v29, 5  ;;  %v555_v42 = vrot.slane %v553_v30, 4  ;;  %v318_v27 = vld [vmem:[%s4579_s20 + $0x74] sm:$0xf] }
  0x34   : > { %v517_v43 = vrot.slane %v516_v32, 4  ;;  %v541_v44 = vrot.slane %v539_v33, 5  ;;  %v545_v45 = vrot.slane %v543_v34, 4  ;;  %v507_v47 = vrot.slane %v506_v37, 4  ;;  %v319_v33 = vld [vmem:[%s4579_s20 + $0x78] sm:$0xf] }
  0x35   : > { %v535_v49 = vrot.slane %v533_v35, 4  ;;  %v532_v50 = vsel %vm4589_vm2, %v527_v38, %v531_v39  ;;  %v556_v51 = vor.u32 %v555_v42, %v551_v41  ;;  %v559_v52 = vshll.u32 %v312_v40, 16 }
  0x36   : > { %v579_v53 = vshll.u32 %v314_v46, 16  ;;  %v583_v54 = vshrl.u32 %v314_v46, 16  ;;  %v522_v55 = vsel %vm4589_vm2, %v517_v43, %v521_v13  ;;  %v546_v56 = vor.u32 %v545_v45, %v541_v44 }
  0x37   : > { %v569_v57 = vshll.u32 %v313_v48, 16  ;;  %v573_v58 = vshrl.u32 %v313_v48, 16  ;;  %v563_v59 = vshrl.u32 %v312_v40, 16  ;;  %v512_v60 = vsel %vm4589_vm2, %v507_v47, %v511_v19 }
  0x38   : > { %715 = vrot.lane.b32.xlu2 %v452_v11, %s4529_s21  ;;  %v536_v61 = vor.u32 %v535_v49, %v531_v39  ;;  %v557_v62 = vrot.slane %v556_v51, 4  ;;  %v561_v63 = vrot.slane %v559_v52, 5  ;;  %v581_v0 = vrot.slane %v579_v53, 5  ;;  %v321_v49 = vld [vmem:[%s4579_s20 + $0x80] sm:$0xf] }
  0x39   : > { %719 = vrot.lane.b32.xlu1 %v472_v3, %s4529_s21  ;;  %v585_v1 = vrot.slane %v583_v54, 4  ;;  %v547_v3 = vrot.slane %v546_v56, 4  ;;  %v571_v5 = vrot.slane %v569_v57, 5  ;;  %v565_v9 = vrot.slane %v563_v59, 4  ;;  %v323_v52 = vld [vmem:[%s4579_s20 + $0x88] sm:$0xf] }
  0x3a   : > { %717 = vrot.lane.b32.xlu0 %v462_v6, %s4529_s21  ;;  %v575_v6 = vrot.slane %v573_v58, 4  ;;  %v537_v7 = vrot.slane %v536_v61, 4  ;;  %v609_v10 = vshll.u32 %v317_v2, 16  ;;  %v613_v11 = vshrl.u32 %v317_v2, 16  ;;  %v322_v56 = vld [vmem:[%s4579_s20 + $0x84] sm:$0xf] }
  0x3b   : > { %v562_v12 = vsel %vm4589_vm2, %v557_v62, %v561_v63  ;;  %v586_v13 = vor.u32 %v585_v1, %v581_v0  ;;  %v589_v14 = vshll.u32 %v315_v4, 16  ;;  %v552_v15 = vsel %vm4589_vm2, %v547_v3, %v551_v41 }
  0x3c   : > { %v576_v16 = vor.u32 %v575_v6, %v571_v5  ;;  %v599_v17 = vshll.u32 %v316_v8, 16  ;;  %v603_v18 = vshrl.u32 %v316_v8, 16  ;;  %v593_v19 = vshrl.u32 %v315_v4, 16 }
  0x3d   : > { %v542_v20 = vsel %vm4589_vm2, %v537_v7, %v541_v44  ;;  %v566_v21 = vor.u32 %v565_v9, %v561_v63  ;;  %v611_v22 = vrot.slane %v609_v10, 5  ;;  %v615_v23 = vrot.slane %v613_v11, 4  ;;  %v324_v11 = vld [vmem:[%s4579_s20 + $0x8c] sm:$0xf] }
  0x3e   : > { %v587_v25 = vrot.slane %v586_v13, 4  ;;  %v591_v26 = vrot.slane %v589_v14, 5  ;;  %v601_v29 = vrot.slane %v599_v17, 5  ;;  %v605_v30 = vrot.slane %v603_v18, 4 }
  0x3f   : > { %v567_v32 = vrot.slane %v566_v21, 4  ;;  %v595_v34 = vrot.slane %v593_v19, 4  ;;  %v616_v35 = vor.u32 %v615_v23, %v611_v22  ;;  %v629_v42 = vshll.u32 %v319_v33, 16 }
  0x40   : > { %721 = vrot.lane.b32.xlu2 %v482_v36, %s4529_s21  ;;  %v619_v36 = vshll.u32 %v318_v27, 16  ;;  %v592_v37 = vsel %vm4589_vm2, %v587_v25, %v591_v26  ;;  %v606_v41 = vor.u32 %v605_v30, %v601_v29  ;;  %v633_v43 = vshrl.u32 %v319_v33, 16  ;;  %v220_v30 = vld [vmem:[%s4579_s20 + $0x10] sm:$0xf] }
  0x41   : > { %725 = vrot.lane.b32.xlu1 %v502_v28, %s4529_s21  ;;  %v577_v28 = vrot.slane %v576_v16, 4  ;;  %v623_v44 = vshrl.u32 %v318_v27, 16  ;;  %v572_v45 = vsel %vm4589_vm2, %v567_v32, %v571_v5  ;;  %v596_v46 = vor.u32 %v595_v34, %v591_v26  ;;  %257 = vst.msk [vmem:[#allocation2 + $0x10] sm:$0xf] %vm252_vm3, %v220_v30  ;;  %v216_v32 = vld [vmem:[%s4579_s20] sm:$0xf] }
  0x42   : > { %723 = vrot.lane.b32.xlu0 %v492_v31, %s4529_s21  ;;  %v320_v31 = vld [vmem:[%s4579_s20 + $0x7c] sm:$0xf]  ;;  %v617_v47 = vrot.slane %v616_v35, 4  ;;  %v621_v48 = vrot.slane %v619_v36, 5  ;;  %v607_v53 = vrot.slane %v606_v41, 4  ;;  %v631_v54 = vrot.slane %v629_v42, 5 }
  0x43   : > { %v639_v38 = vshll.u32 %v320_v31, 16  ;;  %v643_v39 = vshrl.u32 %v320_v31, 16  ;;  %v582_v40 = vsel %vm4589_vm2, %v577_v28, %v581_v0  ;;  %v597_v57 = vrot.slane %v596_v46, 4  ;;  %v218_v31 = vld [vmem:[%s4579_s20 + $0x8] sm:$0xf] }
  0x44   : > { %v625_v58 = vrot.slane %v623_v44, 4  ;;  %v622_v59 = vsel %vm4589_vm2, %v617_v47, %v621_v48  ;;  %v673_v61 = vshrl.u32 %v323_v52, 16  ;;  %v649_v63 = vshll.u32 %v321_v49, 16  ;;  %255 = vst.msk [vmem:[#allocation2 + $0x8] sm:$0xf] %vm252_vm3, %v218_v31 }
  0x45   : > { %v645_v51 = vrot.slane %v643_v39, 4  ;;  %v659_v0 = vshll.u32 %v322_v56, 16  ;;  %v663_v1 = vshrl.u32 %v322_v56, 16  ;;  %v612_v2 = vsel %vm4589_vm2, %v607_v53, %v611_v22  ;;  %v325_v36 = vld [vmem:[%s4579_s20 + $0x90] sm:$0x1] }
  0x46   : > { %v653_v4 = vshrl.u32 %v321_v49, 16  ;;  %v602_v5 = vsel %vm4589_vm2, %v597_v57, %v601_v29  ;;  %v626_v6 = vor.u32 %v625_v58, %v621_v48  ;;  %v675_v8 = vrot.slane %v673_v61, 4  ;;  %v839_v29 = vld [vmem:[%s4579_s20 + $0x4] sm:$0xf]  ;;  %253 = vst.msk [vmem:[#allocation2] sm:$0xf] %vm252_vm3, %v216_v32 }
  0x47   : > { %v651_v10 = vrot.slane %v649_v63, 5  ;;  %v665_v13 = vrot.slane %v663_v1, 4  ;;  %v679_v18 = vshll.u32 %v324_v11, 16  ;;  %v683_v22 = vshrl.u32 %v324_v11, 16  ;;  %v838_v39 = vld [vmem:[%s4579_s20] sm:$0xe] }
  0x48   : > { %727 = vrot.lane.b32.xlu2 %v512_v60, %s4529_s21  ;;  %v669_v60 = vshll.u32 %v323_v52, 16  ;;  %v655_v16 = vrot.slane %v653_v4, 4  ;;  %v917_v35 = vrot.slane %v839_v29, 5  ;;  %v4360_v46 = vrot.slane %v838_v39, 9  ;;  %v842_v47 = vld [vmem:[%s4579_s20 + $0x10] sm:$0xf] }
  0x49   : > { %731 = vrot.lane.b32.xlu1 %v532_v50, %s4529_s21  ;;  %v641_v50 = vrot.slane %v639_v38, 5  ;;  %v681_v27 = vrot.slane %v679_v18, 5  ;;  %v685_v34 = vrot.slane %v683_v22, 4  ;;  %v840_v38 = vld [vmem:[%s4579_s20 + $0x8] sm:$0xf]  ;;  %vm3225_vm9 = vcmask 257248  }
  0x4a   : > { %729 = vrot.lane.b32.xlu0 %v522_v55, %s4529_s21  ;;  %v635_v55 = vrot.slane %v633_v43, 4  ;;  %v671_v7 = vrot.slane %v669_v60, 5  ;;  %v656_v25 = vor.u32 %v655_v16, %v651_v10  ;;  %v689_v43 = vshll.u32 %v325_v36, 16  ;;  %v841_v48 = vld [vmem:[%s4579_s20 + $0xc] sm:$0xf] }
  0x4b   : > { %v646_v62 = vor.u32 %v645_v51, %v641_v50  ;;  %v686_v42 = vor.u32 %v685_v34, %v681_v27  ;;  %v919_v44 = vrot.slane %v917_v35, 4  ;;  %v221_v49 = vld [vmem:[%s4579_s20 + $0x14] sm:$0xf]  ;;  %v219_v51 = vld [vmem:[%s4579_s20 + $0xc] sm:$0xf]  ;;  %v923_v58 = vrot.slane %v841_v48, 5 }
  0x4c   : > { %v636_v3 = vor.u32 %v635_v55, %v631_v54  ;;  %v676_v17 = vor.u32 %v675_v8, %v671_v7  ;;  %v657_v33 = vrot.slane %v656_v25, 4  ;;  %258 = vst.msk [vmem:[#allocation2 + $0x14] sm:$0xf] %vm252_vm3, %v221_v49  ;;  %v217_v52 = vld [vmem:[%s4579_s20 + $0x4] sm:$0xf]  ;;  %v926_v55 = vrot.slane %v842_v47, 5 }
  0x4d   : > { %v647_v9 = vrot.slane %v646_v62, 4  ;;  %v687_v53 = vrot.slane %v686_v42, 4  ;;  %256 = vst.msk [vmem:[#allocation2 + $0xc] sm:$0xf] %vm252_vm3, %v219_v51  ;;  %v843_v57 = vld [vmem:[%s4579_s20 + $0x14] sm:$0xf] }
  0x4e   : > { %v637_v14 = vrot.slane %v636_v3, 4  ;;  %v677_v26 = vrot.slane %v676_v17, 4  ;;  %254 = vst.msk [vmem:[#allocation2 + $0x4] sm:$0xf] %vm252_vm3, %v217_v52  ;;  %v928_v61 = vrot.slane %v926_v55, 4  ;;  %v929_v62 = vrot.slane %v843_v57, 5 }
  0x4f   : > { %v652_v19 = vsel %vm4589_vm2, %v647_v9, %v651_v10  ;;  %v845_v63 = vld [vmem:[%s4579_s20 + $0x1c] sm:$0xf]  ;;  %v844_v1 = vld [vmem:[%s4579_s20 + $0x18] sm:$0xf]  ;;  %v846_v9 = vld [vmem:[%s4579_s20 + $0x20] sm:$0xf] }
  0x50   : > { %733 = vrot.lane.b32.xlu2 %v542_v20, %s4529_s21  ;;  %v642_v21 = vsel %vm4589_vm2, %v637_v14, %v641_v50  ;;  %v223_v3 = vld [vmem:[%s4579_s20 + $0x1c] sm:$0xf]  ;;  %v930_v8 = vsel %vm4740_vm6, %v928_v61, %v929_v62  ;;  %v847_v16 = vld [vmem:[%s4579_s20 + $0x24] sm:$0xf]  ;;  %v227_v17 = vld [vmem:[%s4579_s20 + $0x2c] sm:$0xf] }
  0x51   : > { %737 = vrot.lane.b32.xlu1 %v562_v12, %s4529_s21  ;;  %v661_v12 = vrot.slane %v659_v0, 5  ;;  %v925_v0 = vrot.slane %v923_v58, 4  ;;  %260 = vst.msk [vmem:[#allocation2 + $0x1c] sm:$0xf] %vm252_vm3, %v223_v3  ;;  %v226_v18 = vld [vmem:[%s4579_s20 + $0x28] sm:$0xf] }
  0x52   : > { %735 = vrot.lane.b32.xlu0 %v552_v15, %s4529_s21  ;;  %v627_v15 = vrot.slane %v626_v6, 4  ;;  %v932_v6 = vrot.slane %v844_v1, 5  ;;  %264 = vst.msk [vmem:[#allocation2 + $0x2c] sm:$0xf] %vm252_vm3, %v227_v17  ;;  %v941_v25 = vrot.slane %v847_v16, 5  ;;  %vm3556_vm10 = vcmask 290048  }
  0x53   : > { %v666_v20 = vor.u32 %v665_v13, %v661_v12  ;;  %v662_v41 = vsel %vm4589_vm2, %v657_v33, %v661_v12  ;;  %v927_v10 = vsel %vm4740_vm6, %v925_v0, %v926_v55  ;;  %v938_v13 = vrot.slane %v846_v9, 5  ;;  %263 = vst.msk [vmem:[#allocation2 + $0x28] sm:$0xf] %vm252_vm3, %v226_v18  ;;  %v230_v32 = vld [vmem:[%s4579_s20 + $0x38] sm:$0xf] }
  0x54   : > { %v632_v23 = vsel %vm4589_vm2, %v627_v15, %v631_v54  ;;  %v691_v54 = vrot.slane %v689_v43, 5  ;;  %v934_v14 = vrot.slane %v932_v6, 4  ;;  %v848_v15 = vld [vmem:[%s4579_s20 + $0x28] sm:$0xf]  ;;  %v943_v31 = vrot.slane %v941_v25, 4 }
  0x55   : > { %v667_v28 = vrot.slane %v666_v20, 4  ;;  %v931_v20 = vrot.slane %v929_v62, 4  ;;  %v851_v34 = vld [vmem:[%s4579_s20 + $0x34] sm:$0xf]  ;;  %267 = vst.msk [vmem:[#allocation2 + $0x38] sm:$0xf] %vm252_vm3, %v230_v32 }
  0x56   : > { %v692_v60 = vsel %vm4589_vm2, %v687_v53, %v691_v54  ;;  %v953_v42 = vrot.slane %v851_v34, 5  ;;  %v233_v51 = vld [vmem:[%s4579_s20 + $0x44] sm:$0xf]  ;;  %v854_v53 = vld [vmem:[%s4579_s20 + $0x40] sm:$0xf] }
  0x57   : > { %v853_v54 = vld [vmem:[%s4579_s20 + $0x3c] sm:$0xf]  ;;  %270 = vst.msk [vmem:[#allocation2 + $0x44] sm:$0xf] %vm252_vm3, %v233_v51  ;;  %v232_v57 = vld [vmem:[%s4579_s20 + $0x40] sm:$0xf] }
  0x58   : > { %739 = vrot.lane.b32.xlu2 %v572_v45, %s4529_s21  ;;  %v920_v45 = vrot.slane %v840_v38, 5  ;;  %v229_v38 = vld [vmem:[%s4579_s20 + $0x34] sm:$0xf]  ;;  %v955_v47 = vrot.slane %v953_v42, 4  ;;  %v962_v61 = vrot.slane %v854_v53, 5  ;;  %v959_v62 = vrot.slane %v853_v54, 5 }
  0x59   : > { %743 = vrot.lane.b32.xlu1 %v592_v37, %s4529_s21  ;;  %v682_v37 = vsel %vm4589_vm2, %v677_v26, %v681_v27  ;;  %v849_v27 = vld [vmem:[%s4579_s20 + $0x2c] sm:$0xf]  ;;  %266 = vst.msk [vmem:[#allocation2 + $0x34] sm:$0xf] %vm252_vm3, %v229_v38  ;;  %v855_v0 = vld [vmem:[%s4579_s20 + $0x44] sm:$0xf] }
  0x5a   : > { %741 = vrot.lane.b32.xlu0 %v582_v40, %s4529_s21  ;;  %v672_v40 = vsel %vm4589_vm2, %v667_v28, %v671_v7  ;;  %v921_v56 = vsel %vm4740_vm6, %v919_v44, %v920_v45  ;;  %v922_v4 = vrot.slane %v920_v45, 4  ;;  %v933_v28 = vsel %vm4740_vm6, %v931_v20, %v932_v6  ;;  %v852_v45 = vld [vmem:[%s4579_s20 + $0x38] sm:$0xf]  ;;  %269 = vst.msk [vmem:[#allocation2 + $0x40] sm:$0xf] %vm252_vm3, %v232_v57  ;;  %vm5328_vm2 = vmor %vm2746_vm0, %vm2747_vm1 }
  0x5b   : > { %v947_v30 = vrot.slane %v849_v27, 5  ;;  %v956_v48 = vrot.slane %v852_v45, 5  ;;  %v965_v3 = vrot.slane %v855_v0, 5  ;;  %v961_v24 = vrot.slane %v959_v62, 4  ;;  %v857_v6 = vld [vmem:[%s4579_s20 + $0x4c] sm:$0xf] }
  0x5c   : > { %v924_v11 = vsel %vm4740_vm6, %v922_v4, %v923_v58  ;;  %v236_v4 = vld [vmem:[%s4579_s20 + $0x50] sm:$0xf] }
  0x5d   : > { %273 = vst.msk [vmem:[#allocation2 + $0x50] sm:$0xf] %vm252_vm3, %v236_v4  ;;  %v958_v9 = vrot.slane %v956_v48, 4  ;;  %v963_v16 = vsel %vm4740_vm6, %v961_v24, %v962_v61  ;;  %v858_v17 = vld [vmem:[%s4579_s20 + $0x50] sm:$0xf] }
  0x5e   : > { %v974_v20 = vrot.slane %v858_v17, 5  ;;  %v243_v24 = vld [vmem:[%s4579_s20 + $0x6c] sm:$0xf] }
  0x5f   : > { %v960_v18 = vsel %vm4740_vm6, %v958_v9, %v959_v62  ;;  %v866_v62 = vld [vmem:[%s4579_s20 + $0x70] sm:$0xf]  ;;  %280 = vst.msk [vmem:[#allocation2 + $0x6c] sm:$0xf] %vm252_vm3, %v243_v24 }
  0x60   : > { %745 = vrot.lane.b32.xlu2 %v602_v5, %s4529_s21  ;;  %v935_v5 = vrot.slane %v845_v63, 5 }
  0x61   : > { %749 = vrot.lane.b32.xlu1 %v622_v59, %s4529_s21  ;;  %v918_v59 = vsel %vm4740_vm6, %v4360_v46, %v917_v35  ;;  %v850_v35 = vld [vmem:[%s4579_s20 + $0x30] sm:$0xf] }
  0x62   : > { %747 = vrot.lane.b32.xlu0 %v612_v2, %s4529_s21  ;;  %v224_v2 = vld [vmem:[%s4579_s20 + $0x20] sm:$0xf]  ;;  %v937_v12 = vrot.slane %v935_v5, 4  ;;  %v936_v26 = vsel %vm4740_vm6, %v934_v14, %v935_v5  ;;  %v950_v43 = vrot.slane %v850_v35, 5  ;;  %v971_v14 = vrot.slane %v857_v6, 5 }
  0x63   : > { %261 = vst.msk [vmem:[#allocation2 + $0x20] sm:$0xf] %vm252_vm3, %v224_v2  ;;  %v964_v2 = vrot.slane %v962_v61, 4 }
  0x64   : > { %v939_v22 = vsel %vm4740_vm6, %v937_v12, %v938_v13  ;;  %v952_v49 = vrot.slane %v950_v43, 4  ;;  %v234_v12 = vld [vmem:[%s4579_s20 + $0x48] sm:$0xf] }
  0x65   : > { %271 = vst.msk [vmem:[#allocation2 + $0x48] sm:$0xf] %vm252_vm3, %v234_v12 }
  0x66   : > { %v954_v63 = vsel %vm4740_vm6, %v952_v49, %v953_v42  ;;  %v240_v49 = vld [vmem:[%s4579_s20 + $0x60] sm:$0xf] }
  0x67   : > { %277 = vst.msk [vmem:[#allocation2 + $0x60] sm:$0xf] %vm252_vm3, %v240_v49 }
  0x68   : > { %751 = vrot.lane.b32.xlu2 %v632_v23, %s4529_s21  ;;  %v944_v23 = vrot.slane %v848_v15, 5 }
  0x69   : > { %755 = vrot.lane.b32.xlu1 %v652_v19, %s4529_s21  ;;  %v225_v19 = vld [vmem:[%s4579_s20 + $0x24] sm:$0xf] }
  0x6a   : > { %753 = vrot.lane.b32.xlu0 %v642_v21, %s4529_s21  ;;  %262 = vst.msk [vmem:[#allocation2 + $0x24] sm:$0xf] %vm252_vm3, %v225_v19  ;;  %v946_v29 = vrot.slane %v944_v23, 4  ;;  %v945_v44 = vsel %vm4740_vm6, %v943_v31, %v944_v23  ;;  %v973_v19 = vrot.slane %v971_v14, 4  ;;  %v237_v31 = vld [vmem:[%s4579_s20 + $0x54] sm:$0xf] }
  0x6b   : > { %274 = vst.msk [vmem:[#allocation2 + $0x54] sm:$0xf] %vm252_vm3, %v237_v31 }
  0x6c   : > { %v975_v32 = vsel %vm4740_vm6, %v973_v19, %v974_v20  ;;  %v247_v19 = vld [vmem:[%s4579_s20 + $0x7c] sm:$0xf] }
  0x6d   : > { %284 = vst.msk [vmem:[#allocation2 + $0x7c] sm:$0xf] %vm252_vm3, %v247_v19 }
  0x70   : > { %757 = vrot.lane.b32.xlu2 %v662_v41, %s4529_s21  ;;  %v948_v41 = vsel %vm4740_vm6, %v946_v29, %v947_v30  ;;  %v238_v29 = vld [vmem:[%s4579_s20 + $0x58] sm:$0xf] }
  0x71   : > { %761 = vrot.lane.b32.xlu1 %v682_v37, %s4529_s21  ;;  %v940_v37 = vrot.slane %v938_v13, 4  ;;  %v966_v13 = vsel %vm4740_vm6, %v964_v2, %v965_v3  ;;  %275 = vst.msk [vmem:[#allocation2 + $0x58] sm:$0xf] %vm252_vm3, %v238_v29  ;;  %v244_v2 = vld [vmem:[%s4579_s20 + $0x70] sm:$0xf] }
  0x72   : > { %759 = vrot.lane.b32.xlu0 %v672_v40, %s4529_s21  ;;  %v228_v40 = vld [vmem:[%s4579_s20 + $0x30] sm:$0xf]  ;;  %281 = vst.msk [vmem:[#allocation2 + $0x70] sm:$0xf] %vm252_vm3, %v244_v2 }
  0x73   : > { %v942_v46 = vsel %vm4740_vm6, %v940_v37, %v941_v25  ;;  %265 = vst.msk [vmem:[#allocation2 + $0x30] sm:$0xf] %vm252_vm3, %v228_v40  ;;  %v860_v25 = vld [vmem:[%s4579_s20 + $0x58] sm:$0xf] }
  0x78   : > { %763 = vrot.lane.b32.xlu2 %v692_v60, %s4529_s21  ;;  %v957_v60 = vsel %vm4740_vm6, %v955_v47, %v956_v48  ;;  %v241_v47 = vld [vmem:[%s4579_s20 + $0x64] sm:$0xf] }
  0x79   : > { %1026 = vrot.lane.b32.xlu1 %v921_v56, %s4530_s22  ;;  %v949_v56 = vrot.slane %v947_v30, 4  ;;  %278 = vst.msk [vmem:[#allocation2 + $0x64] sm:$0xf] %vm252_vm3, %v241_v47 }
  0x7a   : > { %1024 = vrot.lane.b32.xlu0 %v918_v59, %s4530_s22  ;;  %v702_v7 = vpop.permute.xlu2 %701  ;;  %v231_v59 = vld [vmem:[%s4579_s20 + $0x3c] sm:$0xf] }
  0x7b   : > { %806 = vst.msk [vmem:[#allocation2 + $0x10] sm:$0xf] %vm801_vm7, %v702_v7  ;;  %v951_v1 = vsel %vm4740_vm6, %v949_v56, %v950_v43  ;;  %v856_v7 = vld [vmem:[%s4579_s20 + $0x48] sm:$0xf]  ;;  %v863_v43 = vld [vmem:[%s4579_s20 + $0x64] sm:$0xf] }
  0x7c   : > { %268 = vst.msk [vmem:[#allocation2 + $0x3c] sm:$0xf] %vm252_vm3, %v231_v59  ;;  %v968_v15 = vrot.slane %v856_v7, 5 }
  0x80   : > { %1028 = vrot.lane.b32.xlu2 %v924_v11, %s4530_s22 }
  0x81   : > { %1032 = vrot.lane.b32.xlu1 %v930_v8, %s4530_s22 }
  0x82   : > { %1030 = vrot.lane.b32.xlu0 %v927_v10, %s4530_s22  ;;  %v704_v21 = vpop.permute.xlu2 %703  ;;  %v235_v10 = vld [vmem:[%s4579_s20 + $0x4c] sm:$0xf] }
  0x83   : > { %807 = vst.msk [vmem:[#allocation2 + $0x14] sm:$0xf] %vm801_vm7, %v704_v21  ;;  %v970_v21 = vrot.slane %v968_v15, 4 }
  0x84   : > { %272 = vst.msk [vmem:[#allocation2 + $0x4c] sm:$0xf] %vm252_vm3, %v235_v10 }
  0x85   : > { %v972_v35 = vsel %vm4740_vm6, %v970_v21, %v971_v14  ;;  %v246_v21 = vld [vmem:[%s4579_s20 + $0x78] sm:$0xf] }
  0x86   : > { %283 = vst.msk [vmem:[#allocation2 + $0x78] sm:$0xf] %vm252_vm3, %v246_v21 }
  0x88   : > { %1034 = vrot.lane.b32.xlu2 %v933_v28, %s4530_s22  ;;  %v967_v28 = vrot.slane %v965_v3, 4 }
  0x89   : > { %1038 = vrot.lane.b32.xlu1 %v939_v22, %s4530_s22  ;;  %v239_v22 = vld [vmem:[%s4579_s20 + $0x5c] sm:$0xf] }
  0x8a   : > { %1036 = vrot.lane.b32.xlu0 %v936_v26, %s4530_s22  ;;  %v710_v39 = vpop.permute.xlu2 %709  ;;  %v859_v26 = vld [vmem:[%s4579_s20 + $0x54] sm:$0xf]  ;;  %276 = vst.msk [vmem:[#allocation2 + $0x5c] sm:$0xf] %vm252_vm3, %v239_v22  ;;  %v969_v37 = vsel %vm4740_vm6, %v967_v28, %v968_v15  ;;  %v869_v15 = vld [vmem:[%s4579_s20 + $0x7c] sm:$0xf] }
  0x8b   : > { %v698_v33 = vpop.permute.xlu1 %697  ;;  %810 = vst.msk [vmem:[#allocation2 + $0x20] sm:$0xf] %vm801_vm7, %v710_v39  ;;  %v977_v34 = vrot.slane %v859_v26, 5 }
  0x8c   : > { %804 = vst.msk [vmem:[#allocation2 + $0x8] sm:$0xf] %vm801_vm7, %v698_v33  ;;  %v694_v36 = vpop.permute.xlu0 %693  ;;  %v980_v33 = vrot.slane %v860_v25, 5 }
  0x8d   : > { %802 = vst.msk [vmem:[#allocation2] sm:$0xf] %vm801_vm7, %v694_v36  ;;  %v861_v36 = vld [vmem:[%s4579_s20 + $0x5c] sm:$0xf]  ;;  %v979_v40 = vrot.slane %v977_v34, 4 }
  0x8e   : > { %v982_v38 = vrot.slane %v980_v33, 4  ;;  %v983_v39 = vrot.slane %v861_v36, 5 }
  0x8f   : > { %v981_v54 = vsel %vm4740_vm6, %v979_v40, %v980_v33  ;;  %v249_v40 = vld [vmem:[%s4579_s20 + $0x84] sm:$0xf] }
  0x90   : > { %1040 = vrot.lane.b32.xlu2 %v942_v46, %s4530_s22  ;;  %v976_v46 = vrot.slane %v974_v20, 4  ;;  %v984_v51 = vsel %vm4740_vm6, %v982_v38, %v983_v39  ;;  %v250_v38 = vld [vmem:[%s4579_s20 + $0x88] sm:$0xf]  ;;  %286 = vst.msk [vmem:[#allocation2 + $0x84] sm:$0xf] %vm252_vm3, %v249_v40 }
  0x91   : > { %1044 = vrot.lane.b32.xlu1 %v948_v41, %s4530_s22  ;;  %v242_v41 = vld [vmem:[%s4579_s20 + $0x68] sm:$0xf]  ;;  %287 = vst.msk [vmem:[#allocation2 + $0x88] sm:$0xf] %vm252_vm3, %v250_v38 }
  0x92   : > { %1042 = vrot.lane.b32.xlu0 %v945_v44, %s4530_s22  ;;  %v716_v58 = vpop.permute.xlu2 %715  ;;  %v862_v44 = vld [vmem:[%s4579_s20 + $0x60] sm:$0xf]  ;;  %279 = vst.msk [vmem:[#allocation2 + $0x68] sm:$0xf] %vm252_vm3, %v242_v41  ;;  %v978_v56 = vsel %vm4740_vm6, %v976_v46, %v977_v34  ;;  %v872_v34 = vld [vmem:[%s4579_s20 + $0x88] sm:$0xf] }
  0x93   : > { %v700_v52 = vpop.permute.xlu1 %699  ;;  %813 = vst.msk [vmem:[#allocation2 + $0x2c] sm:$0xf] %vm801_vm7, %v716_v58  ;;  %v986_v53 = vrot.slane %v862_v44, 5  ;;  %v873_v44 = vld [vmem:[%s4579_s20 + $0x8c] sm:$0xf] }
  0x94   : > { %805 = vst.msk [vmem:[#allocation2 + $0xc] sm:$0xf] %vm801_vm7, %v700_v52  ;;  %v696_v55 = vpop.permute.xlu0 %695  ;;  %v989_v52 = vrot.slane %v863_v43, 5 }
  0x95   : > { %803 = vst.msk [vmem:[#allocation2 + $0x4] sm:$0xf] %vm801_vm7, %v696_v55  ;;  %v864_v55 = vld [vmem:[%s4579_s20 + $0x68] sm:$0xf]  ;;  %v988_v59 = vrot.slane %v986_v53, 4 }
  0x96   : > { %v991_v57 = vrot.slane %v989_v52, 4  ;;  %v992_v58 = vrot.slane %v864_v55, 5 }
  0x97   : > { %v990_v7 = vsel %vm4740_vm6, %v988_v59, %v989_v52  ;;  %v1170_v52 = vld [vmem:[%s4579_s20 + $0xc] sm:$0xf]  ;;  %v1171_v59 = vld [vmem:[%s4579_s20 + $0x10] sm:$0xf] }
  0x98   : > { %1046 = vrot.lane.b32.xlu2 %v951_v1, %s4530_s22  ;;  %v985_v1 = vrot.slane %v983_v39, 4  ;;  %v993_v4 = vsel %vm4740_vm6, %v991_v57, %v992_v58  ;;  %v1245_v57 = vrot.slane %v1170_v52, 5  ;;  %v1181_v52 = vld [vmem:[%s4579_s20 + $0x38] sm:$0xf] }
  0x99   : > { %1050 = vrot.lane.b32.xlu1 %v957_v60, %s4530_s22  ;;  %v245_v60 = vld [vmem:[%s4579_s20 + $0x74] sm:$0xf] }
  0x9a   : > { %1048 = vrot.lane.b32.xlu0 %v954_v63, %s4530_s22  ;;  %v722_v11 = vpop.permute.xlu2 %721  ;;  %v865_v63 = vld [vmem:[%s4579_s20 + $0x6c] sm:$0xf]  ;;  %282 = vst.msk [vmem:[#allocation2 + $0x74] sm:$0xf] %vm252_vm3, %v245_v60  ;;  %v987_v9 = vsel %vm4740_vm6, %v985_v1, %v986_v53  ;;  %v1169_v60 = vld [vmem:[%s4579_s20 + $0x8] sm:$0xe] }
  0x9b   : > { %v708_v5 = vpop.permute.xlu1 %707  ;;  %816 = vst.msk [vmem:[#allocation2 + $0x38] sm:$0xf] %vm801_vm7, %v722_v11  ;;  %v995_v6 = vrot.slane %v865_v63, 5  ;;  %v1247_v63 = vrot.slane %v1245_v57, 4  ;;  %v4361_v2 = vrot.slane %v1169_v60, 9 }
  0x9c   : > { %809 = vst.msk [vmem:[#allocation2 + $0x1c] sm:$0xf] %vm801_vm7, %v708_v5  ;;  %v706_v8 = vpop.permute.xlu0 %705  ;;  %v998_v5 = vrot.slane %v866_v62, 5  ;;  %v874_v62 = vld [vmem:[%s4579_s20 + $0x90] sm:$0x1] }
  0x9d   : > { %808 = vst.msk [vmem:[#allocation2 + $0x18] sm:$0xf] %vm801_vm7, %v706_v8  ;;  %v867_v8 = vld [vmem:[%s4579_s20 + $0x74] sm:$0xf]  ;;  %v997_v12 = vrot.slane %v995_v6, 4 }
  0x9e   : > { %v1000_v10 = vrot.slane %v998_v5, 4  ;;  %v1001_v11 = vrot.slane %v867_v8, 5 }
  0x9f   : > { %v999_v26 = vsel %vm4740_vm6, %v997_v12, %v998_v5 }
  0xa0   : > { %1052 = vrot.lane.b32.xlu2 %v960_v18, %s4530_s22  ;;  %v994_v18 = vrot.slane %v992_v58, 4  ;;  %v1002_v22 = vsel %vm4740_vm6, %v1000_v10, %v1001_v11  ;;  %v1246_v10 = vsel %vm4740_vm6, %v4361_v2, %v1245_v57 }
  0xa1   : > { %1056 = vrot.lane.b32.xlu1 %v966_v13, %s4530_s22  ;;  %v248_v13 = vld [vmem:[%s4579_s20 + $0x80] sm:$0xf] }
  0xa2   : > { %1054 = vrot.lane.b32.xlu0 %v963_v16, %s4530_s22  ;;  %v728_v30 = vpop.permute.xlu2 %727  ;;  %v868_v16 = vld [vmem:[%s4579_s20 + $0x78] sm:$0xf]  ;;  %285 = vst.msk [vmem:[#allocation2 + $0x80] sm:$0xf] %vm252_vm3, %v248_v13  ;;  %v996_v28 = vsel %vm4740_vm6, %v994_v18, %v995_v6  ;;  %v1022_v6 = vrot.slane %v874_v62, 5 }
  0xa3   : > { %v714_v23 = vpop.permute.xlu1 %713  ;;  %819 = vst.msk [vmem:[#allocation2 + $0x44] sm:$0xf] %vm801_vm7, %v728_v30  ;;  %v1004_v25 = vrot.slane %v868_v16, 5  ;;  %v1176_v18 = vld [vmem:[%s4579_s20 + $0x24] sm:$0xf] }
  0xa4   : > { %812 = vst.msk [vmem:[#allocation2 + $0x28] sm:$0xf] %vm801_vm7, %v714_v23  ;;  %v712_v27 = vpop.permute.xlu0 %711  ;;  %v1007_v23 = vrot.slane %v869_v15, 5 }
  0xa5   : > { %811 = vst.msk [vmem:[#allocation2 + $0x24] sm:$0xf] %vm801_vm7, %v712_v27  ;;  %v870_v27 = vld [vmem:[%s4579_s20 + $0x80] sm:$0xf]  ;;  %v1006_v31 = vrot.slane %v1004_v25, 4 }
  0xa6   : > { %v1009_v29 = vrot.slane %v1007_v23, 4  ;;  %v1010_v30 = vrot.slane %v870_v27, 5  ;;  %v1177_v27 = vld [vmem:[%s4579_s20 + $0x28] sm:$0xf] }
  0xa7   : > { %v1008_v43 = vsel %vm4740_vm6, %v1006_v31, %v1007_v23  ;;  %v1266_v31 = vrot.slane %v1177_v27, 5 }
  0xa8   : > { %1058 = vrot.lane.b32.xlu2 %v969_v37, %s4530_s22  ;;  %v1003_v37 = vrot.slane %v1001_v11, 4  ;;  %v1011_v41 = vsel %vm4740_vm6, %v1009_v29, %v1010_v30  ;;  %v1174_v11 = vld [vmem:[%s4579_s20 + $0x1c] sm:$0xf] }
  0xa9   : > { %1062 = vrot.lane.b32.xlu1 %v975_v32, %s4530_s22  ;;  %v251_v32 = vld [vmem:[%s4579_s20 + $0x8c] sm:$0xf]  ;;  %v1257_v15 = vrot.slane %v1174_v11, 5 }
  0xaa   : > { %1060 = vrot.lane.b32.xlu0 %v972_v35, %s4530_s22  ;;  %v734_v48 = vpop.permute.xlu2 %733  ;;  %v871_v35 = vld [vmem:[%s4579_s20 + $0x84] sm:$0xf]  ;;  %288 = vst.msk [vmem:[#allocation2 + $0x8c] sm:$0xf] %vm252_vm3, %v251_v32  ;;  %v1005_v46 = vsel %vm4740_vm6, %v1003_v37, %v1004_v25  ;;  %v1263_v25 = vrot.slane %v1176_v18, 5  ;;  %vm3336_vm3 = vcmask 1040384  }
  0xab   : > { %v720_v42 = vpop.permute.xlu1 %719  ;;  %822 = vst.msk [vmem:[#allocation2 + $0x50] sm:$0xf] %vm801_vm7, %v734_v48  ;;  %v1019_v48 = vrot.slane %v873_v44, 5  ;;  %v1259_v37 = vrot.slane %v1257_v15, 4  ;;  %vm5353_vm5 = vmor %vm3336_vm3, %vm3337_vm4 }
  0xac   : > { %815 = vst.msk [vmem:[#allocation2 + $0x34] sm:$0xf] %vm801_vm7, %v720_v42  ;;  %v718_v45 = vpop.permute.xlu0 %717  ;;  %v1016_v42 = vrot.slane %v872_v34, 5  ;;  %v1179_v34 = vld [vmem:[%s4579_s20 + $0x30] sm:$0xf] }
  0xad   : > { %814 = vst.msk [vmem:[#allocation2 + $0x30] sm:$0xf] %vm801_vm7, %v718_v45  ;;  %v1013_v45 = vrot.slane %v871_v35, 5  ;;  %v1021_v5 = vrot.slane %v1019_v48, 4  ;;  %v1272_v40 = vrot.slane %v1179_v34, 5 }
  0xae   : > { %v1018_v47 = vrot.slane %v1016_v42, 4 }
  0xaf   : > { %v1023_v13 = vsel %vm4740_vm6, %v1021_v5, %v1022_v6 }
  0xb0   : > { %1064 = vrot.lane.b32.xlu2 %v978_v56, %s4530_s22  ;;  %v1020_v56 = vsel %vm4740_vm6, %v1018_v47, %v1019_v48 }
  0xb1   : > { %1068 = vrot.lane.b32.xlu1 %v984_v51, %s4530_s22  ;;  %v1015_v51 = vrot.slane %v1013_v45, 4 }
  0xb2   : > { %1066 = vrot.lane.b32.xlu0 %v981_v54, %s4530_s22  ;;  %v740_v3 = vpop.permute.xlu2 %739  ;;  %v1012_v54 = vrot.slane %v1010_v30, 4  ;;  %v1265_v30 = vrot.slane %v1263_v25, 4 }
  0xb3   : > { %v726_v61 = vpop.permute.xlu1 %725  ;;  %825 = vst.msk [vmem:[#allocation2 + $0x5c] sm:$0xf] %vm801_vm7, %v740_v3  ;;  %v1017_v58 = vsel %vm4740_vm6, %v1015_v51, %v1016_v42  ;;  %v1173_v3 = vld [vmem:[%s4579_s20 + $0x18] sm:$0xf]  ;;  %v1180_v42 = vld [vmem:[%s4579_s20 + $0x34] sm:$0xf] }
  0xb4   : > { %818 = vst.msk [vmem:[#allocation2 + $0x40] sm:$0xf] %vm801_vm7, %v726_v61  ;;  %v724_v0 = vpop.permute.xlu0 %723  ;;  %v1014_v61 = vsel %vm4740_vm6, %v1012_v54, %v1013_v45  ;;  %v1274_v45 = vrot.slane %v1272_v40, 4 }
  0xb5   : > { %817 = vst.msk [vmem:[#allocation2 + $0x3c] sm:$0xf] %vm801_vm7, %v724_v0  ;;  %v1248_v0 = vrot.slane %v1171_v59, 5  ;;  %v1278_v59 = vrot.slane %v1181_v52, 5 }
  0xb7   : > { %v1249_v8 = vsel %vm4740_vm6, %v1247_v63, %v1248_v0  ;;  %v1250_v21 = vrot.slane %v1248_v0, 4  ;;  %v1280_v0 = vrot.slane %v1278_v59, 4 }
  0xb8   : > { %1070 = vrot.lane.b32.xlu2 %v987_v9, %s4530_s22  ;;  %v1254_v9 = vrot.slane %v1173_v3, 5  ;;  %v1184_v3 = vld [vmem:[%s4579_s20 + $0x44] sm:$0xf] }
  0xb9   : > { %1074 = vrot.lane.b32.xlu1 %v993_v4, %s4530_s22  ;;  %v1172_v4 = vld [vmem:[%s4579_s20 + $0x14] sm:$0xf] }
  0xba   : > { %1072 = vrot.lane.b32.xlu0 %v990_v7, %s4530_s22  ;;  %v746_v20 = vpop.permute.xlu2 %745  ;;  %v1251_v12 = vrot.slane %v1172_v4, 5 }
  0xbb   : > { %v732_v14 = vpop.permute.xlu1 %731  ;;  %828 = vst.msk [vmem:[#allocation2 + $0x68] sm:$0xf] %vm801_vm7, %v746_v20  ;;  %v1175_v20 = vld [vmem:[%s4579_s20 + $0x20] sm:$0xf] }
  0xbc   : > { %821 = vst.msk [vmem:[#allocation2 + $0x4c] sm:$0xf] %vm801_vm7, %v732_v14  ;;  %v730_v17 = vpop.permute.xlu0 %729  ;;  %v1256_v14 = vrot.slane %v1254_v9, 4  ;;  %v1252_v29 = vsel %vm4740_vm6, %v1250_v21, %v1251_v12 }
  0xbd   : > { %820 = vst.msk [vmem:[#allocation2 + $0x48] sm:$0xf] %vm801_vm7, %v730_v17  ;;  %v1253_v17 = vrot.slane %v1251_v12, 4 }
  0xbe   : > { %v1258_v23 = vsel %vm4740_vm6, %v1256_v14, %v1257_v15  ;;  %v1188_v15 = vld [vmem:[%s4579_s20 + $0x54] sm:$0xf] }
  0xbf   : > { %v1299_v21 = vrot.slane %v1188_v15, 5 }
  0xc0   : > { %1076 = vrot.lane.b32.xlu2 %v996_v28, %s4530_s22  ;;  %v1260_v28 = vrot.slane %v1175_v20, 5 }
  0xc1   : > { %1080 = vrot.lane.b32.xlu1 %v1002_v22, %s4530_s22  ;;  %v1301_v27 = vrot.slane %v1299_v21, 4 }
  0xc2   : > { %1078 = vrot.lane.b32.xlu0 %v999_v26, %s4530_s22  ;;  %v752_v39 = vpop.permute.xlu2 %751  ;;  %v1255_v26 = vsel %vm4740_vm6, %v1253_v17, %v1254_v9  ;;  %v1261_v44 = vsel %vm4740_vm6, %v1259_v37, %v1260_v28  ;;  %v1287_v9 = vrot.slane %v1184_v3, 5  ;;  %v1187_v17 = vld [vmem:[%s4579_s20 + $0x50] sm:$0xf] }
  0xc3   : > { %v738_v33 = vpop.permute.xlu1 %737  ;;  %831 = vst.msk [vmem:[#allocation2 + $0x74] sm:$0xf] %vm801_vm7, %v752_v39  ;;  %v1267_v39 = vsel %vm4740_vm6, %v1265_v30, %v1266_v31 }
  0xc4   : > { %824 = vst.msk [vmem:[#allocation2 + $0x58] sm:$0xf] %vm801_vm7, %v738_v33  ;;  %v736_v36 = vpop.permute.xlu0 %735  ;;  %v1262_v33 = vrot.slane %v1260_v28, 4  ;;  %v1289_v14 = vrot.slane %v1287_v9, 4 }
  0xc5   : > { %823 = vst.msk [vmem:[#allocation2 + $0x54] sm:$0xf] %vm801_vm7, %v736_v36  ;;  %v1178_v36 = vld [vmem:[%s4579_s20 + $0x2c] sm:$0xf] }
  0xc8   : > { %1082 = vrot.lane.b32.xlu2 %v1005_v46, %s4530_s22  ;;  %v1275_v46 = vrot.slane %v1180_v42, 5 }
  0xc9   : > { %1086 = vrot.lane.b32.xlu1 %v1011_v41, %s4530_s22  ;;  %v1264_v41 = vsel %vm4740_vm6, %v1262_v33, %v1263_v25  ;;  %v1296_v25 = vrot.slane %v1187_v17, 5  ;;  %v1190_v33 = vld [vmem:[%s4579_s20 + $0x5c] sm:$0xf] }
  0xca   : > { %1084 = vrot.lane.b32.xlu0 %v1008_v43, %s4530_s22  ;;  %v758_v55 = vpop.permute.xlu2 %757  ;;  %v1269_v43 = vrot.slane %v1178_v36, 5 }
  0xcb   : > { %v744_v49 = vpop.permute.xlu1 %743  ;;  %834 = vst.msk [vmem:[#allocation2 + $0x80] sm:$0xf] %vm801_vm7, %v758_v55  ;;  %v1276_v55 = vsel %vm4740_vm6, %v1274_v45, %v1275_v46  ;;  %v1298_v30 = vrot.slane %v1296_v25, 4 }
  0xcc   : > { %827 = vst.msk [vmem:[#allocation2 + $0x64] sm:$0xf] %vm801_vm7, %v744_v49  ;;  %v742_v53 = vpop.permute.xlu0 %741  ;;  %v1271_v48 = vrot.slane %v1269_v43, 4  ;;  %v1182_v49 = vld [vmem:[%s4579_s20 + $0x3c] sm:$0xf] }
  0xcd   : > { %826 = vst.msk [vmem:[#allocation2 + $0x60] sm:$0xf] %vm801_vm7, %v742_v53  ;;  %v1268_v53 = vrot.slane %v1266_v31, 4  ;;  %v1191_v31 = vld [vmem:[%s4579_s20 + $0x60] sm:$0xf] }
  0xce   : > { %v1273_v57 = vsel %vm4740_vm6, %v1271_v48, %v1272_v40  ;;  %v1308_v37 = vrot.slane %v1191_v31, 5  ;;  %v1305_v40 = vrot.slane %v1190_v33, 5  ;;  %v1193_v48 = vld [vmem:[%s4579_s20 + $0x68] sm:$0xf] }
  0xcf   : > { %v1270_v60 = vsel %vm4740_vm6, %v1268_v53, %v1269_v43  ;;  %v1497_v33 = vld [vmem:[%s4579_s20 + $0x8] sm:$0xe] }
  0xd0   : > { %1088 = vrot.lane.b32.xlu2 %v1014_v61, %s4530_s22  ;;  %v1310_v42 = vrot.slane %v1308_v37, 4  ;;  %v1307_v45 = vrot.slane %v1305_v40, 4 }
  0xd1   : > { %1092 = vrot.lane.b32.xlu1 %v1020_v56, %s4530_s22  ;;  %v1281_v56 = vrot.slane %v1182_v49, 5 }
  0xd2   : > { %1090 = vrot.lane.b32.xlu0 %v1017_v58, %s4530_s22  ;;  %v764_v7 = vpop.permute.xlu2 %763  ;;  %v1183_v58 = vld [vmem:[%s4579_s20 + $0x40] sm:$0xf] }
  0xd3   : > { %v750_v1 = vpop.permute.xlu1 %749  ;;  %837 = vst.msk [vmem:[#allocation2 + $0x8c] sm:$0xf] %vm801_vm7, %v764_v7  ;;  %v1283_v61 = vrot.slane %v1281_v56, 4  ;;  %v1284_v62 = vrot.slane %v1183_v58, 5  ;;  %v1282_v7 = vsel %vm4740_vm6, %v1280_v0, %v1281_v56  ;;  %v1314_v56 = vrot.slane %v1193_v48, 5 }
  0xd4   : > { %830 = vst.msk [vmem:[#allocation2 + $0x70] sm:$0xf] %vm801_vm7, %v750_v1  ;;  %v748_v24 = vpop.permute.xlu0 %747  ;;  %v1185_v1 = vld [vmem:[%s4579_s20 + $0x48] sm:$0xf]  ;;  %v1196_v0 = vld [vmem:[%s4579_s20 + $0x74] sm:$0xf] }
  0xd5   : > { %829 = vst.msk [vmem:[#allocation2 + $0x6c] sm:$0xf] %vm801_vm7, %v748_v24  ;;  %v1277_v24 = vrot.slane %v1275_v46, 4  ;;  %v1285_v5 = vsel %vm4740_vm6, %v1283_v61, %v1284_v62  ;;  %v1290_v6 = vrot.slane %v1185_v1, 5  ;;  %v1286_v18 = vrot.slane %v1284_v62, 4 }
  0xd6   : > { %v1194_v46 = vld [vmem:[%s4579_s20 + $0x6c] sm:$0xf]  ;;  %v1316_v61 = vrot.slane %v1314_v56, 4  ;;  %v1197_v62 = vld [vmem:[%s4579_s20 + $0x78] sm:$0xf] }
  0xd7   : > { %v1292_v11 = vrot.slane %v1290_v6, 4  ;;  %v1317_v53 = vrot.slane %v1194_v46, 5 }
  0xd8   : > { %1094 = vrot.lane.b32.xlu2 %v1023_v13, %s4530_s22 }
  0xd9   : > { %1354 = vrot.lane.b32.xlu1 %v1249_v8, %s4531_s23  ;;  %v1186_v8 = vld [vmem:[%s4579_s20 + $0x4c] sm:$0xf]  ;;  %v1319_v58 = vrot.slane %v1317_v53, 4 }
  0xda   : > { %1352 = vrot.lane.b32.xlu0 %v1246_v10, %s4531_s23  ;;  %v1029_v22 = vpop.permute.xlu2 %1028  ;;  %v1279_v10 = vsel %vm4740_vm6, %v1277_v24, %v1278_v59  ;;  %v1293_v12 = vrot.slane %v1186_v8, 5  ;;  %v1326_v24 = vrot.slane %v1197_v62, 5 }
  0xdb   : > { %v756_v16 = vpop.permute.xlu1 %755  ;;  %1135 = vst.msk [vmem:[#allocation2 + $0x8] sm:$0xf] %vm1132_vm8, %v1029_v22  ;;  %v1291_v22 = vsel %vm4740_vm6, %v1289_v14, %v1290_v6  ;;  %v1323_v6 = vrot.slane %v1196_v0, 5  ;;  %v1199_v14 = vld [vmem:[%s4579_s20 + $0x80] sm:$0xf] }
  0xdc   : > { %833 = vst.msk [vmem:[#allocation2 + $0x7c] sm:$0xf] %vm801_vm7, %v756_v16  ;;  %v754_v19 = vpop.permute.xlu0 %753  ;;  %v1294_v20 = vsel %vm4740_vm6, %v1292_v11, %v1293_v12  ;;  %v1295_v34 = vrot.slane %v1293_v12, 4  ;;  %v1328_v8 = vrot.slane %v1326_v24, 4  ;;  %v1200_v12 = vld [vmem:[%s4579_s20 + $0x84] sm:$0xf] }
  0xdd   : > { %832 = vst.msk [vmem:[#allocation2 + $0x78] sm:$0xf] %vm801_vm7, %v754_v19  ;;  %v1325_v11 = vrot.slane %v1323_v6, 4 }
  0xe0   : > { %1356 = vrot.lane.b32.xlu2 %v1252_v29, %s4531_s23 }
  0xe1   : > { %1360 = vrot.lane.b32.xlu1 %v1258_v23, %s4531_s23  ;;  %v1189_v23 = vld [vmem:[%s4579_s20 + $0x58] sm:$0xf] }
  0xe2   : > { %1358 = vrot.lane.b32.xlu0 %v1255_v26, %s4531_s23  ;;  %v1035_v38 = vpop.permute.xlu2 %1034  ;;  %v1288_v26 = vsel %vm4740_vm6, %v1286_v18, %v1287_v9  ;;  %v1302_v28 = vrot.slane %v1189_v23, 5  ;;  %v1335_v18 = vrot.slane %v1200_v12, 5 }
  0xe3   : > { %v762_v32 = vpop.permute.xlu1 %761  ;;  %1138 = vst.msk [vmem:[#allocation2 + $0x14] sm:$0xf] %vm1132_vm8, %v1035_v38  ;;  %v1300_v38 = vsel %vm4740_vm6, %v1298_v30, %v1299_v21  ;;  %v1332_v21 = vrot.slane %v1199_v14, 5  ;;  %v1202_v30 = vld [vmem:[%s4579_s20 + $0x8c] sm:$0xf] }
  0xe4   : > { %836 = vst.msk [vmem:[#allocation2 + $0x88] sm:$0xf] %vm801_vm7, %v762_v32  ;;  %v760_v35 = vpop.permute.xlu0 %759  ;;  %v1303_v36 = vsel %vm4740_vm6, %v1301_v27, %v1302_v28  ;;  %v1304_v49 = vrot.slane %v1302_v28, 4  ;;  %v1337_v23 = vrot.slane %v1335_v18, 4 }
  0xe5   : > { %835 = vst.msk [vmem:[#allocation2 + $0x84] sm:$0xf] %vm801_vm7, %v760_v35  ;;  %v1334_v28 = vrot.slane %v1332_v21, 4  ;;  %vm2344_vm7 = vcmask 191648  }
  0xe8   : > { %1362 = vrot.lane.b32.xlu2 %v1261_v44, %s4531_s23 }
  0xe9   : > { %1366 = vrot.lane.b32.xlu1 %v1267_v39, %s4531_s23  ;;  %v1192_v39 = vld [vmem:[%s4579_s20 + $0x64] sm:$0xf] }
  0xea   : > { %1364 = vrot.lane.b32.xlu0 %v1264_v41, %s4531_s23  ;;  %v1041_v54 = vpop.permute.xlu2 %1040  ;;  %v1297_v41 = vsel %vm4740_vm6, %v1295_v34, %v1296_v25  ;;  %v1311_v43 = vrot.slane %v1192_v39, 5  ;;  %v1499_v39 = vld [vmem:[%s4579_s20 + $0x10] sm:$0xf] }
  0xeb   : > { %v1027_v47 = vpop.permute.xlu1 %1026  ;;  %1141 = vst.msk [vmem:[#allocation2 + $0x20] sm:$0xf] %vm1132_vm8, %v1041_v54  ;;  %v1309_v54 = vsel %vm4740_vm6, %v1307_v45, %v1308_v37  ;;  %v1557_v48 = vshrl.u32 %v1499_v39, 16 }
  0xec   : > { %1134 = vst.msk [vmem:[#allocation2 + $0x4] sm:$0xf] %vm1132_vm8, %v1027_v47  ;;  %v1025_v51 = vpop.permute.xlu0 %1024  ;;  %v1312_v52 = vsel %vm4740_vm6, %v1310_v42, %v1311_v43  ;;  %v1313_v1 = vrot.slane %v1311_v43, 4  ;;  %v1341_v42 = vrot.slane %v1202_v30, 5  ;;  %v1538_v43 = vshrl.u32 %v1497_v33, 16 }
  0xed   : > { %1133 = vst.msk [vmem:[#allocation2] sm:$0xf] %vm1132_vm8, %v1025_v51  ;;  %v1559_v62 = vrot.slane %v1557_v48, 5 }
  0xf0   : > { %1368 = vrot.lane.b32.xlu2 %v1270_v60, %s4531_s23 }
  0xf1   : > { %1372 = vrot.lane.b32.xlu1 %v1276_v55, %s4531_s23  ;;  %v1195_v55 = vld [vmem:[%s4579_s20 + $0x70] sm:$0xf] }
  0xf2   : > { %1370 = vrot.lane.b32.xlu0 %v1273_v57, %s4531_s23  ;;  %v1047_v4 = vpop.permute.xlu2 %1046  ;;  %v1306_v57 = vsel %vm4740_vm6, %v1304_v49, %v1305_v40  ;;  %v1320_v59 = vrot.slane %v1195_v55, 5  ;;  %v1336_v40 = vsel %vm4740_vm6, %v1334_v28, %v1335_v18  ;;  %v1560_v49 = vshll.u32 %v1499_v39, 16 }
  0xf3   : > { %v1033_v63 = vpop.permute.xlu1 %1032  ;;  %1144 = vst.msk [vmem:[#allocation2 + $0x2c] sm:$0xf] %vm1132_vm8, %v1047_v4  ;;  %v1318_v4 = vsel %vm4740_vm6, %v1316_v61, %v1317_v53  ;;  %v1540_v55 = vrot.slane %v1538_v43, 5 }
  0xf4   : > { %1137 = vst.msk [vmem:[#allocation2 + $0x10] sm:$0xf] %vm1132_vm8, %v1033_v63  ;;  %v1031_v2 = vpop.permute.xlu0 %1030  ;;  %v1321_v3 = vsel %vm4740_vm6, %v1319_v58, %v1320_v59  ;;  %v1322_v15 = vrot.slane %v1320_v59, 4 }
  0xf5   : > { %1136 = vst.msk [vmem:[#allocation2 + $0xc] sm:$0xf] %vm1132_vm8, %v1031_v2 }
  0xf8   : > { %1374 = vrot.lane.b32.xlu2 %v1279_v10, %s4531_s23 }
  0xf9   : > { %1378 = vrot.lane.b32.xlu1 %v1285_v5, %s4531_s23  ;;  %v1198_v5 = vld [vmem:[%s4579_s20 + $0x7c] sm:$0xf] }
  0xfa   : > { %1376 = vrot.lane.b32.xlu0 %v1282_v7, %s4531_s23  ;;  %v1053_v19 = vpop.permute.xlu2 %1052  ;;  %v1315_v7 = vsel %vm4740_vm6, %v1313_v1, %v1314_v56  ;;  %v1329_v9 = vrot.slane %v1198_v5, 5  ;;  %v1502_v5 = vld [vmem:[%s4579_s20 + $0x1c] sm:$0xf] }
  0xfb   : > { %v1039_v13 = vpop.permute.xlu1 %1038  ;;  %1147 = vst.msk [vmem:[#allocation2 + $0x38] sm:$0xf] %vm1132_vm8, %v1053_v19  ;;  %v1327_v19 = vsel %vm4740_vm6, %v1325_v11, %v1326_v24  ;;  %v1205_v11 = vld [vmem:[%s4579_s20 + $0x98] sm:$0x1]  ;;  %v1587_v14 = vshrl.u32 %v1502_v5, 16 }
  0xfc   : > { %1140 = vst.msk [vmem:[#allocation2 + $0x1c] sm:$0xf] %vm1132_vm8, %v1039_v13  ;;  %v1037_v16 = vpop.permute.xlu0 %1036  ;;  %v1330_v17 = vsel %vm4740_vm6, %v1328_v8, %v1329_v9 }
  0xfd   : > { %1139 = vst.msk [vmem:[#allocation2 + $0x18] sm:$0xf] %vm1132_vm8, %v1037_v16 }
 0x100   : > { %1380 = vrot.lane.b32.xlu2 %v1288_v26, %s4531_s23  ;;  %v1498_v26 = vld [vmem:[%s4579_s20 + $0xc] sm:$0xf] }
 0x101   : > { %1384 = vrot.lane.b32.xlu1 %v1294_v20, %s4531_s23  ;;  %v1201_v20 = vld [vmem:[%s4579_s20 + $0x88] sm:$0xf] }
 0x102   : > { %1382 = vrot.lane.b32.xlu0 %v1291_v22, %s4531_s23  ;;  %v1059_v35 = vpop.permute.xlu2 %1058  ;;  %v1324_v22 = vsel %vm4740_vm6, %v1322_v15, %v1323_v6  ;;  %v1338_v25 = vrot.slane %v1201_v20, 5  ;;  %v1590_v15 = vshll.u32 %v1502_v5, 16 }
 0x103   : > { %v1045_v29 = vpop.permute.xlu1 %1044  ;;  %1150 = vst.msk [vmem:[#allocation2 + $0x44] sm:$0xf] %vm1132_vm8, %v1059_v35  ;;  %v1547_v35 = vshrl.u32 %v1498_v26, 16 }
 0x104   : > { %1143 = vst.msk [vmem:[#allocation2 + $0x28] sm:$0xf] %vm1132_vm8, %v1045_v29  ;;  %v1043_v32 = vpop.permute.xlu0 %1042  ;;  %v1203_v29 = vld [vmem:[%s4579_s20 + $0x90] sm:$0xf]  ;;  %v1339_v37 = vsel %vm4740_vm6, %v1337_v23, %v1338_v25  ;;  %v1340_v59 = vrot.slane %v1338_v25, 4  ;;  %v1350_v25 = vrot.slane %v1205_v11, 5 }
 0x105   : > { %1142 = vst.msk [vmem:[#allocation2 + $0x24] sm:$0xf] %vm1132_vm8, %v1043_v32  ;;  %v1331_v32 = vrot.slane %v1329_v9, 4  ;;  %v1549_v46 = vrot.slane %v1547_v35, 5 }
 0x106   : > { %v1342_v8 = vsel %vm4740_vm6, %v1340_v59, %v1341_v42 }
 0x107   : > { %v1333_v45 = vsel %vm4740_vm6, %v1331_v32, %v1332_v21  ;;  %v1589_v32 = vrot.slane %v1587_v14, 5 }
 0x108   : > { %1386 = vrot.lane.b32.xlu2 %v1297_v41, %s4531_s23  ;;  %v1204_v41 = vld [vmem:[%s4579_s20 + $0x94] sm:$0xf] }
 0x109   : > { %1390 = vrot.lane.b32.xlu1 %v1303_v36, %s4531_s23  ;;  %v1550_v36 = vshll.u32 %v1498_v26, 16  ;;  %v1503_v26 = vld [vmem:[%s4579_s20 + $0x20] sm:$0xf] }
 0x10a   : > { %1388 = vrot.lane.b32.xlu0 %v1300_v38, %s4531_s23  ;;  %v1065_v51 = vpop.permute.xlu2 %1064  ;;  %v1344_v38 = vrot.slane %v1203_v29, 5 }
 0x10b   : > { %v1051_v44 = vpop.permute.xlu1 %1050  ;;  %1153 = vst.msk [vmem:[#allocation2 + $0x50] sm:$0xf] %vm1132_vm8, %v1065_v51 }
 0x10c   : > { %1146 = vst.msk [vmem:[#allocation2 + $0x34] sm:$0xf] %vm1132_vm8, %v1051_v44  ;;  %v1049_v47 = vpop.permute.xlu0 %1048  ;;  %v1541_v44 = vshll.u32 %v1497_v33, 16  ;;  %v1346_v51 = vrot.slane %v1344_v38, 4  ;;  %v1592_v33 = vrot.slane %v1590_v15, 6 }
 0x10d   : > { %1145 = vst.msk [vmem:[#allocation2 + $0x30] sm:$0xf] %vm1132_vm8, %v1049_v47  ;;  %v1552_v47 = vrot.slane %v1550_v36, 6  ;;  %v1509_v15 = vld [vmem:[%s4579_s20 + $0x38] sm:$0xf] }
 0x10e   : > { %v1543_v56 = vrot.slane %v1541_v44, 6 }
 0x10f   : > { %v1553_v61 = vor.u32 %v1552_v47, %v1549_v46 }
 0x110   : > { %1392 = vrot.lane.b32.xlu2 %v1306_v57, %s4531_s23  ;;  %v1501_v57 = vld [vmem:[%s4579_s20 + $0x18] sm:$0xf] }
 0x111   : > { %1396 = vrot.lane.b32.xlu1 %v1312_v52, %s4531_s23  ;;  %v1347_v52 = vrot.slane %v1204_v41, 5  ;;  %v1555_v9 = vrot.slane %v1553_v61, 4 }
 0x112   : > { %1394 = vrot.lane.b32.xlu0 %v1309_v54, %s4531_s23  ;;  %v1071_v2 = vpop.permute.xlu2 %1070  ;;  %v1343_v54 = vrot.slane %v1341_v42, 4 }
 0x113   : > { %v1057_v60 = vpop.permute.xlu1 %1056  ;;  %1156 = vst.msk [vmem:[#allocation2 + $0x5c] sm:$0xf] %vm1132_vm8, %v1071_v2  ;;  %v1348_v1 = vsel %vm4740_vm6, %v1346_v51, %v1347_v52  ;;  %v1577_v2 = vshrl.u32 %v1501_v57, 16  ;;  %v1349_v23 = vrot.slane %v1347_v52, 4 }
 0x114   : > { %1149 = vst.msk [vmem:[#allocation2 + $0x40] sm:$0xf] %vm1132_vm8, %v1057_v60  ;;  %v1055_v63 = vpop.permute.xlu0 %1054  ;;  %v1500_v60 = vld [vmem:[%s4579_s20 + $0x14] sm:$0xf]  ;;  %v1345_v24 = vsel %vm4740_vm6, %v1343_v54, %v1344_v38  ;;  %v1600_v38 = vshll.u32 %v1503_v26, 16 }
 0x115   : > { %1148 = vst.msk [vmem:[#allocation2 + $0x3c] sm:$0xf] %vm1132_vm8, %v1055_v63  ;;  %v1562_v63 = vrot.slane %v1560_v49, 6  ;;  %v1567_v6 = vshrl.u32 %v1500_v60, 16  ;;  %v1579_v12 = vrot.slane %v1577_v2, 5  ;;  %v1351_v39 = vsel %vm4740_vm6, %v1349_v23, %v1350_v25 }
 0x116   : > { %v1602_v50 = vrot.slane %v1600_v38, 6  ;;  %v1507_v49 = vld [vmem:[%s4579_s20 + $0x30] sm:$0xf]  ;;  %v1511_v25 = vld [vmem:[%s4579_s20 + $0x40] sm:$0xf]  ;;  %vm2013_vm6 = vcmask 158848  }
 0x117   : > { %v1569_v20 = vrot.slane %v1567_v6, 5  ;;  %v1637_v59 = vshrl.u32 %v1507_v49, 16 }
 0x118   : > { %1398 = vrot.lane.b32.xlu2 %v1315_v7, %s4531_s23  ;;  %v1570_v7 = vshll.u32 %v1500_v60, 16  ;;  %v1640_v60 = vshll.u32 %v1507_v49, 16 }
 0x119   : > { %1402 = vrot.lane.b32.xlu1 %v1321_v3, %s4531_s23  ;;  %v1580_v3 = vshll.u32 %v1501_v57, 16 }
 0x11a   : > { %1400 = vrot.lane.b32.xlu0 %v1318_v4, %s4531_s23  ;;  %v1077_v16 = vpop.permute.xlu2 %1076  ;;  %v1544_v4 = vor.u32 %v1543_v56, %v1540_v55  ;;  %v1572_v21 = vrot.slane %v1570_v7, 6  ;;  %v1642_v5 = vrot.slane %v1640_v60, 6 }
 0x11b   : > { %v1063_v10 = vpop.permute.xlu1 %1062  ;;  %1159 = vst.msk [vmem:[#allocation2 + $0x68] sm:$0xf] %vm1132_vm8, %v1077_v16  ;;  %v1504_v16 = vld [vmem:[%s4579_s20 + $0x24] sm:$0xf] }
 0x11c   : > { %1152 = vst.msk [vmem:[#allocation2 + $0x4c] sm:$0xf] %vm1132_vm8, %v1063_v10  ;;  %v1061_v13 = vpop.permute.xlu0 %1060  ;;  %v5163_v10 = vor.u32 %v1562_v63, %v1559_v62  ;;  %v1607_v28 = vshrl.u32 %v1504_v16, 16  ;;  %v1610_v29 = vshll.u32 %v1504_v16, 16  ;;  %v1573_v36 = vor.u32 %v1572_v21, %v1569_v20  ;;  %v1508_v63 = vld [vmem:[%s4579_s20 + $0x34] sm:$0xf] }
 0x11d   : > { %1151 = vst.msk [vmem:[#allocation2 + $0x48] sm:$0xf] %vm1132_vm8, %v1061_v13  ;;  %v1582_v13 = vrot.slane %v1580_v3, 6  ;;  %v1647_v6 = vshrl.u32 %v1508_v63, 16  ;;  %v1650_v7 = vshll.u32 %v1508_v63, 16 }
 0x11e   : > { %v1564_v30 = vsel %vm5168_vm11, %v1555_v9, %v5163_v10  ;;  %v1612_v41 = vrot.slane %v1610_v29, 6  ;;  %v1575_v47 = vrot.slane %v1573_v36, 4  ;;  %v1565_v52 = vrot.slane %v5163_v10, 4 }
 0x11f   : > { %v1652_v23 = vrot.slane %v1650_v7, 6  ;;  %v1660_v29 = vshll.u32 %v1509_v15, 16 }
 0x120   : > { %1404 = vrot.lane.b32.xlu2 %v1324_v22, %s4531_s23  ;;  %v1574_v2 = vsel %vm5168_vm11, %v1565_v52, %v1573_v36 }
 0x121   : > { %1408 = vrot.lane.b32.xlu1 %v1330_v17, %s4531_s23 }
 0x122   : > { %1406 = vrot.lane.b32.xlu0 %v1327_v19, %s4531_s23  ;;  %v1083_v34 = vpop.permute.xlu2 %1082  ;;  %v1545_v19 = vrot.slane %v1544_v4, 4  ;;  %v1639_v4 = vrot.slane %v1637_v59, 5 }
 0x123   : > { %v1069_v27 = vpop.permute.xlu1 %1068  ;;  %1162 = vst.msk [vmem:[#allocation2 + $0x74] sm:$0xf] %vm1132_vm8, %v1083_v34  ;;  %v1505_v34 = vld [vmem:[%s4579_s20 + $0x28] sm:$0xf] }
 0x124   : > { %1155 = vst.msk [vmem:[#allocation2 + $0x58] sm:$0xf] %vm1132_vm8, %v1069_v27  ;;  %v1067_v31 = vpop.permute.xlu0 %1066  ;;  %v1554_v35 = vsel %vm5168_vm11, %v1545_v19, %v1553_v61  ;;  %v1617_v42 = vshrl.u32 %v1505_v34, 16  ;;  %v1620_v43 = vshll.u32 %v1505_v34, 16  ;;  %v1643_v21 = vor.u32 %v1642_v5, %v1639_v4 }
 0x125   : > { %1154 = vst.msk [vmem:[#allocation2 + $0x54] sm:$0xf] %vm1132_vm8, %v1067_v31  ;;  %v1583_v31 = vor.u32 %v1582_v13, %v1579_v12  ;;  %v1680_v34 = vshll.u32 %v1511_v25, 16 }
 0x126   : > { %v1619_v55 = vrot.slane %v1617_v42, 5  ;;  %v1622_v56 = vrot.slane %v1620_v43, 6 }
 0x127   : > { %v1585_v44 = vrot.slane %v1583_v31, 4  ;;  %v1584_v61 = vsel %vm5168_vm11, %v1575_v47, %v1583_v31  ;;  %v1682_v47 = vrot.slane %v1680_v34, 6 }
 0x128   : > { %1410 = vrot.lane.b32.xlu2 %v1333_v45, %s4531_s23  ;;  %v1593_v45 = vor.u32 %v1592_v33, %v1589_v32  ;;  %v1677_v33 = vshrl.u32 %v1511_v25, 16 }
 0x129   : > { %1414 = vrot.lane.b32.xlu1 %v1339_v37, %s4531_s23  ;;  %v1597_v37 = vshrl.u32 %v1503_v26, 16 }
 0x12a   : > { %1412 = vrot.lane.b32.xlu0 %v1336_v40, %s4531_s23  ;;  %v1089_v0 = vpop.permute.xlu2 %1088  ;;  %v1609_v40 = vrot.slane %v1607_v28, 5  ;;  %v1595_v14 = vrot.slane %v1593_v45, 4  ;;  %v1657_v28 = vshrl.u32 %v1509_v15, 16 }
 0x12b   : > { %v1075_v53 = vpop.permute.xlu1 %1074  ;;  %1165 = vst.msk [vmem:[#allocation2 + $0x80] sm:$0xf] %vm1132_vm8, %v1089_v0  ;;  %v1599_v48 = vrot.slane %v1597_v37, 5 }
 0x12c   : > { %1158 = vst.msk [vmem:[#allocation2 + $0x64] sm:$0xf] %vm1132_vm8, %v1075_v53  ;;  %v1073_v58 = vpop.permute.xlu0 %1072  ;;  %v1506_v53 = vld [vmem:[%s4579_s20 + $0x2c] sm:$0xf]  ;;  %v1613_v54 = vor.u32 %v1612_v41, %v1609_v40  ;;  %v1662_v40 = vrot.slane %v1660_v29, 6 }
 0x12d   : > { %1157 = vst.msk [vmem:[#allocation2 + $0x60] sm:$0xf] %vm1132_vm8, %v1073_v58  ;;  %v1594_v58 = vsel %vm5168_vm11, %v1585_v44, %v1593_v45  ;;  %v1603_v62 = vor.u32 %v1602_v50, %v1599_v48  ;;  %v1627_v0 = vshrl.u32 %v1506_v53, 16  ;;  %v1513_v41 = vld [vmem:[%s4579_s20 + $0x48] sm:$0xf] }
 0x12e   : > { %v1615_v3 = vrot.slane %v1613_v54, 4  ;;  %v1512_v44 = vld [vmem:[%s4579_s20 + $0x44] sm:$0xf]  ;;  %v1697_v49 = vshrl.u32 %v1513_v41, 16 }
 0x12f   : > { %v1605_v10 = vrot.slane %v1603_v62, 4  ;;  %v1629_v11 = vrot.slane %v1627_v0, 5  ;;  %v1516_v0 = vld [vmem:[%s4579_s20 + $0x54] sm:$0xf] }
 0x130   : > { %1416 = vrot.lane.b32.xlu2 %v1342_v8, %s4531_s23  ;;  %v1510_v8 = vld [vmem:[%s4579_s20 + $0x3c] sm:$0xf]  ;;  %v1699_v60 = vrot.slane %v1697_v49, 5 }
 0x131   : > { %1420 = vrot.lane.b32.xlu1 %v1348_v1, %s4531_s23  ;;  %v1630_v1 = vshll.u32 %v1506_v53, 16  ;;  %v1670_v19 = vshll.u32 %v1510_v8, 16  ;;  %v1614_v26 = vsel %vm5168_vm11, %v1605_v10, %v1613_v54  ;;  %v1514_v54 = vld [vmem:[%s4579_s20 + $0x4c] sm:$0xf] }
 0x132   : > { %1418 = vrot.lane.b32.xlu0 %v1345_v24, %s4531_s23  ;;  %v1095_v27 = vpop.permute.xlu2 %1094  ;;  %v5202_v24 = vor.u32 %v1622_v56, %v1619_v55  ;;  %v1687_v55 = vshrl.u32 %v1512_v44, 16  ;;  %v1690_v56 = vshll.u32 %v1512_v44, 16  ;;  %v1710_v63 = vshll.u32 %v1514_v54, 16 }
 0x133   : > { %v1081_v17 = vpop.permute.xlu1 %1080  ;;  %1168 = vst.msk [vmem:[#allocation2 + $0x8c] sm:$0xf] %vm1132_vm8, %v1095_v27  ;;  %v1632_v12 = vrot.slane %v1630_v1, 6  ;;  %v1672_v32 = vrot.slane %v1670_v19, 6 }
 0x134   : > { %1161 = vst.msk [vmem:[#allocation2 + $0x70] sm:$0xf] %vm1132_vm8, %v1081_v17  ;;  %v1079_v22 = vpop.permute.xlu0 %1078  ;;  %v1667_v17 = vshrl.u32 %v1510_v8, 16  ;;  %v1624_v20 = vsel %vm5168_vm11, %v1615_v3, %v5202_v24  ;;  %v1625_v43 = vrot.slane %v5202_v24, 4  ;;  %v1689_v3 = vrot.slane %v1687_v55, 5 }
 0x135   : > { %1160 = vst.msk [vmem:[#allocation2 + $0x6c] sm:$0xf] %vm1132_vm8, %v1079_v22  ;;  %v1649_v22 = vrot.slane %v1647_v6, 5  ;;  %v1633_v27 = vor.u32 %v1632_v12, %v1629_v11  ;;  %v1692_v24 = vrot.slane %v1690_v56, 6  ;;  %v1515_v6 = vld [vmem:[%s4579_s20 + $0x50] sm:$0xf] }
 0x136   : > { %v1669_v31 = vrot.slane %v1667_v17, 5  ;;  %v1727_v8 = vshrl.u32 %v1516_v0, 16  ;;  %v1717_v17 = vshrl.u32 %v1515_v6, 16  ;;  %v1720_v19 = vshll.u32 %v1515_v6, 16 }
 0x137   : > { %v1653_v36 = vor.u32 %v1652_v23, %v1649_v22  ;;  %v1635_v38 = vrot.slane %v1633_v27, 4 }
 0x138   : > { %1422 = vrot.lane.b32.xlu2 %v1351_v39, %s4531_s23  ;;  %v1659_v39 = vrot.slane %v1657_v28, 5  ;;  %v1673_v45 = vor.u32 %v1672_v32, %v1669_v31  ;;  %v1722_v31 = vrot.slane %v1720_v19, 6  ;;  %v1519_v32 = vld [vmem:[%s4579_s20 + $0x60] sm:$0xf] }
 0x139   : > { %1907 = vrot.lane.b32.xlu1 %v1564_v30, %s4532_s24  ;;  %v1604_v30 = vsel %vm5168_vm11, %v1595_v14, %v1603_v62  ;;  %v1644_v52 = vsel %vm5168_vm11, %v1635_v38, %v1643_v21  ;;  %v1707_v62 = vshrl.u32 %v1514_v54, 16  ;;  %v1655_v5 = vrot.slane %v1653_v36, 4  ;;  %v1517_v14 = vld [vmem:[%s4579_s20 + $0x58] sm:$0xf] }
 0x13a   : > { %1905 = vrot.lane.b32.xlu0 %v1554_v35, %s4532_s24  ;;  %v1357_v57 = vpop.permute.xlu2 %1356  ;;  %v1645_v35 = vrot.slane %v1643_v21, 4  ;;  %v1663_v53 = vor.u32 %v1662_v40, %v1659_v39  ;;  %v1729_v21 = vrot.slane %v1727_v8, 5  ;;  %v1737_v23 = vshrl.u32 %v1517_v14, 16  ;;  %v2051_v8 = vld [vmem:[%s4579_s20 + $0xc] sm:$0xf] }
 0x13b   : > { %v1087_v46 = vpop.permute.xlu1 %1086  ;;  %1463 = vst.msk [vmem:[#allocation2 + $0x8] sm:$0xf] %vm1460_vm12, %v1357_v57  ;;  %v1634_v57 = vsel %vm5168_vm11, %v1625_v43, %v1633_v27  ;;  %v1709_v12 = vrot.slane %v1707_v62, 5  ;;  %v1740_v25 = vshll.u32 %v1517_v14, 16 }
 0x13c   : > { %1164 = vst.msk [vmem:[#allocation2 + $0x7c] sm:$0xf] %vm1132_vm8, %v1087_v46  ;;  %v1085_v51 = vpop.permute.xlu0 %1084  ;;  %v1679_v46 = vrot.slane %v1677_v33, 5  ;;  %v1654_v50 = vsel %vm5168_vm11, %v1645_v35, %v1653_v36  ;;  %v1518_v35 = vld [vmem:[%s4579_s20 + $0x5c] sm:$0xf] }
 0x13d   : > { %1163 = vst.msk [vmem:[#allocation2 + $0x78] sm:$0xf] %vm1132_vm8, %v1085_v51  ;;  %v1700_v51 = vshll.u32 %v1513_v41, 16  ;;  %v1742_v38 = vrot.slane %v1740_v25, 6  ;;  %v1757_v41 = vshrl.u32 %v1519_v32, 16 }
 0x13e   : > { %v5236_v59 = vor.u32 %v1682_v47, %v1679_v46  ;;  %v1747_v46 = vshrl.u32 %v1518_v35, 16  ;;  %v1750_v47 = vshll.u32 %v1518_v35, 16 }
 0x140   : > { %1909 = vrot.lane.b32.xlu2 %v1574_v2, %s4532_s24  ;;  %v1665_v2 = vrot.slane %v1663_v53, 4  ;;  %v1685_v34 = vrot.slane %v5236_v59, 4 }
 0x141   : > { %1913 = vrot.lane.b32.xlu1 %v1594_v58, %s4532_s24  ;;  %v1675_v58 = vrot.slane %v1673_v45, 4 }
 0x142   : > { %1911 = vrot.lane.b32.xlu0 %v1584_v61, %s4532_s24  ;;  %v1363_v16 = vpop.permute.xlu2 %1362  ;;  %v1702_v61 = vrot.slane %v1700_v51, 6  ;;  %v1674_v15 = vsel %vm5168_vm11, %v1665_v2, %v1673_v45  ;;  %v1520_v45 = vld [vmem:[%s4579_s20 + $0x64] sm:$0xf]  ;;  %v1759_v51 = vrot.slane %v1757_v41, 5 }
 0x143   : > { %v1093_v9 = vpop.permute.xlu1 %1092  ;;  %1466 = vst.msk [vmem:[#allocation2 + $0x14] sm:$0xf] %vm1460_vm12, %v1363_v16  ;;  %v1684_v10 = vsel %vm5168_vm11, %v1675_v58, %v5236_v59  ;;  %v1693_v16 = vor.u32 %v1692_v24, %v1689_v3  ;;  %v1770_v54 = vshll.u32 %v1520_v45, 16  ;;  %v1752_v58 = vrot.slane %v1750_v47, 6 }
 0x144   : > { %1167 = vst.msk [vmem:[#allocation2 + $0x88] sm:$0xf] %vm1132_vm8, %v1093_v9  ;;  %v1091_v13 = vpop.permute.xlu0 %1090  ;;  %v1730_v9 = vshll.u32 %v1516_v0, 16  ;;  %v1703_v11 = vor.u32 %v1702_v61, %v1699_v60 }
 0x145   : > { %1166 = vst.msk [vmem:[#allocation2 + $0x84] sm:$0xf] %vm1132_vm8, %v1091_v13  ;;  %v1712_v13 = vrot.slane %v1710_v63, 6  ;;  %v1695_v29 = vrot.slane %v1693_v16, 4  ;;  %vm2672_vm8 = vcmask 224448  }
 0x146   : > { %v1732_v22 = vrot.slane %v1730_v9, 6  ;;  %v2710_v9 = vld [vmem:[%s4579_s20 + $0x14] sm:$0xf] }
 0x147   : > { %v1713_v27 = vor.u32 %v1712_v13, %v1709_v12  ;;  %v1704_v43 = vsel %vm5168_vm11, %v1695_v29, %v1703_v11  ;;  %v2709_v12 = vld [vmem:[%s4579_s20 + $0x10] sm:$0xc]  ;;  %v2762_v19 = vshll.u32 %v2710_v9, 16 }
 0x148   : > { %1915 = vrot.lane.b32.xlu2 %v1604_v30, %s4532_s24  ;;  %v1719_v30 = vrot.slane %v1717_v17, 5  ;;  %v1733_v36 = vor.u32 %v1732_v22, %v1729_v21  ;;  %v2381_v13 = vld [vmem:[%s4579_s20 + $0x10] sm:$0xc]  ;;  %v2759_v17 = vshrl.u32 %v2710_v9, 16  ;;  %v2129_v21 = vrot.slane %v2051_v8, 6 }
 0x149   : > { %1919 = vrot.lane.b32.xlu1 %v1624_v20, %s4532_s24  ;;  %v1664_v20 = vsel %vm5168_vm11, %v1655_v5, %v1663_v53  ;;  %v1767_v53 = vshrl.u32 %v1520_v45, 16  ;;  %v1715_v60 = vrot.slane %v1713_v27, 4  ;;  %v2711_v22 = vld [vmem:[%s4579_s20 + $0x18] sm:$0xf]  ;;  %v2753_v25 = vshll.u32 %v2709_v12, 16 }
 0x14a   : > { %1917 = vrot.lane.b32.xlu0 %v1614_v26, %s4532_s24  ;;  %v1369_v48 = vpop.permute.xlu2 %1368  ;;  %v1705_v26 = vrot.slane %v1703_v11, 4  ;;  %v1723_v44 = vor.u32 %v1722_v31, %v1719_v30  ;;  %v2050_v30 = vld [vmem:[%s4579_s20 + $0x8] sm:$0xc]  ;;  %v2761_v31 = vrot.slane %v2759_v17, 6 }
 0x14b   : > { %v1355_v37 = vpop.permute.xlu1 %1354  ;;  %1469 = vst.msk [vmem:[#allocation2 + $0x20] sm:$0xf] %vm1460_vm12, %v1369_v48  ;;  %v1694_v48 = vsel %vm5168_vm11, %v1685_v34, %v1693_v16  ;;  %v1769_v0 = vrot.slane %v1767_v53, 5  ;;  %v2382_v16 = vld [vmem:[%s4579_s20 + $0x14] sm:$0xf]  ;;  %v2772_v34 = vshll.u32 %v2711_v22, 16 }
 0x14c   : > { %1462 = vst.msk [vmem:[#allocation2 + $0x4] sm:$0xf] %vm1460_vm12, %v1355_v37  ;;  %v1353_v42 = vpop.permute.xlu0 %1352  ;;  %v1739_v37 = vrot.slane %v1737_v23, 5  ;;  %v1714_v40 = vsel %vm5168_vm11, %v1705_v26, %v1713_v27  ;;  %v1725_v56 = vrot.slane %v1723_v44, 4  ;;  %v1724_v24 = vsel %vm5168_vm11, %v1715_v60, %v1723_v44  ;;  %v5301_v26 = vld [vmem:[%s4579_s20 + $0x10] sm:$0xf] }
 0x14d   : > { %1461 = vst.msk [vmem:[#allocation2] sm:$0xf] %vm1460_vm12, %v1353_v42  ;;  %v1760_v42 = vshll.u32 %v1519_v32, 16  ;;  %v2750_v23 = vshrl.u32 %v2709_v12, 16  ;;  %v2457_v29 = vrot.slane %v2382_v16, 6  ;;  %v2764_v32 = vrot.slane %v2762_v19, 7 }
 0x14e   : > { %v1743_v49 = vor.u32 %v1742_v38, %v1739_v37  ;;  %v1734_v2 = vsel %vm5168_vm11, %v1725_v56, %v1733_v36  ;;  %v2131_v37 = vrot.slane %v2129_v21, 4  ;;  %v2132_v38 = vrot.slane %v5301_v26, 6  ;;  %v2383_v56 = vld [vmem:[%s4579_s20 + $0x18] sm:$0xf] }
 0x14f   : > { %v2765_v45 = vor.u32 %v2764_v32, %v2761_v31  ;;  %v2774_v47 = vrot.slane %v2772_v34, 7  ;;  %v2054_v34 = vld [vmem:[%s4579_s20 + $0x18] sm:$0xf] }
 0x150   : > { %1921 = vrot.lane.b32.xlu2 %v1634_v57, %s4532_s24  ;;  %v1749_v57 = vrot.slane %v1747_v46, 5  ;;  %v1745_v11 = vrot.slane %v1743_v49, 4 }
 0x151   : > { %1925 = vrot.lane.b32.xlu1 %v1654_v50, %s4532_s24  ;;  %v1735_v50 = vrot.slane %v1733_v36, 4 }
 0x152   : > { %1923 = vrot.lane.b32.xlu0 %v1644_v52, %s4532_s24  ;;  %v1375_v7 = vpop.permute.xlu2 %1374  ;;  %v1762_v52 = vrot.slane %v1760_v42, 6  ;;  %v1753_v3 = vor.u32 %v1752_v58, %v1749_v57  ;;  %v4362_v42 = vrot.slane %v2050_v30, 10  ;;  %v3263_v58 = vld [vmem:[%s4579_s20 + $0x14] sm:$0xf] }
 0x153   : > { %v1361_v1 = vpop.permute.xlu1 %1360  ;;  %1472 = vst.msk [vmem:[#allocation2 + $0x2c] sm:$0xf] %vm1460_vm12, %v1375_v7  ;;  %v1744_v62 = vsel %vm5168_vm11, %v1735_v50, %v1743_v49 }
 0x154   : > { %1465 = vst.msk [vmem:[#allocation2 + $0x10] sm:$0xf] %vm1460_vm12, %v1361_v1  ;;  %v1359_v4 = vpop.permute.xlu0 %1358  ;;  %v1763_v63 = vor.u32 %v1762_v52, %v1759_v51  ;;  %v1772_v1 = vrot.slane %v1770_v54, 6  ;;  %v1755_v7 = vrot.slane %v1753_v3, 4  ;;  %v1754_v27 = vsel %vm5168_vm11, %v1745_v11, %v1753_v3 }
 0x155   : > { %1464 = vst.msk [vmem:[#allocation2 + $0xc] sm:$0xf] %vm1460_vm12, %v1359_v4  ;;  %v2130_v49 = vsel %vm5309_vm15, %v4362_v42, %v2129_v21  ;;  %v2767_v51 = vrot.slane %v2765_v45, 4  ;;  %v3265_v42 = vld [vmem:[%s4579_s20 + $0x1c] sm:$0xf] }
 0x156   : > { %v1765_v4 = vrot.slane %v1763_v63, 4  ;;  %v5283_v5 = vor.u32 %v1772_v1, %v1769_v0  ;;  %v2053_v0 = vld [vmem:[%s4579_s20 + $0x14] sm:$0xf]  ;;  %v3341_v1 = vrot.slane %v3263_v58, 7 }
 0x158   : > { %1927 = vrot.lane.b32.xlu2 %v1664_v20, %s4532_s24  ;;  %v1764_v20 = vsel %vm5168_vm11, %v1755_v7, %v1763_v63  ;;  %v3343_v8 = vrot.slane %v3341_v1, 4 }
 0x159   : > { %1931 = vrot.lane.b32.xlu1 %v1684_v10, %s4532_s24 }
 0x15a   : > { %1929 = vrot.lane.b32.xlu0 %v1674_v15, %s4532_s24  ;;  %v1381_v39 = vpop.permute.xlu2 %1380  ;;  %v1774_v15 = vsel %vm5168_vm11, %v1765_v4, %v5283_v5  ;;  %v2134_v4 = vrot.slane %v2132_v38, 4 }
 0x15b   : > { %v1367_v28 = vpop.permute.xlu1 %1366  ;;  %1475 = vst.msk [vmem:[#allocation2 + $0x38] sm:$0xf] %vm1460_vm12, %v1381_v39  ;;  %v2752_v39 = vrot.slane %v2750_v23, 6 }
 0x15c   : > { %1468 = vst.msk [vmem:[#allocation2 + $0x1c] sm:$0xf] %vm1460_vm12, %v1367_v28  ;;  %v1365_v33 = vpop.permute.xlu0 %1364  ;;  %v4363_v28 = vrot.slane %v2381_v13, 10 }
 0x15d   : > { %1467 = vst.msk [vmem:[#allocation2 + $0x18] sm:$0xf] %vm1460_vm12, %v1365_v33  ;;  %v2769_v33 = vshrl.u32 %v2711_v22, 16 }
 0x15e   : > { %v2458_v44 = vsel %vm5309_vm15, %v4363_v28, %v2457_v29 }
 0x15f   : > { %v2771_v46 = vrot.slane %v2769_v33, 6 }
 0x160   : > { %1933 = vrot.lane.b32.xlu2 %v1694_v48, %s4532_s24  ;;  %v2133_v48 = vsel %vm5309_vm15, %v2131_v37, %v2132_v38 }
 0x161   : > { %1937 = vrot.lane.b32.xlu1 %v1714_v40, %s4532_s24  ;;  %v2755_v40 = vrot.slane %v2753_v25, 7  ;;  %v5326_v52 = vor.u32 %v2774_v47, %v2771_v46  ;;  %v2713_v25 = vld [vmem:[%s4579_s20 + $0x20] sm:$0xf] }
 0x162   : > { %1935 = vrot.lane.b32.xlu0 %v1704_v43, %s4532_s24  ;;  %v1387_v61 = vpop.permute.xlu2 %1386  ;;  %v2789_v32 = vshrl.u32 %v2713_v25, 16  ;;  %v2792_v33 = vshll.u32 %v2713_v25, 16 }
 0x163   : > { %v1373_v55 = vpop.permute.xlu1 %1372  ;;  %1478 = vst.msk [vmem:[#allocation2 + $0x44] sm:$0xf] %vm1460_vm12, %v1387_v61  ;;  %v2756_v50 = vor.u32 %v2755_v40, %v2752_v39  ;;  %v2776_v61 = vsel %vm5328_vm2, %v2767_v51, %v5326_v52  ;;  %v2138_v40 = vrot.slane %v2054_v34, 6 }
 0x164   : > { %1471 = vst.msk [vmem:[#allocation2 + $0x28] sm:$0xf] %vm1460_vm12, %v1373_v55  ;;  %v1371_v59 = vpop.permute.xlu0 %1370 }
 0x165   : > { %1470 = vst.msk [vmem:[#allocation2 + $0x24] sm:$0xf] %vm1460_vm12, %v1371_v59  ;;  %v2757_v55 = vrot.slane %v2756_v50, 4  ;;  %v2459_v59 = vrot.slane %v2457_v29, 4 }
 0x167   : > { %v2766_v63 = vsel %vm5328_vm2, %v2757_v55, %v2765_v45  ;;  %v2794_v45 = vrot.slane %v2792_v33, 7 }
 0x168   : > { %1939 = vrot.lane.b32.xlu2 %v1724_v24, %s4532_s24  ;;  %v3262_v24 = vld [vmem:[%s4579_s20 + $0x10] sm:$0x8] }
 0x169   : > { %1943 = vrot.lane.b32.xlu1 %v1744_v62, %s4532_s24  ;;  %v2460_v62 = vrot.slane %v2383_v56, 6  ;;  %v4364_v13 = vrot.slane %v3262_v24, 11  ;;  %v2777_v56 = vrot.slane %v5326_v52, 4  ;;  %v2140_v24 = vrot.slane %v2138_v40, 4 }
 0x16a   : > { %1941 = vrot.lane.b32.xlu0 %v1734_v2, %s4532_s24  ;;  %v1393_v14 = vpop.permute.xlu2 %1392  ;;  %v3264_v2 = vld [vmem:[%s4579_s20 + $0x18] sm:$0xf] }
 0x16b   : > { %v1379_v6 = vpop.permute.xlu1 %1378  ;;  %1481 = vst.msk [vmem:[#allocation2 + $0x50] sm:$0xf] %vm1460_vm12, %v1393_v14  ;;  %v2461_v3 = vsel %vm5309_vm15, %v2459_v59, %v2460_v62  ;;  %v3344_v9 = vrot.slane %v3264_v2, 7  ;;  %v2712_v14 = vld [vmem:[%s4579_s20 + $0x1c] sm:$0xf]  ;;  %v3342_v23 = vsel %vm5353_vm5, %v4364_v13, %v3341_v1  ;;  %v2462_v28 = vrot.slane %v2460_v62, 4 }
 0x16c   : > { %1474 = vst.msk [vmem:[#allocation2 + $0x34] sm:$0xf] %vm1460_vm12, %v1379_v6  ;;  %v1377_v10 = vpop.permute.xlu0 %1376  ;;  %v2135_v6 = vrot.slane %v2053_v0, 6  ;;  %v2779_v21 = vshrl.u32 %v2712_v14, 16  ;;  %v2782_v22 = vshll.u32 %v2712_v14, 16 }
 0x16d   : > { %1473 = vst.msk [vmem:[#allocation2 + $0x30] sm:$0xf] %vm1460_vm12, %v1377_v10  ;;  %v2384_v10 = vld [vmem:[%s4579_s20 + $0x1c] sm:$0xf]  ;;  %v3345_v19 = vsel %vm5353_vm5, %v3343_v8, %v3344_v9  ;;  %v3346_v47 = vrot.slane %v3344_v9, 4 }
 0x16e   : > { %v2136_v16 = vsel %vm5309_vm15, %v2134_v4, %v2135_v6  ;;  %v2463_v17 = vrot.slane %v2384_v10, 6  ;;  %v2781_v30 = vrot.slane %v2779_v21, 6  ;;  %v2784_v31 = vrot.slane %v2782_v22, 7  ;;  %v2714_v62 = vld [vmem:[%s4579_s20 + $0x24] sm:$0xf] }
 0x16f   : > { %v2137_v37 = vrot.slane %v2135_v6, 4  ;;  %v2799_v1 = vshrl.u32 %v2714_v62, 16  ;;  %v2802_v2 = vshll.u32 %v2714_v62, 16  ;;  %v3266_v4 = vld [vmem:[%s4579_s20 + $0x20] sm:$0xf] }
 0x170   : > { %1945 = vrot.lane.b32.xlu2 %v1754_v27, %s4532_s24  ;;  %v2465_v26 = vrot.slane %v2463_v17, 4  ;;  %v3350_v14 = vrot.slane %v3266_v4, 7  ;;  %v2715_v21 = vld [vmem:[%s4579_s20 + $0x28] sm:$0xf] }
 0x171   : > { %1949 = vrot.lane.b32.xlu1 %v1774_v15, %s4532_s24  ;;  %v2139_v46 = vsel %vm5309_vm15, %v2137_v37, %v2138_v40  ;;  %v2804_v13 = vrot.slane %v2802_v2, 7  ;;  %v2812_v33 = vshll.u32 %v2715_v21, 16 }
 0x172   : > { %1947 = vrot.lane.b32.xlu0 %v1764_v20, %s4532_s24  ;;  %v1399_v43 = vpop.permute.xlu2 %1398  ;;  %v5365_v20 = vld [vmem:[%s4579_s20 + $0x20] sm:$0xf] }
 0x173   : > { %v1385_v35 = vpop.permute.xlu1 %1384  ;;  %1484 = vst.msk [vmem:[#allocation2 + $0x5c] sm:$0xf] %vm1460_vm12, %v1399_v43  ;;  %v2466_v27 = vrot.slane %v5365_v20, 6  ;;  %v2785_v43 = vor.u32 %v2784_v31, %v2781_v30  ;;  %v2814_v40 = vrot.slane %v2812_v33, 7 }
 0x174   : > { %1477 = vst.msk [vmem:[#allocation2 + $0x40] sm:$0xf] %vm1460_vm12, %v1385_v35  ;;  %v1383_v41 = vpop.permute.xlu0 %1382 }
 0x175   : > { %1476 = vst.msk [vmem:[#allocation2 + $0x3c] sm:$0xf] %vm1460_vm12, %v1383_v41  ;;  %v2467_v39 = vsel %vm5309_vm15, %v2465_v26, %v2466_v27  ;;  %v2464_v41 = vsel %vm5309_vm15, %v2462_v28, %v2463_v17  ;;  %v2786_v52 = vsel %vm5328_vm2, %v2777_v56, %v2785_v43  ;;  %v5421_v17 = vld [vmem:[%s4579_s20 + $0x28] sm:$0xf]  ;;  %v2468_v31 = vrot.slane %v2466_v27, 4 }
 0x176   : > { %v2472_v28 = vrot.slane %v5421_v17, 6  ;;  %v5443_v27 = vld [vmem:[%s4579_s20 + $0x28] sm:$0xf]  ;;  %v5463_v56 = vld [vmem:[%s4579_s20 + $0x40] sm:$0xf] }
 0x177   : > { %v2168_v4 = vrot.slane %v5463_v56, 6 }
 0x178   : > { %2236 = vrot.lane.b32.xlu2 %v2130_v49, %s4534_s26  ;;  %v2787_v49 = vrot.slane %v2785_v43, 4  ;;  %v5451_v43 = vld [vmem:[%s4579_s20 + $0x48] sm:$0xf] }
 0x179   : > { %2564 = vrot.lane.b32.xlu1 %v2458_v44, %s4533_s25  ;;  %v2791_v44 = vrot.slane %v2789_v32, 6  ;;  %v2809_v32 = vshrl.u32 %v2715_v21, 16 }
 0x17a   : > { %2238 = vrot.lane.b32.xlu0 %v2133_v48, %s4534_s26  ;;  %v1405_v60 = vpop.permute.xlu2 %1404  ;;  %v3347_v48 = vrot.slane %v3265_v42, 7  ;;  %v3356_v42 = vrot.slane %v5443_v27, 7 }
 0x17b   : > { %v1391_v53 = vpop.permute.xlu1 %1390  ;;  %1487 = vst.msk [vmem:[#allocation2 + $0x68] sm:$0xf] %vm1460_vm12, %v1405_v60  ;;  %v2795_v51 = vor.u32 %v2794_v45, %v2791_v44  ;;  %v3352_v45 = vrot.slane %v3350_v14, 4 }
 0x17c   : > { %1480 = vst.msk [vmem:[#allocation2 + $0x4c] sm:$0xf] %vm1460_vm12, %v1391_v53  ;;  %v1389_v57 = vpop.permute.xlu0 %1388  ;;  %v2055_v53 = vld [vmem:[%s4579_s20 + $0x1c] sm:$0xf]  ;;  %v3348_v58 = vsel %vm5353_vm5, %v3346_v47, %v3347_v48  ;;  %v3349_v8 = vrot.slane %v3347_v48, 4 }
 0x17d   : > { %1479 = vst.msk [vmem:[#allocation2 + $0x48] sm:$0xf] %vm1460_vm12, %v1389_v57  ;;  %v2141_v59 = vrot.slane %v2055_v53, 6  ;;  %v2796_v60 = vsel %vm5328_vm2, %v2787_v49, %v2795_v51  ;;  %v2797_v22 = vrot.slane %v2795_v51, 4  ;;  %v2724_v47 = vld [vmem:[%s4579_s20 + $0x4c] sm:$0xf] }
 0x17e   : > { %v2723_v51 = vld [vmem:[%s4579_s20 + $0x48] sm:$0xf]  ;;  %v2496_v53 = vrot.slane %v5451_v43, 6 }
 0x17f   : > { %v2892_v2 = vshll.u32 %v2723_v51, 16 }
 0x180   : > { %2566 = vrot.lane.b32.xlu2 %v2461_v3, %s4533_s25 }
 0x181   : > { %3119 = vrot.lane.b32.xlu1 %v2776_v61, %s4535_s27  ;;  %v5400_v61 = vld [vmem:[%s4579_s20 + $0x20] sm:$0xf] }
 0x182   : > { %3117 = vrot.lane.b32.xlu0 %v2766_v63, %s4535_s27  ;;  %v1411_v15 = vpop.permute.xlu2 %1410  ;;  %v2143_v63 = vrot.slane %v2141_v59, 4  ;;  %v2144_v0 = vrot.slane %v5400_v61, 6 }
 0x183   : > { %v1397_v7 = vpop.permute.xlu1 %1396  ;;  %1490 = vst.msk [vmem:[#allocation2 + $0x74] sm:$0xf] %vm1460_vm12, %v1411_v15  ;;  %v2142_v15 = vsel %vm5309_vm15, %v2140_v24, %v2141_v59  ;;  %v2899_v59 = vshrl.u32 %v2724_v47, 16 }
 0x184   : > { %1483 = vst.msk [vmem:[#allocation2 + $0x58] sm:$0xf] %vm1460_vm12, %v1397_v7  ;;  %v1395_v11 = vpop.permute.xlu0 %1394  ;;  %v2386_v7 = vld [vmem:[%s4579_s20 + $0x24] sm:$0xf]  ;;  %v2145_v10 = vsel %vm5309_vm15, %v2143_v63, %v2144_v0  ;;  %v2725_v63 = vld [vmem:[%s4579_s20 + $0x50] sm:$0xf] }
 0x185   : > { %1482 = vst.msk [vmem:[#allocation2 + $0x54] sm:$0xf] %vm1460_vm12, %v1395_v11  ;;  %v2801_v11 = vrot.slane %v2799_v1, 6  ;;  %v2889_v1 = vshrl.u32 %v2723_v51, 16 }
 0x188   : > { %3448 = vrot.lane.b32.xlu2 %v3342_v23, %s4536_s28  ;;  %v2805_v23 = vor.u32 %v2804_v13, %v2801_v11  ;;  %v2912_v11 = vshll.u32 %v2725_v63, 16 }
 0x189   : > { %2240 = vrot.lane.b32.xlu1 %v2136_v16, %s4534_s26  ;;  %v2469_v16 = vrot.slane %v2386_v7, 6 }
 0x18a   : > { %3450 = vrot.lane.b32.xlu0 %v3345_v19, %s4536_s28  ;;  %v1417_v38 = vpop.permute.xlu2 %1416  ;;  %v3351_v19 = vsel %vm5353_vm5, %v3349_v8, %v3350_v14  ;;  %v2901_v8 = vrot.slane %v2899_v59, 6  ;;  %v2146_v59 = vrot.slane %v2144_v0, 4 }
 0x18b   : > { %v1403_v29 = vpop.permute.xlu1 %1402  ;;  %1493 = vst.msk [vmem:[#allocation2 + $0x80] sm:$0xf] %vm1460_vm12, %v1417_v38  ;;  %v2471_v26 = vrot.slane %v2469_v16, 4  ;;  %v2470_v38 = vsel %vm5309_vm15, %v2468_v31, %v2469_v16  ;;  %v2891_v16 = vrot.slane %v2889_v1, 6  ;;  %v2388_v1 = vld [vmem:[%s4579_s20 + $0x2c] sm:$0xf] }
 0x18c   : > { %1486 = vst.msk [vmem:[#allocation2 + $0x64] sm:$0xf] %vm1460_vm12, %v1403_v29  ;;  %v1401_v35 = vpop.permute.xlu0 %1400  ;;  %v3267_v29 = vld [vmem:[%s4579_s20 + $0x24] sm:$0xf] }
 0x18d   : > { %1485 = vst.msk [vmem:[#allocation2 + $0x60] sm:$0xf] %vm1460_vm12, %v1401_v35  ;;  %v2806_v35 = vsel %vm5328_vm2, %v2797_v22, %v2805_v23  ;;  %v3353_v37 = vrot.slane %v3267_v29, 7  ;;  %v2473_v20 = vsel %vm5309_vm15, %v2471_v26, %v2472_v28  ;;  %v2170_v22 = vrot.slane %v2168_v4, 4 }
 0x18f   : > { %v3354_v62 = vsel %vm5353_vm5, %v3352_v45, %v3353_v37 }
 0x190   : > { %2242 = vrot.lane.b32.xlu2 %v2139_v46, %s4534_s26  ;;  %v2065_v46 = vld [vmem:[%s4579_s20 + $0x44] sm:$0xf] }
 0x191   : > { %2570 = vrot.lane.b32.xlu1 %v2467_v39, %s4533_s25  ;;  %v2811_v39 = vrot.slane %v2809_v32, 6 }
 0x192   : > { %2568 = vrot.lane.b32.xlu0 %v2464_v41, %s4533_s25  ;;  %v1423_v57 = vpop.permute.xlu2 %1422  ;;  %v3355_v41 = vrot.slane %v3353_v37, 4 }
 0x193   : > { %v1409_v50 = vpop.permute.xlu1 %1408  ;;  %1496 = vst.msk [vmem:[#allocation2 + $0x8c] sm:$0xf] %vm1460_vm12, %v1423_v57  ;;  %v5457_v49 = vor.u32 %v2814_v40, %v2811_v39  ;;  %v3277_v40 = vld [vmem:[%s4579_s20 + $0x4c] sm:$0xf] }
 0x194   : > { %1489 = vst.msk [vmem:[#allocation2 + $0x70] sm:$0xf] %vm1460_vm12, %v1409_v50  ;;  %v1407_v55 = vpop.permute.xlu0 %1406  ;;  %v2807_v50 = vrot.slane %v2805_v23, 4  ;;  %v3357_v57 = vsel %vm5353_vm5, %v3355_v41, %v3356_v42  ;;  %v3383_v51 = vrot.slane %v3277_v40, 7 }
 0x195   : > { %1488 = vst.msk [vmem:[#allocation2 + $0x6c] sm:$0xf] %vm1460_vm12, %v1407_v55 }
 0x196   : > { %v2816_v24 = vsel %vm5328_vm2, %v2807_v50, %v5457_v49  ;;  %v2057_v50 = vld [vmem:[%s4579_s20 + $0x24] sm:$0xf] }
 0x198   : > { %3121 = vrot.lane.b32.xlu2 %v2786_v52, %s4535_s27  ;;  %v2171_v52 = vrot.slane %v2065_v46, 6  ;;  %v5516_v46 = vld [vmem:[%s4579_s20 + $0x48] sm:$0xf] }
 0x199   : > { %3452 = vrot.lane.b32.xlu1 %v3348_v58, %s4536_s28  ;;  %v2396_v58 = vld [vmem:[%s4579_s20 + $0x4c] sm:$0xf] }
 0x19a   : > { %3123 = vrot.lane.b32.xlu0 %v2796_v60, %s4535_s27  ;;  %v1910_v9 = vpop.permute.xlu2 %1909  ;;  %v2902_v60 = vshll.u32 %v2724_v47, 16  ;;  %v2499_v7 = vrot.slane %v2396_v58, 6  ;;  %v2173_v14 = vrot.slane %v2171_v52, 4  ;;  %v2172_v33 = vsel %vm5309_vm15, %v2170_v22, %v2171_v52 }
 0x19b   : > { %v1415_v3 = vpop.permute.xlu1 %1414  ;;  %2016 = vst.msk [vmem:[#allocation2 + $0x8] sm:$0xf] %vm2013_vm6, %v1910_v9  ;;  %v3380_v58 = vrot.slane %v5516_v46, 7  ;;  %v3385_v52 = vrot.slane %v3383_v51, 4  ;;  %v2474_v22 = vrot.slane %v2472_v28, 4 }
 0x19c   : > { %1492 = vst.msk [vmem:[#allocation2 + $0x7c] sm:$0xf] %vm1460_vm12, %v1415_v3  ;;  %v1413_v6 = vpop.permute.xlu0 %1412  ;;  %v5475_v3 = vld [vmem:[%s4579_s20 + $0x48] sm:$0xf]  ;;  %v2904_v9 = vrot.slane %v2902_v60, 7  ;;  %v2501_v41 = vrot.slane %v2499_v7, 4 }
 0x19d   : > { %1491 = vst.msk [vmem:[#allocation2 + $0x78] sm:$0xf] %vm1460_vm12, %v1413_v6  ;;  %v2498_v6 = vrot.slane %v2496_v53, 4  ;;  %v2147_v60 = vrot.slane %v2057_v50, 6  ;;  %v2067_v50 = vld [vmem:[%s4579_s20 + $0x4c] sm:$0xf] }
 0x19e   : > { %v2905_v26 = vor.u32 %v2904_v9, %v2901_v8  ;;  %v5553_v9 = vld [vmem:[%s4579_s20 + $0x30] sm:$0xf]  ;;  %v2177_v27 = vrot.slane %v2067_v50, 6 }
 0x19f   : > { %v2148_v0 = vsel %vm5309_vm15, %v2146_v59, %v2147_v60 }
 0x1a0   : > { %3454 = vrot.lane.b32.xlu2 %v3351_v19, %s4536_s28  ;;  %v2894_v19 = vrot.slane %v2892_v2, 7 }
 0x1a1   : > { %2246 = vrot.lane.b32.xlu1 %v2145_v10, %s4534_s26  ;;  %v2909_v10 = vshrl.u32 %v2725_v63, 16 }
 0x1a2   : > { %2244 = vrot.lane.b32.xlu0 %v2142_v15, %s4534_s26  ;;  %v1916_v34 = vpop.permute.xlu2 %1915  ;;  %v2174_v15 = vrot.slane %v5475_v3, 6  ;;  %v5498_v32 = vor.u32 %v2894_v19, %v2891_v16  ;;  %v5560_v16 = vld [vmem:[%s4579_s20 + $0x28] sm:$0xf] }
 0x1a3   : > { %v1421_v25 = vpop.permute.xlu1 %1420  ;;  %2019 = vst.msk [vmem:[#allocation2 + $0x14] sm:$0xf] %vm2013_vm6, %v1916_v34  ;;  %v2911_v29 = vrot.slane %v2909_v10, 6  ;;  %v5504_v34 = vld [vmem:[%s4579_s20 + $0x50] sm:$0xf]  ;;  %v4493_v3 = vld [vmem:[%s6910_s1 + $0x8] sm:$0xff] }
 0x1a4   : > { %1495 = vst.msk [vmem:[#allocation2 + $0x88] sm:$0xf] %vm1460_vm12, %v1421_v25  ;;  %v1419_v30 = vpop.permute.xlu0 %1418  ;;  %v2500_v25 = vsel %vm5309_vm15, %v2498_v6, %v2499_v7  ;;  %v2175_v31 = vsel %vm5309_vm15, %v2173_v14, %v2174_v15  ;;  %v2716_v6 = vld [vmem:[%s4579_s20 + $0x2c] sm:$0xf]  ;;  %v2475_v7 = vrot.slane %v2388_v1, 6 }
 0x1a5   : > { %1494 = vst.msk [vmem:[#allocation2 + $0x84] sm:$0xf] %vm1460_vm12, %v1419_v30  ;;  %v2914_v30 = vrot.slane %v2912_v11, 7  ;;  %v2819_v10 = vshrl.u32 %v2716_v6, 16  ;;  %v2822_v11 = vshll.u32 %v2716_v6, 16  ;;  %vm3739_vm12 = vcmask 293888  }
 0x1a6   : > { %v2717_v14 = vld [vmem:[%s4579_s20 + $0x30] sm:$0xf]  ;;  %v2477_v19 = vrot.slane %v2475_v7, 4  ;;  %v2476_v28 = vsel %vm5309_vm15, %v2474_v22, %v2475_v7  ;;  %v2179_v7 = vrot.slane %v2177_v27, 4  ;;  %v2176_v22 = vrot.slane %v2174_v15, 4 }
 0x1a7   : > { %v5507_v37 = vor.u32 %v2914_v30, %v2911_v29  ;;  %v2829_v29 = vshrl.u32 %v2717_v14, 16  ;;  %v2832_v30 = vshll.u32 %v2717_v14, 16  ;;  %v5603_v6 = vld [vmem:[%s4579_s20 + $0x50] sm:$0xf] }
 0x1a8   : > { %2572 = vrot.lane.b32.xlu2 %v2470_v38, %s4533_s25  ;;  %v2897_v38 = vrot.slane %v5498_v32, 4 }
 0x1a9   : > { %3125 = vrot.lane.b32.xlu1 %v2806_v35, %s4535_s27  ;;  %v2907_v35 = vrot.slane %v2905_v26, 4  ;;  %v2831_v40 = vrot.slane %v2829_v29, 6 }
 0x1aa   : > { %2574 = vrot.lane.b32.xlu0 %v2473_v20, %s4533_s25  ;;  %v1922_v55 = vpop.permute.xlu2 %1921 }
 0x1ab   : > { %v1908_v44 = vpop.permute.xlu1 %1907  ;;  %2022 = vst.msk [vmem:[#allocation2 + $0x20] sm:$0xf] %vm2013_vm6, %v1922_v55  ;;  %v2916_v47 = vsel %vm5328_vm2, %v2907_v35, %v5507_v37  ;;  %v5526_v55 = vld [vmem:[%s4579_s20 + $0x50] sm:$0xf]  ;;  %v2150_v35 = vrot.slane %v5560_v16, 6 }
 0x1ac   : > { %2015 = vst.msk [vmem:[#allocation2 + $0x4] sm:$0xf] %vm2013_vm6, %v1908_v44  ;;  %v1906_v48 = vpop.permute.xlu0 %1905  ;;  %v2502_v44 = vrot.slane %v5504_v34, 6  ;;  %v3386_v63 = vrot.slane %v5526_v55, 7  ;;  %v5659_v34 = vld [vmem:[%s4579_s20 + $0x58] sm:$0xf] }
 0x1ad   : > { %2014 = vst.msk [vmem:[#allocation2] sm:$0xf] %vm2013_vm6, %v1906_v48  ;;  %v2906_v48 = vsel %vm5328_vm2, %v2897_v38, %v2905_v26  ;;  %v2824_v26 = vrot.slane %v2822_v11, 7  ;;  %v3269_v38 = vld [vmem:[%s4579_s20 + $0x2c] sm:$0xf] }
 0x1ae   : > { %v3387_v8 = vsel %vm5353_vm5, %v3385_v52, %v3386_v63  ;;  %v3633_v52 = vld [vmem:[%s6910_s1 + $0x10] sm:$0x3] }
 0x1b0   : > { %3127 = vrot.lane.b32.xlu2 %v2816_v24, %s4535_s27  ;;  %v3382_v24 = vrot.slane %v3380_v58, 4 }
 0x1b1   : > { %3458 = vrot.lane.b32.xlu1 %v3357_v57, %s4536_s28  ;;  %v2503_v57 = vsel %vm5309_vm15, %v2501_v41, %v2502_v44  ;;  %v2834_v41 = vrot.slane %v2832_v30, 7 }
 0x1b2   : > { %3456 = vrot.lane.b32.xlu0 %v3354_v62, %s4536_s28  ;;  %v1928_v23 = vpop.permute.xlu2 %1927 }
 0x1b3   : > { %v1914_v13 = vpop.permute.xlu1 %1913  ;;  %2025 = vst.msk [vmem:[#allocation2 + $0x2c] sm:$0xf] %vm2013_vm6, %v1928_v23  ;;  %v5587_v59 = vor.u32 %v2834_v41, %v2831_v40  ;;  %v4492_v40 = vld [vmem:[%s6910_s1] sm:$0xff]  ;;  %v2917_v41 = vrot.slane %v5507_v37, 4 }
 0x1b4   : > { %2018 = vst.msk [vmem:[#allocation2 + $0x10] sm:$0xf] %vm2013_vm6, %v1914_v13  ;;  %v1912_v21 = vpop.permute.xlu0 %1911  ;;  %v3384_v13 = vsel %vm5353_vm5, %v3382_v24, %v3383_v51 }
 0x1b5   : > { %2017 = vst.msk [vmem:[#allocation2 + $0xc] sm:$0xf] %vm2013_vm6, %v1912_v21  ;;  %v2478_v21 = vrot.slane %v5553_v9, 6 }
 0x1b7   : > { %v2479_v17 = vsel %vm5309_vm15, %v2477_v19, %v2478_v21 }
 0x1b8   : > { %2264 = vrot.lane.b32.xlu2 %v2172_v33, %s4534_s26  ;;  %v2149_v33 = vrot.slane %v2147_v60, 4 }
 0x1b9   : > { %2592 = vrot.lane.b32.xlu1 %v2500_v25, %s4533_s25  ;;  %v2821_v25 = vrot.slane %v2819_v10, 6  ;;  %v2180_v10 = vrot.slane %v5603_v6, 6 }
 0x1ba   : > { %2266 = vrot.lane.b32.xlu0 %v2175_v31, %s4534_s26  ;;  %v1934_v45 = vpop.permute.xlu2 %1933 }
 0x1bb   : > { %v1920_v20 = vpop.permute.xlu1 %1919  ;;  %2028 = vst.msk [vmem:[#allocation2 + $0x38] sm:$0xf] %vm2013_vm6, %v1934_v45  ;;  %v2151_v45 = vsel %vm5309_vm15, %v2149_v33, %v2150_v35  ;;  %v2181_v15 = vsel %vm5309_vm15, %v2179_v7, %v2180_v10 }
 0x1bc   : > { %2021 = vst.msk [vmem:[#allocation2 + $0x1c] sm:$0xf] %vm2013_vm6, %v1920_v20  ;;  %v1918_v39 = vpop.permute.xlu0 %1917 }
 0x1bd   : > { %2020 = vst.msk [vmem:[#allocation2 + $0x18] sm:$0xf] %vm2013_vm6, %v1918_v39  ;;  %v2825_v39 = vor.u32 %v2824_v26, %v2821_v25  ;;  %v2398_v25 = vld [vmem:[%s4579_s20 + $0x54] sm:$0xf] }
 0x1c0   : > { %2594 = vrot.lane.b32.xlu2 %v2503_v57, %s4533_s25  ;;  %v2827_v57 = vrot.slane %v2825_v39, 4 }
 0x1c1   : > { %3147 = vrot.lane.b32.xlu1 %v2916_v47, %s4535_s27  ;;  %v3358_v47 = vrot.slane %v3356_v42, 4 }
 0x1c2   : > { %3145 = vrot.lane.b32.xlu0 %v2906_v48, %s4535_s27  ;;  %v1940_v61 = vpop.permute.xlu2 %1939  ;;  %v3359_v48 = vrot.slane %v3269_v38, 7  ;;  %v2836_v24 = vsel %vm5328_vm2, %v2827_v57, %v5587_v59 }
 0x1c3   : > { %v1926_v62 = vpop.permute.xlu1 %1925  ;;  %2031 = vst.msk [vmem:[#allocation2 + $0x44] sm:$0xf] %vm2013_vm6, %v1940_v61 }
 0x1c4   : > { %2024 = vst.msk [vmem:[#allocation2 + $0x28] sm:$0xf] %vm2013_vm6, %v1926_v62  ;;  %v1924_v2 = vpop.permute.xlu0 %1923  ;;  %v2817_v62 = vrot.slane %v5457_v49, 4  ;;  %v3360_v1 = vsel %vm5353_vm5, %v3358_v47, %v3359_v48  ;;  %v2726_v49 = vld [vmem:[%s4579_s20 + $0x54] sm:$0xf]  ;;  %v3361_v26 = vrot.slane %v3359_v48, 4 }
 0x1c5   : > { %2023 = vst.msk [vmem:[#allocation2 + $0x24] sm:$0xf] %vm2013_vm6, %v1924_v2  ;;  %v3733_v2 = vunpack.c.l.b16 %v3633_v52  ;;  %v2919_v11 = vshrl.u32 %v2726_v49, 16 }
 0x1c6   : > { %v2826_v61 = vsel %vm5328_vm2, %v2817_v62, %v2825_v39  ;;  %v2727_v39 = vld [vmem:[%s4579_s20 + $0x58] sm:$0xf] }
 0x1c7   : > { %v2929_v62 = vshrl.u32 %v2727_v39, 16 }
 0x1c8   : > { %3476 = vrot.lane.b32.xlu2 %v3384_v13, %s4536_s28  ;;  %v2922_v13 = vshll.u32 %v2726_v49, 16 }
 0x1c9   : > { %2248 = vrot.lane.b32.xlu1 %v2148_v0, %s4534_s26  ;;  %v3736_v0 = vpack.c.b16 %v3733_v2, %v3733_v2  ;;  %v2931_v2 = vrot.slane %v2929_v62, 6 }
 0x1ca   : > { %3478 = vrot.lane.b32.xlu0 %v3387_v8, %s4536_s28  ;;  %v1946_v20 = vpop.permute.xlu2 %1945  ;;  %v5610_v8 = vld [vmem:[%s4579_s20 + $0x30] sm:$0xf]  ;;  %v2924_v33 = vrot.slane %v2922_v13, 7 }
 0x1cb   : > { %v1932_v23 = vpop.permute.xlu1 %1931  ;;  %2034 = vst.msk [vmem:[#allocation2 + $0x50] sm:$0xf] %vm2013_vm6, %v1946_v20  ;;  %v3796_v14 = vsel %vm2124_vm13, %v3736_v0, 0  ;;  %v3362_v29 = vrot.slane %v5610_v8, 7  ;;  %v2178_v20 = vsel %vm5309_vm15, %v2176_v22, %v2177_v27  ;;  %v2932_v27 = vshll.u32 %v2727_v39, 16 }
 0x1cc   : > { %2027 = vst.msk [vmem:[#allocation2 + $0x34] sm:$0xf] %vm2013_vm6, %v1932_v23  ;;  %v1930_v31 = vpop.permute.xlu0 %1929  ;;  %3803 = vmatpush.bf16.msra.mxu0 %v3796_v14  ;;  %4494 = vmatpush.bf16.msra.mxu2 %v3796_v14  ;;  %v2718_v0 = vld [vmem:[%s4579_s20 + $0x34] sm:$0xf]  ;;  %vm3933_vm13 = vcmask 125952  }
 0x1cd   : > { %2026 = vst.msk [vmem:[#allocation2 + $0x30] sm:$0xf] %vm2013_vm6, %v1930_v31  ;;  %4495 = vmatpush.bf16.msra.mxu3 %v3796_v14  ;;  %v2921_v31 = vrot.slane %v2919_v11, 6  ;;  %v3363_v38 = vsel %vm5353_vm5, %v3361_v26, %v3362_v29  ;;  %v3388_v11 = vrot.slane %v3386_v63, 4  ;;  %v2059_v14 = vld [vmem:[%s4579_s20 + $0x2c] sm:$0xf] }
 0x1ce   : > { %v2842_v26 = vshll.u32 %v2718_v0, 16  ;;  %v2719_v63 = vld [vmem:[%s4579_s20 + $0x38] sm:$0xf] }
 0x1cf   : > { %v2852_v39 = vshll.u32 %v2719_v63, 16 }
 0x1d0   : > { %2250 = vrot.lane.b32.xlu2 %v2151_v45, %s4534_s26  ;;  %3804 = vmatpush.bf16.msra.mxu0 %v4493_v3  ;;  %v2925_v45 = vor.u32 %v2924_v33, %v2921_v31  ;;  %v2153_v31 = vrot.slane %v2059_v14, 6  ;;  %v5686_v33 = vld [vmem:[%s4579_s20 + $0x30] sm:$0xf]  ;;  %v2837_v14 = vrot.slane %v5587_v59, 4 }
 0x1d1   : > { %2578 = vrot.lane.b32.xlu1 %v2479_v17, %s4533_s25  ;;  %v2505_v17 = vrot.slane %v2398_v25, 6  ;;  %4496 = vmatpush.bf16.msra.mxu2 %v4493_v3  ;;  %v2839_v25 = vshrl.u32 %v2718_v0, 16  ;;  %v2854_v62 = vrot.slane %v2852_v39, 7 }
 0x1d2   : > { %2576 = vrot.lane.b32.xlu0 %v2476_v28, %s4533_s25  ;;  %v2237_v42 = vpop.permute.xlu2 %2236  ;;  %v5632_v28 = vld [vmem:[%s4579_s20 + $0x58] sm:$0xf]  ;;  %4497 = vmatpush.bf16.msra.mxu3 %v4493_v3 }
 0x1d3   : > { %v1938_v51 = vpop.permute.xlu1 %1937  ;;  %2345 = vst.msk [vmem:[#allocation2] sm:$0xf] %vm2344_vm7, %v2237_v42  ;;  %v2507_v48 = vrot.slane %v2505_v17, 4  ;;  %v2508_v50 = vrot.slane %v5632_v28, 6  ;;  %v2926_v42 = vsel %vm5328_vm2, %v2917_v41, %v2925_v45 }
 0x1d4   : > { %2030 = vst.msk [vmem:[#allocation2 + $0x40] sm:$0xf] %vm2013_vm6, %v1938_v51  ;;  %v1936_v60 = vpop.permute.xlu0 %1935  ;;  %v3279_v51 = vld [vmem:[%s4579_s20 + $0x54] sm:$0xf]  ;;  %3805 = vmatpush.bf16.msra.mxu0 %v4492_v40 }
 0x1d5   : > { %2029 = vst.msk [vmem:[#allocation2 + $0x3c] sm:$0xf] %vm2013_vm6, %v1936_v60  ;;  %v2504_v60 = vrot.slane %v2502_v44, 4  ;;  %4498 = vmatpush.bf16.msra.mxu2 %v4492_v40  ;;  %v3389_v52 = vrot.slane %v3279_v51, 7  ;;  %v1523_v51 = vld [vmem:[%s4579_s20 + $0x70] sm:$0xf] }
 0x1d6   : > { %4499 = vmatpush.bf16.msra.mxu3 %v4492_v40  ;;  %v2480_v40 = vrot.slane %v2478_v21, 4 }
 0x1d7   : > { %v2506_v44 = vsel %vm5309_vm15, %v2504_v60, %v2505_v17  ;;  %v3391_v49 = vrot.slane %v3389_v52, 4  ;;  %v3390_v3 = vsel %vm5353_vm5, %v3388_v11, %v3389_v52  ;;  %v2844_v17 = vrot.slane %v2842_v26, 7 }
 0x1d8   : > { %3129 = vrot.lane.b32.xlu2 %v2826_v61, %s4535_s27  ;;  %v3392_v61 = vrot.slane %v5659_v34, 7  ;;  %v2152_v60 = vrot.slane %v2150_v35, 4  ;;  %v1797_v52 = vshrl.u32 %v1523_v51, 16  ;;  %v1524_v35 = vld [vmem:[%s4579_s20 + $0x74] sm:$0xf] }
 0x1d9   : > { %3460 = vrot.lane.b32.xlu1 %v3360_v1, %s4536_s28  ;;  %v2509_v1 = vsel %vm5309_vm15, %v2507_v48, %v2508_v50  ;;  %v2156_v48 = vrot.slane %v5686_v33, 6  ;;  %v1810_v11 = vshll.u32 %v1524_v35, 16 }
 0x1da   : > { %3131 = vrot.lane.b32.xlu0 %v2836_v24, %s4535_s27  ;;  %v2567_v30 = vpop.permute.xlu2 %2566  ;;  %v2934_v24 = vrot.slane %v2932_v27, 7  ;;  %v3393_v55 = vsel %vm5353_vm5, %v3391_v49, %v3392_v61  ;;  %v1799_v49 = vrot.slane %v1797_v52, 5 }
 0x1db   : > { %v1944_v19 = vpop.permute.xlu1 %1943 }
 0x1dc   : > { %2033 = vst.msk [vmem:[#allocation2 + $0x4c] sm:$0xf] %vm2013_vm6, %v1944_v19  ;;  %v1942_v23 = vpop.permute.xlu0 %1941  ;;  %v2927_v19 = vrot.slane %v2925_v45, 4  ;;  %v5672_v22 = vor.u32 %v2934_v24, %v2931_v2 }
 0x1dd   : > { %2032 = vst.msk [vmem:[#allocation2 + $0x48] sm:$0xf] %vm2013_vm6, %v1942_v23 }
 0x1e0   : > { %3462 = vrot.lane.b32.xlu2 %v3363_v38, %s4536_s28  ;;  %v2849_v38 = vshrl.u32 %v2719_v63, 16 }
 0x1e1   : > { %2270 = vrot.lane.b32.xlu1 %v2181_v15, %s4534_s26  ;;  %v2390_v15 = vld [vmem:[%s4579_s20 + $0x34] sm:$0xf] }
 0x1e2   : > { %2268 = vrot.lane.b32.xlu0 %v2178_v20, %s4534_s26  ;;  %v3449_v37 = vpop.permute.xlu2 %3448  ;;  %v2841_v20 = vrot.slane %v2839_v25, 6  ;;  %v2481_v41 = vrot.slane %v2390_v15, 6  ;;  %v2851_v21 = vrot.slane %v2849_v38, 6  ;;  %v1812_v15 = vrot.slane %v1810_v11, 6  ;;  %v1525_v38 = vld [vmem:[%s4579_s20 + $0x78] sm:$0xf] }
 0x1e3   : > { %v1950_v47 = vpop.permute.xlu1 %1949  ;;  %v2077_v11 = vld [vmem:[%s4579_s20 + $0x74] sm:$0xf] }
 0x1e4   : > { %2036 = vst.msk [vmem:[#allocation2 + $0x58] sm:$0xf] %vm2013_vm6, %v1950_v47  ;;  %v1948_v57 = vpop.permute.xlu0 %1947  ;;  %v2155_v47 = vrot.slane %v2153_v31, 4  ;;  %v2845_v9 = vor.u32 %v2844_v17, %v2841_v20  ;;  %v5713_v24 = vor.u32 %v2854_v62, %v2851_v21  ;;  %v2483_v25 = vrot.slane %v2481_v41, 4  ;;  %v5733_v20 = vld [vmem:[%s4579_s20 + $0x38] sm:$0xf] }
 0x1e5   : > { %2035 = vst.msk [vmem:[#allocation2 + $0x54] sm:$0xf] %vm2013_vm6, %v1948_v57  ;;  %v1817_v21 = vshrl.u32 %v1525_v38, 16  ;;  %v1820_v62 = vshll.u32 %v1525_v38, 16  ;;  %v5800_v38 = vld [vmem:[%s4579_s20 + $0x78] sm:$0xf] }
 0x1e6   : > { %v2157_v16 = vsel %vm5309_vm15, %v2155_v47, %v2156_v48  ;;  %v2847_v2 = vrot.slane %v2845_v9, 4  ;;  %v3368_v47 = vrot.slane %v5733_v20, 7  ;;  %v2857_v20 = vrot.slane %v5713_v24, 4 }
 0x1e8   : > { %2596 = vrot.lane.b32.xlu2 %v2506_v44, %s4533_s25  ;;  %v2154_v44 = vsel %vm5309_vm15, %v2152_v60, %v2153_v31  ;;  %v2856_v63 = vsel %vm5328_vm2, %v2847_v2, %v5713_v24  ;;  %v2846_v31 = vsel %vm5328_vm2, %v2837_v14, %v2845_v9  ;;  %v3364_v9 = vrot.slane %v3362_v29, 4  ;;  %v5759_v29 = vld [vmem:[%s4579_s20 + $0x58] sm:$0xf] }
 0x1e9   : > { %3149 = vrot.lane.b32.xlu1 %v2926_v42, %s4535_s27  ;;  %v2482_v42 = vsel %vm5309_vm15, %v2480_v40, %v2481_v41  ;;  %v2186_v2 = vrot.slane %v5759_v29, 6 }
 0x1ea   : > { %2598 = vrot.lane.b32.xlu0 %v2509_v1, %s4533_s25  ;;  %v2243_v23 = vpop.permute.xlu2 %2242  ;;  %v1800_v1 = vshll.u32 %v1523_v51, 16  ;;  %v2069_v51 = vld [vmem:[%s4579_s20 + $0x54] sm:$0xf] }
 0x1eb   : > { %v2565_v7 = vpop.permute.xlu1 %2564  ;;  %2348 = vst.msk [vmem:[#allocation2 + $0xc] sm:$0xf] %vm2344_vm7, %v2243_v23  ;;  %v3271_v23 = vld [vmem:[%s4579_s20 + $0x34] sm:$0xf] }
 0x1ec   : > { %2673 = vst.msk [vmem:[#allocation2] sm:$0xf] %vm2672_vm8, %v2565_v7  ;;  %v2239_v13 = vpop.permute.xlu0 %2238  ;;  %v1802_v0 = vrot.slane %v1800_v1, 6  ;;  %v1807_v7 = vshrl.u32 %v1524_v35, 16  ;;  %v2183_v1 = vrot.slane %v2069_v51, 6  ;;  %v1819_v35 = vrot.slane %v1817_v21, 5 }
 0x1ed   : > { %2346 = vst.msk [vmem:[#allocation2 + $0x4] sm:$0xf] %vm2344_vm7, %v2239_v13 }
 0x1ee   : > { %2674 = vst.msk [vmem:[#allocation2 + $0x4] sm:$0xf] %vm2672_vm8, %v2567_v30  ;;  %v2936_v30 = vsel %vm5328_vm2, %v2927_v19, %v5672_v22  ;;  %v1809_v59 = vrot.slane %v1807_v7, 5 }
 0x1f0   : > { %3151 = vrot.lane.b32.xlu2 %v2936_v30, %s4535_s27  ;;  %v3365_v30 = vrot.slane %v3271_v23, 7  ;;  %v1813_v40 = vor.u32 %v1812_v15, %v1809_v59  ;;  %v5777_v23 = vld [vmem:[%s4579_s20 + $0x70] sm:$0xf]  ;;  %v5788_v59 = vld [vmem:[%s4579_s20 + $0x78] sm:$0xf] }
 0x1f1   : > { %3482 = vrot.lane.b32.xlu1 %v3393_v55, %s4536_s28 }
 0x1f2   : > { %3480 = vrot.lane.b32.xlu0 %v3390_v3, %s4536_s28  ;;  %v3122_v27 = vpop.permute.xlu2 %3121  ;;  %v5728_v3 = vor.u32 %v1802_v0, %v1799_v49  ;;  %v2182_v0 = vrot.slane %v2180_v10, 4 }
 0x1f3   : > { %v3120_v45 = vpop.permute.xlu1 %3119 }
 0x1f4   : > { %3227 = vst.msk [vmem:[#allocation2 + $0x4] sm:$0xf] %vm3225_vm9, %v3120_v45  ;;  %v3118_v57 = vpop.permute.xlu0 %3117  ;;  %v1805_v39 = vrot.slane %v5728_v3, 4  ;;  %v3367_v45 = vrot.slane %v3365_v30, 4  ;;  %v2184_v10 = vsel %vm5309_vm15, %v2182_v0, %v2183_v1 }
 0x1f5   : > { %3226 = vst.msk [vmem:[#allocation2] sm:$0xf] %vm3225_vm9, %v3118_v57 }
 0x1f6   : > { %3557 = vst.msk [vmem:[#allocation2] sm:$0xf] %vm3556_vm10, %v3449_v37  ;;  %v5716_v37 = vld [vmem:[%s4579_s20 + $0x38] sm:$0xf]  ;;  %v1814_v52 = vsel %vm5168_vm11, %v1805_v39, %v1813_v40  ;;  %v3369_v8 = vsel %vm5353_vm5, %v3367_v45, %v3368_v47 }
 0x1f7   : > { %v2484_v26 = vrot.slane %v5716_v37, 6  ;;  %v2735_v45 = vld [vmem:[%s4579_s20 + $0x78] sm:$0xf] }
 0x1f8   : > { %2252 = vrot.lane.b32.xlu2 %v2154_v44, %s4534_s26  ;;  %v2185_v44 = vrot.slane %v2183_v1, 4  ;;  %v3009_v1 = vshrl.u32 %v2735_v45, 16 }
 0x1f9   : > { %2580 = vrot.lane.b32.xlu1 %v2482_v42, %s4533_s25  ;;  %v2485_v17 = vsel %vm5309_vm15, %v2483_v25, %v2484_v26  ;;  %v2400_v25 = vld [vmem:[%s4579_s20 + $0x5c] sm:$0xf] }
 0x1fa   : > { %2254 = vrot.lane.b32.xlu0 %v2157_v16, %s4534_s26  ;;  %v3455_v55 = vpop.permute.xlu2 %3454  ;;  %v3366_v16 = vsel %vm5353_vm5, %v3364_v9, %v3365_v30  ;;  %v2187_v6 = vsel %vm5309_vm15, %v2185_v44, %v2186_v2  ;;  %v2511_v30 = vrot.slane %v2400_v25, 6  ;;  %v2532_v9 = vrot.slane %v5800_v38, 6 }
 0x1fb   : > { %v2241_v13 = vpop.permute.xlu1 %2240 }
 0x1fc   : > { %2347 = vst.msk [vmem:[#allocation2 + $0x8] sm:$0xf] %vm2344_vm7, %v2241_v13  ;;  %v3451_v19 = vpop.permute.xlu0 %3450  ;;  %v1815_v13 = vrot.slane %v1813_v40, 4 }
 0x1fd   : > { %3558 = vst.msk [vmem:[#allocation2 + $0x4] sm:$0xf] %vm3556_vm10, %v3451_v19 }
 0x200   : > { %2582 = vrot.lane.b32.xlu2 %v2485_v17, %s4533_s25  ;;  %v2408_v17 = vld [vmem:[%s4579_s20 + $0x7c] sm:$0xf] }
 0x201   : > { %3135 = vrot.lane.b32.xlu1 %v2856_v63, %s4535_s27  ;;  %v2207_v63 = vrot.slane %v2077_v11, 6  ;;  %v2534_v11 = vrot.slane %v2532_v9, 4 }
 0x202   : > { %3133 = vrot.lane.b32.xlu0 %v2846_v31, %s4535_s27  ;;  %v2573_v42 = vpop.permute.xlu2 %2572  ;;  %v2510_v31 = vrot.slane %v2508_v50, 4  ;;  %v2728_v50 = vld [vmem:[%s4579_s20 + $0x5c] sm:$0xf] }
 0x203   : > { %v2571_v41 = vpop.permute.xlu1 %2570  ;;  %v2209_v40 = vrot.slane %v2207_v63, 4 }
 0x204   : > { %2676 = vst.msk [vmem:[#allocation2 + $0xc] sm:$0xf] %vm2672_vm8, %v2571_v41  ;;  %v2569_v57 = vpop.permute.xlu0 %2568  ;;  %v4474_v60 = vld [vmem:[#allocation2] sm:$0xff]  ;;  %v2210_v41 = vrot.slane %v5788_v59, 6 }
 0x205   : > { %2675 = vst.msk [vmem:[#allocation2 + $0x8] sm:$0xf] %vm2672_vm8, %v2569_v57  ;;  %4445 = vmatmul.msk.bf16.vlgmr.msra.gmra.mxu0 %vm3739_vm12, %v4474_v60  ;;  %v2535_v60 = vrot.slane %v2408_v17, 6 }
 0x206   : > { %3228 = vst.msk [vmem:[#allocation2 + $0x8] sm:$0xf] %vm3225_vm9, %v3122_v27  ;;  %v1822_v27 = vrot.slane %v1820_v62, 6  ;;  %v2512_v62 = vsel %vm5309_vm15, %v2510_v31, %v2511_v30 }
 0x207   : > { %v2537_v0 = vrot.slane %v2535_v60, 4 }
 0x208   : > { %3464 = vrot.lane.b32.xlu2 %v3366_v16, %s4536_s28  ;;  %v5771_v14 = vor.u32 %v1822_v27, %v1819_v35  ;;  %v2211_v16 = vsel %vm5309_vm15, %v2209_v40, %v2210_v41  ;;  %v2736_v35 = vld [vmem:[%s4579_s20 + $0x7c] sm:$0xf]  ;;  %v2939_v27 = vshrl.u32 %v2728_v50, 16 }
 0x209   : > { %1957 = vrot.lane.b32.xlu1 %v1814_v52, %s4532_s24  ;;  %v5815_v52 = vld [vmem:[%s4579_s20 + $0x80] sm:$0xf]  ;;  %v3019_v25 = vshrl.u32 %v2736_v35, 16 }
 0x20a   : > { %3466 = vrot.lane.b32.xlu0 %v3369_v8, %s4536_s28  ;;  %v5774_v19 = vpop.permute.xlu2 %3127  ;;  %v1824_v15 = vsel %vm5168_vm11, %v1815_v13, %v5771_v14  ;;  %v3012_v8 = vshll.u32 %v2735_v45, 16  ;;  %v5832_v13 = vld [vmem:[%s4579_s20 + $0x60] sm:$0xf] }
 0x20b   : > { %v3453_v49 = vpop.permute.xlu1 %3452 }
 0x20c   : > { %3559 = vst.msk [vmem:[#allocation2 + $0x8] sm:$0xf] %vm3556_vm10, %v3453_v49  ;;  %v3124_v7 = vpop.permute.xlu0 %3123  ;;  %v2729_v49 = vld [vmem:[%s4579_s20 + $0x60] sm:$0xf] }
 0x20d   : > { %3229 = vst.msk [vmem:[#allocation2 + $0xc] sm:$0xf] %vm3225_vm9, %v3124_v7  ;;  %v2538_v7 = vrot.slane %v5815_v52, 6  ;;  %v2952_v40 = vshll.u32 %v2729_v49, 16 }
 0x20e   : > { %3560 = vst.msk [vmem:[#allocation2 + $0xc] sm:$0xf] %vm3556_vm10, %v3455_v55  ;;  %v2204_v55 = vrot.slane %v5777_v23, 6 }
 0x210   : > { %1959 = vrot.lane.b32.xlu2 %v1824_v15, %s4532_s24  ;;  %v2206_v28 = vrot.slane %v2204_v55, 4  ;;  %v3022_v15 = vshll.u32 %v2736_v35, 16  ;;  %v2954_v35 = vrot.slane %v2952_v40, 7  ;;  %v5870_v40 = vld [vmem:[%s4579_s20 + $0x60] sm:$0xf] }
 0x211   : > { %2274 = vrot.lane.b32.xlu1 %v2187_v6, %s4534_s26  ;;  %v3011_v6 = vrot.slane %v3009_v1, 6 }
 0x212   : > { %2272 = vrot.lane.b32.xlu0 %v2184_v10, %s4534_s26  ;;  %v2265_v21 = vpop.permute.xlu2 %2264  ;;  %v2208_v44 = vsel %vm5309_vm15, %v2206_v28, %v2207_v63  ;;  %v3014_v10 = vrot.slane %v3012_v8, 7  ;;  %v2941_v63 = vrot.slane %v2939_v27, 6  ;;  %v2514_v28 = vrot.slane %v5832_v13, 6  ;;  %v2737_v27 = vld [vmem:[%s4579_s20 + $0x80] sm:$0xf] }
 0x213   : > { %v2247_v39 = vpop.permute.xlu1 %2246  ;;  %2359 = vst.msk [vmem:[#allocation2 + $0x38] sm:$0xf] %vm2344_vm7, %v2265_v21  ;;  %v3024_v1 = vrot.slane %v3022_v15, 7  ;;  %v3032_v15 = vshll.u32 %v2737_v27, 16 }
 0x214   : > { %2350 = vst.msk [vmem:[#allocation2 + $0x14] sm:$0xf] %vm2344_vm7, %v2247_v39  ;;  %v2245_v51 = vpop.permute.xlu0 %2244  ;;  %v2949_v39 = vshrl.u32 %v2729_v49, 16  ;;  %v5845_v21 = vor.u32 %v3014_v10, %v3011_v6  ;;  %v2937_v10 = vrot.slane %v5672_v22, 4 }
 0x215   : > { %2349 = vst.msk [vmem:[#allocation2 + $0x10] sm:$0xf] %vm2344_vm7, %v2245_v51  ;;  %v4475_v57 = vld [vmem:[#allocation2 + $0x8] sm:$0xff]  ;;  %v2513_v51 = vrot.slane %v2511_v30, 4  ;;  %v2536_v30 = vsel %vm5309_vm15, %v2534_v11, %v2535_v60  ;;  %v3281_v11 = vld [vmem:[%s4579_s20 + $0x5c] sm:$0xf] }
 0x216   : > { %2677 = vst.msk [vmem:[#allocation2 + $0x10] sm:$0xf] %vm2672_vm8, %v2573_v42  ;;  %4446 = vmatmul.msk.bf16.gmra.mxu0 %vm3739_vm12, %v4475_v57  ;;  %v2942_v42 = vshll.u32 %v2728_v50, 16  ;;  %v2539_v57 = vsel %vm5309_vm15, %v2537_v0, %v2538_v7 }
 0x218   : > { %2288 = vrot.lane.b32.xlu2 %v2208_v44, %s4534_s26  ;;  %v2944_v17 = vrot.slane %v2942_v42, 7  ;;  %v3017_v42 = vrot.slane %v5845_v21, 4 }
 0x219   : > { %2600 = vrot.lane.b32.xlu1 %v2512_v62, %s4533_s25  ;;  %v3021_v62 = vrot.slane %v3019_v25, 6  ;;  %v3029_v25 = vshrl.u32 %v2737_v27, 16 }
 0x21a   : > { %2290 = vrot.lane.b32.xlu0 %v2211_v16, %s4534_s26  ;;  %v2595_v50 = vpop.permute.xlu2 %2594  ;;  %v2945_v8 = vor.u32 %v2944_v17, %v2941_v63  ;;  %v2951_v16 = vrot.slane %v2949_v39, 6  ;;  %v3395_v17 = vrot.slane %v3281_v11, 7  ;;  %v5899_v11 = vld [vmem:[%s4579_s20 + $0x80] sm:$0xf] }
 0x21b   : > { %v3126_v31 = vpop.permute.xlu1 %3125  ;;  %v3025_v44 = vor.u32 %v3024_v1, %v3021_v62  ;;  %v3031_v22 = vrot.slane %v3029_v25, 6  ;;  %v3398_v62 = vrot.slane %v5870_v40, 7 }
 0x21c   : > { %3230 = vst.msk [vmem:[#allocation2 + $0x10] sm:$0xf] %vm3225_vm9, %v3126_v31  ;;  %v2575_v45 = vpop.permute.xlu0 %2574  ;;  %v2947_v0 = vrot.slane %v2945_v8, 4  ;;  %v5857_v60 = vor.u32 %v2954_v35, %v2951_v16  ;;  %v3289_v35 = vld [vmem:[%s4579_s20 + $0x7c] sm:$0xf] }
 0x21d   : > { %2678 = vst.msk [vmem:[#allocation2 + $0x14] sm:$0xf] %vm2672_vm8, %v2575_v45  ;;  %v3026_v63 = vsel %vm5328_vm2, %v3017_v42, %v3025_v44  ;;  %v2946_v45 = vsel %vm5328_vm2, %v2937_v10, %v2945_v8  ;;  %v2158_v10 = vrot.slane %v2156_v48, 4 }
 0x21e   : > { %3231 = vst.msk [vmem:[#allocation2 + $0x14] sm:$0xf] %vm3225_vm9, %v5774_v19  ;;  %v2515_v19 = vsel %vm5309_vm15, %v2513_v51, %v2514_v28  ;;  %v2956_v39 = vsel %vm5328_vm2, %v2947_v0, %v5857_v60  ;;  %v3034_v51 = vrot.slane %v3032_v15, 7  ;;  %v3419_v0 = vrot.slane %v3289_v35, 7 }
 0x220   : > { %2602 = vrot.lane.b32.xlu2 %v2515_v19, %s4533_s25  ;;  %v3027_v19 = vrot.slane %v3025_v44, 4  ;;  %v5882_v27 = vor.u32 %v3034_v51, %v3031_v22  ;;  %v2061_v44 = vld [vmem:[%s4579_s20 + $0x34] sm:$0xf]  ;;  %v2720_v51 = vld [vmem:[%s4579_s20 + $0x3c] sm:$0xf] }
 0x221   : > { %2618 = vrot.lane.b32.xlu1 %v2539_v57, %s4533_s25  ;;  %v3397_v57 = vrot.slane %v3395_v17, 4  ;;  %v2159_v25 = vrot.slane %v2061_v44, 6 }
 0x222   : > { %2616 = vrot.lane.b32.xlu0 %v2536_v30, %s4533_s25  ;;  %v3477_v31 = vpop.permute.xlu2 %3476  ;;  %v3394_v30 = vrot.slane %v3392_v61, 4 }
 0x223   : > { %v3459_v49 = vpop.permute.xlu1 %3458  ;;  %v3399_v34 = vsel %vm5353_vm5, %v3397_v57, %v3398_v62  ;;  %v2160_v48 = vsel %vm5309_vm15, %v2158_v10, %v2159_v25 }
 0x224   : > { %3562 = vst.msk [vmem:[#allocation2 + $0x14] sm:$0xf] %vm3556_vm10, %v3459_v49  ;;  %v3457_v6 = vpop.permute.xlu0 %3456  ;;  %v5886_v49 = vld [vmem:[%s4579_s20 + $0x78] sm:$0xf]  ;;  %v3396_v61 = vsel %vm5353_vm5, %v3394_v30, %v3395_v17  ;;  %v3422_v17 = vrot.slane %v5899_v11, 7 }
 0x225   : > { %3561 = vst.msk [vmem:[#allocation2 + $0x10] sm:$0xf] %vm3556_vm10, %v3457_v6  ;;  %v6914_v6 = vrot.slane %v5886_v49, 7  ;;  %v5925_v30 = vld [vmem:[%s4579_s20 + $0x40] sm:$0xf] }
 0x227   : > { %v3418_v22 = vrot.slane %v6914_v6, 4 }
 0x228   : > { %3153 = vrot.lane.b32.xlu2 %v2946_v45, %s4535_s27 }
 0x229   : > { %3169 = vrot.lane.b32.xlu1 %v3026_v63, %s4535_s27  ;;  %v3421_v63 = vrot.slane %v3419_v0, 4  ;;  %v3420_v35 = vsel %vm5353_vm5, %v3418_v22, %v3419_v0 }
 0x22a   : > { %3155 = vrot.lane.b32.xlu0 %v2956_v39, %s4535_s27  ;;  %v2251_v42 = vpop.permute.xlu2 %2250  ;;  %v2392_v39 = vld [vmem:[%s4579_s20 + $0x3c] sm:$0xf] }
 0x22b   : > { %v2593_v1 = vpop.permute.xlu1 %2592  ;;  %2352 = vst.msk [vmem:[#allocation2 + $0x1c] sm:$0xf] %vm2344_vm7, %v2251_v42  ;;  %v2487_v57 = vrot.slane %v2392_v39, 6 }
 0x22c   : > { %2687 = vst.msk [vmem:[#allocation2 + $0x38] sm:$0xf] %vm2672_vm8, %v2593_v1  ;;  %v2267_v8 = vpop.permute.xlu0 %2266  ;;  %v4476_v16 = vld [vmem:[#allocation2 + $0x10] sm:$0xff]  ;;  %v3423_v1 = vsel %vm5353_vm5, %v3421_v63, %v3422_v17  ;;  %v1526_v63 = vld [vmem:[%s4579_s20 + $0x7c] sm:$0xf] }
 0x22d   : > { %2360 = vst.msk [vmem:[#allocation2 + $0x3c] sm:$0xf] %vm2344_vm7, %v2267_v8  ;;  %4447 = vmatmul.msk.bf16.gmra.mxu0 %vm3739_vm12, %v4476_v16  ;;  %v2859_v8 = vshrl.u32 %v2720_v51, 16  ;;  %v2862_v16 = vshll.u32 %v2720_v51, 16  ;;  %v2489_v42 = vrot.slane %v2487_v57, 4 }
 0x22e   : > { %2688 = vst.msk [vmem:[#allocation2 + $0x3c] sm:$0xf] %vm2672_vm8, %v2595_v50  ;;  %v3036_v50 = vsel %vm5328_vm2, %v3027_v19, %v5882_v27  ;;  %v2721_v19 = vld [vmem:[%s4579_s20 + $0x40] sm:$0xf]  ;;  %v3273_v51 = vld [vmem:[%s4579_s20 + $0x3c] sm:$0xf] }
 0x22f   : > { %v2864_v10 = vrot.slane %v2862_v16, 7  ;;  %v2869_v0 = vshrl.u32 %v2721_v19, 16 }
 0x230   : > { %3171 = vrot.lane.b32.xlu2 %v3036_v50, %s4535_s27  ;;  %v2861_v50 = vrot.slane %v2859_v8, 6 }
 0x231   : > { %3486 = vrot.lane.b32.xlu1 %v3399_v34, %s4536_s28  ;;  %v2490_v34 = vrot.slane %v5925_v30, 6 }
 0x232   : > { %3484 = vrot.lane.b32.xlu0 %v3396_v61, %s4536_s28  ;;  %v3130_v33 = vpop.permute.xlu2 %3129  ;;  %v2486_v61 = vrot.slane %v2484_v26, 4  ;;  %v2865_v16 = vor.u32 %v2864_v10, %v2861_v50 }
 0x233   : > { %v3148_v15 = vpop.permute.xlu1 %3147  ;;  %v2491_v26 = vsel %vm5309_vm15, %v2489_v42, %v2490_v34  ;;  %v3370_v42 = vrot.slane %v3368_v47, 4 }
 0x234   : > { %3241 = vst.msk [vmem:[#allocation2 + $0x3c] sm:$0xf] %vm3225_vm9, %v3148_v15  ;;  %v3146_v45 = vpop.permute.xlu0 %3145  ;;  %v2872_v15 = vshll.u32 %v2721_v19, 16  ;;  %v2488_v8 = vsel %vm5309_vm15, %v2486_v61, %v2487_v57  ;;  %v2867_v10 = vrot.slane %v2865_v16, 4  ;;  %v2866_v24 = vsel %vm5328_vm2, %v2857_v20, %v2865_v16  ;;  %v2071_v16 = vld [vmem:[%s4579_s20 + $0x5c] sm:$0xf] }
 0x235   : > { %3240 = vst.msk [vmem:[#allocation2 + $0x38] sm:$0xf] %vm3225_vm9, %v3146_v45  ;;  %v2161_v45 = vrot.slane %v2159_v25, 4  ;;  %v1527_v25 = vld [vmem:[%s4579_s20 + $0x80] sm:$0xf] }
 0x236   : > { %3571 = vst.msk [vmem:[#allocation2 + $0x38] sm:$0xf] %vm3556_vm10, %v3477_v31  ;;  %v5932_v31 = vld [vmem:[%s4579_s20 + $0x38] sm:$0xf]  ;;  %v2874_v19 = vrot.slane %v2872_v15, 7  ;;  %v1837_v57 = vshrl.u32 %v1527_v25, 16 }
 0x237   : > { %v2162_v22 = vrot.slane %v5932_v31, 6  ;;  %v1840_v61 = vshll.u32 %v1527_v25, 16  ;;  %v1825_v25 = vrot.slane %v5771_v14, 4 }
 0x238   : > { %3500 = vrot.lane.b32.xlu2 %v3420_v35, %s4536_s28  ;;  %v2871_v35 = vrot.slane %v2869_v0, 6 }
 0x239   : > { %2256 = vrot.lane.b32.xlu1 %v2160_v48, %s4534_s26  ;;  %v1827_v48 = vshrl.u32 %v1526_v63, 16 }
 0x23a   : > { %3502 = vrot.lane.b32.xlu0 %v3423_v1, %s4536_s28  ;;  %v3463_v37 = vpop.permute.xlu2 %3462  ;;  %v1830_v1 = vshll.u32 %v1526_v63, 16  ;;  %v5959_v0 = vor.u32 %v2874_v19, %v2871_v35  ;;  %v5976_v35 = vld [vmem:[%s4579_s20 + $0x40] sm:$0xf] }
 0x23b   : > { %v2249_v44 = vpop.permute.xlu1 %2248  ;;  %v1829_v63 = vrot.slane %v1827_v48, 5  ;;  %v1839_v48 = vrot.slane %v1837_v57, 5 }
 0x23c   : > { %2351 = vst.msk [vmem:[#allocation2 + $0x18] sm:$0xf] %vm2344_vm7, %v2249_v44  ;;  %v3479_v39 = vpop.permute.xlu0 %3478  ;;  %v2163_v44 = vsel %vm5309_vm15, %v2161_v45, %v2162_v22  ;;  %v1832_v6 = vrot.slane %v1830_v1, 6  ;;  %v1842_v1 = vrot.slane %v1840_v61, 6  ;;  %v2877_v56 = vrot.slane %v5959_v0, 4 }
 0x23d   : > { %3572 = vst.msk [vmem:[#allocation2 + $0x3c] sm:$0xf] %vm3556_vm10, %v3479_v39  ;;  %v3371_v39 = vrot.slane %v3273_v51, 7 }
 0x23e   : > { %v1833_v51 = vor.u32 %v1832_v6, %v1829_v63  ;;  %v5979_v19 = vor.u32 %v1842_v1, %v1839_v48  ;;  %v3374_v63 = vrot.slane %v5976_v35, 7  ;;  %v2402_v48 = vld [vmem:[%s4579_s20 + $0x64] sm:$0xf] }
 0x240   : > { %2258 = vrot.lane.b32.xlu2 %v2163_v44, %s4534_s26  ;;  %v1834_v14 = vsel %vm5168_vm11, %v1825_v25, %v1833_v51 }
 0x241   : > { %2586 = vrot.lane.b32.xlu1 %v2491_v26, %s4533_s25  ;;  %v3372_v26 = vsel %vm5353_vm5, %v3370_v42, %v3371_v39  ;;  %v3373_v42 = vrot.slane %v3371_v39, 4 }
 0x242   : > { %2584 = vrot.lane.b32.xlu0 %v2488_v8, %s4533_s25  ;;  %v2597_v47 = vpop.permute.xlu2 %2596  ;;  %v2876_v8 = vsel %vm5328_vm2, %v2867_v10, %v5959_v0  ;;  %v2189_v10 = vrot.slane %v2071_v16, 6  ;;  %v6029_v16 = vld [vmem:[%s4579_s20 + $0x80] sm:$0xf] }
 0x243   : > { %v2579_v50 = vpop.permute.xlu1 %2578  ;;  %v3375_v39 = vsel %vm5353_vm5, %v3373_v42, %v3374_v63 }
 0x244   : > { %2680 = vst.msk [vmem:[#allocation2 + $0x1c] sm:$0xf] %vm2672_vm8, %v2579_v50  ;;  %v2577_v15 = vpop.permute.xlu0 %2576  ;;  %v4481_v45 = vld [vmem:[#allocation2 + $0x38] sm:$0xff] }
 0x245   : > { %2679 = vst.msk [vmem:[#allocation2 + $0x18] sm:$0xf] %vm2672_vm8, %v2577_v15  ;;  %4452 = vmatmul.msk.bf16.vlgmr.msra.gmra.mxu2 %vm3739_vm12, %v4481_v45  ;;  %v2079_v50 = vld [vmem:[%s4579_s20 + $0x7c] sm:$0xf]  ;;  %v5995_v15 = vld [vmem:[%s4579_s20 + $0x60] sm:$0xf] }
 0x246   : > { %3232 = vst.msk [vmem:[#allocation2 + $0x18] sm:$0xf] %vm3225_vm9, %v3130_v33  ;;  %v1835_v33 = vrot.slane %v1833_v51, 4  ;;  %v2213_v45 = vrot.slane %v2079_v50, 6  ;;  %v2192_v51 = vrot.slane %v5995_v15, 6  ;;  %v2516_v50 = vrot.slane %v2514_v28, 4 }
 0x248   : > { %3137 = vrot.lane.b32.xlu2 %v2866_v24, %s4535_s27  ;;  %v1844_v61 = vsel %vm5168_vm11, %v1835_v33, %v5979_v19  ;;  %v2517_v33 = vrot.slane %v2402_v48, 6 }
 0x249   : > { %3468 = vrot.lane.b32.xlu1 %v3372_v26, %s4536_s28  ;;  %v2191_v26 = vrot.slane %v2189_v10, 4 }
 0x24a   : > { %3139 = vrot.lane.b32.xlu0 %v2876_v8, %s4535_s27  ;;  %v3152_v57 = vpop.permute.xlu2 %3151  ;;  %v2188_v8 = vrot.slane %v2186_v2, 4  ;;  %v6022_v2 = vld [vmem:[%s4579_s20 + $0x68] sm:$0xf]  ;;  %v2519_v42 = vrot.slane %v2517_v33, 4 }
 0x24b   : > { %v3461_v6 = vpop.permute.xlu1 %3460  ;;  %v2193_v29 = vsel %vm5309_vm15, %v2191_v26, %v2192_v51  ;;  %v2216_v26 = vrot.slane %v6029_v16, 6  ;;  %v2194_v16 = vrot.slane %v2192_v51, 4  ;;  %v6258_v51 = vld [vmem:[%s4579_s20 + $0x70] sm:$0xf] }
 0x24c   : > { %3563 = vst.msk [vmem:[#allocation2 + $0x18] sm:$0xf] %vm3556_vm10, %v3461_v6  ;;  %v3132_v44 = vpop.permute.xlu0 %3131  ;;  %v2730_v6 = vld [vmem:[%s4579_s20 + $0x64] sm:$0xf] }
 0x24d   : > { %3233 = vst.msk [vmem:[#allocation2 + $0x1c] sm:$0xf] %vm3225_vm9, %v3132_v44  ;;  %v2959_v25 = vshrl.u32 %v2730_v6, 16  ;;  %v2962_v44 = vshll.u32 %v2730_v6, 16  ;;  %v6050_v6 = vld [vmem:[%s4579_s20 + $0x88] sm:$0xf] }
 0x24e   : > { %3564 = vst.msk [vmem:[#allocation2 + $0x1c] sm:$0xf] %vm3556_vm10, %v3463_v37  ;;  %v2212_v37 = vrot.slane %v2210_v41, 4 }
 0x24f   : > { %v2961_v48 = vrot.slane %v2959_v25, 6  ;;  %v2731_v25 = vld [vmem:[%s4579_s20 + $0x68] sm:$0xf] }
 0x250   : > { %3470 = vrot.lane.b32.xlu2 %v3375_v39, %s4536_s28  ;;  %v2214_v24 = vsel %vm5309_vm15, %v2212_v37, %v2213_v45  ;;  %v2738_v39 = vld [vmem:[%s4579_s20 + $0x84] sm:$0xf] }
 0x251   : > { %1963 = vrot.lane.b32.xlu1 %v1844_v61, %s4532_s24  ;;  %v2520_v61 = vrot.slane %v6022_v2, 6  ;;  %v2410_v37 = vld [vmem:[%s4579_s20 + $0x84] sm:$0xf]  ;;  %v3039_v28 = vshrl.u32 %v2738_v39, 16 }
 0x252   : > { %1961 = vrot.lane.b32.xlu0 %v1834_v14, %s4532_s24  ;;  %v2253_v41 = vpop.permute.xlu2 %2252 }
 0x253   : > { %v2271_v20 = vpop.permute.xlu1 %2270  ;;  %2353 = vst.msk [vmem:[#allocation2 + $0x20] sm:$0xf] %vm2344_vm7, %v2253_v41  ;;  %v2521_v13 = vsel %vm5309_vm15, %v2519_v42, %v2520_v61  ;;  %v2541_v41 = vrot.slane %v2410_v37, 6 }
 0x254   : > { %2362 = vst.msk [vmem:[#allocation2 + $0x44] sm:$0xf] %vm2344_vm7, %v2271_v20  ;;  %v2269_v1 = vpop.permute.xlu0 %2268  ;;  %v2215_v20 = vrot.slane %v2213_v45, 4  ;;  %v2518_v45 = vsel %vm5309_vm15, %v2516_v50, %v2517_v33 }
 0x255   : > { %2361 = vst.msk [vmem:[#allocation2 + $0x40] sm:$0xf] %vm2344_vm7, %v2269_v1  ;;  %v4477_v59 = vld [vmem:[#allocation2 + $0x18] sm:$0xff]  ;;  %v2964_v1 = vrot.slane %v2962_v44, 7  ;;  %v3041_v44 = vrot.slane %v3039_v28, 6 }
 0x256   : > { %2689 = vst.msk [vmem:[#allocation2 + $0x40] sm:$0xf] %vm2672_vm8, %v2597_v47  ;;  %4448 = vmatmul.msk.bf16.gmra.mxu0 %vm3739_vm12, %v4477_v59  ;;  %v2190_v47 = vsel %vm5309_vm15, %v2188_v8, %v2189_v10  ;;  %v3042_v59 = vshll.u32 %v2738_v39, 16  ;;  %v2543_v39 = vrot.slane %v2541_v41, 4 }
 0x258   : > { %2276 = vrot.lane.b32.xlu2 %v2190_v47, %s4534_s26  ;;  %v2965_v47 = vor.u32 %v2964_v1, %v2961_v48  ;;  %v3044_v42 = vrot.slane %v3042_v59, 7  ;;  %v2972_v48 = vshll.u32 %v2731_v25, 16 }
 0x259   : > { %2292 = vrot.lane.b32.xlu1 %v2214_v24, %s4534_s26  ;;  %v2739_v24 = vld [vmem:[%s4579_s20 + $0x88] sm:$0xf] }
 0x25a   : > { %2278 = vrot.lane.b32.xlu0 %v2193_v29, %s4534_s26  ;;  %v2583_v8 = vpop.permute.xlu2 %2582  ;;  %v2217_v29 = vsel %vm5309_vm15, %v2215_v20, %v2216_v26  ;;  %v3049_v33 = vshrl.u32 %v2739_v24, 16  ;;  %v2969_v20 = vshrl.u32 %v2731_v25, 16  ;;  %v3045_v28 = vor.u32 %v3044_v42, %v3041_v44 }
 0x25b   : > { %v3150_v14 = vpop.permute.xlu1 %3149  ;;  %v3037_v42 = vrot.slane %v5882_v27, 4 }
 0x25c   : > { %3242 = vst.msk [vmem:[#allocation2 + $0x40] sm:$0xf] %vm3225_vm9, %v3150_v14  ;;  %v2599_v10 = vpop.permute.xlu0 %2598  ;;  %v3052_v14 = vshll.u32 %v2739_v24, 16  ;;  %v3051_v59 = vrot.slane %v3049_v33, 6  ;;  %v3047_v25 = vrot.slane %v3045_v28, 4 }
 0x25d   : > { %2690 = vst.msk [vmem:[#allocation2 + $0x44] sm:$0xf] %vm2672_vm8, %v2599_v10  ;;  %v2544_v10 = vrot.slane %v6050_v6, 6 }
 0x25e   : > { %3243 = vst.msk [vmem:[#allocation2 + $0x44] sm:$0xf] %vm3225_vm9, %v3152_v57  ;;  %v2957_v57 = vrot.slane %v5857_v60, 4  ;;  %v2540_v60 = vrot.slane %v2538_v7, 4  ;;  %v2971_v7 = vrot.slane %v2969_v20, 6 }
 0x25f   : > { %v2545_v24 = vsel %vm5309_vm15, %v2543_v39, %v2544_v10  ;;  %v3291_v20 = vld [vmem:[%s4579_s20 + $0x84] sm:$0xf] }
 0x260   : > { %2294 = vrot.lane.b32.xlu2 %v2217_v29, %s4534_s26  ;;  %v2542_v52 = vsel %vm5309_vm15, %v2540_v60, %v2541_v41  ;;  %v2974_v29 = vrot.slane %v2972_v48, 7  ;;  %v3046_v60 = vsel %vm5328_vm2, %v3037_v42, %v3045_v28  ;;  %v2722_v42 = vld [vmem:[%s4579_s20 + $0x44] sm:$0xf] }
 0x261   : > { %2606 = vrot.lane.b32.xlu1 %v2521_v13, %s4533_s25  ;;  %v2966_v13 = vsel %vm5328_vm2, %v2957_v57, %v2965_v47 }
 0x262   : > { %2604 = vrot.lane.b32.xlu0 %v2518_v45, %s4533_s25  ;;  %v3465_v1 = vpop.permute.xlu2 %3464  ;;  %v3054_v45 = vrot.slane %v3052_v14, 7  ;;  %v3283_v14 = vld [vmem:[%s4579_s20 + $0x64] sm:$0xf]  ;;  %v6082_v39 = vor.u32 %v2974_v29, %v2971_v7  ;;  %v3400_v29 = vrot.slane %v3398_v62, 4  ;;  %v6123_v62 = vld [vmem:[%s4579_s20 + $0x88] sm:$0xf] }
 0x263   : > { %v3483_v50 = vpop.permute.xlu1 %3482  ;;  %v3401_v48 = vrot.slane %v3283_v14, 7 }
 0x264   : > { %3574 = vst.msk [vmem:[#allocation2 + $0x44] sm:$0xf] %vm3556_vm10, %v3483_v50  ;;  %v3481_v37 = vpop.permute.xlu0 %3480  ;;  %v6076_v57 = vor.u32 %v3054_v45, %v3051_v59  ;;  %v2967_v50 = vrot.slane %v2965_v47, 4  ;;  %v6095_v47 = vld [vmem:[%s4579_s20 + $0x68] sm:$0xf]  ;;  %v3425_v59 = vrot.slane %v3291_v20, 7 }
 0x265   : > { %3573 = vst.msk [vmem:[#allocation2 + $0x40] sm:$0xf] %vm3556_vm10, %v3481_v37  ;;  %v3403_v45 = vrot.slane %v3401_v48, 4  ;;  %v3402_v40 = vsel %vm5353_vm5, %v3400_v29, %v3401_v48  ;;  %v3428_v20 = vrot.slane %v6123_v62, 7 }
 0x266   : > { %v3056_v27 = vsel %vm5328_vm2, %v3047_v25, %v6076_v57 }
 0x268   : > { %2620 = vrot.lane.b32.xlu2 %v2542_v52, %s4533_s25  ;;  %v2063_v52 = vld [vmem:[%s4579_s20 + $0x3c] sm:$0xf] }
 0x269   : > { %3157 = vrot.lane.b32.xlu1 %v2966_v13, %s4535_s27  ;;  %v3424_v13 = vrot.slane %v3422_v17, 4  ;;  %v2165_v25 = vrot.slane %v2063_v52, 6 }
 0x26a   : > { %2622 = vrot.lane.b32.xlu0 %v2545_v24, %s4533_s25  ;;  %v1960_v37 = vpop.permute.xlu2 %1959  ;;  %v3404_v24 = vrot.slane %v6095_v47, 7 }
 0x26b   : > { %v2581_v44 = vpop.permute.xlu1 %2580  ;;  %2041 = vst.msk [vmem:[#allocation2 + $0x6c] sm:$0xf] %vm2013_vm6, %v1960_v37  ;;  %v3426_v17 = vsel %vm5353_vm5, %v3424_v13, %v3425_v59 }
 0x26c   : > { %2681 = vst.msk [vmem:[#allocation2 + $0x20] sm:$0xf] %vm2672_vm8, %v2581_v44  ;;  %v2255_v33 = vpop.permute.xlu0 %2254  ;;  %v4482_v41 = vld [vmem:[#allocation2 + $0x40] sm:$0xff]  ;;  %v3405_v44 = vsel %vm5353_vm5, %v3403_v45, %v3404_v24 }
 0x26d   : > { %2354 = vst.msk [vmem:[#allocation2 + $0x24] sm:$0xf] %vm2344_vm7, %v2255_v33  ;;  %4453 = vmatmul.msk.bf16.gmra.mxu2 %vm3739_vm12, %v4482_v41  ;;  %v2879_v33 = vshrl.u32 %v2722_v42, 16  ;;  %v2882_v41 = vshll.u32 %v2722_v42, 16  ;;  %v3275_v45 = vld [vmem:[%s4579_s20 + $0x44] sm:$0xf] }
 0x26e   : > { %2682 = vst.msk [vmem:[#allocation2 + $0x24] sm:$0xf] %vm2672_vm8, %v2583_v8  ;;  %v2976_v8 = vsel %vm5328_vm2, %v2967_v50, %v6082_v39  ;;  %v2164_v50 = vrot.slane %v2162_v22, 4  ;;  %v3377_v42 = vrot.slane %v3275_v45, 7 }
 0x26f   : > { %v2881_v31 = vrot.slane %v2879_v33, 6  ;;  %v2884_v22 = vrot.slane %v2882_v41, 7 }
 0x270   : > { %3159 = vrot.lane.b32.xlu2 %v2976_v8, %s4535_s27  ;;  %v2166_v13 = vsel %vm5309_vm15, %v2164_v50, %v2165_v25  ;;  %v3379_v50 = vrot.slane %v3377_v42, 4 }
 0x271   : > { %3175 = vrot.lane.b32.xlu1 %v3056_v27, %s4535_s27  ;;  %v2394_v27 = vld [vmem:[%s4579_s20 + $0x44] sm:$0xf] }
 0x272   : > { %3173 = vrot.lane.b32.xlu0 %v3046_v60, %s4535_s27  ;;  %v2289_v11 = vpop.permute.xlu2 %2288  ;;  %v3427_v60 = vrot.slane %v3425_v59, 4  ;;  %v2493_v59 = vrot.slane %v2394_v27, 6  ;;  %v3381_v35 = vsel %vm5353_vm5, %v3379_v50, %v3380_v58  ;;  %v6227_v50 = vld [vmem:[%s4579_s20 + $0x68] sm:$0xf] }
 0x273   : > { %v3136_v28 = vpop.permute.xlu1 %3135 }
 0x274   : > { %3235 = vst.msk [vmem:[#allocation2 + $0x24] sm:$0xf] %vm3225_vm9, %v3136_v28  ;;  %v3134_v7 = vpop.permute.xlu0 %3133  ;;  %v3429_v28 = vsel %vm5353_vm5, %v3427_v60, %v3428_v20  ;;  %v2495_v29 = vrot.slane %v2493_v59, 4 }
 0x275   : > { %3234 = vst.msk [vmem:[#allocation2 + $0x20] sm:$0xf] %vm3225_vm9, %v3134_v7 }
 0x276   : > { %3565 = vst.msk [vmem:[#allocation2 + $0x20] sm:$0xf] %vm3556_vm10, %v3465_v1  ;;  %v2167_v1 = vrot.slane %v2165_v25, 4  ;;  %v2497_v30 = vsel %vm5309_vm15, %v2495_v29, %v2496_v53  ;;  %v3376_v53 = vrot.slane %v3374_v63, 4 }
 0x278   : > { %3488 = vrot.lane.b32.xlu2 %v3402_v40, %s4536_s28  ;;  %v2169_v8 = vsel %vm5309_vm15, %v2167_v1, %v2168_v4  ;;  %v2885_v4 = vor.u32 %v2884_v22, %v2881_v31 }
 0x279   : > { %3504 = vrot.lane.b32.xlu1 %v3426_v17, %s4536_s28 }
 0x27a   : > { %3490 = vrot.lane.b32.xlu0 %v3405_v44, %s4536_s28  ;;  %v2603_v48 = vpop.permute.xlu2 %2602  ;;  %v2492_v44 = vrot.slane %v2490_v34, 4  ;;  %v2886_v1 = vsel %vm5328_vm2, %v2877_v56, %v2885_v4  ;;  %v1529_v34 = vld [vmem:[%s4579_s20 + $0x88] sm:$0xf] }
 0x27b   : > { %v1958_v14 = vpop.permute.xlu1 %1957  ;;  %v1860_v43 = vshll.u32 %v1529_v34, 16 }
 0x27c   : > { %2040 = vst.msk [vmem:[#allocation2 + $0x68] sm:$0xf] %vm2013_vm6, %v1958_v14  ;;  %v3467_v37 = vpop.permute.xlu0 %3466  ;;  %v2494_v14 = vsel %vm5309_vm15, %v2492_v44, %v2493_v59  ;;  %v2887_v59 = vrot.slane %v2885_v4, 4  ;;  %v1845_v44 = vrot.slane %v5979_v19, 4 }
 0x27d   : > { %3566 = vst.msk [vmem:[#allocation2 + $0x24] sm:$0xf] %vm3556_vm10, %v3467_v37  ;;  %v1521_v37 = vld [vmem:[%s4579_s20 + $0x68] sm:$0xf]  ;;  %v1862_v29 = vrot.slane %v1860_v43, 6 }
 0x27e   : > { %2371 = vst.msk [vmem:[#allocation2 + $0x68] sm:$0xf] %vm2344_vm7, %v2289_v11  ;;  %v1528_v11 = vld [vmem:[%s4579_s20 + $0x84] sm:$0xf]  ;;  %v1780_v56 = vshll.u32 %v1521_v37, 16  ;;  %v2896_v4 = vsel %vm5328_vm2, %v2887_v59, %v5498_v32 }
 0x27f   : > { %v1847_v33 = vshrl.u32 %v1528_v11, 16  ;;  %v1850_v41 = vshll.u32 %v1528_v11, 16  ;;  %v3378_v11 = vsel %vm5353_vm5, %v3376_v53, %v3377_v42  ;;  %v2404_v53 = vld [vmem:[%s4579_s20 + $0x6c] sm:$0xf] }
 0x280   : > { %3506 = vrot.lane.b32.xlu2 %v3429_v28, %s4536_s28  ;;  %v1777_v28 = vshrl.u32 %v1521_v37, 16 }
 0x281   : > { %2262 = vrot.lane.b32.xlu1 %v2169_v8, %s4534_s26  ;;  %v1849_v27 = vrot.slane %v1847_v33, 5  ;;  %v1852_v60 = vrot.slane %v1850_v41, 6  ;;  %v1857_v8 = vshrl.u32 %v1529_v34, 16  ;;  %v2081_v34 = vld [vmem:[%s4579_s20 + $0x84] sm:$0xf] }
 0x282   : > { %2260 = vrot.lane.b32.xlu0 %v2166_v13, %s4534_s26  ;;  %v6154_v7 = vpop.f32.mrf.mxu0  ;;  %v3154_v40 = vpop.permute.xlu2 %3153 }
 0x283   : > { %v2275_v52 = vpop.permute.xlu1 %2274  ;;  %v3897_v17 = vpack.c.bf16 %v6154_v7, %v6154_v7  ;;  %v1853_v63 = vor.u32 %v1852_v60, %v1849_v27  ;;  %v2218_v27 = vrot.slane %v2216_v26, 4  ;;  %v2219_v60 = vrot.slane %v2081_v34, 6 }
 0x284   : > { %2364 = vst.msk [vmem:[#allocation2 + $0x4c] sm:$0xf] %vm2344_vm7, %v2275_v52  ;;  %v2273_v0 = vpop.permute.xlu0 %2272  ;;  %v4478_v25 = vld [vmem:[#allocation2 + $0x20] sm:$0xff]  ;;  %v1859_v52 = vrot.slane %v1857_v8, 5 }
 0x285   : > { %2363 = vst.msk [vmem:[#allocation2 + $0x48] sm:$0xf] %vm2344_vm7, %v2273_v0  ;;  %4449 = vmatmul.msk.bf16.gmra.mxu0 %vm3739_vm12, %v4478_v25  ;;  %v1779_v0 = vrot.slane %v1777_v28, 5  ;;  %v1855_v46 = vrot.slane %v1853_v63, 4  ;;  %v2220_v28 = vsel %vm5309_vm15, %v2218_v27, %v2219_v60 }
 0x286   : > { %3934 = vst.msk [vmem:[%s6152_s12] sm:$0xf] %vm3933_vm13, %v3897_v17  ;;  %v1782_v17 = vrot.slane %v1780_v56, 6  ;;  %v6203_v58 = vor.u32 %v1862_v29, %v1859_v52  ;;  %v2523_v56 = vrot.slane %v2404_v53, 6  ;;  %v6265_v29 = vld [vmem:[%s4579_s20 + $0x88] sm:$0xf] }
 0x287   : > { %2692 = vst.msk [vmem:[#allocation2 + $0x4c] sm:$0xf] %vm2672_vm8, %v2603_v48 }
 0x288   : > { %2588 = vrot.lane.b32.xlu2 %v2494_v14, %s4533_s25  ;;  %v6212_v33 = vor.u32 %v1782_v17, %v1779_v0  ;;  %v1864_v19 = vsel %vm5168_vm11, %v1855_v46, %v6203_v58  ;;  %v2522_v17 = vrot.slane %v2520_v61, 4  ;;  %v2740_v46 = vld [vmem:[%s4579_s20 + $0x8c] sm:$0xf] }
 0x289   : > { %3141 = vrot.lane.b32.xlu1 %v2886_v1, %s4535_s27  ;;  %v1775_v1 = vrot.slane %v5283_v5, 4  ;;  %v1854_v5 = vsel %vm5168_vm11, %v1845_v44, %v1853_v63  ;;  %v2412_v44 = vld [vmem:[%s4579_s20 + $0x8c] sm:$0xf]  ;;  %v3059_v61 = vshrl.u32 %v2740_v46, 16 }
 0x28a   : > { %2590 = vrot.lane.b32.xlu0 %v2497_v30, %s4533_s25  ;;  %v6180_v22 = vpop.f32.mrf.mxu0  ;;  %v3172_v45 = vpop.permute.xlu2 %3171  ;;  %v2547_v34 = vrot.slane %v2412_v44, 6 }
 0x28b   : > { %v2601_v31 = vpop.permute.xlu1 %2600  ;;  %v3898_v13 = vpack.c.bf16 %v6180_v22, %v6180_v22  ;;  %v1784_v37 = vsel %vm5168_vm11, %v1775_v1, %v6212_v33  ;;  %v3061_v53 = vrot.slane %v3059_v61, 6 }
 0x28c   : > { %2691 = vst.msk [vmem:[#allocation2 + $0x48] sm:$0xf] %vm2672_vm8, %v2601_v31  ;;  %v2291_v48 = vpop.permute.xlu0 %2290  ;;  %v2198_v31 = vrot.slane %v6227_v50, 6 }
 0x28d   : > { %2372 = vst.msk [vmem:[#allocation2 + $0x6c] sm:$0xf] %vm2344_vm7, %v2291_v48 }
 0x28e   : > { %3935 = vst.msk [vmem:[%s6152_s12 + $0x4] sm:$0xf] %vm3933_vm13, %v3898_v13 }
 0x28f   : > { %3244 = vst.msk [vmem:[#allocation2 + $0x48] sm:$0xf] %vm3225_vm9, %v3154_v40  ;;  %v2073_v40 = vld [vmem:[%s4579_s20 + $0x64] sm:$0xf] }
 0x290   : > { %3143 = vrot.lane.b32.xlu2 %v2896_v4, %s4535_s27  ;;  %v2195_v14 = vrot.slane %v2073_v40, 6  ;;  %v2526_v4 = vrot.slane %v6258_v51, 6  ;;  %v2222_v40 = vrot.slane %v6265_v29, 6 }
 0x291   : > { %3474 = vrot.lane.b32.xlu1 %v3381_v35, %s4536_s28 }
 0x292   : > { %3472 = vrot.lane.b32.xlu0 %v3378_v11, %s4536_s28  ;;  %v3501_v30 = vpop.permute.xlu2 %3500  ;;  %v2197_v43 = vrot.slane %v2195_v14, 4  ;;  %v2196_v35 = vsel %vm5309_vm15, %v2194_v16, %v2195_v14  ;;  %v2525_v11 = vrot.slane %v2523_v56, 4  ;;  %v2741_v14 = vld [vmem:[%s4579_s20 + $0x90] sm:$0xf] }
 0x293   : > { %v2619_v25 = vpop.permute.xlu1 %2618  ;;  %v6208_v42 = vpop.f32.mrf.mxu0  ;;  %v3069_v16 = vshrl.u32 %v2741_v14, 16 }
 0x294   : > { %2700 = vst.msk [vmem:[#allocation2 + $0x6c] sm:$0xf] %vm2672_vm8, %v2619_v25  ;;  %v2617_v32 = vpop.permute.xlu0 %2616  ;;  %v3899_v41 = vpack.c.bf16 %v6208_v42, %v6208_v42  ;;  %v2199_v15 = vsel %vm5309_vm15, %v2197_v43, %v2198_v31  ;;  %v2527_v2 = vsel %vm5309_vm15, %v2525_v11, %v2526_v4  ;;  %v2733_v43 = vld [vmem:[%s4579_s20 + $0x70] sm:$0xf] }
 0x295   : > { %2699 = vst.msk [vmem:[#allocation2 + $0x68] sm:$0xf] %vm2672_vm8, %v2617_v32  ;;  %v2221_v32 = vrot.slane %v2219_v60, 4  ;;  %v2977_v60 = vrot.slane %v6082_v39, 4  ;;  %v2992_v11 = vshll.u32 %v2733_v43, 16 }
 0x296   : > { %3253 = vst.msk [vmem:[#allocation2 + $0x6c] sm:$0xf] %vm3225_vm9, %v3172_v45  ;;  %v2732_v45 = vld [vmem:[%s4579_s20 + $0x6c] sm:$0xf] }
 0x297   : > { %3936 = vst.msk [vmem:[%s6152_s12 + $0x8] sm:$0xf] %vm3933_vm13, %v3899_v41  ;;  %v2979_v63 = vshrl.u32 %v2732_v45, 16  ;;  %v2982_v52 = vshll.u32 %v2732_v45, 16  ;;  %v2223_v27 = vsel %vm5309_vm15, %v2221_v32, %v2222_v40 }
 0x298   : > { %1951 = vrot.lane.b32.xlu2 %v1784_v37, %s4532_s24  ;;  %v6285_v37 = vld [vmem:[%s4579_s20 + $0x90] sm:$0xf] }
 0x299   : > { %1967 = vrot.lane.b32.xlu1 %v1864_v19, %s4532_s24  ;;  %v2981_v1 = vrot.slane %v2979_v63, 6  ;;  %v2984_v41 = vrot.slane %v2982_v52, 7  ;;  %v3062_v19 = vshll.u32 %v2740_v46, 16  ;;  %v2550_v45 = vrot.slane %v6285_v37, 6  ;;  %v2742_v37 = vld [vmem:[%s4579_s20 + $0x94] sm:$0xf] }
 0x29a   : > { %1965 = vrot.lane.b32.xlu0 %v1854_v5, %s4532_s24  ;;  %v2259_v59 = vpop.permute.xlu2 %2258  ;;  %v2524_v5 = vsel %vm5309_vm15, %v2522_v17, %v2523_v56  ;;  %v2549_v56 = vrot.slane %v2547_v34, 4  ;;  %v2546_v63 = vrot.slane %v2544_v10, 4  ;;  %v2989_v52 = vshrl.u32 %v2733_v43, 16  ;;  %v3285_v43 = vld [vmem:[%s4579_s20 + $0x6c] sm:$0xf] }
 0x29b   : > { %v3170_v8 = vpop.permute.xlu1 %3169  ;;  %v6240_v13 = vpop.f32.mrf.mxu0  ;;  %2356 = vst.msk [vmem:[#allocation2 + $0x2c] sm:$0xf] %vm2344_vm7, %v2259_v59 }
 0x29c   : > { %3252 = vst.msk [vmem:[#allocation2 + $0x68] sm:$0xf] %vm3225_vm9, %v3170_v8  ;;  %v3156_v48 = vpop.permute.xlu0 %3155  ;;  %v3900_v26 = vpack.c.bf16 %v6240_v13, %v6240_v13  ;;  %v2985_v8 = vor.u32 %v2984_v41, %v2981_v1  ;;  %v2551_v6 = vsel %vm5309_vm15, %v2549_v56, %v2550_v45  ;;  %v2548_v10 = vsel %vm5309_vm15, %v2546_v63, %v2547_v34  ;;  %v3293_v56 = vld [vmem:[%s4579_s20 + $0x8c] sm:$0xf] }
 0x29d   : > { %3245 = vst.msk [vmem:[#allocation2 + $0x4c] sm:$0xf] %vm3225_vm9, %v3156_v48  ;;  %v3064_v48 = vrot.slane %v3062_v19, 7  ;;  %v2991_v32 = vrot.slane %v2989_v52, 6  ;;  %v2994_v1 = vrot.slane %v2992_v11, 7  ;;  %v3431_v63 = vrot.slane %v3293_v56, 7 }
 0x29e   : > { %3583 = vst.msk [vmem:[#allocation2 + $0x68] sm:$0xf] %vm3556_vm10, %v3501_v30  ;;  %v2986_v17 = vsel %vm5328_vm2, %v2977_v60, %v2985_v8 }
 0x29f   : > { %3937 = vst.msk [vmem:[%s6152_s12 + $0xc] sm:$0xf] %vm3933_vm13, %v3900_v26  ;;  %v3072_v26 = vshll.u32 %v2741_v14, 16  ;;  %v3065_v46 = vor.u32 %v3064_v48, %v3061_v53  ;;  %v1522_v14 = vld [vmem:[%s4579_s20 + $0x6c] sm:$0xf]  ;;  %v2987_v53 = vrot.slane %v2985_v8, 4  ;;  %v6329_v48 = vor.u32 %v2994_v1, %v2991_v32 }
 0x2a0   : > { %2280 = vrot.lane.b32.xlu2 %v2196_v35, %s4534_s26 }
 0x2a1   : > { %2296 = vrot.lane.b32.xlu1 %v2220_v28, %s4534_s26  ;;  %v3074_v44 = vrot.slane %v3072_v26, 7  ;;  %v3067_v41 = vrot.slane %v3065_v46, 4  ;;  %v1787_v26 = vshrl.u32 %v1522_v14, 16 }
 0x2a2   : > { %2282 = vrot.lane.b32.xlu0 %v2199_v15, %s4534_s26  ;;  %v3138_v30 = vpop.permute.xlu2 %3137 }
 0x2a3   : > { %v3487_v0 = vpop.permute.xlu1 %3486  ;;  %v1789_v52 = vrot.slane %v1787_v26, 5 }
 0x2a4   : > { %3576 = vst.msk [vmem:[#allocation2 + $0x4c] sm:$0xf] %vm3556_vm10, %v3487_v0  ;;  %v3485_v25 = vpop.permute.xlu0 %3484 }
 0x2a5   : > { %3575 = vst.msk [vmem:[#allocation2 + $0x48] sm:$0xf] %vm3556_vm10, %v3485_v25  ;;  %v3071_v25 = vrot.slane %v3069_v16, 6 }
 0x2a8   : > { %2298 = vrot.lane.b32.xlu2 %v2223_v27, %s4534_s26 }
 0x2a9   : > { %2610 = vrot.lane.b32.xlu1 %v2527_v2, %s4533_s25  ;;  %v6318_v2 = vor.u32 %v3074_v44, %v3071_v25 }
 0x2aa   : > { %2608 = vrot.lane.b32.xlu0 %v2524_v5, %s4533_s25  ;;  %v6295_v28 = vpop.f32.mrf.mxu0  ;;  %v3471_v0 = vpop.permute.xlu2 %3470  ;;  %v3057_v5 = vrot.slane %v6076_v57, 4 }
 0x2ab   : > { %v2257_v59 = vpop.permute.xlu1 %2256  ;;  %v3901_v15 = vpack.c.bf16 %v6295_v28, %v6295_v28  ;;  %v3076_v16 = vsel %vm5328_vm2, %v3067_v41, %v6318_v2 }
 0x2ac   : > { %2355 = vst.msk [vmem:[#allocation2 + $0x28] sm:$0xf] %vm2344_vm7, %v2257_v59  ;;  %v3503_v39 = vpop.permute.xlu0 %3502  ;;  %v4483_v35 = vld [vmem:[#allocation2 + $0x48] sm:$0xff]  ;;  %v1790_v59 = vshll.u32 %v1522_v14, 16  ;;  %v3066_v8 = vsel %vm5328_vm2, %v3057_v5, %v3065_v46  ;;  %v6372_v5 = vld [vmem:[%s4579_s20 + $0x90] sm:$0xf] }
 0x2ad   : > { %3584 = vst.msk [vmem:[#allocation2 + $0x6c] sm:$0xf] %vm3556_vm10, %v3503_v39  ;;  %4454 = vmatmul.msk.bf16.gmra.mxu2 %vm3739_vm12, %v4483_v35  ;;  %v3407_v39 = vrot.slane %v3285_v43, 7  ;;  %v3430_v35 = vrot.slane %v3428_v20, 4  ;;  %v1785_v14 = vrot.slane %v6212_v33, 4  ;;  %v3434_v26 = vrot.slane %v6372_v5, 7 }
 0x2ae   : > { %3938 = vst.msk [vmem:[%s6152_s12 + $0x10] sm:$0xf] %vm3933_vm13, %v3901_v15  ;;  %v6343_v15 = vld [vmem:[%s4579_s20 + $0x70] sm:$0xf]  ;;  %v1792_v11 = vrot.slane %v1790_v59, 6 }
 0x2af   : > { %v3409_v46 = vrot.slane %v3407_v39, 4  ;;  %v3410_v25 = vrot.slane %v6343_v15, 7  ;;  %v3432_v20 = vsel %vm5353_vm5, %v3430_v35, %v3431_v63 }
 0x2b0   : > { %2624 = vrot.lane.b32.xlu2 %v2548_v10, %s4533_s25  ;;  %v1530_v10 = vld [vmem:[%s4579_s20 + $0x8c] sm:$0xf]  ;;  %v1793_v32 = vor.u32 %v1792_v11, %v1789_v52 }
 0x2b1   : > { %3161 = vrot.lane.b32.xlu1 %v2986_v17, %s4535_s27  ;;  %v3411_v1 = vsel %vm5353_vm5, %v3409_v46, %v3410_v25  ;;  %v1867_v41 = vshrl.u32 %v1530_v10, 16 }
 0x2b2   : > { %2626 = vrot.lane.b32.xlu0 %v2551_v6, %s4533_s25  ;;  %v6320_v19 = vpop.f32.mrf.mxu0  ;;  %v2277_v57 = vpop.permute.xlu2 %2276  ;;  %v3406_v6 = vrot.slane %v3404_v24, 4  ;;  %v1531_v24 = vld [vmem:[%s4579_s20 + $0x90] sm:$0xf]  ;;  %v1794_v56 = vsel %vm5168_vm11, %v1785_v14, %v1793_v32 }
 0x2b3   : > { %v2587_v61 = vpop.permute.xlu1 %2586  ;;  %v3902_v27 = vpack.c.bf16 %v6320_v19, %v6320_v19  ;;  %2365 = vst.msk [vmem:[#allocation2 + $0x50] sm:$0xf] %vm2344_vm7, %v2277_v57  ;;  %v1877_v43 = vshrl.u32 %v1531_v24, 16 }
 0x2b4   : > { %2684 = vst.msk [vmem:[#allocation2 + $0x2c] sm:$0xf] %vm2672_vm8, %v2587_v61  ;;  %v2585_v34 = vpop.permute.xlu0 %2584  ;;  %v4487_v60 = vld [vmem:[#allocation2 + $0x68] sm:$0xff]  ;;  %v1870_v61 = vshll.u32 %v1530_v10, 16  ;;  %v3408_v47 = vsel %vm5353_vm5, %v3406_v6, %v3407_v39 }
 0x2b5   : > { %2683 = vst.msk [vmem:[#allocation2 + $0x28] sm:$0xf] %vm2672_vm8, %v2585_v34  ;;  %4458 = vmatmul.msk.bf16.vlgmr.msra.gmra.mxu3 %vm3739_vm12, %v4487_v60  ;;  %v2075_v39 = vld [vmem:[%s4579_s20 + $0x6c] sm:$0xf]  ;;  %v1879_v35 = vrot.slane %v1877_v43, 5 }
 0x2b6   : > { %3236 = vst.msk [vmem:[#allocation2 + $0x28] sm:$0xf] %vm3225_vm9, %v3138_v30  ;;  %v2996_v30 = vsel %vm5328_vm2, %v2987_v53, %v6329_v48  ;;  %v1872_v60 = vrot.slane %v1870_v61, 6  ;;  %v1880_v53 = vshll.u32 %v1531_v24, 16  ;;  %v2201_v46 = vrot.slane %v2075_v39, 6 }
 0x2b7   : > { %3939 = vst.msk [vmem:[%s6152_s12 + $0x14] sm:$0xf] %vm3933_vm13, %v3902_v27  ;;  %v1869_v27 = vrot.slane %v1867_v41, 5  ;;  %v6412_v61 = vld [vmem:[%s4579_s20 + $0x90] sm:$0xf] }
 0x2b8   : > { %3163 = vrot.lane.b32.xlu2 %v2996_v30, %s4535_s27  ;;  %v2734_v43 = vld [vmem:[%s4579_s20 + $0x74] sm:$0xf] }
 0x2b9   : > { %3179 = vrot.lane.b32.xlu1 %v3076_v16, %s4535_s27  ;;  %v3433_v16 = vrot.slane %v3431_v63, 4  ;;  %v1873_v30 = vor.u32 %v1872_v60, %v1869_v27  ;;  %v1882_v63 = vrot.slane %v1880_v53, 6  ;;  %v2224_v60 = vrot.slane %v2222_v40, 4 }
 0x2ba   : > { %3177 = vrot.lane.b32.xlu0 %v3066_v8, %s4535_s27  ;;  %v2295_v62 = vpop.permute.xlu2 %2294  ;;  %v3002_v39 = vshll.u32 %v2734_v43, 16 }
 0x2bb   : > { %v3469_v17 = vpop.permute.xlu1 %3468  ;;  %v3435_v52 = vsel %vm5353_vm5, %v3433_v16, %v3434_v26  ;;  %v1875_v6 = vrot.slane %v1873_v30, 4  ;;  %v6396_v10 = vor.u32 %v1882_v63, %v1879_v35  ;;  %v2414_v35 = vld [vmem:[%s4579_s20 + $0x94] sm:$0xf] }
 0x2bc   : > { %3567 = vst.msk [vmem:[#allocation2 + $0x28] sm:$0xf] %vm3556_vm10, %v3469_v17  ;;  %v3140_v44 = vpop.permute.xlu0 %3139  ;;  %v2200_v17 = vrot.slane %v2198_v31, 4 }
 0x2bd   : > { %3237 = vst.msk [vmem:[#allocation2 + $0x2c] sm:$0xf] %vm3225_vm9, %v3140_v44  ;;  %v1884_v41 = vsel %vm5168_vm11, %v1875_v6, %v6396_v10 }
 0x2be   : > { %3568 = vst.msk [vmem:[#allocation2 + $0x2c] sm:$0xf] %vm3556_vm10, %v3471_v0  ;;  %v1795_v0 = vrot.slane %v1793_v32, 4  ;;  %v1865_v32 = vrot.slane %v6203_v58, 4  ;;  %v2202_v50 = vsel %vm5309_vm15, %v2200_v17, %v2201_v46 }
 0x2c0   : > { %3492 = vrot.lane.b32.xlu2 %v3408_v47, %s4536_s28  ;;  %v1804_v33 = vsel %vm5168_vm11, %v1795_v0, %v5728_v3  ;;  %v1874_v58 = vsel %vm5168_vm11, %v1865_v32, %v1873_v30 }
 0x2c1   : > { %3508 = vrot.lane.b32.xlu1 %v3432_v20, %s4536_s28 }
 0x2c2   : > { %3494 = vrot.lane.b32.xlu0 %v3411_v1, %s4536_s28  ;;  %v2621_v8 = vpop.permute.xlu2 %2620 }
 0x2c3   : > { %v1964_v34 = vpop.permute.xlu1 %1963 }
 0x2c4   : > { %2043 = vst.msk [vmem:[#allocation2 + $0x74] sm:$0xf] %vm2013_vm6, %v1964_v34  ;;  %v1962_v57 = vpop.permute.xlu0 %1961  ;;  %v2228_v34 = vrot.slane %v6412_v61, 6 }
 0x2c5   : > { %2042 = vst.msk [vmem:[#allocation2 + $0x70] sm:$0xf] %vm2013_vm6, %v1962_v57  ;;  %v4479_v59 = vld [vmem:[#allocation2 + $0x28] sm:$0xff] }
 0x2c6   : > { %2374 = vst.msk [vmem:[#allocation2 + $0x74] sm:$0xf] %vm2344_vm7, %v2295_v62  ;;  %4450 = vmatmul.msk.bf16.gmra.mxu0 %vm3739_vm12, %v4479_v59  ;;  %v2083_v62 = vld [vmem:[%s4579_s20 + $0x8c] sm:$0xf]  ;;  %v2406_v59 = vld [vmem:[%s4579_s20 + $0x74] sm:$0xf] }
 0x2c7   : > { %v2225_v31 = vrot.slane %v2083_v62, 6  ;;  %v2529_v63 = vrot.slane %v2406_v59, 6  ;;  %v2528_v62 = vrot.slane %v2526_v4, 4  ;;  %v3079_v4 = vshrl.u32 %v2742_v37, 16 }
 0x2c8   : > { %v3842_v3 = vpop.f32.mrf.mxu2  ;;  %3510 = vrot.lane.b32.xlu2 %v3435_v52, %s4536_s28 }
 0x2c9   : > { %1955 = vrot.lane.b32.xlu1 %v1804_v33, %s4532_s24  ;;  %v3911_v11 = vpack.c.bf16 %v3842_v3, %v3842_v3  ;;  %v2227_v14 = vrot.slane %v2225_v31, 4  ;;  %v4165_v16 = vmul.f32 %v3842_v3, %v3842_v3  ;;  %v2226_v30 = vsel %vm5309_vm15, %v2224_v60, %v2225_v31 }
 0x2ca   : > { %1953 = vrot.lane.b32.xlu0 %v1794_v56, %s4532_s24  ;;  %v3160_v1 = vpop.permute.xlu2 %3159  ;;  %v2999_v56 = vshrl.u32 %v2734_v43, 16  ;;  %v2531_v6 = vrot.slane %v2529_v63, 4  ;;  %v2530_v31 = vsel %vm5309_vm15, %v2528_v62, %v2529_v63 }
 0x2cb   : > { %v2293_v44 = vpop.permute.xlu1 %2292  ;;  %3948 = vst.msk [vmem:[%s6152_s12 + $0x38] sm:$0xf] %vm3933_vm13, %v3911_v11  ;;  %v2229_v33 = vsel %vm5309_vm15, %v2227_v14, %v2228_v34  ;;  %v2553_v11 = vrot.slane %v2414_v35, 6 }
 0x2cc   : > { %v2279_v20 = vpop.permute.xlu0 %2278  ;;  %2373 = vst.msk [vmem:[#allocation2 + $0x70] sm:$0xf] %vm2344_vm7, %v2293_v44  ;;  %v3001_v17 = vrot.slane %v2999_v56, 6  ;;  %v2533_v51 = vsel %vm5309_vm15, %v2531_v6, %v2532_v9  ;;  %v3081_v9 = vrot.slane %v3079_v4, 6  ;;  %v6511_v6 = vld [vmem:[%s4579_s20 + $0x98] sm:$0xf] }
 0x2cd   : > { %2366 = vst.msk [vmem:[#allocation2 + $0x54] sm:$0xf] %vm2344_vm7, %v2279_v20  ;;  %v2555_v43 = vrot.slane %v2553_v11, 4 }
 0x2ce   : > { %2701 = vst.msk [vmem:[#allocation2 + $0x70] sm:$0xf] %vm2672_vm8, %v2621_v8  ;;  %v2203_v8 = vrot.slane %v2201_v46, 4  ;;  %v3004_v46 = vrot.slane %v3002_v39, 7 }
 0x2d0   : > { %v3844_v47 = vpop.f32.mrf.mxu2  ;;  %1969 = vrot.lane.b32.xlu2 %v1874_v58, %s4532_s24  ;;  %v2205_v52 = vsel %vm5309_vm15, %v2203_v8, %v2204_v55  ;;  %v6474_v58 = vld [vmem:[%s4579_s20 + $0x98] sm:$0xf]  ;;  %v3287_v8 = vld [vmem:[%s4579_s20 + $0x74] sm:$0xf] }
 0x2d1   : > { %2284 = vrot.lane.b32.xlu1 %v2202_v50, %s4534_s26  ;;  %v3912_v24 = vpack.c.bf16 %v3844_v47, %v3844_v47  ;;  %4089 = vmatpush.msra.mxu1 %v3844_v47  ;;  %v4166_v0 = vmul.f32 %v3844_v47, %v3844_v47  ;;  %v3082_v50 = vshll.u32 %v2742_v37, 16  ;;  %v3413_v39 = vrot.slane %v3287_v8, 7 }
 0x2d2   : > { %1971 = vrot.lane.b32.xlu0 %v1884_v41, %s4532_s24  ;;  %v3489_v40 = vpop.permute.xlu2 %3488  ;;  %v2743_v41 = vld [vmem:[%s4579_s20 + $0x98] sm:$0xf] }
 0x2d3   : > { %v2607_v27 = vpop.permute.xlu1 %2606  ;;  %3949 = vst.msk [vmem:[%s6152_s12 + $0x3c] sm:$0xf] %vm3933_vm13, %v3912_v24  ;;  %v6425_v57 = vpop.f32.mrf.mxu0  ;;  %4090 = vmatpush.msra.mxu1 %v3842_v3  ;;  %4187 = vmatpush.msrb.mxu3 %v4166_v0  ;;  %v2552_v3 = vrot.slane %v2550_v45, 4  ;;  %v2997_v24 = vrot.slane %v6329_v48, 4  ;;  %v3084_v0 = vrot.slane %v3082_v50, 7  ;;  %v3089_v14 = vshrl.u32 %v2743_v41, 16 }
 0x2d4   : > { %v2605_v53 = vpop.permute.xlu0 %2604  ;;  %2694 = vst.msk [vmem:[#allocation2 + $0x54] sm:$0xf] %vm2672_vm8, %v2607_v27  ;;  %v3903_v29 = vpack.c.bf16 %v6425_v57, %v6425_v57  ;;  %v3092_v27 = vshll.u32 %v2743_v41, 16 }
 0x2d5   : > { %2693 = vst.msk [vmem:[#allocation2 + $0x50] sm:$0xf] %vm2672_vm8, %v2605_v53  ;;  %4188 = vmatpush.msrb.mxu3 %v4165_v16  ;;  %v2554_v32 = vsel %vm5309_vm15, %v2552_v3, %v2553_v11  ;;  %v2556_v53 = vrot.slane %v6474_v58, 6  ;;  %v3077_v11 = vrot.slane %v6318_v2, 4  ;;  %v1533_v2 = vld [vmem:[%s4579_s20 + $0x98] sm:$0x3] }
 0x2d6   : > { %3940 = vst.msk [vmem:[%s6152_s12 + $0x18] sm:$0xf] %vm3933_vm13, %v3903_v29  ;;  %v3085_v29 = vor.u32 %v3084_v0, %v3081_v9  ;;  %v3415_v0 = vrot.slane %v3413_v39, 4 }
 0x2d7   : > { %3247 = vst.msk [vmem:[#allocation2 + $0x54] sm:$0xf] %vm3225_vm9, %v3160_v1  ;;  %v3005_v1 = vor.u32 %v3004_v46, %v3001_v17  ;;  %v2557_v56 = vsel %vm5309_vm15, %v2555_v43, %v2556_v53  ;;  %v1532_v17 = vld [vmem:[%s4579_s20 + $0x94] sm:$0xf] }
 0x2d8   : > { %2286 = vrot.lane.b32.xlu2 %v2205_v52, %s4534_s26  ;;  %v3087_v35 = vrot.slane %v3085_v29, 4  ;;  %v3295_v52 = vld [vmem:[%s4579_s20 + $0x94] sm:$0xf]  ;;  %v1890_v62 = vshll.u32 %v1532_v17, 16  ;;  %v3086_v37 = vsel %vm5328_vm2, %v3077_v11, %v3085_v29 }
 0x2d9   : > { %2302 = vrot.lane.b32.xlu1 %v2229_v33, %s4534_s26  ;;  %v3007_v47 = vrot.slane %v3005_v1, 4  ;;  %v3006_v59 = vsel %vm5328_vm2, %v2997_v24, %v3005_v1  ;;  %v3094_v33 = vrot.slane %v3092_v27, 7  ;;  %v3437_v46 = vrot.slane %v3295_v52, 7 }
 0x2da   : > { %2300 = vrot.lane.b32.xlu0 %v2226_v30, %s4534_s26  ;;  %v3507_v20 = vpop.permute.xlu2 %3506  ;;  %v3440_v1 = vrot.slane %v6511_v6, 7  ;;  %v1892_v41 = vrot.slane %v1890_v62, 6  ;;  %v1900_v24 = vshll.u32 %v1533_v2, 16  ;;  %v1885_v52 = vrot.slane %v6396_v10, 4  ;;  %v2745_v10 = vld [vmem:[%s4579_s20 + $0xa0] sm:$0x7] }
 0x2db   : > { %v3158_v44 = vpop.permute.xlu1 %3157  ;;  %v6452_v55 = vpop.f32.mrf.mxu0  ;;  %v3016_v48 = vsel %vm5328_vm2, %v3007_v47, %v5845_v21  ;;  %v3412_v21 = vrot.slane %v3410_v25, 4  ;;  %v1897_v47 = vshrl.u32 %v1533_v2, 16  ;;  %v3112_v18 = vshll.u32 %v2745_v10, 16 }
 0x2dc   : > { %3246 = vst.msk [vmem:[#allocation2 + $0x50] sm:$0xf] %vm3225_vm9, %v3158_v44  ;;  %v2623_v23 = vpop.permute.xlu0 %2622  ;;  %v3904_v45 = vpack.c.bf16 %v6452_v55, %v6452_v55  ;;  %v1902_v43 = vrot.slane %v1900_v24, 6 }
 0x2dd   : > { %2702 = vst.msk [vmem:[#allocation2 + $0x74] sm:$0xf] %vm2672_vm8, %v2623_v23  ;;  %v3414_v25 = vsel %vm5353_vm5, %v3412_v21, %v3413_v39  ;;  %v1887_v23 = vshrl.u32 %v1532_v17, 16  ;;  %v2416_v39 = vld [vmem:[%s4579_s20 + $0x9c] sm:$0xf] }
 0x2de   : > { %3577 = vst.msk [vmem:[#allocation2 + $0x50] sm:$0xf] %vm3556_vm10, %v3489_v40  ;;  %v3091_v40 = vrot.slane %v3089_v14, 6  ;;  %v2417_v17 = vld [vmem:[%s4579_s20 + $0xa0] sm:$0x3] }
 0x2df   : > { %3941 = vst.msk [vmem:[%s6152_s12 + $0x1c] sm:$0xf] %vm3933_vm13, %v3904_v45 }
 0x2e0   : > { %2612 = vrot.lane.b32.xlu2 %v2530_v31, %s4533_s25  ;;  %v6497_v63 = vor.u32 %v3094_v33, %v3091_v40  ;;  %v1889_v31 = vrot.slane %v1887_v23, 5  ;;  %v2230_v40 = vrot.slane %v2228_v34, 4  ;;  %v2086_v23 = vld [vmem:[%s4579_s20 + $0x98] sm:$0x3] }
 0x2e1   : > { %2628 = vrot.lane.b32.xlu1 %v2554_v32, %s4533_s25  ;;  %v3439_v32 = vrot.slane %v3437_v46, 4 }
 0x2e2   : > { %2614 = vrot.lane.b32.xlu0 %v2533_v51, %s4533_s25  ;;  %v2589_v16 = vpop.permute.xlu2 %2588  ;;  %v3096_v44 = vsel %vm5328_vm2, %v3087_v35, %v6497_v63  ;;  %v3436_v51 = vrot.slane %v3434_v26, 4  ;;  %v1893_v27 = vor.u32 %v1892_v41, %v1889_v31  ;;  %v2744_v35 = vld [vmem:[%s4579_s20 + $0x9c] sm:$0xf]  ;;  %v2234_v31 = vrot.slane %v2086_v23, 6 }
 0x2e3   : > { %v3176_v38 = vpop.permute.xlu1 %3175  ;;  %v3441_v26 = vsel %vm5353_vm5, %v3439_v32, %v3440_v1 }
 0x2e4   : > { %3255 = vst.msk [vmem:[#allocation2 + $0x74] sm:$0xf] %vm3225_vm9, %v3176_v38  ;;  %v3174_v60 = vpop.permute.xlu0 %3173  ;;  %v3438_v14 = vsel %vm5353_vm5, %v3436_v51, %v3437_v46  ;;  %v1895_v21 = vrot.slane %v1893_v27, 4  ;;  %v3102_v46 = vshll.u32 %v2744_v35, 16 }
 0x2e5   : > { %3254 = vst.msk [vmem:[#allocation2 + $0x70] sm:$0xf] %vm3225_vm9, %v3174_v60  ;;  %v1899_v60 = vrot.slane %v1897_v47, 5 }
 0x2e6   : > { %3586 = vst.msk [vmem:[#allocation2 + $0x74] sm:$0xf] %vm3556_vm10, %v3507_v20  ;;  %v3104_v51 = vrot.slane %v3102_v46, 7 }
 0x2e8   : > { %2630 = vrot.lane.b32.xlu2 %v2557_v56, %s4533_s25 }
 0x2e9   : > { %3167 = vrot.lane.b32.xlu1 %v3016_v48, %s4535_s27  ;;  %v2085_v48 = vld [vmem:[%s4579_s20 + $0x94] sm:$0xf] }
 0x2ea   : > { %3165 = vrot.lane.b32.xlu0 %v3006_v59, %s4535_s27  ;;  %v3144_v15 = vpop.permute.xlu2 %3143  ;;  %v6927_v59 = vrot.slane %v5886_v49, 7  ;;  %v2231_v33 = vrot.slane %v2085_v48, 6  ;;  %v1903_v49 = vor.u32 %v1902_v43, %v1899_v60 }
 0x2eb   : > { %v3505_v30 = vpop.permute.xlu1 %3504 }
 0x2ec   : > { %3585 = vst.msk [vmem:[#allocation2 + $0x70] sm:$0xf] %vm3556_vm10, %v3505_v30  ;;  %v3491_v3 = vpop.permute.xlu0 %3490  ;;  %v3417_v8 = vsel %vm5353_vm5, %v3415_v0, %v6927_v59  ;;  %v2232_v34 = vsel %vm5309_vm15, %v2230_v40, %v2231_v33  ;;  %v1904_v11 = vsel %vm5168_vm11, %v1895_v21, %v1903_v49  ;;  %v3114_v0 = vrot.slane %v3112_v18, 7 }
 0x2ed   : > { %3578 = vst.msk [vmem:[#allocation2 + $0x54] sm:$0xf] %vm3556_vm10, %v3491_v3  ;;  %v2559_v3 = vrot.slane %v2416_v39, 6  ;;  %v3097_v40 = vrot.slane %v6497_v63, 4  ;;  %v3298_v63 = vld [vmem:[%s4579_s20 + $0xa0] sm:$0x7] }
 0x2ef   : > { %v2561_v62 = vrot.slane %v2559_v3, 4 }
 0x2f0   : > { %v6517_v45 = vpop.f32.mrf.mxu2  ;;  %3181 = vrot.lane.b32.xlu2 %v3086_v37, %s4535_s27  ;;  %v2562_v37 = vrot.slane %v2417_v17, 6 }
 0x2f1   : > { %3496 = vrot.lane.b32.xlu1 %v3414_v25, %s4536_s28  ;;  %v3913_v20 = vpack.c.bf16 %v6517_v45, %v6517_v45  ;;  %v3099_v25 = vshrl.u32 %v2744_v35, 16 }
 0x2f2   : > { %3183 = vrot.lane.b32.xlu0 %v3096_v44, %s4535_s27  ;;  %v1952_v5 = vpop.permute.xlu2 %1951  ;;  %v1894_v44 = vsel %vm5168_vm11, %v1885_v52, %v1893_v27  ;;  %v2563_v47 = vsel %vm5309_vm15, %v2561_v62, %v2562_v37 }
 0x2f3   : > { %v2263_v4 = vpop.permute.xlu1 %2262  ;;  %v4488_v50 = vld [vmem:[#allocation2 + $0x70] sm:$0xff]  ;;  %3950 = vst.msk [vmem:[%s6152_s12 + $0x40] sm:$0xf] %vm3933_vm13, %v3913_v20  ;;  %v3101_v32 = vrot.slane %v3099_v25, 6 }
 0x2f4   : > { %v2261_v38 = vpop.permute.xlu0 %2260  ;;  %v4484_v9 = vld [vmem:[#allocation2 + $0x50] sm:$0xff]  ;;  %2358 = vst.msk [vmem:[#allocation2 + $0x34] sm:$0xf] %vm2344_vm7, %v2263_v4  ;;  %4459 = vmatmul.msk.bf16.gmra.mxu3 %vm3739_vm12, %v4488_v50  ;;  %v3109_v4 = vshrl.u32 %v2745_v10, 16 }
 0x2f5   : > { %2357 = vst.msk [vmem:[#allocation2 + $0x30] sm:$0xf] %vm2344_vm7, %v2261_v38  ;;  %4455 = vmatmul.msk.bf16.gmra.mxu2 %vm3739_vm12, %v4484_v9  ;;  %v3105_v38 = vor.u32 %v3104_v51, %v3101_v32 }
 0x2f6   : > { %2685 = vst.msk [vmem:[#allocation2 + $0x30] sm:$0xf] %vm2672_vm8, %v2589_v16  ;;  %v3111_v9 = vrot.slane %v3109_v4, 6 }
 0x2f7   : > { %2037 = vst.msk [vmem:[#allocation2 + $0x5c] sm:$0xf] %vm2013_vm6, %v1952_v5  ;;  %v3297_v5 = vld [vmem:[%s4579_s20 + $0x9c] sm:$0xf]  ;;  %v3107_v48 = vrot.slane %v3105_v38, 4  ;;  %s214_s20 = scalar_lea.vmem %s6913_s4, %s6931_s16 }
 0x2f8   : > { %v6546_v16 = vpop.f32.mrf.mxu2  ;;  %3498 = vrot.lane.b32.xlu2 %v3417_v8, %s4536_s28  ;;  %v3443_v27 = vrot.slane %v3297_v5, 7  ;;  %v3115_v59 = vor.u32 %v3114_v0, %v3111_v9 }
 0x2f9   : > { %3514 = vrot.lane.b32.xlu1 %v3441_v26, %s4536_s28  ;;  %v3914_v29 = vpack.c.bf16 %v6546_v16, %v6546_v16 }
 0x2fa   : > { %3512 = vrot.lane.b32.xlu0 %v3438_v14, %s4536_s28  ;;  %v2281_v61 = vpop.permute.xlu2 %2280  ;;  %v3442_v14 = vrot.slane %v3440_v1, 4  ;;  %v3445_v39 = vrot.slane %v3443_v27, 4 }
 0x2fb   : > { %v3142_v56 = vpop.permute.xlu1 %3141  ;;  %3951 = vst.msk [vmem:[%s6152_s12 + $0x44] sm:$0xf] %vm3933_vm13, %v3914_v29 }
 0x2fc   : > { %v2591_v30 = vpop.permute.xlu0 %2590  ;;  %3238 = vst.msk [vmem:[#allocation2 + $0x30] sm:$0xf] %vm3225_vm9, %v3142_v56  ;;  %v3444_v1 = vsel %vm5353_vm5, %v3442_v14, %v3443_v27  ;;  %v3106_v56 = vsel %vm5328_vm2, %v3097_v40, %v3105_v38 }
 0x2fd   : > { %2686 = vst.msk [vmem:[#allocation2 + $0x34] sm:$0xf] %vm2672_vm8, %v2591_v30  ;;  %v3446_v30 = vrot.slane %v3298_v63, 7 }
 0x2fe   : > { %3239 = vst.msk [vmem:[#allocation2 + $0x34] sm:$0xf] %vm3225_vm9, %v3144_v15  ;;  %v2558_v15 = vrot.slane %v2556_v53, 4  ;;  %v2233_v53 = vrot.slane %v2231_v33, 4  ;;  %v3116_v33 = vsel %vm5328_vm2, %v3107_v48, %v3115_v59 }
 0x2ff   : > { %2367 = vst.msk [vmem:[#allocation2 + $0x58] sm:$0xf] %vm2344_vm7, %v2281_v61  ;;  %v3447_v54 = vsel %vm5353_vm5, %v3445_v39, %v3446_v30 }
 0x300   : > { %1973 = vrot.lane.b32.xlu2 %v1894_v44, %s4532_s24  ;;  %v2560_v24 = vsel %vm5309_vm15, %v2558_v15, %v2559_v3  ;;  %v2235_v26 = vsel %vm5309_vm15, %v2233_v53, %v2234_v31 }
 0x301   : > { %2304 = vrot.lane.b32.xlu1 %v2232_v34, %s4534_s26 }
 0x302   : > { %1975 = vrot.lane.b32.xlu0 %v1904_v11, %s4532_s24  ;;  %v6576_v20 = vpop.f32.mrf.mxu0  ;;  %v2299_v41 = vpop.permute.xlu2 %2298 }
 0x303   : > { %v3475_v2 = vpop.permute.xlu1 %3474  ;;  %v3905_v58 = vpack.c.bf16 %v6576_v20, %v6576_v20 }
 0x304   : > { %3570 = vst.msk [vmem:[#allocation2 + $0x34] sm:$0xf] %vm3556_vm10, %v3475_v2  ;;  %v3473_v50 = vpop.permute.xlu0 %3472 }
 0x305   : > { %3569 = vst.msk [vmem:[#allocation2 + $0x30] sm:$0xf] %vm3556_vm10, %v3473_v50 }
 0x306   : > { %3942 = vst.msk [vmem:[%s6152_s12 + $0x20] sm:$0xf] %vm3933_vm13, %v3905_v58 }
 0x308   : > { %2306 = vrot.lane.b32.xlu2 %v2235_v26, %s4534_s26 }
 0x309   : > { %2634 = vrot.lane.b32.xlu1 %v2563_v47, %s4533_s25 }
 0x30a   : > { %2632 = vrot.lane.b32.xlu0 %v2560_v24, %s4533_s25  ;;  %v6596_v43 = vpop.f32.mrf.mxu0  ;;  %v2625_v6 = vpop.permute.xlu2 %2624 }
 0x30b   : > { %v1968_v60 = vpop.permute.xlu1 %1967  ;;  %v3906_v8 = vpack.c.bf16 %v6596_v43, %v6596_v43 }
 0x30c   : > { %2045 = vst.msk [vmem:[#allocation2 + $0x7c] sm:$0xf] %vm2013_vm6, %v1968_v60  ;;  %v1966_v36 = vpop.permute.xlu0 %1965  ;;  %v4480_v29 = vld [vmem:[#allocation2 + $0x30] sm:$0xff] }
 0x30d   : > { %2044 = vst.msk [vmem:[#allocation2 + $0x78] sm:$0xf] %vm2013_vm6, %v1966_v36  ;;  %4451 = vmatmul.msk.bf16.gmra.mxu0 %vm3739_vm12, %v4480_v29 }
 0x30e   : > { %3943 = vst.msk [vmem:[%s6152_s12 + $0x24] sm:$0xf] %vm3933_vm13, %v3906_v8 }
 0x30f   : > { %2376 = vst.msk [vmem:[#allocation2 + $0x7c] sm:$0xf] %vm2344_vm7, %v2299_v41 }
 0x310   : > { %3185 = vrot.lane.b32.xlu2 %v3106_v56, %s4535_s27 }
 0x311   : > { %3516 = vrot.lane.b32.xlu1 %v3444_v1, %s4536_s28 }
 0x312   : > { %3187 = vrot.lane.b32.xlu0 %v3116_v33, %s4535_s27  ;;  %v3164_v35 = vpop.permute.xlu2 %3163 }
 0x313   : > { %v2297_v21 = vpop.permute.xlu1 %2296 }
 0x314   : > { %2375 = vst.msk [vmem:[#allocation2 + $0x78] sm:$0xf] %vm2344_vm7, %v2297_v21  ;;  %v2283_v49 = vpop.permute.xlu0 %2282 }
 0x315   : > { %2368 = vst.msk [vmem:[#allocation2 + $0x5c] sm:$0xf] %vm2344_vm7, %v2283_v49 }
 0x316   : > { %2703 = vst.msk [vmem:[#allocation2 + $0x78] sm:$0xf] %vm2672_vm8, %v2625_v6 }
 0x318   : > { %3518 = vrot.lane.b32.xlu2 %v3447_v54, %s4536_s28 }
 0x31a   : > { %v3493_v34 = vpop.permute.xlu2 %3492 }
 0x31b   : > { %v2611_v52 = vpop.permute.xlu1 %2610 }
 0x31c   : > { %2696 = vst.msk [vmem:[#allocation2 + $0x5c] sm:$0xf] %vm2672_vm8, %v2611_v52  ;;  %v2609_v61 = vpop.permute.xlu0 %2608 }
 0x31d   : > { %2695 = vst.msk [vmem:[#allocation2 + $0x58] sm:$0xf] %vm2672_vm8, %v2609_v61 }
 0x31e   : > { %3249 = vst.msk [vmem:[#allocation2 + $0x5c] sm:$0xf] %vm3225_vm9, %v3164_v35 }
 0x322   : > { %v3511_v12 = vpop.permute.xlu2 %3510 }
 0x323   : > { %v3162_v3 = vpop.permute.xlu1 %3161 }
 0x324   : > { %3248 = vst.msk [vmem:[#allocation2 + $0x58] sm:$0xf] %vm3225_vm9, %v3162_v3  ;;  %v2627_v11 = vpop.permute.xlu0 %2626 }
 0x325   : > { %2704 = vst.msk [vmem:[#allocation2 + $0x7c] sm:$0xf] %vm2672_vm8, %v2627_v11 }
 0x326   : > { %3579 = vst.msk [vmem:[#allocation2 + $0x58] sm:$0xf] %vm3556_vm10, %v3493_v34 }
 0x32a   : > { %v1970_v46 = vpop.permute.xlu2 %1969 }
 0x32b   : > { %v3180_v17 = vpop.permute.xlu1 %3179  ;;  %2046 = vst.msk [vmem:[#allocation2 + $0x80] sm:$0xf] %vm2013_vm6, %v1970_v46 }
 0x32c   : > { %3257 = vst.msk [vmem:[#allocation2 + $0x7c] sm:$0xf] %vm3225_vm9, %v3180_v17  ;;  %v3178_v25 = vpop.permute.xlu0 %3177 }
 0x32d   : > { %3256 = vst.msk [vmem:[#allocation2 + $0x78] sm:$0xf] %vm3225_vm9, %v3178_v25 }
 0x32e   : > { %3588 = vst.msk [vmem:[#allocation2 + $0x7c] sm:$0xf] %vm3556_vm10, %v3511_v12 }
 0x330   : > { %v6634_v10 = vpop.f32.mrf.mxu2 }
 0x331   : > { %v3915_v44 = vpack.c.bf16 %v6634_v10, %v6634_v10 }
 0x332   : > { %v2287_v62 = vpop.permute.xlu2 %2286 }
 0x333   : > { %v3509_v23 = vpop.permute.xlu1 %3508  ;;  %3952 = vst.msk [vmem:[%s6152_s12 + $0x48] sm:$0xf] %vm3933_vm13, %v3915_v44 }
 0x334   : > { %v3495_v15 = vpop.permute.xlu0 %3494  ;;  %3587 = vst.msk [vmem:[#allocation2 + $0x78] sm:$0xf] %vm3556_vm10, %v3509_v23 }
 0x335   : > { %3580 = vst.msk [vmem:[#allocation2 + $0x5c] sm:$0xf] %vm3556_vm10, %v3495_v15 }
 0x338   : > { %v6642_v37 = vpop.f32.mrf.mxu2  ;;  %v6644_v2 = vpop.f32.mrf.mxu3 }
 0x339   : > { %v3916_v32 = vpack.c.bf16 %v6642_v37, %v6642_v37  ;;  %v3923_v51 = vpack.c.bf16 %v6644_v2, %v6644_v2 }
 0x33a   : > { %v2613_v53 = vpop.permute.xlu2 %2612 }
 0x33b   : > { %v1956_v4 = vpop.permute.xlu1 %1955  ;;  %3953 = vst.msk [vmem:[%s6152_s12 + $0x4c] sm:$0xf] %vm3933_vm13, %v3916_v32  ;;  %v4489_v50 = vld [vmem:[#allocation2 + $0x78] sm:$0xff] }
 0x33c   : > { %v1954_v18 = vpop.permute.xlu0 %1953  ;;  %3960 = vst.msk [vmem:[%s6152_s12 + $0x68] sm:$0xf] %vm3933_vm13, %v3923_v51  ;;  %v4485_v58 = vld [vmem:[#allocation2 + $0x58] sm:$0xff]  ;;  %4460 = vmatmul.msk.bf16.gmra.mxu3 %vm3739_vm12, %v4489_v50 }
 0x33d   : > { %2039 = vst.msk [vmem:[#allocation2 + $0x64] sm:$0xf] %vm2013_vm6, %v1956_v4  ;;  %4456 = vmatmul.msk.bf16.gmra.mxu2 %vm3739_vm12, %v4485_v58 }
 0x33e   : > { %2038 = vst.msk [vmem:[#allocation2 + $0x60] sm:$0xf] %vm2013_vm6, %v1954_v18 }
 0x33f   : > { %2370 = vst.msk [vmem:[#allocation2 + $0x64] sm:$0xf] %vm2344_vm7, %v2287_v62 }
 0x340   : > { %v6659_v31 = vpop.f32.mrf.mxu3 }
 0x341   : > { %v3924_v41 = vpack.c.bf16 %v6659_v31, %v6659_v31 }
 0x342   : > { %v2631_v0 = vpop.permute.xlu2 %2630 }
 0x343   : > { %v2285_v47 = vpop.permute.xlu1 %2284  ;;  %3961 = vst.msk [vmem:[%s6152_s12 + $0x6c] sm:$0xf] %vm3933_vm13, %v3924_v41  ;;  %v6665_v38 = vpop.f32.mrf.mxu0 }
 0x344   : > { %v1972_v24 = vpop.permute.xlu0 %1971  ;;  %2369 = vst.msk [vmem:[#allocation2 + $0x60] sm:$0xf] %vm2344_vm7, %v2285_v47  ;;  %v3907_v9 = vpack.c.bf16 %v6665_v38, %v6665_v38  ;;  %v4161_v41 = vmul.f32 %v6665_v38, %v6665_v38  ;;  %v4160_v47 = vmul.f32 %v6596_v43, %v6596_v43 }
 0x345   : > { %2047 = vst.msk [vmem:[#allocation2 + $0x84] sm:$0xf] %vm2013_vm6, %v1972_v24  ;;  %v4159_v24 = vmul.f32 %v6576_v20, %v6576_v20 }
 0x346   : > { %3944 = vst.msk [vmem:[%s6152_s12 + $0x28] sm:$0xf] %vm3933_vm13, %v3907_v9  ;;  %v4158_v9 = vmul.f32 %v6452_v55, %v6452_v55 }
 0x347   : > { %2697 = vst.msk [vmem:[#allocation2 + $0x60] sm:$0xf] %vm2672_vm8, %v2613_v53 }
 0x34a   : > { %v3182_v60 = vpop.permute.xlu2 %3181 }
 0x34b   : > { %v2303_v5 = vpop.permute.xlu1 %2302  ;;  %v6675_v14 = vpop.f32.mrf.mxu0 }
 0x34c   : > { %2378 = vst.msk [vmem:[#allocation2 + $0x84] sm:$0xf] %vm2344_vm7, %v2303_v5  ;;  %v2301_v26 = vpop.permute.xlu0 %2300  ;;  %v3908_v27 = vpack.c.bf16 %v6675_v14, %v6675_v14  ;;  %v4162_v53 = vmul.f32 %v6675_v14, %v6675_v14 }
 0x34d   : > { %2377 = vst.msk [vmem:[#allocation2 + $0x80] sm:$0xf] %vm2344_vm7, %v2301_v26 }
 0x34e   : > { %2706 = vst.msk [vmem:[#allocation2 + $0x84] sm:$0xf] %vm2672_vm8, %v2631_v0 }
 0x34f   : > { %3945 = vst.msk [vmem:[%s6152_s12 + $0x2c] sm:$0xf] %vm3933_vm13, %v3908_v27  ;;  %v3970_v27 = vlaneseq }
 0x352   : > { %v3499_v36 = vpop.permute.xlu2 %3498 }
 0x353   : > { %v2629_v48 = vpop.permute.xlu1 %2628 }
 0x354   : > { %2705 = vst.msk [vmem:[#allocation2 + $0x80] sm:$0xf] %vm2672_vm8, %v2629_v48  ;;  %v2615_v59 = vpop.permute.xlu0 %2614 }
 0x355   : > { %2698 = vst.msk [vmem:[#allocation2 + $0x64] sm:$0xf] %vm2672_vm8, %v2615_v59 }
 0x356   : > { %3258 = vst.msk [vmem:[#allocation2 + $0x80] sm:$0xf] %vm3225_vm9, %v3182_v60  ;;  %v6800_v60 = vand.u32 127, %v3970_v27 }
 0x358   : > { %v6803_v48 = vadd.s32 128, %v6800_v60  ;;  %v3977_v59 = vand.u32 65535, %v6800_v60 }
 0x35a   : > { %v1974_v40 = vpop.permute.xlu2 %1973 }
 0x35b   : > { %v3168_v8 = vpop.permute.xlu1 %3167  ;;  %2048 = vst.msk [vmem:[#allocation2 + $0x88] sm:$0xf] %vm2013_vm6, %v1974_v40  ;;  %v4007_v40 = vshrl.u32 %v6803_v48, 16 }
 0x35c   : > { %3251 = vst.msk [vmem:[#allocation2 + $0x64] sm:$0xf] %vm3225_vm9, %v3168_v8  ;;  %v3166_v29 = vpop.permute.xlu0 %3165  ;;  %v3978_v8 = vshrl.u32 %v6800_v60, 16 }
 0x35d   : > { %3250 = vst.msk [vmem:[#allocation2 + $0x60] sm:$0xf] %vm3225_vm9, %v3166_v29  ;;  %v3981_v29 = vmul.u32 58254, %v3977_v59 }
 0x35e   : > { %3582 = vst.msk [vmem:[#allocation2 + $0x64] sm:$0xf] %vm3556_vm10, %v3499_v36  ;;  %v4006_v36 = vand.u32 65535, %v6803_v48 }
 0x362   : > { %v2307_v21 = vpop.permute.xlu2 %2306 }
 0x363   : > { %v3497_v6 = vpop.permute.xlu1 %3496 }
 0x364   : > { %3581 = vst.msk [vmem:[#allocation2 + $0x60] sm:$0xf] %vm3556_vm10, %v3497_v6  ;;  %v3184_v1 = vpop.permute.xlu0 %3183  ;;  %v4010_v6 = vmul.u32 58254, %v4006_v36 }
 0x365   : > { %3259 = vst.msk [vmem:[#allocation2 + $0x84] sm:$0xf] %vm3225_vm9, %v3184_v1  ;;  %v3980_v1 = vmul.u32 14564, %v3977_v59 }
 0x36a   : > { %v3186_v61 = vpop.permute.xlu2 %3185 }
 0x36b   : > { %v3515_v33 = vpop.permute.xlu1 %3514  ;;  %v4486_v56 = vld [vmem:[#allocation2 + $0x60] sm:$0xff] }
 0x36c   : > { %3590 = vst.msk [vmem:[#allocation2 + $0x84] sm:$0xf] %vm3556_vm10, %v3515_v33  ;;  %v3513_v63 = vpop.permute.xlu0 %3512  ;;  %4457 = vmatmul.msk.bf16.gmra.mxu2 %vm3739_vm12, %v4486_v56  ;;  %v3982_v33 = vmul.u32 14564, %v3978_v8  ;;  %v3984_v56 = vshll.u32 %v3981_v29, 16 }
 0x36d   : > { %3589 = vst.msk [vmem:[#allocation2 + $0x80] sm:$0xf] %vm3556_vm10, %v3513_v63  ;;  %v4009_v63 = vmul.u32 14564, %v4006_v36 }
 0x36e   : > { %vm3988_vm11 = vc.u32 %v3980_v1, %v3984_v56 }
 0x372   : > { %v3519_v44 = vpop.permute.xlu2 %3518 }
 0x373   : > { %v2305_v49 = vpop.permute.xlu1 %2304 }
 0x374   : > { %v1976_v39 = vpop.permute.xlu0 %1975  ;;  %2379 = vst.msk [vmem:[#allocation2 + $0x88] sm:$0xf] %vm2344_vm7, %v2305_v49  ;;  %v4490_v30 = vld [vmem:[#allocation2 + $0x80] sm:$0xff]  ;;  %v4013_v49 = vshll.u32 %v4010_v6, 16 }
 0x375   : > { %2049 = vst.msk [vmem:[#allocation2 + $0x8c] sm:$0xf] %vm2013_vm6, %v1976_v39  ;;  %4461 = vmatmul.msk.bf16.gmra.mxu3 %vm3739_vm12, %v4490_v30  ;;  %v6810_v39 = vadd.s32 256, %v6800_v60  ;;  %v3983_v30 = vmul.u32 58254, %v3978_v8 }
 0x376   : > { %2380 = vst.msk [vmem:[#allocation2 + $0x8c] sm:$0xf] %vm2344_vm7, %v2307_v21  ;;  %v4011_v21 = vmul.u32 14564, %v4007_v40  ;;  %vm4017_vm14 = vc.u32 %v4009_v63, %v4013_v49 }
 0x377   : > { %v6699_v35 = vpop.f32.mrf.mxu3 }
 0x378   : > { %v6701_v54 = vpop.f32.mrf.mxu2  ;;  %v3925_v52 = vpack.c.bf16 %v6699_v35, %v6699_v35 }
 0x379   : > { %v3917_v34 = vpack.c.bf16 %v6701_v54, %v6701_v54 }
 0x37a   : > { %3962 = vst.msk [vmem:[%s6152_s12 + $0x70] sm:$0xf] %vm3933_vm13, %v3925_v52  ;;  %v3986_v52 = vshll.u32 %v3982_v33, 16 }
 0x37b   : > { %v2635_v3 = vpop.permute.xlu1 %2634  ;;  %3954 = vst.msk [vmem:[%s6152_s12 + $0x50] sm:$0xf] %vm3933_vm13, %v3917_v34 }
 0x37c   : > { %v2633_v11 = vpop.permute.xlu0 %2632  ;;  %2708 = vst.msk [vmem:[#allocation2 + $0x8c] sm:$0xf] %vm2672_vm8, %v2635_v3  ;;  %v3990_v3 = vadd.s32 %v3984_v56, %v3980_v1 }
 0x37d   : > { %2707 = vst.msk [vmem:[#allocation2 + $0x88] sm:$0xf] %vm2672_vm8, %v2633_v11  ;;  %v4012_v11 = vmul.u32 58254, %v4007_v40 }
 0x37e   : > { %3260 = vst.msk [vmem:[#allocation2 + $0x88] sm:$0xf] %vm3225_vm9, %v3186_v61  ;;  %v4537_v61 = vmov 0   ;;  %vm3992_vm15 = vc.u32 %v3990_v3, %v3986_v52 }
 0x37f   : > { %v6714_v12 = vpop.f32.mrf.mxu3  ;;  %v3989_v34 = vsel %vm3988_vm11, 1, %v4537_v61 }
 0x380   : > { %v6716_v17 = vpop.f32.mrf.mxu2  ;;  %v3926_v25 = vpack.c.bf16 %v6714_v12, %v6714_v12 }
 0x381   : > { %v3918_v46 = vpack.c.bf16 %v6716_v17, %v6716_v17 }
 0x382   : > { %3963 = vst.msk [vmem:[%s6152_s12 + $0x74] sm:$0xf] %vm3933_vm13, %v3926_v25  ;;  %v4015_v25 = vshll.u32 %v4011_v21, 16 }
 0x383   : > { %3955 = vst.msk [vmem:[%s6152_s12 + $0x54] sm:$0xf] %vm3933_vm13, %v3918_v46  ;;  %v3517_v15 = vpop.permute.xlu1 %3516  ;;  %v3991_v46 = vadd.s32 %v3989_v34, %v3983_v30 }
 0x384   : > { %v3188_v23 = vpop.permute.xlu0 %3187  ;;  %3591 = vst.msk [vmem:[#allocation2 + $0x88] sm:$0xf] %vm3556_vm10, %v3517_v15  ;;  %v4018_v15 = vsel %vm4017_vm14, 1, %v4537_v61 }
 0x385   : > { %3261 = vst.msk [vmem:[#allocation2 + $0x8c] sm:$0xf] %vm3225_vm9, %v3188_v23  ;;  %v4035_v23 = vand.u32 65535, %v6810_v39 }
 0x386   : > { %3592 = vst.msk [vmem:[#allocation2 + $0x8c] sm:$0xf] %vm3556_vm10, %v3519_v44  ;;  %v4019_v44 = vadd.s32 %v4013_v49, %v4009_v63 }
 0x388   : > { %vm4021_vm0 = vc.u32 %v4019_v44, %v4015_v25 }
 0x38a   : > { %v3837_v62 = vpop.f32.mrf.mxu0 }
 0x38b   : > { %v3909_v32 = vpack.c.bf16 %v3837_v62, %v3837_v62  ;;  %v4163_v58 = vmul.f32 %v3837_v62, %v3837_v62 }
 0x38d   : > { %3946 = vst.msk [vmem:[%s6152_s12 + $0x30] sm:$0xf] %vm3933_vm13, %v3909_v32  ;;  %v4491_v51 = vld [vmem:[#allocation2 + $0x88] sm:$0xff]  ;;  %v3985_v32 = vshrl.u32 %v3981_v29, 16 }
 0x38e   : > { %4462 = vmatmul.msk.bf16.gmra.mxu3 %vm3739_vm12, %v4491_v51  ;;  %v3993_v51 = vsel %vm3992_vm15, 1, %v4537_v61 }
 0x392   : > { %v3839_v4 = vpop.f32.mrf.mxu0 }
 0x393   : > { %v3910_v18 = vpack.c.bf16 %v3839_v4, %v3839_v4  ;;  %4091 = vmatpush.msra.mxu1 %v3839_v4  ;;  %v4164_v50 = vmul.f32 %v3839_v4, %v3839_v4  ;;  %v4020_v4 = vadd.s32 %v4018_v15, %v4012_v11 }
 0x395   : > { %3947 = vst.msk [vmem:[%s6152_s12 + $0x34] sm:$0xf] %vm3933_vm13, %v3910_v18  ;;  %4092 = vmatpush.msra.mxu1 %v3837_v62  ;;  %4189 = vmatpush.msrb.mxu3 %v4164_v50  ;;  %v4036_v62 = vshrl.u32 %v6810_v39, 16  ;;  %v3995_v18 = vadd.s32 %v3993_v51, %v3991_v46  ;;  %v4014_v50 = vshrl.u32 %v4010_v6, 16 }
 0x397   : > { %4093 = vmatpush.msra.mxu1 %v6675_v14  ;;  %4190 = vmatpush.msrb.mxu3 %v4163_v58  ;;  %v4039_v58 = vmul.u32 58254, %v4035_v23  ;;  %v4041_v27 = vmul.u32 58254, %v4036_v62 }
 0x399   : > { %4094 = vmatpush.msra.mxu1 %v6665_v38  ;;  %4191 = vmatpush.msrb.mxu3 %v4162_v53  ;;  %v4157_v38 = vmul.f32 %v6425_v57, %v6425_v57  ;;  %v4043_v52 = vshrl.u32 %v4039_v58, 16 }
 0x39b   : > { %4095 = vmatpush.msra.mxu1 %v6596_v43  ;;  %4192 = vmatpush.msrb.mxu3 %v4161_v41  ;;  %v4156_v43 = vmul.f32 %v6320_v19, %v6320_v19  ;;  %v3987_v41 = vshrl.u32 %v3982_v33, 16 }
 0x39d   : > { %4096 = vmatpush.msra.mxu1 %v6576_v20  ;;  %4193 = vmatpush.msrb.mxu3 %v4160_v47  ;;  %v4155_v20 = vmul.f32 %v6295_v28, %v6295_v28  ;;  %v4022_v47 = vsel %vm4021_vm0, 1, %v4537_v61  ;;  %vm4085_vm0 = vcmask 261120  }
 0x39f   : > { %4097 = vmatpush.msra.mxu1 %v6452_v55  ;;  %4194 = vmatpush.msrb.mxu3 %v4159_v24  ;;  %v4154_v55 = vmul.f32 %v6240_v13, %v6240_v13  ;;  %v4038_v24 = vmul.u32 14564, %v4035_v23 }
 0x3a1   : > { %4098 = vmatpush.msra.mxu1 %v6425_v57  ;;  %4195 = vmatpush.msrb.mxu3 %v4158_v9  ;;  %v4040_v9 = vmul.u32 14564, %v4036_v62 }
 0x3a3   : > { %4099 = vmatpush.msra.mxu1 %v6320_v19  ;;  %4196 = vmatpush.msrb.mxu3 %v4157_v38  ;;  %v4153_v19 = vmul.f32 %v6208_v42, %v6208_v42 }
 0x3a5   : > { %4100 = vmatpush.msra.mxu1 %v6295_v28  ;;  %4197 = vmatpush.msrb.mxu3 %v4156_v43  ;;  %v4152_v28 = vmul.f32 %v6180_v22, %v6180_v22  ;;  %v3996_v43 = vadd.s32 %v3995_v18, %v3985_v32 }
 0x3a7   : > { %4101 = vmatpush.msra.mxu1 %v6240_v13  ;;  %4198 = vmatpush.msrb.mxu3 %v4155_v20  ;;  %v4151_v13 = vmul.f32 %v6154_v7, %v6154_v7  ;;  %v4016_v20 = vshrl.u32 %v4011_v21, 16 }
 0x3a9   : > { %4102 = vmatpush.msra.mxu1 %v6208_v42  ;;  %4199 = vmatpush.msrb.mxu3 %v4154_v55  ;;  %v4024_v55 = vadd.s32 %v4022_v47, %v4020_v4 }
 0x3ab   : > { %4103 = vmatpush.msra.mxu1 %v6180_v22  ;;  %4200 = vmatpush.msrb.mxu3 %v4153_v19  ;;  %v4042_v19 = vshll.u32 %v4039_v58, 16 }
 0x3ad   : > { %4104 = vmatpush.msra.mxu1 %v6154_v7  ;;  %4201 = vmatpush.msrb.mxu3 %v4152_v28  ;;  %v3997_v28 = vadd.s32 %v3996_v43, %v3987_v41  ;;  %vm4046_vm1 = vc.u32 %v4038_v24, %v4042_v19  ;;  %v4539_v43 = vmov 0.0  }
 0x3ae   : > { %v4047_v59 = vsel %vm4046_vm1, 1, %v4537_v61 }
 0x3af   : > { %4202 = vmatpush.msrb.mxu3 %v4151_v13  ;;  %v4025_v13 = vadd.s32 %v4024_v55, %v4014_v50  ;;  %v4049_v56 = vadd.s32 %v4047_v59, %v4041_v27 }
 0x3bf   : > { %v6770_v57 = vpop.f32.mrf.mxu3 }
 0x3c0   : > { %v6772_v0 = vpop.f32.mrf.mxu2  ;;  %v3927_v42 = vpack.c.bf16 %v6770_v57, %v6770_v57 }
 0x3c1   : > { %v3919_v5 = vpack.c.bf16 %v6772_v0, %v6772_v0 }
 0x3c2   : > { %3964 = vst.msk [vmem:[%s6152_s12 + $0x78] sm:$0xf] %vm3933_vm13, %v3927_v42  ;;  %v4044_v42 = vshll.u32 %v4040_v9, 16 }
 0x3c3   : > { %3956 = vst.msk [vmem:[%s6152_s12 + $0x58] sm:$0xf] %vm3933_vm13, %v3919_v5  ;;  %v4048_v5 = vadd.s32 %v4042_v19, %v4038_v24  ;;  %v4181_v19 = vmul.f32 %v6770_v57, %v6770_v57 }
 0x3c5   : > { %vm4050_vm2 = vc.u32 %v4048_v5, %v4044_v42  ;;  %v4177_v42 = vmul.f32 %v6644_v2, %v6644_v2  ;;  %v4171_v5 = vmul.f32 %v6701_v54, %v6701_v54 }
 0x3c6   : > { %v4051_v21 = vsel %vm4050_vm2, 1, %v4537_v61  ;;  %v4538_v61 = vmov 1.0  }
 0x3c7   : > { %v6782_v22 = vpop.f32.mrf.mxu3  ;;  %v4053_v34 = vadd.s32 %v4051_v21, %v4049_v56 }
 0x3c8   : > { %v6784_v26 = vpop.f32.mrf.mxu2  ;;  %v3928_v7 = vpack.c.bf16 %v6782_v22, %v6782_v22  ;;  %4109 = vmatpush.msrb.mxu2 %v6782_v22 }
 0x3c9   : > { %v3920_v14 = vpack.c.bf16 %v6784_v26, %v6784_v26  ;;  %v4054_v11 = vadd.s32 %v4053_v34, %v4043_v52 }
 0x3ca   : > { %3965 = vst.msk [vmem:[%s6152_s12 + $0x7c] sm:$0xf] %vm3933_vm13, %v3928_v7  ;;  %4110 = vmatpush.msrb.mxu2 %v6770_v57  ;;  %v3998_v7 = vshrl.u32 %v3997_v28, 4  ;;  %v4180_v28 = vmul.f32 %v6714_v12, %v6714_v12 }
 0x3cb   : > { %3957 = vst.msk [vmem:[%s6152_s12 + $0x5c] sm:$0xf] %vm3933_vm13, %v3920_v14  ;;  %v4026_v14 = vadd.s32 %v4025_v13, %v4016_v20  ;;  %v4178_v13 = vmul.f32 %v6659_v31, %v6659_v31 }
 0x3cc   : > { %4111 = vmatpush.msrb.mxu2 %v6714_v12  ;;  %v3999_v36 = vmul.u32 18, %v3998_v7 }
 0x3cd   : > { %v4027_v8 = vshrl.u32 %v4026_v14, 4 }
 0x3ce   : > { %4112 = vmatpush.msrb.mxu2 %v6699_v35  ;;  %v4000_v1 = vsub.s32 %v6800_v60, %v3999_v36 }
 0x3cf   : > { %v4028_v33 = vmul.u32 18, %v4027_v8 }
 0x3d0   : > { %4113 = vmatpush.msrb.mxu2 %v6659_v31  ;;  %vm4061_vm3 = vcmp.ne.s32.totalorder %v4000_v1, 0  ;;  %vm4064_vm4 = vcmp.lt.s32.totalorder %v4000_v1, 0  ;;  %v4070_v49 = vadd.s32 18, %v4000_v1  ;;  %v4173_v31 = vmul.f32 %v6772_v0, %v6772_v0 }
 0x3d1   : > { %vm4067_vm5 = vmand %vm4064_vm4, %vm4061_vm3  ;;  %v4029_v30 = vsub.s32 %v6803_v48, %v4028_v33  ;;  %v4045_v48 = vshrl.u32 %v4040_v9, 16 }
 0x3d2   : > { %4114 = vmatpush.msrb.mxu2 %v6644_v2  ;;  %v4073_v60 = vsel %vm4067_vm5, %v4070_v49, %v4000_v1  ;;  %v4172_v2 = vmul.f32 %v6716_v17, %v6716_v17 }
 0x3d3   : > { %vm4076_vm6 = vcmp.lt.s32.totalorder %v4073_v60, 16  ;;  %vm4062_vm7 = vcmp.ne.s32.totalorder %v4029_v30, 0  ;;  %vm4065_vm8 = vcmp.lt.s32.totalorder %v4029_v30, 0  ;;  %v4071_v46 = vadd.s32 18, %v4029_v30 }
 0x3d4   : > { %4466 = vmatmul.msk.f32.vlgmr.msra.gmra.mxu1 %vm4076_vm6, %v4538_v61  ;;  %4469 = vmatmul.msk.f32.vlgmr.msrb.gmra.mxu3 %vm4076_vm6, %v4538_v61  ;;  %vm4068_vm9 = vmand %vm4065_vm8, %vm4062_vm7  ;;  %v4055_v44 = vadd.s32 %v4054_v11, %v4045_v48 }
 0x3d5   : > { %v4074_v23 = vsel %vm4068_vm9, %v4071_v46, %v4029_v30 }
 0x3d6   : > { %vm6847_vm10 = vcmp.lt.s32.totalorder %v4074_v23, 16  ;;  %v4056_v62 = vshrl.u32 %v4055_v44, 4 }
 0x3d8   : > { %v4057_v32 = vmul.u32 18, %v4056_v62 }
 0x3da   : > { %v4058_v51 = vsub.s32 %v6810_v39, %v4057_v32 }
 0x3dc   : > { %vm4063_vm12 = vcmp.ne.s32.totalorder %v4058_v51, 0  ;;  %vm4066_vm11 = vcmp.lt.s32.totalorder %v4058_v51, 0  ;;  %v4072_v50 = vadd.s32 18, %v4058_v51 }
 0x3dd   : > { %vm4069_vm14 = vmand %vm4066_vm11, %vm4063_vm12 }
 0x3de   : > { %v4075_v41 = vsel %vm4069_vm14, %v4072_v50, %v4058_v51 }
 0x3df   : > { %vm4078_vm15 = vcmp.lt.s32.totalorder %v4075_v41, 16 }
 0x3e0   : > { %v4465_v20 = vsel %vm4078_vm15, 1.0, %v4539_v43 }
 0x3ef   : > { %v6814_v53 = vpop.f32.mrf.mxu2 }
 0x3f0   : > { %v3921_v38 = vpack.c.bf16 %v6814_v53, %v6814_v53  ;;  %v4175_v12 = vmul.f32 %v6814_v53, %v6814_v53 }
 0x3f2   : > { %3958 = vst.msk [vmem:[%s6152_s12 + $0x60] sm:$0xf] %vm3933_vm13, %v3921_v38  ;;  %v4182_v38 = vmul.f32 %v6782_v22, %v6782_v22  ;;  %v4179_v22 = vmul.f32 %v6699_v35, %v6699_v35  ;;  %v4174_v35 = vmul.f32 %v6784_v26, %v6784_v26 }
 0x3f7   : > { %v6820_v29 = vpop.f32.mrf.mxu2 }
 0x3f8   : > { %v3922_v40 = vpack.c.bf16 %v6820_v29, %v6820_v29  ;;  %v6824_v6 = vpop.f32.mrf.mxu3  ;;  %4115 = vmatpush.msrb.mxu2 %v6820_v29  ;;  %v4176_v57 = vmul.f32 %v6820_v29, %v6820_v29 }
 0x3f9   : > { %v3929_v63 = vpack.c.bf16 %v6824_v6, %v6824_v6  ;;  %v4183_v55 = vmul.f32 %v6824_v6, %v6824_v6 }
 0x3fa   : > { %3959 = vst.msk [vmem:[%s6152_s12 + $0x64] sm:$0xf] %vm3933_vm13, %v3922_v40  ;;  %4116 = vmatpush.msrb.mxu2 %v6814_v53  ;;  %v4170_v53 = vmul.f32 %v6642_v37, %v6642_v37 }
 0x3fb   : > { %3966 = vst.msk [vmem:[%s6152_s12 + $0x80] sm:$0xf] %vm3933_vm13, %v3929_v63 }
 0x3fc   : > { %4117 = vmatpush.msrb.mxu2 %v6784_v26  ;;  %v4169_v26 = vmul.f32 %v6634_v10, %v6634_v10 }
 0x3fe   : > { %4118 = vmatpush.msrb.mxu2 %v6772_v0  ;;  %v4168_v0 = vmul.f32 %v6546_v16, %v6546_v16 }
 0x400   : > { %v3889_v3 = vpop.f32.mrf.mxu3  ;;  %4119 = vmatpush.msrb.mxu2 %v6716_v17  ;;  %v4167_v17 = vmul.f32 %v6517_v45, %v6517_v45 }
 0x401   : > { %v3930_v25 = vpack.c.bf16 %v3889_v3, %v3889_v3  ;;  %v4184_v39 = vmul.f32 %v3889_v3, %v3889_v3 }
 0x402   : > { %4120 = vmatpush.msrb.mxu2 %v6701_v54 }
 0x403   : > { %3967 = vst.msk [vmem:[%s6152_s12 + $0x84] sm:$0xf] %vm3933_vm13, %v3930_v25 }
 0x404   : > { %4121 = vmatpush.msrb.mxu2 %v6642_v37 }
 0x406   : > { %4122 = vmatpush.msrb.mxu2 %v6634_v10 }
 0x408   : > { %4123 = vmatpush.msrb.mxu2 %v6546_v16 }
 0x40a   : > { %4124 = vmatpush.msrb.mxu2 %v6517_v45 }
 0x40b   : > { %4467 = vmatmul.msk.f32.vlgmr.msrb.gmra.mxu2 %vm6847_vm10, %v4538_v61 }
 0x411   : > { %v3892_v4 = vpop.f32.mrf.mxu3 }
 0x412   : > { %v3931_v18 = vpack.c.bf16 %v3892_v4, %v3892_v4  ;;  %v4185_v9 = vmul.f32 %v3892_v4, %v3892_v4 }
 0x414   : > { %3968 = vst.msk [vmem:[%s6152_s12 + $0x88] sm:$0xf] %vm3933_vm13, %v3931_v18 }
 0x419   : > { %v3894_v58 = vpop.f32.mrf.mxu3 }
 0x41a   : > { %v3932_v47 = vpack.c.bf16 %v3894_v58, %v3894_v58  ;;  %v4186_v24 = vmul.f32 %v3894_v58, %v3894_v58  ;;  %4141 = vmatpush.msrb.mxu1 %v3894_v58 }
 0x41c   : > { %3969 = vst.msk [vmem:[%s6152_s12 + $0x8c] sm:$0xf] %vm3933_vm13, %v3932_v47  ;;  %4142 = vmatpush.msrb.mxu1 %v3892_v4  ;;  %4239 = vmatpush.msra.mxu2 %v4186_v24  ;;  %vm4149_vm13 = vcmask 122880  }
 0x41e   : > { %4143 = vmatpush.msrb.mxu1 %v3889_v3  ;;  %4240 = vmatpush.msra.mxu2 %v4185_v9 }
 0x420   : > { %4144 = vmatpush.msrb.mxu1 %v6824_v6  ;;  %4241 = vmatpush.msra.mxu2 %v4184_v39 }
 0x421   : > { %4468 = vmatmul.msk.f32.vlgmr.msrb.gmra.mxu1 %vm4085_vm0, %v4465_v20 }
 0x422   : > { %4207 = vmatpush.msra.mxu1 %v4182_v38  ;;  %4242 = vmatpush.msra.mxu2 %v4183_v55 }
 0x423   : > { %4471 = vmatmul.msk.f32.vlgmr.msra.gmra.mxu2 %vm4085_vm0, %v4465_v20 }
 0x424   : > { %4208 = vmatpush.msra.mxu1 %v4181_v19 }
 0x426   : > { %4209 = vmatpush.msra.mxu1 %v4180_v28 }
 0x428   : > { %4210 = vmatpush.msra.mxu1 %v4179_v22 }
 0x42a   : > { %4211 = vmatpush.msra.mxu1 %v4178_v13 }
 0x42c   : > { %4212 = vmatpush.msra.mxu1 %v4177_v42 }
 0x42e   : > { %4213 = vmatpush.msra.mxu1 %v4176_v57 }
 0x430   : > { %4214 = vmatpush.msra.mxu1 %v4175_v12 }
 0x432   : > { %4215 = vmatpush.msra.mxu1 %v4174_v35 }
 0x434   : > { %4216 = vmatpush.msra.mxu1 %v4173_v31 }
 0x436   : > { %4217 = vmatpush.msra.mxu1 %v4172_v2 }
 0x438   : > { %4218 = vmatpush.msra.mxu1 %v4171_v5 }
 0x43a   : > { %4219 = vmatpush.msra.mxu1 %v4170_v53 }
 0x43c   : > { %4220 = vmatpush.msra.mxu1 %v4169_v26 }
 0x43e   : > { %4221 = vmatpush.msra.mxu1 %v4168_v0 }
 0x440   : > { %4222 = vmatpush.msra.mxu1 %v4167_v17 }
 0x441   : > { %4470 = vmatmul.msk.f32.vlgmr.msra.gmra.mxu1 %vm6847_vm10, %v4538_v61 }
 0x451   : > { %v4106_v37 = vpop.f32.mrf.mxu1 }
 0x457   : > { %v4204_v14 = vpop.f32.mrf.mxu3 }
 0x48e   : > { %v4126_v54 = vpop.f32.mrf.mxu2 }
 0x48f   : > { %v4127_v7 = vadd.f32 %v4126_v54, %v4106_v37 }
 0x49e   : > { %v4146_v10 = vpop.f32.mrf.mxu1 }
 0x49f   : > { %v4147_v16 = vadd.f32 %v4146_v10, %v4127_v7 }
 0x4a1   : > { %4150 = vst.msk [vmem:[%s211_s17] sm:$0x1] %vm4149_vm13, %v4147_v16 }
 0x4a6   : > { %v4244_v27 = vpop.f32.mrf.mxu2 }
 0x4be   : > { %v4224_v45 = vpop.f32.mrf.mxu1 }
 0x4bf   : > { %v4225_v59 = vadd.f32 %v4224_v45, %v4204_v14 }
 0x4c1   : > { %v4245_v36 = vadd.f32 %v4244_v27, %v4225_v59 }
 0x4c3   : > { %4247 = vst.msk [vmem:[%s214_s20] sm:$0x1] %vm4149_vm13, %v4245_v36 }
 0x4c4 PF: > { %s15_s15 = sadd.s32 1, %s4527_s15  }
 0x4c5   : > { %p12_p4 = scmp.ge.s32.totalorder %s15_s15, 4  }
 0x4c7   :  { %14 = sbr.rel (!%p12_p4) target bundleno = 1 (0x1), region = 82 }

</bundles_post_ra>
